<compile_context>
chip_gen: v7x
topology: tpu7x:2x2x1
jax: 0.10.0
libtpu: 0.0.40
codegen_flags: <defaults>
</compile_context>

<pallas_src>
import functools

import jax
import jax.numpy as jnp
from jax.experimental import pallas as pl
from jax.experimental.pallas import tpu as pltpu


# ----------------------------------------------------------------------------
# Fused matmul + bias + epilogue Pallas kernel
# ----------------------------------------------------------------------------
def _mm_epilogue_kernel(*refs, epilogue, phases, slope, eps):
  """refs = (x, w, b[, gamma, beta], out).

  acc = x @ w + b in f32; epilogue is one of:
    "leaky"    : LeakyReLU(slope)
    "sigmoid"  : logistic (EUP exp + approx reciprocal)
    "bn_leaky" : training-mode BatchNorm2d (batch stats over all rows and,
                 for phase-packed transposed-conv outputs, over the `phases`
                 column groups of each channel) followed by LeakyReLU.
  """
  if epilogue == "bn_leaky":
    x_ref, w_ref, b_ref, g_ref, bt_ref, o_ref = refs
  else:
    x_ref, w_ref, b_ref, o_ref = refs

  acc = jnp.dot(x_ref[...], w_ref[...], preferred_element_type=jnp.float32)
  acc = acc + b_ref[...]

  if epilogue == "leaky":
    y = jnp.where(acc >= 0, acc, slope * acc)
  elif epilogue == "sigmoid":
    y = pl.reciprocal(1.0 + jnp.exp(-acc), approx=True)
  elif epilogue == "bn_leaky":
    m, n = acc.shape
    c = n // phases                     # real channel count
    inv = 1.0 / float(m * phases)       # elements per channel in the batch

    def phase_sum(v):                   # [1, n] -> [1, c]
      if phases == 1:
        return v
      return sum(v[:, p * c:(p + 1) * c] for p in range(phases))

    def phase_tile(v):                  # [1, c] -> [1, n]
      if phases == 1:
        return v
      return jnp.concatenate([v] * phases, axis=1)

    mean = phase_sum(jnp.sum(acc, axis=0, keepdims=True)) * inv     # [1, c]
    xc = acc - phase_tile(mean)
    var = phase_sum(jnp.sum(xc * xc, axis=0, keepdims=True)) * inv  # biased
    scale = g_ref[...] * jax.lax.rsqrt(var + eps)                   # [1, c]
    y = xc * phase_tile(scale) + phase_tile(bt_ref[...])
    y = jnp.where(y >= 0, y, slope * y)
  else:
    y = acc

  o_ref[...] = y.astype(o_ref.dtype)


def matmul_fused(x, w, b, *, epilogue="none", gamma=None, beta=None,
                 phases=1, slope=0.2, eps=1e-5, out_dtype=jnp.float32):
  """x: [M, K] bf16, w: [K, N] bf16, b: [N] f32  ->  [M, N] out_dtype."""
  M, K = x.shape
  N = w.shape[1]

  if epilogue == "bn_leaky":
    bm = M                       # batch statistics need every row in one block
  else:
    bm = M
    for cand in (256, 128):      # MXU-friendly row tiles; >=2 programs if M big
      if M > cand and M % cand == 0:
        bm = cand
        break
  grid = (M // bm,)

  in_specs = [
      pl.BlockSpec((bm, K), lambda i: (i, 0)),
      pl.BlockSpec((K, N), lambda i: (0, 0)),
      pl.BlockSpec((1, N), lambda i: (0, 0)),
  ]
  args = [x, w, b.reshape(1, N).astype(jnp.float32)]
  if epilogue == "bn_leaky":
    c = N // phases
    in_specs += [pl.BlockSpec((1, c), lambda i: (0, 0)),
                 pl.BlockSpec((1, c), lambda i: (0, 0))]
    args += [gamma.reshape(1, c).astype(jnp.float32),
             beta.reshape(1, c).astype(jnp.float32)]

  return pl.pallas_call(
      functools.partial(_mm_epilogue_kernel, epilogue=epilogue, phases=phases,
                        slope=slope, eps=eps),
      out_shape=jax.ShapeDtypeStruct((M, N), out_dtype),
      grid_spec=pltpu.PrefetchScalarGridSpec(
          num_scalar_prefetch=0,
          grid=grid,
          in_specs=in_specs,
          out_specs=pl.BlockSpec((bm, N), lambda i: (i, 0)),
      ),
      compiler_params=pltpu.CompilerParams(
          dimension_semantics=("parallel",)),
  )(*args)


# ----------------------------------------------------------------------------
# Thin XLA glue: im2col, conv / phase-packed transposed-conv wrappers
# ----------------------------------------------------------------------------
def _im2col(x_nhwc, k, stride, pad):
  """[N,H,W,C] -> ([N*OH*OW, k*k*C], OH, OW); columns ordered (tap, channel)."""
  x = jnp.pad(x_nhwc, ((0, 0), (pad, pad), (pad, pad), (0, 0)))
  N, H, W, C = x.shape
  oh = (H - k) // stride + 1
  ow = (W - k) // stride + 1
  taps = []
  for i in range(k):
    for j in range(k):
      taps.append(x[:, i:i + stride * oh:stride, j:j + stride * ow:stride, :])
  p = jnp.stack(taps, axis=3)                       # [N, oh, ow, k*k, C]
  return p.reshape(N * oh * ow, k * k * C), oh, ow


def conv2d_fused(x_nhwc, wmat, b, *, k, stride, pad, epilogue,
                 gamma=None, beta=None, out_dtype=jnp.bfloat16):
  """Conv2d (+bias +BN/activation) with a pre-reshaped [k*k*Cin, Cout] weight."""
  patches, oh, ow = _im2col(x_nhwc, k, stride, pad)
  y = matmul_fused(patches, wmat, b, epilogue=epilogue, gamma=gamma,
                   beta=beta, phases=1, out_dtype=out_dtype)
  return y.reshape(x_nhwc.shape[0], oh, ow, wmat.shape[1])


def deconv2x_fused(x_nhwc, wmat, b, cout, *, epilogue, gamma=None, beta=None,
                   out_dtype=jnp.bfloat16):
  """ConvTranspose2d(k=4, stride=2, pad=1) via sub-pixel phase decomposition.

  One lane-dense matmul over 3x3/pad-1 input patches produces the 4 output
  parities packed along columns (order: row-phase, col-phase, channel); the
  interleave back to full resolution is a cheap depth-to-space reshape.
  """
  N, IH, IW, _ = x_nhwc.shape
  patches, _, _ = _im2col(x_nhwc, 3, 1, 1)
  y = matmul_fused(patches, wmat, b, epilogue=epilogue, gamma=gamma,
                   beta=beta, phases=4, out_dtype=out_dtype)
  y = y.reshape(N, IH, IW, 2, 2, cout)
  y = jnp.transpose(y, (0, 1, 3, 2, 4, 5)).reshape(N, 2 * IH, 2 * IW, cout)
  return y


# ----------------------------------------------------------------------------
# One-time parameter re-layout (torch layout -> kernel-ready bf16 matrices)
# ----------------------------------------------------------------------------
def _conv_wmat(w):
  """Conv2d weight [Cout, Cin, kh, kw] -> bf16 [kh*kw*Cin, Cout]."""
  cout, cin, kh, kw = w.shape
  return (jnp.transpose(w, (2, 3, 1, 0))
          .reshape(kh * kw * cin, cout).astype(jnp.bfloat16))


def _deconv_s2_wmat(w):
  """ConvTranspose2d(k=4, s=2, p=1) weight [Cin, Cout, 4, 4] ->
  phase-packed bf16 [9*Cin, 4*Cout] acting on 3x3/pad-1 *input* patches.

  For output row 2*m + p, the input row m + d contributes kernel row kh:
    p=0: d=-1 -> kh=3, d=0 -> kh=1 ;  p=1: d=0 -> kh=2, d=+1 -> kh=0
  (same mapping for columns / q).
  """
  cin, cout = w.shape[0], w.shape[1]
  tap = {0: {-1: 3, 0: 1}, 1: {0: 2, 1: 0}}
  wb = jnp.zeros((3, 3, cin, 2, 2, cout), w.dtype)
  for p in (0, 1):
    for q in (0, 1):
      for dh, kh in tap[p].items():
        for dw, kw in tap[q].items():
          wb = wb.at[dh + 1, dw + 1, :, p, q, :].set(w[:, :, kh, kw])
  return wb.reshape(9 * cin, 4 * cout).astype(jnp.bfloat16)


def prepare_params(p):
  dp = {}
  for name in ("c1", "c2", "c3", "c4"):
    dp[name + "_w"] = _conv_wmat(p[name + "_w"])
    dp[name + "_b"] = p[name + "_b"]
  for name in ("d1", "d2", "d3"):
    dp[name + "_w"] = _deconv_s2_wmat(p[name + "_w"])
    dp[name + "_b"] = jnp.tile(p[name + "_b"], 4)      # (phase, channel) order
  # d4: stride-1 transposed conv == conv with spatially flipped kernel,
  # pad = k-1-pad = 1.  Pad the single output channel to 128 lanes so the
  # output stores are lane-dense; slice the real channel once in the wrapper.
  w4 = jnp.transpose(jnp.flip(p["d4_w"], axis=(2, 3)), (1, 0, 2, 3))
  dp["d4_w"] = jnp.pad(_conv_wmat(w4), ((0, 0), (0, 127)))
  dp["d4_b"] = jnp.pad(p["d4_b"], (0, 127))
  for name in ("bn2", "bn3", "bn4", "dbn1", "dbn2", "dbn3"):
    dp[name + "_g"] = p[name + "_g"]
    dp[name + "_b"] = p[name + "_b"]
  return dp


# ----------------------------------------------------------------------------
# Deterministic torch-layout parameter init
# ----------------------------------------------------------------------------
def init_params(key, in_ch):
  conv_shapes = {      # Conv2d: [Cout, Cin, kh, kw]
      "c1": (32, in_ch, 5, 5),
      "c2": (64, 32, 5, 5),
      "c3": (128, 64, 5, 5),
      "c4": (256, 128, 3, 3),
  }
  deconv_shapes = {    # ConvTranspose2d: [Cin, Cout, kh, kw]
      "d1": (256, 128, 4, 4),
      "d2": (128, 64, 4, 4),
      "d3": (64, 32, 4, 4),
      "d4": (32, 1, 3, 3),
  }
  bn_sizes = {"bn2": 64, "bn3": 128, "bn4": 256,
              "dbn1": 128, "dbn2": 64, "dbn3": 32}
  params = {}
  keys = jax.random.split(key, len(conv_shapes) + len(deconv_shapes))
  k_iter = iter(keys)
  for name, shp in conv_shapes.items():
    fan_in = shp[1] * shp[2] * shp[3]
    params[name + "_w"] = (jax.random.normal(next(k_iter), shp, jnp.float32)
                           / jnp.sqrt(fan_in))
    params[name + "_b"] = jnp.zeros((shp[0],), jnp.float32)
  for name, shp in deconv_shapes.items():
    fan_in = shp[0] * shp[2] * shp[3]
    params[name + "_w"] = (jax.random.normal(next(k_iter), shp, jnp.float32)
                           / jnp.sqrt(fan_in))
    params[name + "_b"] = jnp.zeros((shp[1],), jnp.float32)
  for name, c in bn_sizes.items():   # torch BatchNorm2d default init
    params[name + "_g"] = jnp.ones((c,), jnp.float32)
    params[name + "_b"] = jnp.zeros((c,), jnp.float32)
  return params


# ----------------------------------------------------------------------------
# Forward pass (matches MyAutoEncoder.forward, 8 Pallas kernel launches)
# ----------------------------------------------------------------------------
@jax.jit
def my_autoencoder_forward(x_nchw, dp):
  x = jnp.transpose(x_nchw, (0, 2, 3, 1)).astype(jnp.bfloat16)   # NCHW -> NHWC
  # encoding
  x = conv2d_fused(x, dp["c1_w"], dp["c1_b"], k=5, stride=2, pad=2,
                   epilogue="leaky")
  x = conv2d_fused(x, dp["c2_w"], dp["c2_b"], k=5, stride=2, pad=2,
                   epilogue="bn_leaky", gamma=dp["bn2_g"], beta=dp["bn2_b"])
  x = conv2d_fused(x, dp["c3_w"], dp["c3_b"], k=5, stride=2, pad=2,
                   epilogue="bn_leaky", gamma=dp["bn3_g"], beta=dp["bn3_b"])
  x = conv2d_fused(x, dp["c4_w"], dp["c4_b"], k=3, stride=1, pad=1,
                   epilogue="bn_leaky", gamma=dp["bn4_g"], beta=dp["bn4_b"])
  # decoding
  x = deconv2x_fused(x, dp["d1_w"], dp["d1_b"], 128, epilogue="bn_leaky",
                     gamma=dp["dbn1_g"], beta=dp["dbn1_b"])
  x = deconv2x_fused(x, dp["d2_w"], dp["d2_b"], 64, epilogue="bn_leaky",
                     gamma=dp["dbn2_g"], beta=dp["dbn2_b"])
  x = deconv2x_fused(x, dp["d3_w"], dp["d3_b"], 32, epilogue="bn_leaky",
                     gamma=dp["dbn3_g"], beta=dp["dbn3_b"])
  y = conv2d_fused(x, dp["d4_w"], dp["d4_b"], k=3, stride=1, pad=1,
                   epilogue="sigmoid", out_dtype=jnp.float32)
  y = y[..., :1]                                       # drop lane padding
  return jnp.transpose(y, (0, 3, 1, 2))                # NHWC -> NCHW


# ----------------------------------------------------------------------------
# Pure-JAX (f32, XLA) reference for the self-check
# ----------------------------------------------------------------------------
def _ref_conv(x, w, b, stride, pad):
  y = jax.lax.conv_general_dilated(
      x, w, window_strides=(stride, stride),
      padding=[(pad, pad), (pad, pad)],
      dimension_numbers=("NCHW", "OIHW", "NCHW"))
  return y + b.reshape(1, -1, 1, 1)


def _ref_deconv(x, w, b, stride, pad):
  k = w.shape[2]
  w_conv = jnp.transpose(jnp.flip(w, axis=(2, 3)), (1, 0, 2, 3))
  y = jax.lax.conv_general_dilated(
      x, w_conv, window_strides=(1, 1),
      padding=[(k - 1 - pad, k - 1 - pad)] * 2,
      lhs_dilation=(stride, stride),
      dimension_numbers=("NCHW", "OIHW", "NCHW"))
  return y + b.reshape(1, -1, 1, 1)


def _ref_bn_leaky(x, g, b, eps=1e-5, slope=0.2):
  mean = jnp.mean(x, axis=(0, 2, 3), keepdims=True)
  var = jnp.mean((x - mean) ** 2, axis=(0, 2, 3), keepdims=True)
  y = ((x - mean) * jax.lax.rsqrt(var + eps) * g.reshape(1, -1, 1, 1)
       + b.reshape(1, -1, 1, 1))
  return jnp.where(y >= 0, y, slope * y)


@jax.jit
def reference_forward(x, p):
  y = _ref_conv(x, p["c1_w"], p["c1_b"], 2, 2)
  y = jnp.where(y >= 0, y, 0.2 * y)
  y = _ref_conv(y, p["c2_w"], p["c2_b"], 2, 2)
  y = _ref_bn_leaky(y, p["bn2_g"], p["bn2_b"])
  y = _ref_conv(y, p["c3_w"], p["c3_b"], 2, 2)
  y = _ref_bn_leaky(y, p["bn3_g"], p["bn3_b"])
  y = _ref_conv(y, p["c4_w"], p["c4_b"], 1, 1)
  y = _ref_bn_leaky(y, p["bn4_g"], p["bn4_b"])
  y = _ref_deconv(y, p["d1_w"], p["d1_b"], 2, 1)
  y = _ref_bn_leaky(y, p["dbn1_g"], p["dbn1_b"])
  y = _ref_deconv(y, p["d2_w"], p["d2_b"], 2, 1)
  y = _ref_bn_leaky(y, p["dbn2_g"], p["dbn2_b"])
  y = _ref_deconv(y, p["d3_w"], p["d3_b"], 2, 1)
  y = _ref_bn_leaky(y, p["dbn3_g"], p["dbn3_b"])
  y = _ref_deconv(y, p["d4_w"], p["d4_b"], 1, 1)
  return 1.0 / (1.0 + jnp.exp(-y))


if __name__ == "__main__":
  key = jax.random.PRNGKey(0)
  k_x, k_p = jax.random.split(key)
  ae_in_dim = (1, 16, 16)                  # small MNIST-like input
  batch = 2
  x = jax.random.normal(k_x, (batch,) + ae_in_dim, jnp.float32)
  params = init_params(k_p, ae_in_dim[0])
  dparams = prepare_params(params)

  out = my_autoencoder_forward(x, dparams)
  out = jax.block_until_ready(out)

  assert out.shape == (batch, 1, ae_in_dim[1], ae_in_dim[2]), out.shape
  assert bool(jnp.all(jnp.isfinite(out)))
  assert bool(jnp.all((out > -1e-2) & (out < 1.0 + 1e-2)))  # sigmoid range

  # Loose numerical check vs an f32 XLA reference (kernels use bf16 MXU
  # operands, so allow a generous tolerance).
  ref = jax.block_until_ready(reference_forward(x, params))
  err = float(jnp.max(jnp.abs(out - ref)))
  assert err < 1e-1, f"max abs err vs reference = {err}"

  print("KERNEL_OK")
</pallas_src>

<mosaic_0001>
module attributes {stable_mosaic.version = 11 : i64} {
  func.func @_mm_epilogue_kernel(%arg0: i32, %arg1: memref<128x25xbf16, #tpu.memory_space<vmem>>, %arg2: memref<25x32xbf16, #tpu.memory_space<vmem>>, %arg3: memref<1x32xf32, #tpu.memory_space<vmem>>, %arg4: memref<128x32xbf16, #tpu.memory_space<vmem>>) attributes {dimension_semantics = [#tpu.dimension_semantics<parallel>], iteration_bounds = array<i64: 1>, scalar_prefetch = 0 : i64, scratch_operands = 0 : i64, tpu.core_type = #tpu.core_type<tc>, window_params = [{transform_indices = @transform_0, window_bounds = array<i64: 128, 25>}, {pipeline_mode = #tpu.pipeline_mode<synchronous>, transform_indices = @transform_1, window_bounds = array<i64: 25, 32>}, {pipeline_mode = #tpu.pipeline_mode<synchronous>, transform_indices = @transform_2, window_bounds = array<i64: 1, 32>}, {transform_indices = @transform_3, window_bounds = array<i64: 128, 32>}]} {
    %c0 = arith.constant 0 : index
    %c0_0 = arith.constant 0 : index
    %0 = vector.load %arg1[%c0, %c0_0] : memref<128x25xbf16, #tpu.memory_space<vmem>>, vector<128x25xbf16>
    %c0_1 = arith.constant 0 : index
    %c0_2 = arith.constant 0 : index
    %1 = vector.load %arg2[%c0_1, %c0_2] : memref<25x32xbf16, #tpu.memory_space<vmem>>, vector<25x32xbf16>
    %cst = arith.constant dense<0.000000e+00> : vector<128x32xf32>
    %2 = tpu.matmul %0, %1, %cst {dimension_numbers = #tpu.dot_dimension_numbers<[1], [0], [0], [1], [0, 0, 1, 1], [], []>} : vector<128x25xbf16>, vector<25x32xbf16>, vector<128x32xf32> -> vector<128x32xf32>
    %c0_3 = arith.constant 0 : index
    %c0_4 = arith.constant 0 : index
    %3 = vector.load %arg3[%c0_3, %c0_4] : memref<1x32xf32, #tpu.memory_space<vmem>>, vector<1x32xf32>
    %4 = vector.broadcast %3 : vector<1x32xf32> to vector<128x32xf32>
    %5 = arith.addf %2, %4 : vector<128x32xf32>
    %cst_5 = arith.constant 0.000000e+00 : f32
    %6 = vector.broadcast %cst_5 : f32 to vector<128x32xf32>
    %7 = arith.cmpf oge, %5, %6 : vector<128x32xf32>
    %cst_6 = arith.constant 2.000000e-01 : f32
    %8 = vector.broadcast %cst_6 : f32 to vector<128x32xf32>
    %9 = arith.mulf %8, %5 : vector<128x32xf32>
    %10 = arith.select %7, %5, %9 : vector<128x32xi1>, vector<128x32xf32>
    %11 = arith.truncf %10 : vector<128x32xf32> to vector<128x32xbf16>
    %c0_7 = arith.constant 0 : index
    %c0_8 = arith.constant 0 : index
    %12 = vector.load %arg4[%c0_7, %c0_8] : memref<128x32xbf16, #tpu.memory_space<vmem>>, vector<128x32xbf16>
    tpu.vector_store %arg4[%c0_7, %c0_8], %11 {strides = array<i32>} : memref<128x32xbf16, #tpu.memory_space<vmem>>, vector<128x32xbf16>,
    return
  }
  func.func @transform_0(%arg0: i32) -> (i32, i32) {
    %c0_i32 = arith.constant 0 : i32
    %c0_i32_0 = arith.constant 0 : i32
    return %arg0, %c0_i32 : i32, i32
  }
  func.func @transform_1(%arg0: i32) -> (i32, i32) {
    %c0_i32 = arith.constant 0 : i32
    %c0_i32_0 = arith.constant 0 : i32
    %c0_i32_1 = arith.constant 0 : i32
    return %c0_i32, %c0_i32_0 : i32, i32
  }
  func.func @transform_2(%arg0: i32) -> (i32, i32) {
    %c0_i32 = arith.constant 0 : i32
    %c0_i32_0 = arith.constant 0 : i32
    %c0_i32_1 = arith.constant 0 : i32
    return %c0_i32, %c0_i32_0 : i32, i32
  }
  func.func @transform_3(%arg0: i32) -> (i32, i32) {
    %c0_i32 = arith.constant 0 : i32
    %c0_i32_0 = arith.constant 0 : i32
    return %arg0, %c0_i32 : i32, i32
  }
}

module attributes {stable_mosaic.version = 11 : i64} {
  func.func @_mm_epilogue_kernel(%arg0: i32, %arg1: memref<32x800xbf16, #tpu.memory_space<vmem>>, %arg2: memref<800x64xbf16, #tpu.memory_space<vmem>>, %arg3: memref<1x64xf32, #tpu.memory_space<vmem>>, %arg4: memref<1x64xf32, #tpu.memory_space<vmem>>, %arg5: memref<1x64xf32, #tpu.memory_space<vmem>>, %arg6: memref<32x64xbf16, #tpu.memory_space<vmem>>) attributes {dimension_semantics = [#tpu.dimension_semantics<parallel>], iteration_bounds = array<i64: 1>, scalar_prefetch = 0 : i64, scratch_operands = 0 : i64, tpu.core_type = #tpu.core_type<tc>, window_params = [{transform_indices = @transform_0, window_bounds = array<i64: 32, 800>}, {pipeline_mode = #tpu.pipeline_mode<synchronous>, transform_indices = @transform_1, window_bounds = array<i64: 800, 64>}, {pipeline_mode = #tpu.pipeline_mode<synchronous>, transform_indices = @transform_2, window_bounds = array<i64: 1, 64>}, {pipeline_mode = #tpu.pipeline_mode<synchronous>, transform_indices = @transform_3, window_bounds = array<i64: 1, 64>}, {pipeline_mode = #tpu.pipeline_mode<synchronous>, transform_indices = @transform_4, window_bounds = array<i64: 1, 64>}, {transform_indices = @transform_5, window_bounds = array<i64: 32, 64>}]} {
    %c0 = arith.constant 0 : index
    %c0_0 = arith.constant 0 : index
    %0 = vector.load %arg1[%c0, %c0_0] : memref<32x800xbf16, #tpu.memory_space<vmem>>, vector<32x800xbf16>
    %c0_1 = arith.constant 0 : index
    %c0_2 = arith.constant 0 : index
    %1 = vector.load %arg2[%c0_1, %c0_2] : memref<800x64xbf16, #tpu.memory_space<vmem>>, vector<800x64xbf16>
    %cst = arith.constant dense<0.000000e+00> : vector<32x64xf32>
    %2 = tpu.matmul %0, %1, %cst {dimension_numbers = #tpu.dot_dimension_numbers<[1], [0], [0], [1], [0, 0, 1, 1], [], []>} : vector<32x800xbf16>, vector<800x64xbf16>, vector<32x64xf32> -> vector<32x64xf32>
    %c0_3 = arith.constant 0 : index
    %c0_4 = arith.constant 0 : index
    %3 = vector.load %arg3[%c0_3, %c0_4] : memref<1x64xf32, #tpu.memory_space<vmem>>, vector<1x64xf32>
    %4 = vector.broadcast %3 : vector<1x64xf32> to vector<32x64xf32>
    %5 = arith.addf %2, %4 : vector<32x64xf32>
    %cst_5 = arith.constant dense<0.000000e+00> : vector<64xf32>
    %6 = vector.multi_reduction <add>, %5, %cst_5 [0] : vector<32x64xf32> to vector<64xf32>
    %7 = vector.shape_cast %6 : vector<64xf32> to vector<1x64xf32>
    %cst_6 = arith.constant 3.125000e-02 : f32
    %8 = vector.broadcast %cst_6 : f32 to vector<1x64xf32>
    %9 = arith.mulf %7, %8 : vector<1x64xf32>
    %10 = vector.broadcast %9 : vector<1x64xf32> to vector<32x64xf32>
    %11 = arith.subf %5, %10 : vector<32x64xf32>
    %12 = arith.mulf %11, %11 : vector<32x64xf32>
    %cst_7 = arith.constant dense<0.000000e+00> : vector<64xf32>
    %13 = vector.multi_reduction <add>, %12, %cst_7 [0] : vector<32x64xf32> to vector<64xf32>
    %14 = vector.shape_cast %13 : vector<64xf32> to vector<1x64xf32>
    %cst_8 = arith.constant 3.125000e-02 : f32
    %15 = vector.broadcast %cst_8 : f32 to vector<1x64xf32>
    %16 = arith.mulf %14, %15 : vector<1x64xf32>
    %c0_9 = arith.constant 0 : index
    %c0_10 = arith.constant 0 : index
    %17 = vector.load %arg4[%c0_9, %c0_10] : memref<1x64xf32, #tpu.memory_space<vmem>>, vector<1x64xf32>
    %cst_11 = arith.constant 9.99999974E-6 : f32
    %18 = vector.broadcast %cst_11 : f32 to vector<1x64xf32>
    %19 = arith.addf %16, %18 : vector<1x64xf32>
    %20 = math.rsqrt %19 : vector<1x64xf32>
    %21 = arith.mulf %17, %20 : vector<1x64xf32>
    %22 = vector.broadcast %21 : vector<1x64xf32> to vector<32x64xf32>
    %23 = arith.mulf %11, %22 : vector<32x64xf32>
    %c0_12 = arith.constant 0 : index
    %c0_13 = arith.constant 0 : index
    %24 = vector.load %arg5[%c0_12, %c0_13] : memref<1x64xf32, #tpu.memory_space<vmem>>, vector<1x64xf32>
    %25 = vector.broadcast %24 : vector<1x64xf32> to vector<32x64xf32>
    %26 = arith.addf %23, %25 : vector<32x64xf32>
    %cst_14 = arith.constant 0.000000e+00 : f32
    %27 = vector.broadcast %cst_14 : f32 to vector<32x64xf32>
    %28 = arith.cmpf oge, %26, %27 : vector<32x64xf32>
    %cst_15 = arith.constant 2.000000e-01 : f32
    %29 = vector.broadcast %cst_15 : f32 to vector<32x64xf32>
    %30 = arith.mulf %29, %26 : vector<32x64xf32>
    %31 = arith.select %28, %26, %30 : vector<32x64xi1>, vector<32x64xf32>
    %32 = arith.truncf %31 : vector<32x64xf32> to vector<32x64xbf16>
    %c0_16 = arith.constant 0 : index
    %c0_17 = arith.constant 0 : index
    %33 = vector.load %arg6[%c0_16, %c0_17] : memref<32x64xbf16, #tpu.memory_space<vmem>>, vector<32x64xbf16>
    tpu.vector_store %arg6[%c0_16, %c0_17], %32 {strides = array<i32>} : memref<32x64xbf16, #tpu.memory_space<vmem>>, vector<32x64xbf16>,
    return
  }
  func.func @transform_0(%arg0: i32) -> (i32, i32) {
    %c0_i32 = arith.constant 0 : i32
    %c0_i32_0 = arith.constant 0 : i32
    return %arg0, %c0_i32 : i32, i32
  }
  func.func @transform_1(%arg0: i32) -> (i32, i32) {
    %c0_i32 = arith.constant 0 : i32
    %c0_i32_0 = arith.constant 0 : i32
    %c0_i32_1 = arith.constant 0 : i32
    return %c0_i32, %c0_i32_0 : i32, i32
  }
  func.func @transform_2(%arg0: i32) -> (i32, i32) {
    %c0_i32 = arith.constant 0 : i32
    %c0_i32_0 = arith.constant 0 : i32
    %c0_i32_1 = arith.constant 0 : i32
    return %c0_i32, %c0_i32_0 : i32, i32
  }
  func.func @transform_3(%arg0: i32) -> (i32, i32) {
    %c0_i32 = arith.constant 0 : i32
    %c0_i32_0 = arith.constant 0 : i32
    %c0_i32_1 = arith.constant 0 : i32
    return %c0_i32, %c0_i32_0 : i32, i32
  }
  func.func @transform_4(%arg0: i32) -> (i32, i32) {
    %c0_i32 = arith.constant 0 : i32
    %c0_i32_0 = arith.constant 0 : i32
    %c0_i32_1 = arith.constant 0 : i32
    return %c0_i32, %c0_i32_0 : i32, i32
  }
  func.func @transform_5(%arg0: i32) -> (i32, i32) {
    %c0_i32 = arith.constant 0 : i32
    %c0_i32_0 = arith.constant 0 : i32
    return %arg0, %c0_i32 : i32, i32
  }
}

module attributes {stable_mosaic.version = 11 : i64} {
  func.func @_mm_epilogue_kernel(%arg0: i32, %arg1: memref<8x1600xbf16, #tpu.memory_space<vmem>>, %arg2: memref<1600x128xbf16, #tpu.memory_space<vmem>>, %arg3: memref<1x128xf32, #tpu.memory_space<vmem>>, %arg4: memref<1x128xf32, #tpu.memory_space<vmem>>, %arg5: memref<1x128xf32, #tpu.memory_space<vmem>>, %arg6: memref<8x128xbf16, #tpu.memory_space<vmem>>) attributes {dimension_semantics = [#tpu.dimension_semantics<parallel>], iteration_bounds = array<i64: 1>, scalar_prefetch = 0 : i64, scratch_operands = 0 : i64, tpu.core_type = #tpu.core_type<tc>, window_params = [{transform_indices = @transform_0, window_bounds = array<i64: 8, 1600>}, {pipeline_mode = #tpu.pipeline_mode<synchronous>, transform_indices = @transform_1, window_bounds = array<i64: 1600, 128>}, {pipeline_mode = #tpu.pipeline_mode<synchronous>, transform_indices = @transform_2, window_bounds = array<i64: 1, 128>}, {pipeline_mode = #tpu.pipeline_mode<synchronous>, transform_indices = @transform_3, window_bounds = array<i64: 1, 128>}, {pipeline_mode = #tpu.pipeline_mode<synchronous>, transform_indices = @transform_4, window_bounds = array<i64: 1, 128>}, {transform_indices = @transform_5, window_bounds = array<i64: 8, 128>}]} {
    %c0 = arith.constant 0 : index
    %c0_0 = arith.constant 0 : index
    %0 = vector.load %arg1[%c0, %c0_0] : memref<8x1600xbf16, #tpu.memory_space<vmem>>, vector<8x1600xbf16>
    %c0_1 = arith.constant 0 : index
    %c0_2 = arith.constant 0 : index
    %1 = vector.load %arg2[%c0_1, %c0_2] : memref<1600x128xbf16, #tpu.memory_space<vmem>>, vector<1600x128xbf16>
    %cst = arith.constant dense<0.000000e+00> : vector<8x128xf32>
    %2 = tpu.matmul %0, %1, %cst {dimension_numbers = #tpu.dot_dimension_numbers<[1], [0], [0], [1], [0, 0, 1, 1], [], []>} : vector<8x1600xbf16>, vector<1600x128xbf16>, vector<8x128xf32> -> vector<8x128xf32>
    %c0_3 = arith.constant 0 : index
    %c0_4 = arith.constant 0 : index
    %3 = vector.load %arg3[%c0_3, %c0_4] : memref<1x128xf32, #tpu.memory_space<vmem>>, vector<1x128xf32>
    %4 = vector.broadcast %3 : vector<1x128xf32> to vector<8x128xf32>
    %5 = arith.addf %2, %4 : vector<8x128xf32>
    %cst_5 = arith.constant dense<0.000000e+00> : vector<128xf32>
    %6 = vector.multi_reduction <add>, %5, %cst_5 [0] : vector<8x128xf32> to vector<128xf32>
    %7 = vector.shape_cast %6 : vector<128xf32> to vector<1x128xf32>
    %cst_6 = arith.constant 1.250000e-01 : f32
    %8 = vector.broadcast %cst_6 : f32 to vector<1x128xf32>
    %9 = arith.mulf %7, %8 : vector<1x128xf32>
    %10 = vector.broadcast %9 : vector<1x128xf32> to vector<8x128xf32>
    %11 = arith.subf %5, %10 : vector<8x128xf32>
    %12 = arith.mulf %11, %11 : vector<8x128xf32>
    %cst_7 = arith.constant dense<0.000000e+00> : vector<128xf32>
    %13 = vector.multi_reduction <add>, %12, %cst_7 [0] : vector<8x128xf32> to vector<128xf32>
    %14 = vector.shape_cast %13 : vector<128xf32> to vector<1x128xf32>
    %cst_8 = arith.constant 1.250000e-01 : f32
    %15 = vector.broadcast %cst_8 : f32 to vector<1x128xf32>
    %16 = arith.mulf %14, %15 : vector<1x128xf32>
    %c0_9 = arith.constant 0 : index
    %c0_10 = arith.constant 0 : index
    %17 = vector.load %arg4[%c0_9, %c0_10] : memref<1x128xf32, #tpu.memory_space<vmem>>, vector<1x128xf32>
    %cst_11 = arith.constant 9.99999974E-6 : f32
    %18 = vector.broadcast %cst_11 : f32 to vector<1x128xf32>
    %19 = arith.addf %16, %18 : vector<1x128xf32>
    %20 = math.rsqrt %19 : vector<1x128xf32>
    %21 = arith.mulf %17, %20 : vector<1x128xf32>
    %22 = vector.broadcast %21 : vector<1x128xf32> to vector<8x128xf32>
    %23 = arith.mulf %11, %22 : vector<8x128xf32>
    %c0_12 = arith.constant 0 : index
    %c0_13 = arith.constant 0 : index
    %24 = vector.load %arg5[%c0_12, %c0_13] : memref<1x128xf32, #tpu.memory_space<vmem>>, vector<1x128xf32>
    %25 = vector.broadcast %24 : vector<1x128xf32> to vector<8x128xf32>
    %26 = arith.addf %23, %25 : vector<8x128xf32>
    %cst_14 = arith.constant 0.000000e+00 : f32
    %27 = vector.broadcast %cst_14 : f32 to vector<8x128xf32>
    %28 = arith.cmpf oge, %26, %27 : vector<8x128xf32>
    %cst_15 = arith.constant 2.000000e-01 : f32
    %29 = vector.broadcast %cst_15 : f32 to vector<8x128xf32>
    %30 = arith.mulf %29, %26 : vector<8x128xf32>
    %31 = arith.select %28, %26, %30 : vector<8x128xi1>, vector<8x128xf32>
    %32 = arith.truncf %31 : vector<8x128xf32> to vector<8x128xbf16>
    %c0_16 = arith.constant 0 : index
    %c0_17 = arith.constant 0 : index
    %33 = vector.load %arg6[%c0_16, %c0_17] : memref<8x128xbf16, #tpu.memory_space<vmem>>, vector<8x128xbf16>
    tpu.vector_store %arg6[%c0_16, %c0_17], %32 {strides = array<i32>} : memref<8x128xbf16, #tpu.memory_space<vmem>>, vector<8x128xbf16>,
    return
  }
  func.func @transform_0(%arg0: i32) -> (i32, i32) {
    %c0_i32 = arith.constant 0 : i32
    %c0_i32_0 = arith.constant 0 : i32
    return %arg0, %c0_i32 : i32, i32
  }
  func.func @transform_1(%arg0: i32) -> (i32, i32) {
    %c0_i32 = arith.constant 0 : i32
    %c0_i32_0 = arith.constant 0 : i32
    %c0_i32_1 = arith.constant 0 : i32
    return %c0_i32, %c0_i32_0 : i32, i32
  }
  func.func @transform_2(%arg0: i32) -> (i32, i32) {
    %c0_i32 = arith.constant 0 : i32
    %c0_i32_0 = arith.constant 0 : i32
    %c0_i32_1 = arith.constant 0 : i32
    return %c0_i32, %c0_i32_0 : i32, i32
  }
  func.func @transform_3(%arg0: i32) -> (i32, i32) {
    %c0_i32 = arith.constant 0 : i32
    %c0_i32_0 = arith.constant 0 : i32
    %c0_i32_1 = arith.constant 0 : i32
    return %c0_i32, %c0_i32_0 : i32, i32
  }
  func.func @transform_4(%arg0: i32) -> (i32, i32) {
    %c0_i32 = arith.constant 0 : i32
    %c0_i32_0 = arith.constant 0 : i32
    %c0_i32_1 = arith.constant 0 : i32
    return %c0_i32, %c0_i32_0 : i32, i32
  }
  func.func @transform_5(%arg0: i32) -> (i32, i32) {
    %c0_i32 = arith.constant 0 : i32
    %c0_i32_0 = arith.constant 0 : i32
    return %arg0, %c0_i32 : i32, i32
  }
}

module attributes {stable_mosaic.version = 11 : i64} {
  func.func @_mm_epilogue_kernel(%arg0: i32, %arg1: memref<8x1152xbf16, #tpu.memory_space<vmem>>, %arg2: memref<1152x256xbf16, #tpu.memory_space<vmem>>, %arg3: memref<1x256xf32, #tpu.memory_space<vmem>>, %arg4: memref<1x256xf32, #tpu.memory_space<vmem>>, %arg5: memref<1x256xf32, #tpu.memory_space<vmem>>, %arg6: memref<8x256xbf16, #tpu.memory_space<vmem>>) attributes {dimension_semantics = [#tpu.dimension_semantics<parallel>], iteration_bounds = array<i64: 1>, scalar_prefetch = 0 : i64, scratch_operands = 0 : i64, tpu.core_type = #tpu.core_type<tc>, window_params = [{transform_indices = @transform_0, window_bounds = array<i64: 8, 1152>}, {pipeline_mode = #tpu.pipeline_mode<synchronous>, transform_indices = @transform_1, window_bounds = array<i64: 1152, 256>}, {pipeline_mode = #tpu.pipeline_mode<synchronous>, transform_indices = @transform_2, window_bounds = array<i64: 1, 256>}, {pipeline_mode = #tpu.pipeline_mode<synchronous>, transform_indices = @transform_3, window_bounds = array<i64: 1, 256>}, {pipeline_mode = #tpu.pipeline_mode<synchronous>, transform_indices = @transform_4, window_bounds = array<i64: 1, 256>}, {transform_indices = @transform_5, window_bounds = array<i64: 8, 256>}]} {
    %c0 = arith.constant 0 : index
    %c0_0 = arith.constant 0 : index
    %0 = vector.load %arg1[%c0, %c0_0] : memref<8x1152xbf16, #tpu.memory_space<vmem>>, vector<8x1152xbf16>
    %c0_1 = arith.constant 0 : index
    %c0_2 = arith.constant 0 : index
    %1 = vector.load %arg2[%c0_1, %c0_2] : memref<1152x256xbf16, #tpu.memory_space<vmem>>, vector<1152x256xbf16>
    %cst = arith.constant dense<0.000000e+00> : vector<8x256xf32>
    %2 = tpu.matmul %0, %1, %cst {dimension_numbers = #tpu.dot_dimension_numbers<[1], [0], [0], [1], [0, 0, 1, 1], [], []>} : vector<8x1152xbf16>, vector<1152x256xbf16>, vector<8x256xf32> -> vector<8x256xf32>
    %c0_3 = arith.constant 0 : index
    %c0_4 = arith.constant 0 : index
    %3 = vector.load %arg3[%c0_3, %c0_4] : memref<1x256xf32, #tpu.memory_space<vmem>>, vector<1x256xf32>
    %4 = vector.broadcast %3 : vector<1x256xf32> to vector<8x256xf32>
    %5 = arith.addf %2, %4 : vector<8x256xf32>
    %cst_5 = arith.constant dense<0.000000e+00> : vector<256xf32>
    %6 = vector.multi_reduction <add>, %5, %cst_5 [0] : vector<8x256xf32> to vector<256xf32>
    %7 = vector.shape_cast %6 : vector<256xf32> to vector<1x256xf32>
    %cst_6 = arith.constant 1.250000e-01 : f32
    %8 = vector.broadcast %cst_6 : f32 to vector<1x256xf32>
    %9 = arith.mulf %7, %8 : vector<1x256xf32>
    %10 = vector.broadcast %9 : vector<1x256xf32> to vector<8x256xf32>
    %11 = arith.subf %5, %10 : vector<8x256xf32>
    %12 = arith.mulf %11, %11 : vector<8x256xf32>
    %cst_7 = arith.constant dense<0.000000e+00> : vector<256xf32>
    %13 = vector.multi_reduction <add>, %12, %cst_7 [0] : vector<8x256xf32> to vector<256xf32>
    %14 = vector.shape_cast %13 : vector<256xf32> to vector<1x256xf32>
    %cst_8 = arith.constant 1.250000e-01 : f32
    %15 = vector.broadcast %cst_8 : f32 to vector<1x256xf32>
    %16 = arith.mulf %14, %15 : vector<1x256xf32>
    %c0_9 = arith.constant 0 : index
    %c0_10 = arith.constant 0 : index
    %17 = vector.load %arg4[%c0_9, %c0_10] : memref<1x256xf32, #tpu.memory_space<vmem>>, vector<1x256xf32>
    %cst_11 = arith.constant 9.99999974E-6 : f32
    %18 = vector.broadcast %cst_11 : f32 to vector<1x256xf32>
    %19 = arith.addf %16, %18 : vector<1x256xf32>
    %20 = math.rsqrt %19 : vector<1x256xf32>
    %21 = arith.mulf %17, %20 : vector<1x256xf32>
    %22 = vector.broadcast %21 : vector<1x256xf32> to vector<8x256xf32>
    %23 = arith.mulf %11, %22 : vector<8x256xf32>
    %c0_12 = arith.constant 0 : index
    %c0_13 = arith.constant 0 : index
    %24 = vector.load %arg5[%c0_12, %c0_13] : memref<1x256xf32, #tpu.memory_space<vmem>>, vector<1x256xf32>
    %25 = vector.broadcast %24 : vector<1x256xf32> to vector<8x256xf32>
    %26 = arith.addf %23, %25 : vector<8x256xf32>
    %cst_14 = arith.constant 0.000000e+00 : f32
    %27 = vector.broadcast %cst_14 : f32 to vector<8x256xf32>
    %28 = arith.cmpf oge, %26, %27 : vector<8x256xf32>
    %cst_15 = arith.constant 2.000000e-01 : f32
    %29 = vector.broadcast %cst_15 : f32 to vector<8x256xf32>
    %30 = arith.mulf %29, %26 : vector<8x256xf32>
    %31 = arith.select %28, %26, %30 : vector<8x256xi1>, vector<8x256xf32>
    %32 = arith.truncf %31 : vector<8x256xf32> to vector<8x256xbf16>
    %c0_16 = arith.constant 0 : index
    %c0_17 = arith.constant 0 : index
    %33 = vector.load %arg6[%c0_16, %c0_17] : memref<8x256xbf16, #tpu.memory_space<vmem>>, vector<8x256xbf16>
    tpu.vector_store %arg6[%c0_16, %c0_17], %32 {strides = array<i32>} : memref<8x256xbf16, #tpu.memory_space<vmem>>, vector<8x256xbf16>,
    return
  }
  func.func @transform_0(%arg0: i32) -> (i32, i32) {
    %c0_i32 = arith.constant 0 : i32
    %c0_i32_0 = arith.constant 0 : i32
    return %arg0, %c0_i32 : i32, i32
  }
  func.func @transform_1(%arg0: i32) -> (i32, i32) {
    %c0_i32 = arith.constant 0 : i32
    %c0_i32_0 = arith.constant 0 : i32
    %c0_i32_1 = arith.constant 0 : i32
    return %c0_i32, %c0_i32_0 : i32, i32
  }
  func.func @transform_2(%arg0: i32) -> (i32, i32) {
    %c0_i32 = arith.constant 0 : i32
    %c0_i32_0 = arith.constant 0 : i32
    %c0_i32_1 = arith.constant 0 : i32
    return %c0_i32, %c0_i32_0 : i32, i32
  }
  func.func @transform_3(%arg0: i32) -> (i32, i32) {
    %c0_i32 = arith.constant 0 : i32
    %c0_i32_0 = arith.constant 0 : i32
    %c0_i32_1 = arith.constant 0 : i32
    return %c0_i32, %c0_i32_0 : i32, i32
  }
  func.func @transform_4(%arg0: i32) -> (i32, i32) {
    %c0_i32 = arith.constant 0 : i32
    %c0_i32_0 = arith.constant 0 : i32
    %c0_i32_1 = arith.constant 0 : i32
    return %c0_i32, %c0_i32_0 : i32, i32
  }
  func.func @transform_5(%arg0: i32) -> (i32, i32) {
    %c0_i32 = arith.constant 0 : i32
    %c0_i32_0 = arith.constant 0 : i32
    return %arg0, %c0_i32 : i32, i32
  }
}

module attributes {stable_mosaic.version = 11 : i64} {
  func.func @_mm_epilogue_kernel(%arg0: i32, %arg1: memref<8x2304xbf16, #tpu.memory_space<vmem>>, %arg2: memref<2304x512xbf16, #tpu.memory_space<vmem>>, %arg3: memref<1x512xf32, #tpu.memory_space<vmem>>, %arg4: memref<1x128xf32, #tpu.memory_space<vmem>>, %arg5: memref<1x128xf32, #tpu.memory_space<vmem>>, %arg6: memref<8x512xbf16, #tpu.memory_space<vmem>>) attributes {dimension_semantics = [#tpu.dimension_semantics<parallel>], iteration_bounds = array<i64: 1>, scalar_prefetch = 0 : i64, scratch_operands = 0 : i64, tpu.core_type = #tpu.core_type<tc>, window_params = [{transform_indices = @transform_0, window_bounds = array<i64: 8, 2304>}, {pipeline_mode = #tpu.pipeline_mode<synchronous>, transform_indices = @transform_1, window_bounds = array<i64: 2304, 512>}, {pipeline_mode = #tpu.pipeline_mode<synchronous>, transform_indices = @transform_2, window_bounds = array<i64: 1, 512>}, {pipeline_mode = #tpu.pipeline_mode<synchronous>, transform_indices = @transform_3, window_bounds = array<i64: 1, 128>}, {pipeline_mode = #tpu.pipeline_mode<synchronous>, transform_indices = @transform_4, window_bounds = array<i64: 1, 128>}, {transform_indices = @transform_5, window_bounds = array<i64: 8, 512>}]} {
    %c0 = arith.constant 0 : index
    %c0_0 = arith.constant 0 : index
    %0 = vector.load %arg1[%c0, %c0_0] : memref<8x2304xbf16, #tpu.memory_space<vmem>>, vector<8x2304xbf16>
    %c0_1 = arith.constant 0 : index
    %c0_2 = arith.constant 0 : index
    %1 = vector.load %arg2[%c0_1, %c0_2] : memref<2304x512xbf16, #tpu.memory_space<vmem>>, vector<2304x512xbf16>
    %cst = arith.constant dense<0.000000e+00> : vector<8x512xf32>
    %2 = tpu.matmul %0, %1, %cst {dimension_numbers = #tpu.dot_dimension_numbers<[1], [0], [0], [1], [0, 0, 1, 1], [], []>} : vector<8x2304xbf16>, vector<2304x512xbf16>, vector<8x512xf32> -> vector<8x512xf32>
    %c0_3 = arith.constant 0 : index
    %c0_4 = arith.constant 0 : index
    %3 = vector.load %arg3[%c0_3, %c0_4] : memref<1x512xf32, #tpu.memory_space<vmem>>, vector<1x512xf32>
    %4 = vector.broadcast %3 : vector<1x512xf32> to vector<8x512xf32>
    %5 = arith.addf %2, %4 : vector<8x512xf32>
    %cst_5 = arith.constant dense<0.000000e+00> : vector<512xf32>
    %6 = vector.multi_reduction <add>, %5, %cst_5 [0] : vector<8x512xf32> to vector<512xf32>
    %7 = vector.shape_cast %6 : vector<512xf32> to vector<1x512xf32>
    %8 = vector.extract_strided_slice %7 {offsets = [0, 0], sizes = [1, 128], strides = [1, 1]} : vector<1x512xf32> to vector<1x128xf32>
    %cst_6 = arith.constant 0.000000e+00 : f32
    %9 = vector.broadcast %cst_6 : f32 to vector<1x128xf32>
    %10 = arith.addf %9, %8 : vector<1x128xf32>
    %11 = vector.extract_strided_slice %7 {offsets = [0, 128], sizes = [1, 128], strides = [1, 1]} : vector<1x512xf32> to vector<1x128xf32>
    %12 = arith.addf %10, %11 : vector<1x128xf32>
    %13 = vector.extract_strided_slice %7 {offsets = [0, 256], sizes = [1, 128], strides = [1, 1]} : vector<1x512xf32> to vector<1x128xf32>
    %14 = arith.addf %12, %13 : vector<1x128xf32>
    %15 = vector.extract_strided_slice %7 {offsets = [0, 384], sizes = [1, 128], strides = [1, 1]} : vector<1x512xf32> to vector<1x128xf32>
    %16 = arith.addf %14, %15 : vector<1x128xf32>
    %cst_7 = arith.constant 3.125000e-02 : f32
    %17 = vector.broadcast %cst_7 : f32 to vector<1x128xf32>
    %18 = arith.mulf %16, %17 : vector<1x128xf32>
    %19 = tpu.concatenate %18, %18, %18, %18 in 1 : vector<1x128xf32>, vector<1x128xf32>, vector<1x128xf32>, vector<1x128xf32> -> vector<1x512xf32>
    %20 = vector.broadcast %19 : vector<1x512xf32> to vector<8x512xf32>
    %21 = arith.subf %5, %20 : vector<8x512xf32>
    %22 = arith.mulf %21, %21 : vector<8x512xf32>
    %cst_8 = arith.constant dense<0.000000e+00> : vector<512xf32>
    %23 = vector.multi_reduction <add>, %22, %cst_8 [0] : vector<8x512xf32> to vector<512xf32>
    %24 = vector.shape_cast %23 : vector<512xf32> to vector<1x512xf32>
    %25 = vector.extract_strided_slice %24 {offsets = [0, 0], sizes = [1, 128], strides = [1, 1]} : vector<1x512xf32> to vector<1x128xf32>
    %cst_9 = arith.constant 0.000000e+00 : f32
    %26 = vector.broadcast %cst_9 : f32 to vector<1x128xf32>
    %27 = arith.addf %26, %25 : vector<1x128xf32>
    %28 = vector.extract_strided_slice %24 {offsets = [0, 128], sizes = [1, 128], strides = [1, 1]} : vector<1x512xf32> to vector<1x128xf32>
    %29 = arith.addf %27, %28 : vector<1x128xf32>
    %30 = vector.extract_strided_slice %24 {offsets = [0, 256], sizes = [1, 128], strides = [1, 1]} : vector<1x512xf32> to vector<1x128xf32>
    %31 = arith.addf %29, %30 : vector<1x128xf32>
    %32 = vector.extract_strided_slice %24 {offsets = [0, 384], sizes = [1, 128], strides = [1, 1]} : vector<1x512xf32> to vector<1x128xf32>
    %33 = arith.addf %31, %32 : vector<1x128xf32>
    %cst_10 = arith.constant 3.125000e-02 : f32
    %34 = vector.broadcast %cst_10 : f32 to vector<1x128xf32>
    %35 = arith.mulf %33, %34 : vector<1x128xf32>
    %c0_11 = arith.constant 0 : index
    %c0_12 = arith.constant 0 : index
    %36 = vector.load %arg4[%c0_11, %c0_12] : memref<1x128xf32, #tpu.memory_space<vmem>>, vector<1x128xf32>
    %cst_13 = arith.constant 9.99999974E-6 : f32
    %37 = vector.broadcast %cst_13 : f32 to vector<1x128xf32>
    %38 = arith.addf %35, %37 : vector<1x128xf32>
    %39 = math.rsqrt %38 : vector<1x128xf32>
    %40 = arith.mulf %36, %39 : vector<1x128xf32>
    %41 = tpu.concatenate %40, %40, %40, %40 in 1 : vector<1x128xf32>, vector<1x128xf32>, vector<1x128xf32>, vector<1x128xf32> -> vector<1x512xf32>
    %42 = vector.broadcast %41 : vector<1x512xf32> to vector<8x512xf32>
    %43 = arith.mulf %21, %42 : vector<8x512xf32>
    %c0_14 = arith.constant 0 : index
    %c0_15 = arith.constant 0 : index
    %44 = vector.load %arg5[%c0_14, %c0_15] : memref<1x128xf32, #tpu.memory_space<vmem>>, vector<1x128xf32>
    %45 = tpu.concatenate %44, %44, %44, %44 in 1 : vector<1x128xf32>, vector<1x128xf32>, vector<1x128xf32>, vector<1x128xf32> -> vector<1x512xf32>
    %46 = vector.broadcast %45 : vector<1x512xf32> to vector<8x512xf32>
    %47 = arith.addf %43, %46 : vector<8x512xf32>
    %cst_16 = arith.constant 0.000000e+00 : f32
    %48 = vector.broadcast %cst_16 : f32 to vector<8x512xf32>
    %49 = arith.cmpf oge, %47, %48 : vector<8x512xf32>
    %cst_17 = arith.constant 2.000000e-01 : f32
    %50 = vector.broadcast %cst_17 : f32 to vector<8x512xf32>
    %51 = arith.mulf %50, %47 : vector<8x512xf32>
    %52 = arith.select %49, %47, %51 : vector<8x512xi1>, vector<8x512xf32>
    %53 = arith.truncf %52 : vector<8x512xf32> to vector<8x512xbf16>
    %c0_18 = arith.constant 0 : index
    %c0_19 = arith.constant 0 : index
    %54 = vector.load %arg6[%c0_18, %c0_19] : memref<8x512xbf16, #tpu.memory_space<vmem>>, vector<8x512xbf16>
    tpu.vector_store %arg6[%c0_18, %c0_19], %53 {strides = array<i32>} : memref<8x512xbf16, #tpu.memory_space<vmem>>, vector<8x512xbf16>,
    return
  }
  func.func @transform_0(%arg0: i32) -> (i32, i32) {
    %c0_i32 = arith.constant 0 : i32
    %c0_i32_0 = arith.constant 0 : i32
    return %arg0, %c0_i32 : i32, i32
  }
  func.func @transform_1(%arg0: i32) -> (i32, i32) {
    %c0_i32 = arith.constant 0 : i32
    %c0_i32_0 = arith.constant 0 : i32
    %c0_i32_1 = arith.constant 0 : i32
    return %c0_i32, %c0_i32_0 : i32, i32
  }
  func.func @transform_2(%arg0: i32) -> (i32, i32) {
    %c0_i32 = arith.constant 0 : i32
    %c0_i32_0 = arith.constant 0 : i32
    %c0_i32_1 = arith.constant 0 : i32
    return %c0_i32, %c0_i32_0 : i32, i32
  }
  func.func @transform_3(%arg0: i32) -> (i32, i32) {
    %c0_i32 = arith.constant 0 : i32
    %c0_i32_0 = arith.constant 0 : i32
    %c0_i32_1 = arith.constant 0 : i32
    return %c0_i32, %c0_i32_0 : i32, i32
  }
  func.func @transform_4(%arg0: i32) -> (i32, i32) {
    %c0_i32 = arith.constant 0 : i32
    %c0_i32_0 = arith.constant 0 : i32
    %c0_i32_1 = arith.constant 0 : i32
    return %c0_i32, %c0_i32_0 : i32, i32
  }
  func.func @transform_5(%arg0: i32) -> (i32, i32) {
    %c0_i32 = arith.constant 0 : i32
    %c0_i32_0 = arith.constant 0 : i32
    return %arg0, %c0_i32 : i32, i32
  }
}

module attributes {stable_mosaic.version = 11 : i64} {
  func.func @_mm_epilogue_kernel(%arg0: i32, %arg1: memref<32x1152xbf16, #tpu.memory_space<vmem>>, %arg2: memref<1152x256xbf16, #tpu.memory_space<vmem>>, %arg3: memref<1x256xf32, #tpu.memory_space<vmem>>, %arg4: memref<1x64xf32, #tpu.memory_space<vmem>>, %arg5: memref<1x64xf32, #tpu.memory_space<vmem>>, %arg6: memref<32x256xbf16, #tpu.memory_space<vmem>>) attributes {dimension_semantics = [#tpu.dimension_semantics<parallel>], iteration_bounds = array<i64: 1>, scalar_prefetch = 0 : i64, scratch_operands = 0 : i64, tpu.core_type = #tpu.core_type<tc>, window_params = [{transform_indices = @transform_0, window_bounds = array<i64: 32, 1152>}, {pipeline_mode = #tpu.pipeline_mode<synchronous>, transform_indices = @transform_1, window_bounds = array<i64: 1152, 256>}, {pipeline_mode = #tpu.pipeline_mode<synchronous>, transform_indices = @transform_2, window_bounds = array<i64: 1, 256>}, {pipeline_mode = #tpu.pipeline_mode<synchronous>, transform_indices = @transform_3, window_bounds = array<i64: 1, 64>}, {pipeline_mode = #tpu.pipeline_mode<synchronous>, transform_indices = @transform_4, window_bounds = array<i64: 1, 64>}, {transform_indices = @transform_5, window_bounds = array<i64: 32, 256>}]} {
    %c0 = arith.constant 0 : index
    %c0_0 = arith.constant 0 : index
    %0 = vector.load %arg1[%c0, %c0_0] : memref<32x1152xbf16, #tpu.memory_space<vmem>>, vector<32x1152xbf16>
    %c0_1 = arith.constant 0 : index
    %c0_2 = arith.constant 0 : index
    %1 = vector.load %arg2[%c0_1, %c0_2] : memref<1152x256xbf16, #tpu.memory_space<vmem>>, vector<1152x256xbf16>
    %cst = arith.constant dense<0.000000e+00> : vector<32x256xf32>
    %2 = tpu.matmul %0, %1, %cst {dimension_numbers = #tpu.dot_dimension_numbers<[1], [0], [0], [1], [0, 0, 1, 1], [], []>} : vector<32x1152xbf16>, vector<1152x256xbf16>, vector<32x256xf32> -> vector<32x256xf32>
    %c0_3 = arith.constant 0 : index
    %c0_4 = arith.constant 0 : index
    %3 = vector.load %arg3[%c0_3, %c0_4] : memref<1x256xf32, #tpu.memory_space<vmem>>, vector<1x256xf32>
    %4 = vector.broadcast %3 : vector<1x256xf32> to vector<32x256xf32>
    %5 = arith.addf %2, %4 : vector<32x256xf32>
    %cst_5 = arith.constant dense<0.000000e+00> : vector<256xf32>
    %6 = vector.multi_reduction <add>, %5, %cst_5 [0] : vector<32x256xf32> to vector<256xf32>
    %7 = vector.shape_cast %6 : vector<256xf32> to vector<1x256xf32>
    %8 = vector.extract_strided_slice %7 {offsets = [0, 0], sizes = [1, 64], strides = [1, 1]} : vector<1x256xf32> to vector<1x64xf32>
    %cst_6 = arith.constant 0.000000e+00 : f32
    %9 = vector.broadcast %cst_6 : f32 to vector<1x64xf32>
    %10 = arith.addf %9, %8 : vector<1x64xf32>
    %11 = vector.extract_strided_slice %7 {offsets = [0, 64], sizes = [1, 64], strides = [1, 1]} : vector<1x256xf32> to vector<1x64xf32>
    %12 = arith.addf %10, %11 : vector<1x64xf32>
    %13 = vector.extract_strided_slice %7 {offsets = [0, 128], sizes = [1, 64], strides = [1, 1]} : vector<1x256xf32> to vector<1x64xf32>
    %14 = arith.addf %12, %13 : vector<1x64xf32>
    %15 = vector.extract_strided_slice %7 {offsets = [0, 192], sizes = [1, 64], strides = [1, 1]} : vector<1x256xf32> to vector<1x64xf32>
    %16 = arith.addf %14, %15 : vector<1x64xf32>
    %cst_7 = arith.constant 7.812500e-03 : f32
    %17 = vector.broadcast %cst_7 : f32 to vector<1x64xf32>
    %18 = arith.mulf %16, %17 : vector<1x64xf32>
    %19 = tpu.concatenate %18, %18, %18, %18 in 1 : vector<1x64xf32>, vector<1x64xf32>, vector<1x64xf32>, vector<1x64xf32> -> vector<1x256xf32>
    %20 = vector.broadcast %19 : vector<1x256xf32> to vector<32x256xf32>
    %21 = arith.subf %5, %20 : vector<32x256xf32>
    %22 = arith.mulf %21, %21 : vector<32x256xf32>
    %cst_8 = arith.constant dense<0.000000e+00> : vector<256xf32>
    %23 = vector.multi_reduction <add>, %22, %cst_8 [0] : vector<32x256xf32> to vector<256xf32>
    %24 = vector.shape_cast %23 : vector<256xf32> to vector<1x256xf32>
    %25 = vector.extract_strided_slice %24 {offsets = [0, 0], sizes = [1, 64], strides = [1, 1]} : vector<1x256xf32> to vector<1x64xf32>
    %cst_9 = arith.constant 0.000000e+00 : f32
    %26 = vector.broadcast %cst_9 : f32 to vector<1x64xf32>
    %27 = arith.addf %26, %25 : vector<1x64xf32>
    %28 = vector.extract_strided_slice %24 {offsets = [0, 64], sizes = [1, 64], strides = [1, 1]} : vector<1x256xf32> to vector<1x64xf32>
    %29 = arith.addf %27, %28 : vector<1x64xf32>
    %30 = vector.extract_strided_slice %24 {offsets = [0, 128], sizes = [1, 64], strides = [1, 1]} : vector<1x256xf32> to vector<1x64xf32>
    %31 = arith.addf %29, %30 : vector<1x64xf32>
    %32 = vector.extract_strided_slice %24 {offsets = [0, 192], sizes = [1, 64], strides = [1, 1]} : vector<1x256xf32> to vector<1x64xf32>
    %33 = arith.addf %31, %32 : vector<1x64xf32>
    %cst_10 = arith.constant 7.812500e-03 : f32
    %34 = vector.broadcast %cst_10 : f32 to vector<1x64xf32>
    %35 = arith.mulf %33, %34 : vector<1x64xf32>
    %c0_11 = arith.constant 0 : index
    %c0_12 = arith.constant 0 : index
    %36 = vector.load %arg4[%c0_11, %c0_12] : memref<1x64xf32, #tpu.memory_space<vmem>>, vector<1x64xf32>
    %cst_13 = arith.constant 9.99999974E-6 : f32
    %37 = vector.broadcast %cst_13 : f32 to vector<1x64xf32>
    %38 = arith.addf %35, %37 : vector<1x64xf32>
    %39 = math.rsqrt %38 : vector<1x64xf32>
    %40 = arith.mulf %36, %39 : vector<1x64xf32>
    %41 = tpu.concatenate %40, %40, %40, %40 in 1 : vector<1x64xf32>, vector<1x64xf32>, vector<1x64xf32>, vector<1x64xf32> -> vector<1x256xf32>
    %42 = vector.broadcast %41 : vector<1x256xf32> to vector<32x256xf32>
    %43 = arith.mulf %21, %42 : vector<32x256xf32>
    %c0_14 = arith.constant 0 : index
    %c0_15 = arith.constant 0 : index
    %44 = vector.load %arg5[%c0_14, %c0_15] : memref<1x64xf32, #tpu.memory_space<vmem>>, vector<1x64xf32>
    %45 = tpu.concatenate %44, %44, %44, %44 in 1 : vector<1x64xf32>, vector<1x64xf32>, vector<1x64xf32>, vector<1x64xf32> -> vector<1x256xf32>
    %46 = vector.broadcast %45 : vector<1x256xf32> to vector<32x256xf32>
    %47 = arith.addf %43, %46 : vector<32x256xf32>
    %cst_16 = arith.constant 0.000000e+00 : f32
    %48 = vector.broadcast %cst_16 : f32 to vector<32x256xf32>
    %49 = arith.cmpf oge, %47, %48 : vector<32x256xf32>
    %cst_17 = arith.constant 2.000000e-01 : f32
    %50 = vector.broadcast %cst_17 : f32 to vector<32x256xf32>
    %51 = arith.mulf %50, %47 : vector<32x256xf32>
    %52 = arith.select %49, %47, %51 : vector<32x256xi1>, vector<32x256xf32>
    %53 = arith.truncf %52 : vector<32x256xf32> to vector<32x256xbf16>
    %c0_18 = arith.constant 0 : index
    %c0_19 = arith.constant 0 : index
    %54 = vector.load %arg6[%c0_18, %c0_19] : memref<32x256xbf16, #tpu.memory_space<vmem>>, vector<32x256xbf16>
    tpu.vector_store %arg6[%c0_18, %c0_19], %53 {strides = array<i32>} : memref<32x256xbf16, #tpu.memory_space<vmem>>, vector<32x256xbf16>,
    return
  }
  func.func @transform_0(%arg0: i32) -> (i32, i32) {
    %c0_i32 = arith.constant 0 : i32
    %c0_i32_0 = arith.constant 0 : i32
    return %arg0, %c0_i32 : i32, i32
  }
  func.func @transform_1(%arg0: i32) -> (i32, i32) {
    %c0_i32 = arith.constant 0 : i32
    %c0_i32_0 = arith.constant 0 : i32
    %c0_i32_1 = arith.constant 0 : i32
    return %c0_i32, %c0_i32_0 : i32, i32
  }
  func.func @transform_2(%arg0: i32) -> (i32, i32) {
    %c0_i32 = arith.constant 0 : i32
    %c0_i32_0 = arith.constant 0 : i32
    %c0_i32_1 = arith.constant 0 : i32
    return %c0_i32, %c0_i32_0 : i32, i32
  }
  func.func @transform_3(%arg0: i32) -> (i32, i32) {
    %c0_i32 = arith.constant 0 : i32
    %c0_i32_0 = arith.constant 0 : i32
    %c0_i32_1 = arith.constant 0 : i32
    return %c0_i32, %c0_i32_0 : i32, i32
  }
  func.func @transform_4(%arg0: i32) -> (i32, i32) {
    %c0_i32 = arith.constant 0 : i32
    %c0_i32_0 = arith.constant 0 : i32
    %c0_i32_1 = arith.constant 0 : i32
    return %c0_i32, %c0_i32_0 : i32, i32
  }
  func.func @transform_5(%arg0: i32) -> (i32, i32) {
    %c0_i32 = arith.constant 0 : i32
    %c0_i32_0 = arith.constant 0 : i32
    return %arg0, %c0_i32 : i32, i32
  }
}

module attributes {stable_mosaic.version = 11 : i64} {
  func.func @_mm_epilogue_kernel(%arg0: i32, %arg1: memref<128x576xbf16, #tpu.memory_space<vmem>>, %arg2: memref<576x128xbf16, #tpu.memory_space<vmem>>, %arg3: memref<1x128xf32, #tpu.memory_space<vmem>>, %arg4: memref<1x32xf32, #tpu.memory_space<vmem>>, %arg5: memref<1x32xf32, #tpu.memory_space<vmem>>, %arg6: memref<128x128xbf16, #tpu.memory_space<vmem>>) attributes {dimension_semantics = [#tpu.dimension_semantics<parallel>], iteration_bounds = array<i64: 1>, scalar_prefetch = 0 : i64, scratch_operands = 0 : i64, tpu.core_type = #tpu.core_type<tc>, window_params = [{transform_indices = @transform_0, window_bounds = array<i64: 128, 576>}, {pipeline_mode = #tpu.pipeline_mode<synchronous>, transform_indices = @transform_1, window_bounds = array<i64: 576, 128>}, {pipeline_mode = #tpu.pipeline_mode<synchronous>, transform_indices = @transform_2, window_bounds = array<i64: 1, 128>}, {pipeline_mode = #tpu.pipeline_mode<synchronous>, transform_indices = @transform_3, window_bounds = array<i64: 1, 32>}, {pipeline_mode = #tpu.pipeline_mode<synchronous>, transform_indices = @transform_4, window_bounds = array<i64: 1, 32>}, {transform_indices = @transform_5, window_bounds = array<i64: 128, 128>}]} {
    %c0 = arith.constant 0 : index
    %c0_0 = arith.constant 0 : index
    %0 = vector.load %arg1[%c0, %c0_0] : memref<128x576xbf16, #tpu.memory_space<vmem>>, vector<128x576xbf16>
    %c0_1 = arith.constant 0 : index
    %c0_2 = arith.constant 0 : index
    %1 = vector.load %arg2[%c0_1, %c0_2] : memref<576x128xbf16, #tpu.memory_space<vmem>>, vector<576x128xbf16>
    %cst = arith.constant dense<0.000000e+00> : vector<128x128xf32>
    %2 = tpu.matmul %0, %1, %cst {dimension_numbers = #tpu.dot_dimension_numbers<[1], [0], [0], [1], [0, 0, 1, 1], [], []>} : vector<128x576xbf16>, vector<576x128xbf16>, vector<128x128xf32> -> vector<128x128xf32>
    %c0_3 = arith.constant 0 : index
    %c0_4 = arith.constant 0 : index
    %3 = vector.load %arg3[%c0_3, %c0_4] : memref<1x128xf32, #tpu.memory_space<vmem>>, vector<1x128xf32>
    %4 = vector.broadcast %3 : vector<1x128xf32> to vector<128x128xf32>
    %5 = arith.addf %2, %4 : vector<128x128xf32>
    %cst_5 = arith.constant dense<0.000000e+00> : vector<128xf32>
    %6 = vector.multi_reduction <add>, %5, %cst_5 [0] : vector<128x128xf32> to vector<128xf32>
    %7 = vector.shape_cast %6 : vector<128xf32> to vector<1x128xf32>
    %8 = vector.extract_strided_slice %7 {offsets = [0, 0], sizes = [1, 32], strides = [1, 1]} : vector<1x128xf32> to vector<1x32xf32>
    %cst_6 = arith.constant 0.000000e+00 : f32
    %9 = vector.broadcast %cst_6 : f32 to vector<1x32xf32>
    %10 = arith.addf %9, %8 : vector<1x32xf32>
    %11 = vector.extract_strided_slice %7 {offsets = [0, 32], sizes = [1, 32], strides = [1, 1]} : vector<1x128xf32> to vector<1x32xf32>
    %12 = arith.addf %10, %11 : vector<1x32xf32>
    %13 = vector.extract_strided_slice %7 {offsets = [0, 64], sizes = [1, 32], strides = [1, 1]} : vector<1x128xf32> to vector<1x32xf32>
    %14 = arith.addf %12, %13 : vector<1x32xf32>
    %15 = vector.extract_strided_slice %7 {offsets = [0, 96], sizes = [1, 32], strides = [1, 1]} : vector<1x128xf32> to vector<1x32xf32>
    %16 = arith.addf %14, %15 : vector<1x32xf32>
    %cst_7 = arith.constant 0.001953125 : f32
    %17 = vector.broadcast %cst_7 : f32 to vector<1x32xf32>
    %18 = arith.mulf %16, %17 : vector<1x32xf32>
    %19 = tpu.concatenate %18, %18, %18, %18 in 1 : vector<1x32xf32>, vector<1x32xf32>, vector<1x32xf32>, vector<1x32xf32> -> vector<1x128xf32>
    %20 = vector.broadcast %19 : vector<1x128xf32> to vector<128x128xf32>
    %21 = arith.subf %5, %20 : vector<128x128xf32>
    %22 = arith.mulf %21, %21 : vector<128x128xf32>
    %cst_8 = arith.constant dense<0.000000e+00> : vector<128xf32>
    %23 = vector.multi_reduction <add>, %22, %cst_8 [0] : vector<128x128xf32> to vector<128xf32>
    %24 = vector.shape_cast %23 : vector<128xf32> to vector<1x128xf32>
    %25 = vector.extract_strided_slice %24 {offsets = [0, 0], sizes = [1, 32], strides = [1, 1]} : vector<1x128xf32> to vector<1x32xf32>
    %cst_9 = arith.constant 0.000000e+00 : f32
    %26 = vector.broadcast %cst_9 : f32 to vector<1x32xf32>
    %27 = arith.addf %26, %25 : vector<1x32xf32>
    %28 = vector.extract_strided_slice %24 {offsets = [0, 32], sizes = [1, 32], strides = [1, 1]} : vector<1x128xf32> to vector<1x32xf32>
    %29 = arith.addf %27, %28 : vector<1x32xf32>
    %30 = vector.extract_strided_slice %24 {offsets = [0, 64], sizes = [1, 32], strides = [1, 1]} : vector<1x128xf32> to vector<1x32xf32>
    %31 = arith.addf %29, %30 : vector<1x32xf32>
    %32 = vector.extract_strided_slice %24 {offsets = [0, 96], sizes = [1, 32], strides = [1, 1]} : vector<1x128xf32> to vector<1x32xf32>
    %33 = arith.addf %31, %32 : vector<1x32xf32>
    %cst_10 = arith.constant 0.001953125 : f32
    %34 = vector.broadcast %cst_10 : f32 to vector<1x32xf32>
    %35 = arith.mulf %33, %34 : vector<1x32xf32>
    %c0_11 = arith.constant 0 : index
    %c0_12 = arith.constant 0 : index
    %36 = vector.load %arg4[%c0_11, %c0_12] : memref<1x32xf32, #tpu.memory_space<vmem>>, vector<1x32xf32>
    %cst_13 = arith.constant 9.99999974E-6 : f32
    %37 = vector.broadcast %cst_13 : f32 to vector<1x32xf32>
    %38 = arith.addf %35, %37 : vector<1x32xf32>
    %39 = math.rsqrt %38 : vector<1x32xf32>
    %40 = arith.mulf %36, %39 : vector<1x32xf32>
    %41 = tpu.concatenate %40, %40, %40, %40 in 1 : vector<1x32xf32>, vector<1x32xf32>, vector<1x32xf32>, vector<1x32xf32> -> vector<1x128xf32>
    %42 = vector.broadcast %41 : vector<1x128xf32> to vector<128x128xf32>
    %43 = arith.mulf %21, %42 : vector<128x128xf32>
    %c0_14 = arith.constant 0 : index
    %c0_15 = arith.constant 0 : index
    %44 = vector.load %arg5[%c0_14, %c0_15] : memref<1x32xf32, #tpu.memory_space<vmem>>, vector<1x32xf32>
    %45 = tpu.concatenate %44, %44, %44, %44 in 1 : vector<1x32xf32>, vector<1x32xf32>, vector<1x32xf32>, vector<1x32xf32> -> vector<1x128xf32>
    %46 = vector.broadcast %45 : vector<1x128xf32> to vector<128x128xf32>
    %47 = arith.addf %43, %46 : vector<128x128xf32>
    %cst_16 = arith.constant 0.000000e+00 : f32
    %48 = vector.broadcast %cst_16 : f32 to vector<128x128xf32>
    %49 = arith.cmpf oge, %47, %48 : vector<128x128xf32>
    %cst_17 = arith.constant 2.000000e-01 : f32
    %50 = vector.broadcast %cst_17 : f32 to vector<128x128xf32>
    %51 = arith.mulf %50, %47 : vector<128x128xf32>
    %52 = arith.select %49, %47, %51 : vector<128x128xi1>, vector<128x128xf32>
    %53 = arith.truncf %52 : vector<128x128xf32> to vector<128x128xbf16>
    %c0_18 = arith.constant 0 : index
    %c0_19 = arith.constant 0 : index
    %54 = vector.load %arg6[%c0_18, %c0_19] : memref<128x128xbf16, #tpu.memory_space<vmem>>, vector<128x128xbf16>
    tpu.vector_store %arg6[%c0_18, %c0_19], %53 {strides = array<i32>} : memref<128x128xbf16, #tpu.memory_space<vmem>>, vector<128x128xbf16>,
    return
  }
  func.func @transform_0(%arg0: i32) -> (i32, i32) {
    %c0_i32 = arith.constant 0 : i32
    %c0_i32_0 = arith.constant 0 : i32
    return %arg0, %c0_i32 : i32, i32
  }
  func.func @transform_1(%arg0: i32) -> (i32, i32) {
    %c0_i32 = arith.constant 0 : i32
    %c0_i32_0 = arith.constant 0 : i32
    %c0_i32_1 = arith.constant 0 : i32
    return %c0_i32, %c0_i32_0 : i32, i32
  }
  func.func @transform_2(%arg0: i32) -> (i32, i32) {
    %c0_i32 = arith.constant 0 : i32
    %c0_i32_0 = arith.constant 0 : i32
    %c0_i32_1 = arith.constant 0 : i32
    return %c0_i32, %c0_i32_0 : i32, i32
  }
  func.func @transform_3(%arg0: i32) -> (i32, i32) {
    %c0_i32 = arith.constant 0 : i32
    %c0_i32_0 = arith.constant 0 : i32
    %c0_i32_1 = arith.constant 0 : i32
    return %c0_i32, %c0_i32_0 : i32, i32
  }
  func.func @transform_4(%arg0: i32) -> (i32, i32) {
    %c0_i32 = arith.constant 0 : i32
    %c0_i32_0 = arith.constant 0 : i32
    %c0_i32_1 = arith.constant 0 : i32
    return %c0_i32, %c0_i32_0 : i32, i32
  }
  func.func @transform_5(%arg0: i32) -> (i32, i32) {
    %c0_i32 = arith.constant 0 : i32
    %c0_i32_0 = arith.constant 0 : i32
    return %arg0, %c0_i32 : i32, i32
  }
}

module attributes {stable_mosaic.version = 11 : i64} {
  func.func @_mm_epilogue_kernel(%arg0: i32, %arg1: memref<256x288xbf16, #tpu.memory_space<vmem>>, %arg2: memref<288x128xbf16, #tpu.memory_space<vmem>>, %arg3: memref<1x128xf32, #tpu.memory_space<vmem>>, %arg4: memref<256x128xf32, #tpu.memory_space<vmem>>) attributes {dimension_semantics = [#tpu.dimension_semantics<parallel>], iteration_bounds = array<i64: 2>, scalar_prefetch = 0 : i64, scratch_operands = 0 : i64, tpu.core_type = #tpu.core_type<tc>, window_params = [{transform_indices = @transform_0, window_bounds = array<i64: 256, 288>}, {pipeline_mode = #tpu.pipeline_mode<synchronous>, transform_indices = @transform_1, window_bounds = array<i64: 288, 128>}, {pipeline_mode = #tpu.pipeline_mode<synchronous>, transform_indices = @transform_2, window_bounds = array<i64: 1, 128>}, {transform_indices = @transform_3, window_bounds = array<i64: 256, 128>}]} {
    %c0 = arith.constant 0 : index
    %c0_0 = arith.constant 0 : index
    %0 = vector.load %arg1[%c0, %c0_0] : memref<256x288xbf16, #tpu.memory_space<vmem>>, vector<256x288xbf16>
    %c0_1 = arith.constant 0 : index
    %c0_2 = arith.constant 0 : index
    %1 = vector.load %arg2[%c0_1, %c0_2] : memref<288x128xbf16, #tpu.memory_space<vmem>>, vector<288x128xbf16>
    %cst = arith.constant dense<0.000000e+00> : vector<256x128xf32>
    %2 = tpu.matmul %0, %1, %cst {dimension_numbers = #tpu.dot_dimension_numbers<[1], [0], [0], [1], [0, 0, 1, 1], [], []>} : vector<256x288xbf16>, vector<288x128xbf16>, vector<256x128xf32> -> vector<256x128xf32>
    %c0_3 = arith.constant 0 : index
    %c0_4 = arith.constant 0 : index
    %3 = vector.load %arg3[%c0_3, %c0_4] : memref<1x128xf32, #tpu.memory_space<vmem>>, vector<1x128xf32>
    %4 = vector.broadcast %3 : vector<1x128xf32> to vector<256x128xf32>
    %5 = arith.addf %2, %4 : vector<256x128xf32>
    %cst_5 = arith.constant 0.000000e+00 : f32
    %6 = vector.broadcast %cst_5 : f32 to vector<256x128xf32>
    %7 = arith.subf %6, %5 : vector<256x128xf32>
    %8 = math.exp %7 : vector<256x128xf32>
    %cst_6 = arith.constant 1.000000e+00 : f32
    %9 = vector.broadcast %cst_6 : f32 to vector<256x128xf32>
    %10 = arith.addf %9, %8 : vector<256x128xf32>
    %11 = tpu.reciprocal %10 {approx = true} : vector<256x128xf32> -> vector<256x128xf32>
    %c0_7 = arith.constant 0 : index
    %c0_8 = arith.constant 0 : index
    %12 = vector.load %arg4[%c0_7, %c0_8] : memref<256x128xf32, #tpu.memory_space<vmem>>, vector<256x128xf32>
    tpu.vector_store %arg4[%c0_7, %c0_8], %11 {strides = array<i32>} : memref<256x128xf32, #tpu.memory_space<vmem>>, vector<256x128xf32>,
    return
  }
  func.func @transform_0(%arg0: i32) -> (i32, i32) {
    %c0_i32 = arith.constant 0 : i32
    %c0_i32_0 = arith.constant 0 : i32
    return %arg0, %c0_i32 : i32, i32
  }
  func.func @transform_1(%arg0: i32) -> (i32, i32) {
    %c0_i32 = arith.constant 0 : i32
    %c0_i32_0 = arith.constant 0 : i32
    %c0_i32_1 = arith.constant 0 : i32
    return %c0_i32, %c0_i32_0 : i32, i32
  }
  func.func @transform_2(%arg0: i32) -> (i32, i32) {
    %c0_i32 = arith.constant 0 : i32
    %c0_i32_0 = arith.constant 0 : i32
    %c0_i32_1 = arith.constant 0 : i32
    return %c0_i32, %c0_i32_0 : i32, i32
  }
  func.func @transform_3(%arg0: i32) -> (i32, i32) {
    %c0_i32 = arith.constant 0 : i32
    %c0_i32_0 = arith.constant 0 : i32
    return %arg0, %c0_i32 : i32, i32
  }
}

</mosaic_0001>

<bundles_post_ra>
// kernel: my_autoencoder_forward.8
= control target key start
LH: loop header
LB: loop body
LE: loop exit
PB: predicated region body
PF: predicated region fallthrough
CT: control target
= control target key end

     0   :  { %8 = vsyncpa [#allocation3], 0  ;;  %s694_s0 = inlined_call_operand.vmem [shape: bf16[128,25], index: 0, kind: input, shape index: {}]   ;;  %s695_s1 = inlined_call_operand.hbm [shape: bf16[25,32], index: 1, kind: input, shape index: {}]   ;;  %s696_s2 = inlined_call_operand.hbm [shape: f32[1,32], index: 2, kind: input, shape index: {}]   ;;  %s697_s3 = inlined_call_operand.vmem [shape: bf16[128,32], index: 3, kind: output, shape index: {}]  }
   0x1   :  { %9 = vsyncpa [#allocation5], 0  ;;  %s531_s12 = smov [#allocation2]   ;;  %s483_s16 = scalar_lea.hbm %s695_s1, 256 }
   0x2   :  { %s17_s13 = sshll.u32 %s531_s12, 4  ;;  %p484_p0 = scmp.ne.s32.totalorder %s695_s1, %s483_s16  ;;  %s18_s13 = int_to_ptr.vmem [resolvable:$true] %s17_s13 }
   0x3   :  { %p487_p1 = scmp.lt.u32.totalorder %s483_s16, %s695_s1 }
   0x5   :  { %p489_p2 = pnand %p487_p1, %p484_p0 }
   0x7   :  { %492 = shalt.err (!%p489_p2)
}
   0x8   :  { %s493_s21 = scalar_lea.vmem %s18_s13, 256  ;;  %p498_p4 = scmp.lt.s32.totalorder %s18_s13, %s18_s13 }
   0x9   :  { %p494_p3 = scmp.ne.s32.totalorder %s18_s13, %s493_s21  ;;  %p499_p5 = scmp.lt.s32.totalorder %s493_s21, %s493_s21 }
   0xb   :  { %p500_p6 = por %p499_p5, %p498_p4 }
   0xd   :  { %p501_p7 = pnand %p500_p6, %p494_p3 }
   0xf   :  { %504 = shalt.err (!%p501_p7)
}
  0x10   :  { %s532_s22 = smov 64   ;;  %s533_s23 = smov 4  }
  0x11   :  { %23 = dma.hbm_to_vmem [thread:$0]  %s695_s1, 256, %s18_s13, [#allocation3], %s532_s22, %s532_s22, %s533_s23  }
  0x12   :  { %s534_s26 = smov [#allocation4]   ;;  %s505_s30 = scalar_lea.hbm %s696_s2, 16 }
  0x13   :  { %s30_s27 = sshll.u32 %s534_s26, 4  ;;  %p506_p8 = scmp.ne.s32.totalorder %s696_s2, %s505_s30  ;;  %s31_s27 = int_to_ptr.vmem [resolvable:$true] %s30_s27 }
  0x14   :  { %p509_p9 = scmp.lt.u32.totalorder %s505_s30, %s696_s2 }
  0x16   :  { %p511_p10 = pnand %p509_p9, %p506_p8 }
  0x18   :  { %514 = shalt.err (!%p511_p10)
}
  0x19   :  { %s515_s8 = scalar_lea.vmem %s31_s27, 16  ;;  %s519_s1 = scalar_lea.vmem %s31_s27, 32 }
  0x1a   :  { %p516_p11 = scmp.ne.s32.totalorder %s31_s27, %s515_s8  ;;  %p520_p12 = scmp.lt.s32.totalorder %s31_s27, %s31_s27 }
  0x1b   :  { %p521_p13 = scmp.lt.s32.totalorder %s519_s1, %s515_s8 }
  0x1d   :  { %p522_p0 = por %p521_p13, %p520_p12 }
  0x1f   :  { %p523_p1 = pnand %p522_p0, %p516_p11 }
  0x21   :  { %526 = shalt.err (!%p523_p1)
}
  0x22   :  { %33 = dma.hbm_to_vmem [thread:$0]  %s696_s2, 16, %s31_s27, [#allocation5]  }
  0x23   :  { %527 = dma.done.wait [#allocation3], 256  }
  0x24   :  { %528 = vsyncadd [#allocation3], 4294967040 }
  0x25   :  { %529 = dma.done.wait [#allocation5], 16  }
  0x26   :  { %530 = vsyncadd [#allocation5], 4294967280  ;;  %vm144_vm0 = vcmask 1043456   ;;  %vm145_vm1 = vcmask 1044480   ;;  %v535_v0 = vmov 65535   ;;  %vm119_vm2 = vcmask 203776  }
  0x27   :  { %v146_v1 = vsel %vm144_vm0, 4294967295, %v535_v0  ;;  %v473_v2 = vld [vmem:[#allocation2] sm:$0xff]   ;;  %v474_v4 = vld [vmem:[#allocation2 + $0x8] sm:$0x1f]   ;;  %v479_v10 = vld [vmem:[%s694_s0 + $0x10] sm:$0xff]   ;;  %vm360_vm3 = vcmask 257024  }
  0x28   :  { %v147_v3 = vsel %vm145_vm1, %v146_v1, 0  ;;  %444 = vmatprep.subr.bf16.mxu0 %v473_v2  ;;  %464 = vmatprep.subr.bf16.mxu1 %v473_v2  ;;  %v475_v5 = vld [vmem:[%s694_s0] sm:$0xff]   ;;  %v477_v8 = vld [vmem:[%s694_s0 + $0x8] sm:$0xff]   ;;  %v480_v11 = vld [vmem:[%s694_s0 + $0x30] sm:$0xff]  }
  0x29   :  { %445 = vmatpush3.bf16.msra.mxu0 %v473_v2  ;;  %466 = vmatpush3.bf16.msra.mxu1 %v473_v2  ;;  %v149_v6 = vand.u32 %v474_v4, %v147_v3  ;;  %v476_v7 = vld [vmem:[%s694_s0 + $0x20] sm:$0xff]   ;;  %v478_v9 = vld [vmem:[%s694_s0 + $0x28] sm:$0xff]   ;;  %v481_v12 = vld [vmem:[%s694_s0 + $0x18] sm:$0xff]  }
  0x2a   :  { %448 = vmatprep.mubr.msk.bf16.mxu0 %vm119_vm2, %v475_v5  ;;  %456 = vmatprep.mubr.msk.bf16.mxu1 %vm119_vm2, %v476_v7  ;;  %v482_v13 = vld [vmem:[%s694_s0 + $0x38] sm:$0xff]   ;;  %v612_v14 = vld [vmem:[#allocation4] ss:$0 sm:$0xff] }
  0x2b   :  { %446 = vmatprep.subr.bf16.mxu0 %v149_v6  ;;  %465 = vmatprep.subr.bf16.mxu1 %v149_v6 }
  0x2d   :  { %447 = vmatpush3.bf16.msra.mxu0 %v149_v6  ;;  %467 = vmatpush3.bf16.msra.mxu1 %v149_v6 }
  0x30   :  { %449 = vmatmul.mubr.msk.bf16.vlgmr.msra.gmra.mrb[0].mxu0 %vm119_vm2, %v477_v8  ;;  %457 = vmatmul.mubr.msk.bf16.vlgmr.msra.gmra.mrb[0].mxu1 %vm119_vm2, %v478_v9 }
  0x31   :  { %452 = vmatprep.mubr.msk.bf16.mxu0 %vm119_vm2, %v479_v10  ;;  %460 = vmatprep.mubr.msk.bf16.mxu1 %vm119_vm2, %v480_v11 }
  0x38   :  { %453 = vmatmul.mubr.msk.bf16.gmra.mrb[4].mxu0 %vm119_vm2, %v481_v12  ;;  %461 = vmatmul.mubr.msk.bf16.gmra.mrb[4].mxu1 %vm119_vm2, %v482_v13 }
 0x103   :  { %v450_v15 = vpop.f32.mrb[0].mxu0  ;;  %v458_v16 = vpop.f32.mrb[0].mxu1 }
 0x104   :  { %v194_v17 = vadd.f32 %v450_v15, %v612_v14  ;;  %v226_v18 = vadd.f32 %v458_v16, %v612_v14  ;;  %v185_v19 = vpop.f32.mrb[1].mxu0  ;;  %v217_v20 = vpop.f32.mrb[1].mxu1 }
 0x105   :  { %v186_v21 = vadd.f32 %v612_v14, %v185_v19  ;;  %v218_v22 = vadd.f32 %v612_v14, %v217_v20  ;;  %v451_v23 = vpop.f32.mrb[2].mxu0  ;;  %v459_v24 = vpop.f32.mrb[2].mxu1 }
 0x106   :  { %vm250_vm4 = vcmp.ge.f32.partialorder %v194_v17, 0.0  ;;  %v266_v25 = vmul.f32 0.2, %v194_v17  ;;  %vm258_vm5 = vcmp.ge.f32.partialorder %v226_v18, 0.0  ;;  %v274_v26 = vmul.f32 0.2, %v226_v18 }
 0x107   :  { %vm248_vm6 = vcmp.ge.f32.partialorder %v186_v21, 0.0  ;;  %v264_v27 = vmul.f32 0.2, %v186_v21  ;;  %vm256_vm7 = vcmp.ge.f32.partialorder %v218_v22, 0.0  ;;  %v272_v28 = vmul.f32 0.2, %v218_v22 }
 0x108   :  { %v282_v29 = vsel %vm250_vm4, %v194_v17, %v266_v25  ;;  %v290_v30 = vsel %vm258_vm5, %v226_v18, %v274_v26  ;;  %v197_v31 = vadd.f32 %v451_v23, %v612_v14  ;;  %v229_v32 = vadd.f32 %v459_v24, %v612_v14  ;;  %v188_v33 = vpop.f32.mrb[3].mxu0  ;;  %v220_v34 = vpop.f32.mrb[3].mxu1 }
 0x109   :  { %v420_v35 = vpack.c.bf16 %v282_v29, %v282_v29  ;;  %v428_v36 = vpack.c.bf16 %v290_v30, %v290_v30  ;;  %v280_v37 = vsel %vm248_vm6, %v186_v21, %v264_v27  ;;  %v288_v38 = vsel %vm256_vm7, %v218_v22, %v272_v28 }
 0x10a   :  { %v418_v39 = vpack.c.bf16 %v280_v37, %v280_v37  ;;  %v426_v40 = vpack.c.bf16 %v288_v38, %v288_v38  ;;  %vm251_vm8 = vcmp.ge.f32.partialorder %v197_v31, 0.0  ;;  %v267_v41 = vmul.f32 0.2, %v197_v31 }
 0x10b   :  { %363 = vst.msk [vmem:[%s697_s3 + $0x8] sm:$0xf] %vm360_vm3, %v420_v35  ;;  %371 = vst.msk [vmem:[%s697_s3 + $0x28] sm:$0xf] %vm360_vm3, %v428_v36  ;;  %vm259_vm9 = vcmp.ge.f32.partialorder %v229_v32, 0.0  ;;  %v189_v43 = vadd.f32 %v612_v14, %v188_v33  ;;  %v221_v44 = vadd.f32 %v612_v14, %v220_v34  ;;  %v454_v45 = vpop.f32.mrb[4].mxu0 }
 0x10c   :  { %v275_v42 = vmul.f32 0.2, %v229_v32  ;;  %v462_v46 = vpop.f32.mrb[4].mxu1  ;;  %361 = vst.msk [vmem:[%s697_s3] sm:$0xf] %vm360_vm3, %v418_v39  ;;  %v283_v47 = vsel %vm251_vm8, %v197_v31, %v267_v41  ;;  %v210_v48 = vadd.f32 %v454_v45, %v612_v14  ;;  %v201_v50 = vpop.f32.mrb[5].mxu0 }
 0x10d   :  { %369 = vst.msk [vmem:[%s697_s3 + $0x20] sm:$0xf] %vm360_vm3, %v426_v40  ;;  %v242_v49 = vadd.f32 %v462_v46, %v612_v14  ;;  %v233_v51 = vpop.f32.mrb[5].mxu1  ;;  %v421_v52 = vpack.c.bf16 %v283_v47, %v283_v47  ;;  %vm249_vm10 = vcmp.ge.f32.partialorder %v189_v43, 0.0  ;;  %v265_v54 = vmul.f32 0.2, %v189_v43 }
 0x10e   :  { %v291_v53 = vsel %vm259_vm9, %v229_v32, %v275_v42  ;;  %v455_v55 = vpop.f32.mrb[6].mxu0  ;;  %v463_v56 = vpop.f32.mrb[6].mxu1  ;;  %vm257_vm11 = vcmp.ge.f32.partialorder %v221_v44, 0.0  ;;  %v273_v58 = vmul.f32 0.2, %v221_v44  ;;  %vm254_vm12 = vcmp.ge.f32.partialorder %v210_v48, 0.0 }
 0x10f   :  { %v429_v57 = vpack.c.bf16 %v291_v53, %v291_v53  ;;  %v204_v59 = vpop.f32.mrb[7].mxu0  ;;  %v236_v60 = vpop.f32.mrb[7].mxu1  ;;  %364 = vst.msk [vmem:[%s697_s3 + $0xc] sm:$0xf] %vm360_vm3, %v421_v52  ;;  %v281_v61 = vsel %vm249_vm10, %v189_v43, %v265_v54  ;;  %v270_v62 = vmul.f32 0.2, %v210_v48  ;;  %v202_v2 = vadd.f32 %v612_v14, %v201_v50 }
 0x110   :  { %vm262_vm13 = vcmp.ge.f32.partialorder %v242_v49, 0.0  ;;  %v278_v63 = vmul.f32 0.2, %v242_v49  ;;  %v419_v0 = vpack.c.bf16 %v281_v61, %v281_v61  ;;  %v289_v1 = vsel %vm257_vm11, %v221_v44, %v273_v58 }
 0x111   :  { %372 = vst.msk [vmem:[%s697_s3 + $0x2c] sm:$0xf] %vm360_vm3, %v429_v57  ;;  %v234_v3 = vadd.f32 %v612_v14, %v233_v51  ;;  %v427_v4 = vpack.c.bf16 %v289_v1, %v289_v1  ;;  %v286_v5 = vsel %vm254_vm12, %v210_v48, %v270_v62  ;;  %v213_v7 = vadd.f32 %v455_v55, %v612_v14 }
 0x112   :  { %v294_v6 = vsel %vm262_vm13, %v242_v49, %v278_v63  ;;  %362 = vst.msk [vmem:[%s697_s3 + $0x4] sm:$0xf] %vm360_vm3, %v419_v0  ;;  %v424_v8 = vpack.c.bf16 %v286_v5, %v286_v5  ;;  %vm252_vm14 = vcmp.ge.f32.partialorder %v202_v2, 0.0  ;;  %v268_v10 = vmul.f32 0.2, %v202_v2 }
 0x113   :  { %v432_v9 = vpack.c.bf16 %v294_v6, %v294_v6  ;;  %370 = vst.msk [vmem:[%s697_s3 + $0x24] sm:$0xf] %vm360_vm3, %v427_v4  ;;  %vm260_vm15 = vcmp.ge.f32.partialorder %v234_v3, 0.0  ;;  %v276_v11 = vmul.f32 0.2, %v234_v3  ;;  %vm255_vm0 = vcmp.ge.f32.partialorder %v213_v7, 0.0 }
 0x114   :  { %v271_v12 = vmul.f32 0.2, %v213_v7  ;;  %367 = vst.msk [vmem:[%s697_s3 + $0x18] sm:$0xf] %vm360_vm3, %v424_v8  ;;  %v284_v13 = vsel %vm252_vm14, %v202_v2, %v268_v10  ;;  %v245_v15 = vadd.f32 %v463_v56, %v612_v14  ;;  %v205_v16 = vadd.f32 %v612_v14, %v204_v59 }
 0x115   :  { %375 = vst.msk [vmem:[%s697_s3 + $0x38] sm:$0xf] %vm360_vm3, %v432_v9  ;;  %v237_v17 = vadd.f32 %v612_v14, %v236_v60  ;;  %v422_v18 = vpack.c.bf16 %v284_v13, %v284_v13  ;;  %v292_v19 = vsel %vm260_vm15, %v234_v3, %v276_v11 }
 0x116   :  { %v287_v20 = vsel %vm255_vm0, %v213_v7, %v271_v12  ;;  %v430_v21 = vpack.c.bf16 %v292_v19, %v292_v19  ;;  %vm263_vm1 = vcmp.ge.f32.partialorder %v245_v15, 0.0  ;;  %v279_v23 = vmul.f32 0.2, %v245_v15 }
 0x117   :  { %v425_v22 = vpack.c.bf16 %v287_v20, %v287_v20  ;;  %365 = vst.msk [vmem:[%s697_s3 + $0x10] sm:$0xf] %vm360_vm3, %v422_v18  ;;  %vm253_vm2 = vcmp.ge.f32.partialorder %v205_v16, 0.0  ;;  %v269_v24 = vmul.f32 0.2, %v205_v16  ;;  %vm261_vm4 = vcmp.ge.f32.partialorder %v237_v17, 0.0 }
 0x118   :  { %v277_v25 = vmul.f32 0.2, %v237_v17  ;;  %373 = vst.msk [vmem:[%s697_s3 + $0x30] sm:$0xf] %vm360_vm3, %v430_v21  ;;  %v295_v14 = vsel %vm263_vm1, %v245_v15, %v279_v23 }
 0x119   :  { %368 = vst.msk [vmem:[%s697_s3 + $0x1c] sm:$0xf] %vm360_vm3, %v425_v22  ;;  %v433_v26 = vpack.c.bf16 %v295_v14, %v295_v14  ;;  %v285_v27 = vsel %vm253_vm2, %v205_v16, %v269_v24 }
 0x11a   :  { %v293_v28 = vsel %vm261_vm4, %v237_v17, %v277_v25  ;;  %v423_v29 = vpack.c.bf16 %v285_v27, %v285_v27 }
 0x11b   :  { %v431_v30 = vpack.c.bf16 %v293_v28, %v293_v28  ;;  %376 = vst.msk [vmem:[%s697_s3 + $0x3c] sm:$0xf] %vm360_vm3, %v433_v26 }
 0x11c   :  { %366 = vst.msk [vmem:[%s697_s3 + $0x14] sm:$0xf] %vm360_vm3, %v423_v29 }
 0x11d   :  { %374 = vst.msk [vmem:[%s697_s3 + $0x34] sm:$0xf] %vm360_vm3, %v431_v30 }
 0x11e   :  { %381 = vsyncpa [#allocation3], 1 }
 0x11f   :  { %382 = vsyncpa [#allocation5], 1 }

// kernel: my_autoencoder_forward.9
= control target key start
LH: loop header
LB: loop body
LE: loop exit
PB: predicated region body
PF: predicated region fallthrough
CT: control target
= control target key end

     0   :  { %vm514_vm0 = vcmask 261120   ;;  %vm717_vm1 = vcmask 523264   ;;  %vm807_vm6 = vcmask 519168   ;;  %s1311_s1 = inlined_call_operand.vmem [shape: bf16[800,64], index: 1, kind: input, shape index: {}]   ;;  %s1312_s0 = inlined_call_operand.vmem [shape: bf16[32,800], index: 0, kind: input, shape index: {}]   ;;  %s1313_s2 = inlined_call_operand.vmem [shape: f32[1,64], index: 2, kind: input, shape index: {}]   ;;  %s1314_s3 = inlined_call_operand.vmem [shape: f32[1,64], index: 3, kind: input, shape index: {}]   ;;  %s1315_s4 = inlined_call_operand.vmem [shape: f32[1,64], index: 4, kind: input, shape index: {}]   ;;  %s1316_s5 = inlined_call_operand.vmem [shape: bf16[32,64], index: 5, kind: output, shape index: {}]  }
   0x1   :  { %v988_v0 = vld [vmem:[%s1311_s1 + $0x40] sm:$0xff]   ;;  %v992_v4 = vld [vmem:[%s1311_s1 + $0x48] sm:$0xff]   ;;  %v996_v8 = vld [vmem:[%s1311_s1 + $0x50] sm:$0xff]  }
   0x2   :  { %v989_v1 = vld [vmem:[%s1311_s1] sm:$0xff]   ;;  %892 = vmatprep.subr.bf16.mxu0 %v988_v0  ;;  %v993_v5 = vld [vmem:[%s1311_s1 + $0x8] sm:$0xff]   ;;  %v997_v9 = vld [vmem:[%s1311_s1 + $0x10] sm:$0xff]  }
   0x3   :  { %v990_v2 = vld [vmem:[%s1311_s1 + $0xc0] sm:$0xff]   ;;  %893 = vmatpush3.bf16.msra.mxu0 %v989_v1  ;;  %v994_v6 = vld [vmem:[%s1311_s1 + $0xc8] sm:$0xff]   ;;  %v998_v10 = vld [vmem:[%s1311_s1 + $0xd0] sm:$0xff]  }
   0x4   :  { %v991_v3 = vld [vmem:[%s1311_s1 + $0x80] sm:$0xff]   ;;  %920 = vmatprep.subr.bf16.mxu1 %v990_v2  ;;  %894 = vmatprep.subr.bf16.mxu0 %v992_v4  ;;  %v995_v7 = vld [vmem:[%s1311_s1 + $0x88] sm:$0xff]   ;;  %v999_v11 = vld [vmem:[%s1311_s1 + $0x90] sm:$0xff]  }
   0x5   :  { %921 = vmatpush3.bf16.msra.mxu1 %v991_v3  ;;  %v1000_v12 = vld [vmem:[%s1311_s1 + $0x58] sm:$0xff]   ;;  %v1004_v16 = vld [vmem:[%s1311_s1 + $0x60] sm:$0xff]   ;;  %v1008_v20 = vld [vmem:[%s1311_s1 + $0x68] sm:$0xff]  }
   0x6   :  { %922 = vmatprep.subr.bf16.mxu1 %v994_v6  ;;  %v1001_v13 = vld [vmem:[%s1311_s1 + $0x18] sm:$0xff]   ;;  %v1005_v17 = vld [vmem:[%s1311_s1 + $0x20] sm:$0xff]   ;;  %v1009_v21 = vld [vmem:[%s1311_s1 + $0x28] sm:$0xff]  }
   0x7   :  { %895 = vmatpush3.bf16.msra.mxu0 %v993_v5  ;;  %v1002_v14 = vld [vmem:[%s1311_s1 + $0xd8] sm:$0xff]   ;;  %v1006_v18 = vld [vmem:[%s1311_s1 + $0xe0] sm:$0xff]   ;;  %v1010_v22 = vld [vmem:[%s1311_s1 + $0xe8] sm:$0xff]  }
   0x8   :  { %896 = vmatprep.subr.bf16.mxu0 %v996_v8  ;;  %v1003_v15 = vld [vmem:[%s1311_s1 + $0x98] sm:$0xff]   ;;  %v1007_v19 = vld [vmem:[%s1311_s1 + $0xa0] sm:$0xff]   ;;  %v1011_v23 = vld [vmem:[%s1311_s1 + $0xa8] sm:$0xff]  }
   0x9   :  { %923 = vmatpush3.bf16.msra.mxu1 %v995_v7  ;;  %v1012_v24 = vld [vmem:[%s1311_s1 + $0x70] sm:$0xff]   ;;  %v1016_v28 = vld [vmem:[%s1311_s1 + $0x78] sm:$0xff]   ;;  %v1021_v32 = vld [vmem:[%s1312_s0 + $0x4] ss:$28 sps:$4 sm:$0xff]  }
   0xa   :  { %924 = vmatprep.subr.bf16.mxu1 %v998_v10  ;;  %v1013_v25 = vld [vmem:[%s1311_s1 + $0x30] sm:$0xff]   ;;  %v1017_v29 = vld [vmem:[%s1311_s1 + $0x38] sm:$0xff]   ;;  %553 = vmatprep.mubr.bf16.mxu0 %v1021_v32  ;;  %v1023_v34 = vld [vmem:[%s1311_s1 + $0x140] sm:$0xff]  }
   0xb   :  { %897 = vmatpush3.bf16.msra.mxu0 %v997_v9  ;;  %v1014_v26 = vld [vmem:[%s1311_s1 + $0xf0] sm:$0xff]   ;;  %v1018_v30 = vld [vmem:[%s1311_s1 + $0xf8] sm:$0xff]   ;;  %v1024_v35 = vld [vmem:[%s1312_s0 + $0x8] ss:$28 sps:$4 sm:$0xff]  }
   0xc   :  { %898 = vmatprep.subr.bf16.mxu0 %v1000_v12  ;;  %v1015_v27 = vld [vmem:[%s1311_s1 + $0xb0] sm:$0xff]   ;;  %v1019_v31 = vld [vmem:[%s1312_s0] ss:$28 sps:$4 sm:$0xff]   ;;  %v1026_v36 = vld [vmem:[%s1312_s0 + $0xc] ss:$28 sps:$4 sm:$0xff]  }
   0xd   :  { %925 = vmatpush3.bf16.msra.mxu1 %v999_v11  ;;  %v1022_v33 = vld [vmem:[%s1311_s1 + $0xb8] sm:$0xff]   ;;  %v1027_v37 = vld [vmem:[%s1311_s1 + $0x100] sm:$0xff]   ;;  %602 = vmatprep.mubr.bf16.mxu1 %v1026_v36  ;;  %v1028_v38 = vld [vmem:[%s1311_s1 + $0x148] sm:$0xff]  }
   0xe   :  { %926 = vmatprep.subr.bf16.mxu1 %v1002_v14  ;;  %v1029_v39 = vld [vmem:[%s1311_s1 + $0x108] sm:$0xff]   ;;  %v1030_v40 = vld [vmem:[%s1311_s1 + $0x150] sm:$0xff]   ;;  %v1032_v42 = vld [vmem:[%s1311_s1 + $0x158] sm:$0xff]  }
   0xf   :  { %899 = vmatpush3.bf16.msra.mxu0 %v1001_v13  ;;  %v1031_v41 = vld [vmem:[%s1311_s1 + $0x110] sm:$0xff]   ;;  %v1036_v43 = vld [vmem:[%s1312_s0 + $0x3c] ss:$28 sps:$4 sm:$0xff]   ;;  %v1034_v46 = vld [vmem:[%s1311_s1 + $0x160] sm:$0xff]  }
  0x10   :  { %900 = vmatprep.subr.bf16.mxu0 %v1004_v16  ;;  %v1033_v44 = vld [vmem:[%s1311_s1 + $0x118] sm:$0xff]   ;;  %v1035_v47 = vld [vmem:[%s1311_s1 + $0x120] sm:$0xff]   ;;  %v1038_v51 = vld [vmem:[%s1311_s1 + $0x168] sm:$0xff]  }
  0x11   :  { %927 = vmatpush3.bf16.msra.mxu1 %v1003_v15  ;;  %v1039_v45 = vld [vmem:[%s1312_s0 + $0x38] ss:$28 sps:$4 sm:$0xff]   ;;  %v1041_v48 = vld [vmem:[%s1312_s0 + $0x44] ss:$28 sps:$4 sm:$0xff]   ;;  %v1040_v52 = vld [vmem:[%s1311_s1 + $0x128] sm:$0xff]  }
  0x12   :  { %928 = vmatprep.subr.bf16.mxu1 %v1006_v18  ;;  %v1043_v49 = vld [vmem:[%s1312_s0 + $0x40] ss:$28 sps:$4 sm:$0xff]   ;;  %v1045_v53 = vld [vmem:[%s1311_s1 + $0x170] sm:$0xff]   ;;  %v1052_v56 = vld [vmem:[%s1311_s1 + $0x188] sm:$0xff]  }
  0x13   :  { %901 = vmatpush3.bf16.msra.mxu0 %v1005_v17  ;;  %v1044_v50 = vld [vmem:[%s1311_s1 + $0x180] sm:$0xff]   ;;  %v1051_v54 = vld [vmem:[%s1312_s0 + $0x14] ss:$28 sps:$4 sm:$0xff]   ;;  %v1047_v59 = vld [vmem:[%s1311_s1 + $0x178] sm:$0xff]  }
  0x14   :  { %902 = vmatprep.subr.bf16.mxu0 %v1008_v20  ;;  %v1046_v55 = vld [vmem:[%s1311_s1 + $0x130] sm:$0xff]   ;;  %v1048_v60 = vld [vmem:[%s1311_s1 + $0x138] sm:$0xff]   ;;  %v1055_v62 = vld [vmem:[%s1312_s0 + $0x4c] ss:$28 sps:$4 sm:$0xff]  }
  0x15   :  { %929 = vmatpush3.bf16.msra.mxu1 %v1007_v19  ;;  %v1053_v57 = vld [vmem:[%s1312_s0 + $0x18] ss:$28 sps:$4 sm:$0xff]   ;;  %v1054_v58 = vld [vmem:[%s1312_s0 + $0x50] ss:$28 sps:$4 sm:$0xff]   ;;  %v1057_v63 = vld [vmem:[%s1312_s0 + $0x48] ss:$28 sps:$4 sm:$0xff]  }
  0x16   :  { %930 = vmatprep.subr.bf16.mxu1 %v1010_v22  ;;  %v1049_v61 = vld [vmem:[%s1312_s0 + $0x10] ss:$28 sps:$4 sm:$0xff]   ;;  %v816_v1 = vld [vmem:[%s1313_s2] ss:$0 sm:$0xff] }
  0x17   :  { %903 = vmatpush3.bf16.msra.mxu0 %v1009_v21 }
  0x18   :  { %904 = vmatprep.subr.bf16.mxu0 %v1012_v24 }
  0x19   :  { %931 = vmatpush3.bf16.msra.mxu1 %v1011_v23 }
  0x1a   :  { %932 = vmatprep.subr.bf16.mxu1 %v1014_v26 }
  0x1b   :  { %905 = vmatpush3.bf16.msra.mxu0 %v1013_v25 }
  0x1c   :  { %906 = vmatprep.subr.bf16.mxu0 %v1016_v28 }
  0x1d   :  { %933 = vmatpush3.bf16.msra.mxu1 %v1015_v27 }
  0x1e   :  { %934 = vmatprep.subr.bf16.mxu1 %v1018_v30 }
  0x1f   :  { %907 = vmatpush3.bf16.msra.mxu0 %v1017_v29 }
  0x20   :  { %948 = vmatprep.subr.bf16.mxu0 %v1023_v34 }
  0x21   :  { %935 = vmatpush3.bf16.msra.mxu1 %v1022_v33 }
  0x22   :  { %554 = vmatmul.mubr.bf16.vlgmr.msra.gmra.mrb[0].mxu0 %v1019_v31  ;;  %980 = vmatprep.subr.bf16.mxu1 %v1044_v50 }
  0x23   :  { %949 = vmatpush3.bf16.msra.mxu0 %v1027_v37  ;;  %561 = vmatprep.mubr.bf16.mxu0 %v1036_v43 }
  0x24   :  { %603 = vmatmul.mubr.bf16.vlgmr.msra.gmra.mrb[0].mxu1 %v1024_v35  ;;  %950 = vmatprep.subr.bf16.mxu0 %v1028_v38 }
  0x25   :  { %610 = vmatprep.mubr.bf16.mxu1 %v1041_v48  ;;  %981 = vmatpush3.bf16.msra.mxu1 %v1044_v50 }
  0x26   :  { %982 = vmatprep.subr.bf16.mxu1 %v1052_v56 }
  0x27   :  { %951 = vmatpush3.bf16.msra.mxu0 %v1029_v39 }
  0x28   :  { %952 = vmatprep.subr.bf16.mxu0 %v1030_v40 }
  0x29   :  { %983 = vmatpush3.bf16.msra.mxu1 %v1052_v56 }
  0x2a   :  { %562 = vmatmul.mubr.bf16.gmra.mrb[4].mxu0 %v1039_v45 }
  0x2b   :  { %953 = vmatpush3.bf16.msra.mxu0 %v1031_v41  ;;  %651 = vmatprep.mubr.bf16.mxu0 %v1051_v54 }
  0x2c   :  { %954 = vmatprep.subr.bf16.mxu0 %v1032_v42  ;;  %611 = vmatmul.mubr.bf16.gmra.mrb[4].mxu1 %v1043_v49 }
  0x2d   :  { %984 = vmatprep.mubr.msk.bf16.mxu1 %vm514_vm0, %v1053_v57 }
  0x2f   :  { %955 = vmatpush3.bf16.msra.mxu0 %v1033_v44 }
  0x30   :  { %956 = vmatprep.subr.bf16.mxu0 %v1034_v46 }
  0x33   :  { %957 = vmatpush3.bf16.msra.mxu0 %v1035_v47 }
  0x34   :  { %958 = vmatprep.subr.bf16.mxu0 %v1038_v51  ;;  %985 = vmatmul.mubr.msk.bf16.vlgmr.msra.gmra.mrb[8].mxu1 %vm514_vm0, %v1054_v58 }
  0x37   :  { %959 = vmatpush3.bf16.msra.mxu0 %v1040_v52 }
  0x38   :  { %960 = vmatprep.subr.bf16.mxu0 %v1045_v53 }
  0x3b   :  { %961 = vmatpush3.bf16.msra.mxu0 %v1046_v55 }
  0x3c   :  { %962 = vmatprep.subr.bf16.mxu0 %v1047_v59 }
  0x3f   :  { %963 = vmatpush3.bf16.msra.mxu0 %v1048_v60 }
  0x42   :  { %652 = vmatmul.mubr.bf16.vlgmr.msra.gmra.mrb[8].mxu0 %v1049_v61 }
  0x43   :  { %659 = vmatprep.mubr.bf16.mxu0 %v1055_v62 }
  0x4a   :  { %660 = vmatmul.mubr.bf16.gmra.mrb[12].mxu0 %v1057_v63 }
  0xf5   :  { %v908_v0 = vpop.f32.mrb[0].mxu0 }
  0xf6   :  { %v909_v2 = vpop.f32.mrb[1].mxu0 }
  0xf7   :  { %v910_v3 = vadd.f32 %v909_v2, %v908_v0  ;;  %v911_v4 = vpop.f32.mrb[2].mxu0  ;;  %v936_v5 = vpop.f32.mrb[0].mxu1 }
  0xf8   :  { %v912_v6 = vpop.f32.mrb[3].mxu0  ;;  %v937_v9 = vpop.f32.mrb[1].mxu1 }
  0xf9   :  { %v556_v7 = vadd.f32 %v910_v3, %v816_v1  ;;  %v913_v8 = vadd.f32 %v912_v6, %v911_v4  ;;  %v938_v10 = vadd.f32 %v937_v9, %v936_v5  ;;  %v939_v11 = vpop.f32.mrb[2].mxu1 }
  0xfa   :  { %v940_v13 = vpop.f32.mrb[3].mxu1 }
  0xfb   :  { %v559_v12 = vadd.f32 %v913_v8, %v816_v1  ;;  %v605_v14 = vadd.f32 %v938_v10, %v556_v7  ;;  %v941_v15 = vadd.f32 %v940_v13, %v939_v11 }
  0xfd   :  { %v608_v16 = vadd.f32 %v941_v15, %v559_v12  ;;  %v914_v17 = vpop.f32.mrb[4].mxu0 }
  0xfe   :  { %v915_v18 = vpop.f32.mrb[5].mxu0 }
  0xff   :  { %v916_v19 = vadd.f32 %v915_v18, %v914_v17  ;;  %v917_v20 = vpop.f32.mrb[6].mxu0  ;;  %v942_v21 = vpop.f32.mrb[4].mxu1 }
 0x100   :  { %v918_v22 = vpop.f32.mrb[7].mxu0  ;;  %v943_v25 = vpop.f32.mrb[5].mxu1 }
 0x101   :  { %v564_v23 = vadd.f32 %v916_v19, %v816_v1  ;;  %v919_v24 = vadd.f32 %v918_v22, %v917_v20  ;;  %v944_v26 = vadd.f32 %v943_v25, %v942_v21  ;;  %v945_v27 = vpop.f32.mrb[6].mxu1 }
 0x102   :  { %v946_v29 = vpop.f32.mrb[7].mxu1 }
 0x103   :  { %v567_v28 = vadd.f32 %v919_v24, %v816_v1  ;;  %v613_v30 = vadd.f32 %v944_v26, %v564_v23  ;;  %v947_v31 = vadd.f32 %v946_v29, %v945_v27 }
 0x105   :  { %v616_v32 = vadd.f32 %v947_v31, %v567_v28 }
 0x107   :  { %v986_v33 = vpop.f32.mrb[8].mxu1 }
 0x108   :  { %v702_v34 = vpop.f32.mrb[9].mxu1 }
 0x109   :  { %v987_v35 = vpop.f32.mrb[10].mxu1 }
 0x10a   :  { %v705_v36 = vpop.f32.mrb[11].mxu1 }
 0x115   :  { %v964_v37 = vpop.f32.mrb[8].mxu0 }
 0x116   :  { %v965_v38 = vpop.f32.mrb[9].mxu0 }
 0x117   :  { %v966_v39 = vadd.f32 %v965_v38, %v964_v37  ;;  %v967_v40 = vpop.f32.mrb[10].mxu0  ;;  %v883_v37 = vld [vmem:[%s1315_s4] ss:$0 sm:$0xff] }
 0x118   :  { %v968_v41 = vpop.f32.mrb[11].mxu0 }
 0x119   :  { %v969_v42 = vadd.f32 %v968_v41, %v967_v40  ;;  %v654_v43 = vadd.f32 %v966_v39, %v605_v14 }
 0x11b   :  { %v703_v44 = vadd.f32 %v702_v34, %v654_v43  ;;  %v657_v45 = vadd.f32 %v969_v42, %v608_v16 }
 0x11d   :  { %v706_v46 = vadd.f32 %v705_v36, %v657_v45  ;;  %v970_v47 = vpop.f32.mrb[12].mxu0  ;;  %v718_v49 = vsel %vm717_vm1, %v703_v44, 0.0 }
 0x11e   :  { %v971_v48 = vpop.f32.mrb[13].mxu0 }
 0x11f   :  { %v719_v50 = vsel %vm717_vm1, %v706_v46, 0.0  ;;  %v972_v51 = vadd.f32 %v971_v48, %v970_v47  ;;  %v973_v52 = vpop.f32.mrb[14].mxu0 }
 0x120   :  { %v720_v53 = vadd.f32 %v719_v50, %v718_v49  ;;  %v974_v54 = vpop.f32.mrb[15].mxu0 }
 0x121   :  { %v662_v55 = vadd.f32 %v972_v51, %v613_v30  ;;  %v975_v56 = vadd.f32 %v974_v54, %v973_v52  ;;  %v759_v30 = vlaneseq }
 0x123   :  { %v711_v57 = vadd.f32 %v986_v33, %v662_v55  ;;  %v665_v58 = vadd.f32 %v975_v56, %v616_v32  ;;  %v760_v31 = vshrl.u32 %v759_v30, 7  ;;  %v754_v32 = vld [vmem:[%s1314_s3] sm:$0x1] }
 0x125   :  { %v721_v59 = vsel %vm717_vm1, %v711_v57, 0.0  ;;  %v714_v60 = vadd.f32 %v987_v35, %v665_v58  ;;  %v761_v33 = vsub.s32 0, %v760_v31 }
 0x126   :  { %v722_v61 = vadd.f32 %v721_v59, %v720_v53 }
 0x127   :  { %v723_v62 = vsel %vm717_vm1, %v714_v60, 0.0 }
 0x128   :  { %v724_v63 = vadd.f32 %v723_v62, %v722_v61 }
 0x12a   :  { %v725_v0 = vrot.slane %v724_v63, 4 }
 0x12c   :  { %v726_v1 = vadd.f32 %v725_v0, %v724_v63 }
 0x12e   :  { %v727_v2 = vrot.slane %v726_v1, 2 }
 0x130   :  { %v728_v3 = vadd.f32 %v727_v2, %v726_v1 }
 0x132   :  { %v729_v4 = vrot.slane %v728_v3, 1 }
 0x134   :  { %v730_v5 = vadd.f32 %v729_v4, %v728_v3 }
 0x136   :  { %v731_v6 = vmul.f32 0.03125, %v730_v5 }
 0x138   :  { %v732_v7 = vsub.f32 %v703_v44, %v731_v6  ;;  %v733_v8 = vsub.f32 %v706_v46, %v731_v6  ;;  %v734_v9 = vsub.f32 %v711_v57, %v731_v6  ;;  %v735_v10 = vsub.f32 %v714_v60, %v731_v6 }
 0x13a   :  { %v736_v11 = vmul.f32 %v732_v7, %v732_v7  ;;  %v737_v12 = vmul.f32 %v733_v8, %v733_v8  ;;  %v738_v13 = vmul.f32 %v734_v9, %v734_v9  ;;  %v739_v14 = vmul.f32 %v735_v10, %v735_v10 }
 0x13c   :  { %v740_v15 = vsel %vm717_vm1, %v736_v11, 0.0  ;;  %v741_v16 = vsel %vm717_vm1, %v737_v12, 0.0  ;;  %v743_v18 = vsel %vm717_vm1, %v738_v13, 0.0  ;;  %v745_v20 = vsel %vm717_vm1, %v739_v14, 0.0 }
 0x13d   :  { %v742_v17 = vadd.f32 %v741_v16, %v740_v15 }
 0x13f   :  { %v744_v19 = vadd.f32 %v743_v18, %v742_v17 }
 0x141   :  { %v746_v21 = vadd.f32 %v745_v20, %v744_v19 }
 0x143   :  { %v747_v22 = vrot.slane %v746_v21, 4 }
 0x145   :  { %v748_v23 = vadd.f32 %v747_v22, %v746_v21 }
 0x147   :  { %v749_v24 = vrot.slane %v748_v23, 2 }
 0x149   :  { %v750_v25 = vadd.f32 %v749_v24, %v748_v23 }
 0x14b   :  { %v751_v26 = vrot.slane %v750_v25, 1 }
 0x14d   :  { %v752_v27 = vadd.f32 %v751_v26, %v750_v25 }
 0x14f   :  { %v753_v28 = vmul.f32 0.03125, %v752_v27 }
 0x151   :  { %v755_v29 = vadd.f32 1e-05, %v753_v28 }
 0x153   :  { %1058 = vrsqrt.f32 %v755_v29 }
 0x15d   :  { %v1059_v34 = vpop.eup %1058 }
 0x15e   :  { %v757_v35 = vmul.f32 %v1059_v34, %v754_v32 }
 0x160   :  { %v762_v36 = vrot.slane %v757_v35, %v761_v33 }
 0x162   :  { %v764_v38 = vmul.f32 %v762_v36, %v732_v7  ;;  %v765_v39 = vmul.f32 %v762_v36, %v733_v8  ;;  %v766_v40 = vmul.f32 %v762_v36, %v734_v9  ;;  %v767_v41 = vmul.f32 %v762_v36, %v735_v10 }
 0x164   :  { %v775_v42 = vadd.f32 %v883_v37, %v764_v38  ;;  %v776_v43 = vadd.f32 %v883_v37, %v765_v39  ;;  %v777_v44 = vadd.f32 %v883_v37, %v766_v40  ;;  %v778_v45 = vadd.f32 %v883_v37, %v767_v41 }
 0x166   :  { %vm779_vm2 = vcmp.ge.f32.partialorder %v775_v42, 0.0  ;;  %vm780_vm3 = vcmp.ge.f32.partialorder %v776_v43, 0.0  ;;  %vm781_vm4 = vcmp.ge.f32.partialorder %v777_v44, 0.0  ;;  %vm782_vm5 = vcmp.ge.f32.partialorder %v778_v45, 0.0 }
 0x167   :  { %v783_v46 = vmul.f32 0.2, %v775_v42  ;;  %v784_v47 = vmul.f32 0.2, %v776_v43  ;;  %v785_v48 = vmul.f32 0.2, %v777_v44 }
 0x168   :  { %v786_v49 = vmul.f32 0.2, %v778_v45 }
 0x169   :  { %v787_v50 = vsel %vm779_vm2, %v775_v42, %v783_v46  ;;  %v788_v51 = vsel %vm780_vm3, %v776_v43, %v784_v47  ;;  %v789_v52 = vsel %vm781_vm4, %v777_v44, %v785_v48 }
 0x16a   :  { %v790_v53 = vsel %vm782_vm5, %v778_v45, %v786_v49  ;;  %v888_v54 = vpack.c.bf16 %v787_v50, %v787_v50  ;;  %v889_v55 = vpack.c.bf16 %v788_v51, %v788_v51  ;;  %v890_v56 = vpack.c.bf16 %v789_v52, %v789_v52 }
 0x16b   :  { %v891_v57 = vpack.c.bf16 %v790_v53, %v790_v53 }
 0x16c   :  { %808 = vst.msk [vmem:[%s1316_s5] sm:$0xf] %vm807_vm6, %v888_v54  ;;  %809 = vst.msk [vmem:[%s1316_s5 + $0x4] sm:$0xf] %vm807_vm6, %v889_v55 }
 0x16d   :  { %810 = vst.msk [vmem:[%s1316_s5 + $0x8] sm:$0xf] %vm807_vm6, %v890_v56  ;;  %811 = vst.msk [vmem:[%s1316_s5 + $0xc] sm:$0xf] %vm807_vm6, %v891_v57 }

// kernel: my_autoencoder_forward.10
= control target key start
LH: loop header
LB: loop body
LE: loop exit
PB: predicated region body
PF: predicated region fallthrough
CT: control target
= control target key end

     0   :  { %vm1591_vm0 = vmmov 0   ;;  %vm880_vm1 = vcmask 523264   ;;  %s1955_s1 = inlined_call_operand.vmem [shape: bf16[1600,128], index: 1, kind: input, shape index: {}]   ;;  %s1956_s0 = inlined_call_operand.vmem [shape: bf16[8,1600], index: 0, kind: input, shape index: {}]   ;;  %s1957_s2 = inlined_call_operand.vmem [shape: f32[1,128], index: 2, kind: input, shape index: {}]   ;;  %s1958_s3 = inlined_call_operand.vmem [shape: f32[1,128], index: 3, kind: input, shape index: {}]   ;;  %s1959_s4 = inlined_call_operand.vmem [shape: f32[1,128], index: 4, kind: input, shape index: {}]   ;;  %s1960_s5 = inlined_call_operand.vmem [shape: bf16[8,128], index: 5, kind: output, shape index: {}]  }
   0x1   :  { %v1475_v0 = vld [vmem:[%s1955_s1 + $0x40] sm:$0xff]   ;;  %v1479_v4 = vld [vmem:[%s1955_s1 + $0x48] sm:$0xff]   ;;  %v1483_v8 = vld [vmem:[%s1955_s1 + $0x50] sm:$0xff]  }
   0x2   :  { %v1476_v1 = vld [vmem:[%s1955_s1] sm:$0xff]   ;;  %1324 = vmatprep.subr.bf16.mxu0 %v1475_v0  ;;  %v1480_v5 = vld [vmem:[%s1955_s1 + $0x8] sm:$0xff]   ;;  %v1484_v9 = vld [vmem:[%s1955_s1 + $0x10] sm:$0xff]  }
   0x3   :  { %v1477_v2 = vld [vmem:[%s1955_s1 + $0xc0] sm:$0xff]   ;;  %1325 = vmatpush3.bf16.msra.mxu0 %v1476_v1  ;;  %v1481_v6 = vld [vmem:[%s1955_s1 + $0xc8] sm:$0xff]   ;;  %v1485_v10 = vld [vmem:[%s1955_s1 + $0xd0] sm:$0xff]  }
   0x4   :  { %v1478_v3 = vld [vmem:[%s1955_s1 + $0x80] sm:$0xff]   ;;  %1346 = vmatprep.subr.bf16.mxu1 %v1477_v2  ;;  %1326 = vmatprep.subr.bf16.mxu0 %v1479_v4  ;;  %v1482_v7 = vld [vmem:[%s1955_s1 + $0x88] sm:$0xff]   ;;  %v1486_v11 = vld [vmem:[%s1955_s1 + $0x90] sm:$0xff]  }
   0x5   :  { %1347 = vmatpush3.bf16.msra.mxu1 %v1478_v3  ;;  %v1487_v12 = vld [vmem:[%s1955_s1 + $0x58] sm:$0xff]   ;;  %v1491_v16 = vld [vmem:[%s1955_s1 + $0x60] sm:$0xff]   ;;  %v1495_v20 = vld [vmem:[%s1955_s1 + $0x68] sm:$0xff]  }
   0x6   :  { %1348 = vmatprep.subr.bf16.mxu1 %v1481_v6  ;;  %v1488_v13 = vld [vmem:[%s1955_s1 + $0x18] sm:$0xff]   ;;  %v1492_v17 = vld [vmem:[%s1955_s1 + $0x20] sm:$0xff]   ;;  %v1496_v21 = vld [vmem:[%s1955_s1 + $0x28] sm:$0xff]  }
   0x7   :  { %1327 = vmatpush3.bf16.msra.mxu0 %v1480_v5  ;;  %v1489_v14 = vld [vmem:[%s1955_s1 + $0xd8] sm:$0xff]   ;;  %v1493_v18 = vld [vmem:[%s1955_s1 + $0xe0] sm:$0xff]   ;;  %v1497_v22 = vld [vmem:[%s1955_s1 + $0xe8] sm:$0xff]  }
   0x8   :  { %1328 = vmatprep.subr.bf16.mxu0 %v1483_v8  ;;  %v1490_v15 = vld [vmem:[%s1955_s1 + $0x98] sm:$0xff]   ;;  %v1494_v19 = vld [vmem:[%s1955_s1 + $0xa0] sm:$0xff]   ;;  %v1498_v23 = vld [vmem:[%s1955_s1 + $0xa8] sm:$0xff]  }
   0x9   :  { %1349 = vmatpush3.bf16.msra.mxu1 %v1482_v7  ;;  %v1499_v24 = vld [vmem:[%s1955_s1 + $0x70] sm:$0xff]   ;;  %v1503_v28 = vld [vmem:[%s1955_s1 + $0x78] sm:$0xff]   ;;  %v21_v31 = vld [vmem:[%s1956_s0] sm:$0xff] }
   0xa   :  { %1350 = vmatprep.subr.bf16.mxu1 %v1485_v10  ;;  %v1500_v25 = vld [vmem:[%s1955_s1 + $0x30] sm:$0xff]   ;;  %v1504_v29 = vld [vmem:[%s1955_s1 + $0x38] sm:$0xff]   ;;  %v1209_v32 = vcombine.low %v21_v31, %v21_v31  ;;  %v1210_v33 = vcombine.high %v21_v31, %v21_v31  ;;  %v1509_v35 = vld [vmem:[%s1955_s1 + $0x140] sm:$0xff]  }
   0xb   :  { %1329 = vmatpush3.bf16.msra.mxu0 %v1484_v9  ;;  %v1501_v26 = vld [vmem:[%s1955_s1 + $0xf0] sm:$0xff]   ;;  %v1505_v30 = vld [vmem:[%s1955_s1 + $0xf8] sm:$0xff]   ;;  %v22_v36 = vld [vmem:[%s1956_s0 + $0x8] sm:$0xff] }
   0xc   :  { %1330 = vmatprep.subr.bf16.mxu0 %v1487_v12  ;;  %v1502_v27 = vld [vmem:[%s1955_s1 + $0xb0] sm:$0xff]   ;;  %v1508_v34 = vld [vmem:[%s1955_s1 + $0xb8] sm:$0xff]   ;;  %916 = vmatprep.mubr.bf16.mxu0 %v1210_v33  ;;  %v1211_v37 = vcombine.low %v22_v36, %v22_v36  ;;  %v1212_v38 = vcombine.high %v22_v36, %v22_v36  ;;  %v1512_v39 = vld [vmem:[%s1955_s1 + $0x100] sm:$0xff]  }
   0xd   :  { %1351 = vmatpush3.bf16.msra.mxu1 %v1486_v11  ;;  %v1513_v40 = vld [vmem:[%s1955_s1 + $0x1c0] sm:$0xff]   ;;  %v1515_v42 = vld [vmem:[%s1955_s1 + $0x148] sm:$0xff]   ;;  %v1519_v46 = vld [vmem:[%s1955_s1 + $0x150] sm:$0xff]  }
   0xe   :  { %1352 = vmatprep.subr.bf16.mxu1 %v1489_v14  ;;  %956 = vmatprep.mubr.bf16.mxu1 %v1212_v38  ;;  %v1514_v41 = vld [vmem:[%s1955_s1 + $0x180] sm:$0xff]   ;;  %v1516_v43 = vld [vmem:[%s1955_s1 + $0x108] sm:$0xff]   ;;  %v1520_v47 = vld [vmem:[%s1955_s1 + $0x110] sm:$0xff]  }
   0xf   :  { %1331 = vmatpush3.bf16.msra.mxu0 %v1488_v13  ;;  %v1517_v44 = vld [vmem:[%s1955_s1 + $0x1c8] sm:$0xff]   ;;  %v1521_v48 = vld [vmem:[%s1955_s1 + $0x1d0] sm:$0xff]   ;;  %v1523_v50 = vld [vmem:[%s1955_s1 + $0x158] sm:$0xff]  }
  0x10   :  { %1332 = vmatprep.subr.bf16.mxu0 %v1491_v16  ;;  %v1518_v45 = vld [vmem:[%s1955_s1 + $0x188] sm:$0xff]   ;;  %v1522_v49 = vld [vmem:[%s1955_s1 + $0x190] sm:$0xff]   ;;  %v1524_v51 = vld [vmem:[%s1955_s1 + $0x118] sm:$0xff]  }
  0x11   :  { %1353 = vmatpush3.bf16.msra.mxu1 %v1490_v15  ;;  %v1525_v52 = vld [vmem:[%s1955_s1 + $0x1d8] sm:$0xff]   ;;  %v1527_v54 = vld [vmem:[%s1955_s1 + $0x160] sm:$0xff]   ;;  %v1531_v58 = vld [vmem:[%s1955_s1 + $0x168] sm:$0xff]  }
  0x12   :  { %1354 = vmatprep.subr.bf16.mxu1 %v1493_v18  ;;  %v1526_v53 = vld [vmem:[%s1955_s1 + $0x198] sm:$0xff]   ;;  %v1528_v55 = vld [vmem:[%s1955_s1 + $0x120] sm:$0xff]   ;;  %v1532_v59 = vld [vmem:[%s1955_s1 + $0x128] sm:$0xff]  }
  0x13   :  { %1333 = vmatpush3.bf16.msra.mxu0 %v1492_v17  ;;  %v1529_v56 = vld [vmem:[%s1955_s1 + $0x1e0] sm:$0xff]   ;;  %v1533_v60 = vld [vmem:[%s1955_s1 + $0x1e8] sm:$0xff]   ;;  %v1535_v62 = vld [vmem:[%s1955_s1 + $0x170] sm:$0xff]  }
  0x14   :  { %1334 = vmatprep.subr.bf16.mxu0 %v1495_v20  ;;  %v1530_v57 = vld [vmem:[%s1955_s1 + $0x1a0] sm:$0xff]   ;;  %v1534_v61 = vld [vmem:[%s1955_s1 + $0x1a8] sm:$0xff]   ;;  %v1536_v63 = vld [vmem:[%s1955_s1 + $0x130] sm:$0xff]  }
  0x15   :  { %1355 = vmatpush3.bf16.msra.mxu1 %v1494_v19  ;;  %v1537_v0 = vld [vmem:[%s1955_s1 + $0x1f0] sm:$0xff]   ;;  %v1539_v2 = vld [vmem:[%s1955_s1 + $0x178] sm:$0xff]   ;;  %v1545_v9 = vld [vmem:[%s1955_s1 + $0x240] sm:$0xff]  }
  0x16   :  { %1356 = vmatprep.subr.bf16.mxu1 %v1497_v22  ;;  %v1538_v1 = vld [vmem:[%s1955_s1 + $0x1b0] sm:$0xff]   ;;  %v1540_v3 = vld [vmem:[%s1955_s1 + $0x138] sm:$0xff]   ;;  %v1548_v13 = vld [vmem:[%s1955_s1 + $0x200] sm:$0xff]  }
  0x17   :  { %1335 = vmatpush3.bf16.msra.mxu0 %v1496_v21  ;;  %v1541_v4 = vld [vmem:[%s1955_s1 + $0x1f8] sm:$0xff]   ;;  %v23_v5 = vld [vmem:[%s1956_s0 + $0x10] sm:$0xff]  ;;  %v1549_v14 = vld [vmem:[%s1955_s1 + $0x2c0] sm:$0xff]  }
  0x18   :  { %1336 = vmatprep.subr.bf16.mxu0 %v1499_v24  ;;  %v1213_v6 = vcombine.low %v23_v5, %v23_v5  ;;  %v1214_v7 = vcombine.high %v23_v5, %v23_v5  ;;  %v1544_v8 = vld [vmem:[%s1955_s1 + $0x1b8] sm:$0xff]   ;;  %v1550_v15 = vld [vmem:[%s1955_s1 + $0x280] sm:$0xff]   ;;  %v1551_v16 = vld [vmem:[%s1955_s1 + $0x248] sm:$0xff]  }
  0x19   :  { %1357 = vmatpush3.bf16.msra.mxu1 %v1498_v23  ;;  %v24_v10 = vld [vmem:[%s1956_s0 + $0x18] sm:$0xff]  ;;  %v1552_v17 = vld [vmem:[%s1955_s1 + $0x208] sm:$0xff]   ;;  %v1555_v20 = vld [vmem:[%s1955_s1 + $0x250] sm:$0xff]  }
  0x1a   :  { %1358 = vmatprep.subr.bf16.mxu1 %v1501_v26  ;;  %v1215_v11 = vcombine.low %v24_v10, %v24_v10  ;;  %v1216_v12 = vcombine.high %v24_v10, %v24_v10  ;;  %v1553_v18 = vld [vmem:[%s1955_s1 + $0x2c8] sm:$0xff]   ;;  %v1556_v21 = vld [vmem:[%s1955_s1 + $0x210] sm:$0xff]   ;;  %v1559_v24 = vld [vmem:[%s1955_s1 + $0x258] sm:$0xff]  }
  0x1b   :  { %1337 = vmatpush3.bf16.msra.mxu0 %v1500_v25  ;;  %v1554_v19 = vld [vmem:[%s1955_s1 + $0x288] sm:$0xff]   ;;  %v1557_v22 = vld [vmem:[%s1955_s1 + $0x2d0] sm:$0xff]   ;;  %v1560_v25 = vld [vmem:[%s1955_s1 + $0x218] sm:$0xff]  }
  0x1c   :  { %1338 = vmatprep.subr.bf16.mxu0 %v1503_v28  ;;  %v1558_v23 = vld [vmem:[%s1955_s1 + $0x290] sm:$0xff]   ;;  %v1561_v26 = vld [vmem:[%s1955_s1 + $0x2d8] sm:$0xff]   ;;  %v1563_v28 = vld [vmem:[%s1955_s1 + $0x260] sm:$0xff]  }
  0x1d   :  { %1359 = vmatpush3.bf16.msra.mxu1 %v1502_v27  ;;  %v1562_v27 = vld [vmem:[%s1955_s1 + $0x298] sm:$0xff]   ;;  %v1566_v31 = vld [vmem:[%s1955_s1 + $0x2a0] sm:$0xff]   ;;  %v1568_v33 = vld [vmem:[%s1955_s1 + $0x228] sm:$0xff]  }
  0x1e   :  { %1360 = vmatprep.subr.bf16.mxu1 %v1505_v30  ;;  %v1565_v30 = vld [vmem:[%s1955_s1 + $0x2e0] sm:$0xff]   ;;  %v1571_v36 = vld [vmem:[%s1955_s1 + $0x270] sm:$0xff]  }
  0x1f   :  { %1339 = vmatpush3.bf16.msra.mxu0 %v1504_v29  ;;  %v1564_v29 = vld [vmem:[%s1955_s1 + $0x220] sm:$0xff]   ;;  %v1573_v38 = vld [vmem:[%s1955_s1 + $0x2f0] sm:$0xff]  }
  0x20   :  { %1368 = vmatprep.subr.bf16.mxu0 %v1509_v35  ;;  %v1570_v35 = vld [vmem:[%s1955_s1 + $0x2a8] sm:$0xff]  }
  0x21   :  { %1361 = vmatpush3.bf16.msra.mxu1 %v1508_v34  ;;  %v1569_v34 = vld [vmem:[%s1955_s1 + $0x2e8] sm:$0xff]  }
  0x22   :  { %917 = vmatmul.mubr.bf16.vlgmr.msra.gmra.mrb[0].mxu0 %v1209_v32  ;;  %1390 = vmatprep.subr.bf16.mxu1 %v1513_v40  ;;  %v1567_v32 = vld [vmem:[%s1955_s1 + $0x268] sm:$0xff]   ;;  %v1575_v40 = vld [vmem:[%s1955_s1 + $0x278] sm:$0xff]  }
  0x23   :  { %1369 = vmatpush3.bf16.msra.mxu0 %v1512_v39  ;;  %996 = vmatprep.mubr.bf16.mxu0 %v1214_v7  ;;  %v1574_v39 = vld [vmem:[%s1955_s1 + $0x2b0] sm:$0xff]  }
  0x24   :  { %957 = vmatmul.mubr.bf16.vlgmr.msra.gmra.mrb[0].mxu1 %v1211_v37  ;;  %1370 = vmatprep.subr.bf16.mxu0 %v1515_v42  ;;  %v1572_v37 = vld [vmem:[%s1955_s1 + $0x230] sm:$0xff]   ;;  %v1577_v42 = vld [vmem:[%s1955_s1 + $0x2f8] sm:$0xff]  }
  0x25   :  { %1391 = vmatpush3.bf16.msra.mxu1 %v1514_v41  ;;  %1036 = vmatprep.mubr.bf16.mxu1 %v1216_v12  ;;  %v1576_v41 = vld [vmem:[%s1955_s1 + $0x238] sm:$0xff]  }
  0x26   :  { %1392 = vmatprep.subr.bf16.mxu1 %v1517_v44 }
  0x27   :  { %1371 = vmatpush3.bf16.msra.mxu0 %v1516_v43  ;;  %v25_v43 = vld [vmem:[%s1956_s0 + $0x20] sm:$0xff] }
  0x28   :  { %1372 = vmatprep.subr.bf16.mxu0 %v1519_v46  ;;  %v1217_v44 = vcombine.low %v25_v43, %v25_v43  ;;  %v1580_v46 = vld [vmem:[%s1955_s1 + $0x2b8] sm:$0xff]  }
  0x29   :  { %1393 = vmatpush3.bf16.msra.mxu1 %v1518_v45  ;;  %v1218_v45 = vcombine.high %v25_v43, %v25_v43 }
  0x2a   :  { %1394 = vmatprep.subr.bf16.mxu1 %v1521_v48  ;;  %v1590_v48 = vmov 0.0  }
  0x2b   :  { %1373 = vmatpush3.bf16.msra.mxu0 %v1520_v47  ;;  %v26_v47 = vld [vmem:[%s1956_s0 + $0x28] sm:$0xff] }
  0x2c   :  { %1374 = vmatprep.subr.bf16.mxu0 %v1523_v50  ;;  %v1220_v50 = vcombine.high %v26_v47, %v26_v47 }
  0x2d   :  { %1395 = vmatpush3.bf16.msra.mxu1 %v1522_v49  ;;  %v1219_v49 = vcombine.low %v26_v47, %v26_v47 }
  0x2e   :  { %1396 = vmatprep.subr.bf16.mxu1 %v1525_v52  ;;  %v1584_v52 = vld [vmem:[%s1955_s1 + $0x308] sm:$0xff]  }
  0x2f   :  { %1375 = vmatpush3.bf16.msra.mxu0 %v1524_v51  ;;  %v1583_v51 = vld [vmem:[%s1955_s1 + $0x300] sm:$0xff]  }
  0x30   :  { %1376 = vmatprep.subr.bf16.mxu0 %v1527_v54  ;;  %v1586_v54 = vld [vmem:[%s1955_s1 + $0x318] sm:$0xff]  }
  0x31   :  { %1397 = vmatpush3.bf16.msra.mxu1 %v1526_v53  ;;  %v1585_v53 = vld [vmem:[%s1955_s1 + $0x310] sm:$0xff]  }
  0x32   :  { %1398 = vmatprep.subr.bf16.mxu1 %v1529_v56 }
  0x33   :  { %1377 = vmatpush3.bf16.msra.mxu0 %v1528_v55  ;;  %v1587_v55 = vld [vmem:[%s1956_s0 + $0x30] ss:$0 sps:$4 sm:$0xff]  }
  0x34   :  { %1378 = vmatprep.subr.bf16.mxu0 %v1531_v58 }
  0x35   :  { %1399 = vmatpush3.bf16.msra.mxu1 %v1530_v57  ;;  %v1208_v57 = vld [vmem:[%s1957_s2] ss:$0 sm:$0xff] }
  0x36   :  { %1400 = vmatprep.subr.bf16.mxu1 %v1533_v60 }
  0x37   :  { %1379 = vmatpush3.bf16.msra.mxu0 %v1532_v59 }
  0x38   :  { %1380 = vmatprep.subr.bf16.mxu0 %v1535_v62 }
  0x39   :  { %1401 = vmatpush3.bf16.msra.mxu1 %v1534_v61 }
  0x3a   :  { %1402 = vmatprep.subr.bf16.mxu1 %v1537_v0 }
  0x3b   :  { %1381 = vmatpush3.bf16.msra.mxu0 %v1536_v63 }
  0x3c   :  { %1382 = vmatprep.subr.bf16.mxu0 %v1539_v2 }
  0x3d   :  { %1403 = vmatpush3.bf16.msra.mxu1 %v1538_v1 }
  0x3e   :  { %1404 = vmatprep.subr.bf16.mxu1 %v1541_v4 }
  0x3f   :  { %1383 = vmatpush3.bf16.msra.mxu0 %v1540_v3 }
  0x40   :  { %1412 = vmatprep.subr.bf16.mxu0 %v1545_v9 }
  0x41   :  { %1405 = vmatpush3.bf16.msra.mxu1 %v1544_v8 }
  0x42   :  { %997 = vmatmul.mubr.bf16.vlgmr.msra.gmra.mrb[4].mxu0 %v1213_v6  ;;  %1434 = vmatprep.subr.bf16.mxu1 %v1549_v14 }
  0x43   :  { %1413 = vmatpush3.bf16.msra.mxu0 %v1548_v13  ;;  %1076 = vmatprep.mubr.bf16.mxu0 %v1218_v45 }
  0x44   :  { %1037 = vmatmul.mubr.bf16.vlgmr.msra.gmra.mrb[4].mxu1 %v1215_v11  ;;  %1414 = vmatprep.subr.bf16.mxu0 %v1551_v16 }
  0x45   :  { %1435 = vmatpush3.bf16.msra.mxu1 %v1550_v15  ;;  %1116 = vmatprep.mubr.bf16.mxu1 %v1220_v50 }
  0x46   :  { %1436 = vmatprep.subr.bf16.mxu1 %v1553_v18 }
  0x47   :  { %1415 = vmatpush3.bf16.msra.mxu0 %v1552_v17 }
  0x48   :  { %1416 = vmatprep.subr.bf16.mxu0 %v1555_v20 }
  0x49   :  { %1437 = vmatpush3.bf16.msra.mxu1 %v1554_v19 }
  0x4a   :  { %1438 = vmatprep.subr.bf16.mxu1 %v1557_v22 }
  0x4b   :  { %1417 = vmatpush3.bf16.msra.mxu0 %v1556_v21 }
  0x4c   :  { %1418 = vmatprep.subr.bf16.mxu0 %v1559_v24 }
  0x4d   :  { %1439 = vmatpush3.bf16.msra.mxu1 %v1558_v23 }
  0x4e   :  { %1440 = vmatprep.subr.bf16.mxu1 %v1561_v26 }
  0x4f   :  { %1419 = vmatpush3.bf16.msra.mxu0 %v1560_v25 }
  0x50   :  { %1420 = vmatprep.subr.bf16.mxu0 %v1563_v28 }
  0x51   :  { %1441 = vmatpush3.bf16.msra.mxu1 %v1562_v27 }
  0x52   :  { %1442 = vmatprep.subr.bf16.mxu1 %v1565_v30 }
  0x53   :  { %1421 = vmatpush3.bf16.msra.mxu0 %v1564_v29 }
  0x54   :  { %1422 = vmatprep.subr.bf16.mxu0 %v1567_v32 }
  0x55   :  { %1443 = vmatpush3.bf16.msra.mxu1 %v1566_v31 }
  0x56   :  { %1444 = vmatprep.subr.bf16.mxu1 %v1569_v34 }
  0x57   :  { %1423 = vmatpush3.bf16.msra.mxu0 %v1568_v33 }
  0x58   :  { %1424 = vmatprep.subr.bf16.mxu0 %v1571_v36 }
  0x59   :  { %1445 = vmatpush3.bf16.msra.mxu1 %v1570_v35 }
  0x5a   :  { %1446 = vmatprep.subr.bf16.mxu1 %v1573_v38 }
  0x5b   :  { %1425 = vmatpush3.bf16.msra.mxu0 %v1572_v37 }
  0x5c   :  { %1426 = vmatprep.subr.bf16.mxu0 %v1575_v40 }
  0x5d   :  { %1447 = vmatpush3.bf16.msra.mxu1 %v1574_v39 }
  0x5e   :  { %1448 = vmatprep.subr.bf16.mxu1 %v1577_v42 }
  0x5f   :  { %1427 = vmatpush3.bf16.msra.mxu0 %v1576_v41 }
  0x60   :  { %1461 = vmatprep.subr.bf16.mxu0 %v1590_v48 }
  0x61   :  { %1449 = vmatpush3.bf16.msra.mxu1 %v1580_v46 }
  0x62   :  { %1077 = vmatmul.mubr.bf16.vlgmr.msra.gmra.mrb[8].mxu0 %v1217_v44 }
  0x63   :  { %1462 = vmatpush3.bf16.msra.mxu0 %v1583_v51  ;;  %1469 = vmatprep.mubr.msk.bf16.mxu0 %vm1591_vm0, %v1590_v48  ;;  %v1185_v51 = vlaneseq }
  0x64   :  { %1117 = vmatmul.mubr.bf16.vlgmr.msra.gmra.mrb[8].mxu1 %v1219_v49  ;;  %1463 = vmatprep.subr.bf16.mxu0 %v1590_v48 }
  0x67   :  { %1464 = vmatpush3.bf16.msra.mxu0 %v1584_v52  ;;  %v1186_v52 = vshrl.u32 %v1185_v51, 7 }
  0x68   :  { %1465 = vmatprep.subr.bf16.mxu0 %v1590_v48 }
  0x6b   :  { %1466 = vmatpush3.bf16.msra.mxu0 %v1585_v53  ;;  %v1180_v53 = vld [vmem:[%s1958_s3] sm:$0x1] }
  0x6c   :  { %1467 = vmatprep.subr.bf16.mxu0 %v1590_v48 }
  0x6f   :  { %1468 = vmatpush3.bf16.msra.mxu0 %v1586_v54  ;;  %v1187_v54 = vsub.s32 0, %v1186_v52 }
  0x72   :  { %1470 = vmatmul.mubr.msk.bf16.vlgmr.msra.gmra.mrb[12].mxu0 %vm880_vm1, %v1587_v55 }
  0xf5   :  { %v1340_v56 = vpop.f32.mrb[0].mxu0 }
  0xf6   :  { %v1341_v58 = vpop.f32.mrb[1].mxu0 }
  0xf7   :  { %v1342_v59 = vadd.f32 %v1341_v58, %v1340_v56  ;;  %v1343_v60 = vpop.f32.mrb[2].mxu0  ;;  %v1362_v61 = vpop.f32.mrb[0].mxu1  ;;  %v1323_v58 = vld [vmem:[%s1959_s4] ss:$0 sm:$0xff] }
  0xf8   :  { %v1344_v62 = vpop.f32.mrb[3].mxu0  ;;  %v1363_v63 = vpop.f32.mrb[1].mxu1 }
  0xf9   :  { %v919_v0 = vadd.f32 %v1342_v59, %v1208_v57  ;;  %v1364_v1 = vadd.f32 %v1363_v63, %v1362_v61  ;;  %v1365_v2 = vpop.f32.mrb[2].mxu1 }
  0xfa   :  { %v1366_v3 = vpop.f32.mrb[3].mxu1 }
  0xfb   :  { %v959_v4 = vadd.f32 %v1364_v1, %v919_v0 }
 0x115   :  { %v1384_v5 = vpop.f32.mrb[4].mxu0 }
 0x116   :  { %v1385_v6 = vpop.f32.mrb[5].mxu0 }
 0x117   :  { %v1386_v7 = vadd.f32 %v1385_v6, %v1384_v5  ;;  %v1387_v8 = vpop.f32.mrb[6].mxu0  ;;  %v1406_v9 = vpop.f32.mrb[4].mxu1 }
 0x118   :  { %v1388_v10 = vpop.f32.mrb[7].mxu0  ;;  %v1407_v12 = vpop.f32.mrb[5].mxu1 }
 0x119   :  { %v999_v11 = vadd.f32 %v1386_v7, %v959_v4  ;;  %v1408_v13 = vadd.f32 %v1407_v12, %v1406_v9  ;;  %v1409_v14 = vpop.f32.mrb[6].mxu1 }
 0x11a   :  { %v1410_v15 = vpop.f32.mrb[7].mxu1 }
 0x11b   :  { %v1039_v16 = vadd.f32 %v1408_v13, %v999_v11 }
 0x135   :  { %v1428_v17 = vpop.f32.mrb[8].mxu0 }
 0x136   :  { %v1429_v18 = vpop.f32.mrb[9].mxu0 }
 0x137   :  { %v1430_v19 = vadd.f32 %v1429_v18, %v1428_v17  ;;  %v1431_v20 = vpop.f32.mrb[10].mxu0  ;;  %v1450_v21 = vpop.f32.mrb[8].mxu1 }
 0x138   :  { %v1432_v22 = vpop.f32.mrb[11].mxu0  ;;  %v1451_v23 = vpop.f32.mrb[9].mxu1 }
 0x139   :  { %v1079_v24 = vadd.f32 %v1430_v19, %v1039_v16  ;;  %v1452_v25 = vadd.f32 %v1451_v23, %v1450_v21  ;;  %v1453_v26 = vpop.f32.mrb[10].mxu1 }
 0x13a   :  { %v1454_v27 = vpop.f32.mrb[11].mxu1 }
 0x13b   :  { %v1119_v28 = vadd.f32 %v1452_v25, %v1079_v24 }
 0x145   :  { %v1158_v29 = vpop.f32.mrb[12].mxu0 }
 0x146   :  { %v1159_v30 = vadd.f32 %v1158_v29, %v1119_v28  ;;  %v1471_v31 = vpop.f32.mrb[13].mxu0 }
 0x147   :  { %v1161_v32 = vpop.f32.mrb[14].mxu0 }
 0x148   :  { %v1164_v33 = vrot.slane %v1159_v30, 4  ;;  %v1472_v34 = vpop.f32.mrb[15].mxu0 }
 0x14a   :  { %v1165_v35 = vadd.f32 %v1164_v33, %v1159_v30 }
 0x14c   :  { %v1166_v36 = vrot.slane %v1165_v35, 2 }
 0x14e   :  { %v1167_v37 = vadd.f32 %v1166_v36, %v1165_v35 }
 0x150   :  { %v1168_v38 = vrot.slane %v1167_v37, 1 }
 0x152   :  { %v1169_v39 = vadd.f32 %v1168_v38, %v1167_v37 }
 0x154   :  { %v1170_v40 = vmul.f32 0.125, %v1169_v39 }
 0x156   :  { %v1171_v41 = vsub.f32 %v1159_v30, %v1170_v40 }
 0x158   :  { %v1172_v42 = vmul.f32 %v1171_v41, %v1171_v41 }
 0x15a   :  { %v1173_v43 = vrot.slane %v1172_v42, 4 }
 0x15c   :  { %v1174_v44 = vadd.f32 %v1173_v43, %v1172_v42 }
 0x15e   :  { %v1175_v45 = vrot.slane %v1174_v44, 2 }
 0x160   :  { %v1176_v46 = vadd.f32 %v1175_v45, %v1174_v44 }
 0x162   :  { %v1177_v47 = vrot.slane %v1176_v46, 1 }
 0x164   :  { %v1178_v48 = vadd.f32 %v1177_v47, %v1176_v46 }
 0x166   :  { %v1179_v49 = vmul.f32 0.125, %v1178_v48 }
 0x168   :  { %v1181_v50 = vadd.f32 1e-05, %v1179_v49 }
 0x16a   :  { %1588 = vrsqrt.f32 %v1181_v50 }
 0x174   :  { %v1589_v55 = vpop.eup %1588 }
 0x175   :  { %v1183_v56 = vmul.f32 %v1589_v55, %v1180_v53 }
 0x177   :  { %v1188_v57 = vrot.slane %v1183_v56, %v1187_v54 }
 0x179   :  { %v1190_v59 = vmul.f32 %v1188_v57, %v1171_v41 }
 0x17b   :  { %v1198_v60 = vadd.f32 %v1323_v58, %v1190_v59 }
 0x17d   :  { %vm1199_vm2 = vcmp.ge.f32.partialorder %v1198_v60, 0.0  ;;  %v1200_v61 = vmul.f32 0.2, %v1198_v60 }
 0x17f   :  { %v1201_v62 = vsel %vm1199_vm2, %v1198_v60, %v1200_v61 }
 0x180   :  { %v1202_v63 = vpack.c.bf16 %v1201_v62, %v1201_v62 }
 0x182   :  { %1203 = vst [vmem:[%s1960_s5] sm:$0xf] %v1202_v63 }

// kernel: my_autoencoder_forward.11
= control target key start
LH: loop header
LB: loop body
LE: loop exit
PB: predicated region body
PF: predicated region fallthrough
CT: control target
= control target key end

     0   :  { %s2156_s1 = inlined_call_operand.vmem [shape: bf16[1152,256], index: 1, kind: input, shape index: {}]   ;;  %s2157_s0 = inlined_call_operand.vmem [shape: bf16[8,1152], index: 0, kind: input, shape index: {}]   ;;  %s2158_s2 = inlined_call_operand.vmem [shape: f32[1,256], index: 2, kind: input, shape index: {}]   ;;  %s2159_s3 = inlined_call_operand.vmem [shape: f32[1,256], index: 3, kind: input, shape index: {}]   ;;  %s2160_s4 = inlined_call_operand.vmem [shape: f32[1,256], index: 4, kind: input, shape index: {}]   ;;  %s2161_s5 = inlined_call_operand.vmem [shape: bf16[8,256], index: 5, kind: output, shape index: {}]  }
   0x1   :  { %v1414_v0 = vld [vmem:[%s2156_s1 + $0x4] ss:$8 sps:$4 sm:$0xff]   ;;  %v1418_v2 = vld [vmem:[%s2156_s1] ss:$8 sps:$4 sm:$0xff]   ;;  %v1420_v4 = vld [vmem:[%s2156_s1 + $0x14] ss:$8 sps:$4 sm:$0xff]  }
   0x2   :  { %v1416_v1 = vld [vmem:[%s2156_s1 + $0x204] ss:$8 sps:$4 sm:$0xff]   ;;  %934 = vmatprep.subr.bf16.mxu1 %v1414_v0  ;;  %v1419_v3 = vld [vmem:[%s2156_s1 + $0x200] ss:$8 sps:$4 sm:$0xff]   ;;  %v1422_v5 = vld [vmem:[%s2156_s1 + $0x214] ss:$8 sps:$4 sm:$0xff]  }
   0x3   :  { %1016 = vmatprep.subr.bf16.mxu0 %v1416_v1  ;;  %935 = vmatpush1.bf16.msra.mxu1 %v1418_v2  ;;  %v1424_v6 = vld [vmem:[%s2156_s1 + $0x10] ss:$8 sps:$4 sm:$0xff]   ;;  %v1426_v8 = vld [vmem:[%s2156_s1 + $0x24] ss:$8 sps:$4 sm:$0xff]   ;;  %v1430_v10 = vld [vmem:[%s2156_s1 + $0x20] ss:$8 sps:$4 sm:$0xff]  }
   0x4   :  { %1017 = vmatpush1.bf16.msra.mxu0 %v1419_v3  ;;  %936 = vmatprep.subr.bf16.mxu1 %v1420_v4  ;;  %v1425_v7 = vld [vmem:[%s2156_s1 + $0x210] ss:$8 sps:$4 sm:$0xff]   ;;  %v1428_v9 = vld [vmem:[%s2156_s1 + $0x224] ss:$8 sps:$4 sm:$0xff]   ;;  %v1431_v11 = vld [vmem:[%s2156_s1 + $0x220] ss:$8 sps:$4 sm:$0xff]  }
   0x5   :  { %1018 = vmatprep.subr.bf16.mxu0 %v1422_v5  ;;  %v1432_v12 = vld [vmem:[%s2156_s1 + $0x34] ss:$8 sps:$4 sm:$0xff]   ;;  %v1436_v14 = vld [vmem:[%s2156_s1 + $0x30] ss:$8 sps:$4 sm:$0xff]   ;;  %v1438_v16 = vld [vmem:[%s2156_s1 + $0x44] ss:$8 sps:$4 sm:$0xff]  }
   0x6   :  { %v1434_v13 = vld [vmem:[%s2156_s1 + $0x234] ss:$8 sps:$4 sm:$0xff]   ;;  %v1437_v15 = vld [vmem:[%s2156_s1 + $0x230] ss:$8 sps:$4 sm:$0xff]   ;;  %v1440_v17 = vld [vmem:[%s2156_s1 + $0x244] ss:$8 sps:$4 sm:$0xff]  }
   0x7   :  { %937 = vmatpush1.bf16.msra.mxu1 %v1424_v6  ;;  %v1442_v18 = vld [vmem:[%s2156_s1 + $0x40] ss:$8 sps:$4 sm:$0xff]   ;;  %v1444_v20 = vld [vmem:[%s2156_s1 + $0x54] ss:$8 sps:$4 sm:$0xff]   ;;  %v1448_v22 = vld [vmem:[%s2156_s1 + $0x50] ss:$8 sps:$4 sm:$0xff]  }
   0x8   :  { %1019 = vmatpush1.bf16.msra.mxu0 %v1425_v7  ;;  %938 = vmatprep.subr.bf16.mxu1 %v1426_v8  ;;  %v1443_v19 = vld [vmem:[%s2156_s1 + $0x240] ss:$8 sps:$4 sm:$0xff]   ;;  %v1446_v21 = vld [vmem:[%s2156_s1 + $0x254] ss:$8 sps:$4 sm:$0xff]   ;;  %v1449_v23 = vld [vmem:[%s2156_s1 + $0x250] ss:$8 sps:$4 sm:$0xff]  }
   0x9   :  { %1020 = vmatprep.subr.bf16.mxu0 %v1428_v9  ;;  %v1450_v24 = vld [vmem:[%s2156_s1 + $0x64] ss:$8 sps:$4 sm:$0xff]   ;;  %v1454_v26 = vld [vmem:[%s2156_s1 + $0x60] ss:$8 sps:$4 sm:$0xff]   ;;  %v1456_v28 = vld [vmem:[%s2156_s1 + $0x74] ss:$8 sps:$4 sm:$0xff]  }
   0xa   :  { %v1452_v25 = vld [vmem:[%s2156_s1 + $0x264] ss:$8 sps:$4 sm:$0xff]   ;;  %v1455_v27 = vld [vmem:[%s2156_s1 + $0x260] ss:$8 sps:$4 sm:$0xff]   ;;  %v1458_v29 = vld [vmem:[%s2156_s1 + $0x274] ss:$8 sps:$4 sm:$0xff]  }
   0xb   :  { %939 = vmatpush1.bf16.msra.mxu1 %v1430_v10  ;;  %v1460_v30 = vld [vmem:[%s2156_s1 + $0x70] ss:$8 sps:$4 sm:$0xff]   ;;  %v1462_v32 = vld [vmem:[%s2156_s1 + $0x84] ss:$8 sps:$4 sm:$0xff]   ;;  %v1466_v34 = vld [vmem:[%s2156_s1 + $0x80] ss:$8 sps:$4 sm:$0xff]  }
   0xc   :  { %1021 = vmatpush1.bf16.msra.mxu0 %v1431_v11  ;;  %940 = vmatprep.subr.bf16.mxu1 %v1432_v12  ;;  %v1461_v31 = vld [vmem:[%s2156_s1 + $0x270] ss:$8 sps:$4 sm:$0xff]   ;;  %v1464_v33 = vld [vmem:[%s2156_s1 + $0x284] ss:$8 sps:$4 sm:$0xff]   ;;  %v1467_v35 = vld [vmem:[%s2156_s1 + $0x280] ss:$8 sps:$4 sm:$0xff]  }
   0xd   :  { %1022 = vmatprep.subr.bf16.mxu0 %v1434_v13  ;;  %v1468_v36 = vld [vmem:[%s2156_s1 + $0x94] ss:$8 sps:$4 sm:$0xff]   ;;  %v1472_v38 = vld [vmem:[%s2156_s1 + $0x90] ss:$8 sps:$4 sm:$0xff]   ;;  %v1474_v40 = vld [vmem:[%s2156_s1 + $0xa4] ss:$8 sps:$4 sm:$0xff]  }
   0xe   :  { %v1470_v37 = vld [vmem:[%s2156_s1 + $0x294] ss:$8 sps:$4 sm:$0xff]   ;;  %v1473_v39 = vld [vmem:[%s2156_s1 + $0x290] ss:$8 sps:$4 sm:$0xff]   ;;  %v1476_v41 = vld [vmem:[%s2156_s1 + $0x2a4] ss:$8 sps:$4 sm:$0xff]  }
   0xf   :  { %941 = vmatpush1.bf16.msra.mxu1 %v1436_v14  ;;  %v1478_v42 = vld [vmem:[%s2156_s1 + $0xa0] ss:$8 sps:$4 sm:$0xff]   ;;  %v1480_v44 = vld [vmem:[%s2156_s1 + $0xb4] ss:$8 sps:$4 sm:$0xff]   ;;  %v1484_v47 = vld [vmem:[%s2156_s1 + $0xb0] ss:$8 sps:$4 sm:$0xff]  }
  0x10   :  { %1023 = vmatpush1.bf16.msra.mxu0 %v1437_v15  ;;  %942 = vmatprep.subr.bf16.mxu1 %v1438_v16  ;;  %v1479_v43 = vld [vmem:[%s2156_s1 + $0x2a0] ss:$8 sps:$4 sm:$0xff]   ;;  %v1482_v45 = vld [vmem:[%s2156_s1 + $0x2b4] ss:$8 sps:$4 sm:$0xff]   ;;  %v1485_v49 = vld [vmem:[%s2156_s1 + $0x2b0] ss:$8 sps:$4 sm:$0xff]  }
  0x11   :  { %1024 = vmatprep.subr.bf16.mxu0 %v1440_v17  ;;  %v21_v46 = vld [vmem:[%s2157_s0] sm:$0xff]  ;;  %v23_v50 = vld [vmem:[%s2157_s0 + $0x10] sm:$0xff] }
  0x12   :  { %v1242_v48 = vcombine.high %v21_v46, %v21_v46  ;;  %v1486_v51 = vld [vmem:[%s2156_s1 + $0xc4] ss:$8 sps:$4 sm:$0xff]   ;;  %v1246_v53 = vcombine.high %v23_v50, %v23_v50  ;;  %v1490_v54 = vld [vmem:[%s2156_s1 + $0xc0] ss:$8 sps:$4 sm:$0xff]   ;;  %v1492_v56 = vld [vmem:[%s2156_s1 + $0xd4] ss:$8 sps:$4 sm:$0xff]   ;;  %v1241_v6 = vcombine.low %v21_v46, %v21_v46  ;;  %v1245_v7 = vcombine.low %v23_v50, %v23_v50 }
  0x13   :  { %943 = vmatpush1.bf16.msra.mxu1 %v1442_v18  ;;  %v1488_v52 = vld [vmem:[%s2156_s1 + $0x2c4] ss:$8 sps:$4 sm:$0xff]   ;;  %v1491_v55 = vld [vmem:[%s2156_s1 + $0x2c0] ss:$8 sps:$4 sm:$0xff]   ;;  %v1494_v57 = vld [vmem:[%s2156_s1 + $0x2d4] ss:$8 sps:$4 sm:$0xff]  }
  0x14   :  { %1025 = vmatpush1.bf16.msra.mxu0 %v1443_v19  ;;  %944 = vmatprep.subr.bf16.mxu1 %v1444_v20  ;;  %v1496_v58 = vld [vmem:[%s2156_s1 + $0xd0] ss:$8 sps:$4 sm:$0xff]   ;;  %v1498_v60 = vld [vmem:[%s2156_s1 + $0xe4] ss:$8 sps:$4 sm:$0xff]   ;;  %v1502_v62 = vld [vmem:[%s2156_s1 + $0xe0] ss:$8 sps:$4 sm:$0xff]  }
  0x15   :  { %1026 = vmatprep.subr.bf16.mxu0 %v1446_v21  ;;  %966 = vmatprep.mubr.bf16.mxu1 %v1242_v48  ;;  %v1497_v59 = vld [vmem:[%s2156_s1 + $0x2d0] ss:$8 sps:$4 sm:$0xff]   ;;  %v1500_v61 = vld [vmem:[%s2156_s1 + $0x2e4] ss:$8 sps:$4 sm:$0xff]   ;;  %v1503_v63 = vld [vmem:[%s2156_s1 + $0x2e0] ss:$8 sps:$4 sm:$0xff]  }
  0x16   :  { %1048 = vmatprep.mubr.bf16.mxu0 %v1246_v53  ;;  %v1504_v0 = vld [vmem:[%s2156_s1 + $0xf4] ss:$8 sps:$4 sm:$0xff]   ;;  %v1508_v2 = vld [vmem:[%s2156_s1 + $0xf0] ss:$8 sps:$4 sm:$0xff]   ;;  %v1514_v4 = vld [vmem:[%s2156_s1 + $0x104] ss:$8 sps:$4 sm:$0xff]  }
  0x17   :  { %945 = vmatpush1.bf16.msra.mxu1 %v1448_v22  ;;  %v1506_v1 = vld [vmem:[%s2156_s1 + $0x2f4] ss:$8 sps:$4 sm:$0xff]   ;;  %v1509_v3 = vld [vmem:[%s2156_s1 + $0x2f0] ss:$8 sps:$4 sm:$0xff]   ;;  %v1519_v5 = vld [vmem:[%s2156_s1 + $0x304] ss:$8 sps:$4 sm:$0xff]  }
  0x18   :  { %1027 = vmatpush1.bf16.msra.mxu0 %v1449_v23  ;;  %946 = vmatprep.subr.bf16.mxu1 %v1450_v24  ;;  %v1512_v8 = vld [vmem:[%s2156_s1 + $0x100] ss:$8 sps:$4 sm:$0xff]   ;;  %v1522_v10 = vld [vmem:[%s2156_s1 + $0x114] ss:$8 sps:$4 sm:$0xff]   ;;  %v1520_v12 = vld [vmem:[%s2156_s1 + $0x110] ss:$8 sps:$4 sm:$0xff]  }
  0x19   :  { %1028 = vmatprep.subr.bf16.mxu0 %v1452_v25  ;;  %v1517_v9 = vld [vmem:[%s2156_s1 + $0x300] ss:$8 sps:$4 sm:$0xff]   ;;  %v1525_v11 = vld [vmem:[%s2156_s1 + $0x314] ss:$8 sps:$4 sm:$0xff]   ;;  %v1523_v13 = vld [vmem:[%s2156_s1 + $0x310] ss:$8 sps:$4 sm:$0xff]  }
  0x1a   :  { %v1528_v14 = vld [vmem:[%s2156_s1 + $0x124] ss:$8 sps:$4 sm:$0xff]   ;;  %v1526_v16 = vld [vmem:[%s2156_s1 + $0x120] ss:$8 sps:$4 sm:$0xff]   ;;  %v1534_v18 = vld [vmem:[%s2156_s1 + $0x134] ss:$8 sps:$4 sm:$0xff]  }
  0x1b   :  { %947 = vmatpush1.bf16.msra.mxu1 %v1454_v26  ;;  %v1531_v15 = vld [vmem:[%s2156_s1 + $0x324] ss:$8 sps:$4 sm:$0xff]   ;;  %v1529_v17 = vld [vmem:[%s2156_s1 + $0x320] ss:$8 sps:$4 sm:$0xff]   ;;  %v1537_v19 = vld [vmem:[%s2156_s1 + $0x334] ss:$8 sps:$4 sm:$0xff]  }
  0x1c   :  { %1029 = vmatpush1.bf16.msra.mxu0 %v1455_v27  ;;  %948 = vmatprep.subr.bf16.mxu1 %v1456_v28  ;;  %v1532_v20 = vld [vmem:[%s2156_s1 + $0x130] ss:$8 sps:$4 sm:$0xff]   ;;  %v1540_v22 = vld [vmem:[%s2156_s1 + $0x144] ss:$8 sps:$4 sm:$0xff]   ;;  %v1538_v24 = vld [vmem:[%s2156_s1 + $0x140] ss:$8 sps:$4 sm:$0xff]  }
  0x1d   :  { %1030 = vmatprep.subr.bf16.mxu0 %v1458_v29  ;;  %v1535_v21 = vld [vmem:[%s2156_s1 + $0x330] ss:$8 sps:$4 sm:$0xff]   ;;  %v1543_v23 = vld [vmem:[%s2156_s1 + $0x344] ss:$8 sps:$4 sm:$0xff]   ;;  %v1541_v25 = vld [vmem:[%s2156_s1 + $0x340] ss:$8 sps:$4 sm:$0xff]  }
  0x1e   :  { %v1546_v26 = vld [vmem:[%s2156_s1 + $0x154] ss:$8 sps:$4 sm:$0xff]   ;;  %v1544_v28 = vld [vmem:[%s2156_s1 + $0x150] ss:$8 sps:$4 sm:$0xff]   ;;  %v1576_v50 = vld [vmem:[%s2156_s1 + $0x1a4] ss:$8 sps:$4 sm:$0xff]  }
  0x1f   :  { %949 = vmatpush1.bf16.msra.mxu1 %v1460_v30  ;;  %v1549_v27 = vld [vmem:[%s2156_s1 + $0x354] ss:$8 sps:$4 sm:$0xff]   ;;  %v1547_v29 = vld [vmem:[%s2156_s1 + $0x350] ss:$8 sps:$4 sm:$0xff]   ;;  %v1552_v30 = vld [vmem:[%s2156_s1 + $0x164] ss:$8 sps:$4 sm:$0xff]  }
  0x20   :  { %1031 = vmatpush1.bf16.msra.mxu0 %v1461_v31  ;;  %950 = vmatprep.subr.bf16.mxu1 %v1462_v32  ;;  %v1555_v31 = vld [vmem:[%s2156_s1 + $0x364] ss:$8 sps:$4 sm:$0xff]   ;;  %v1570_v46 = vld [vmem:[%s2156_s1 + $0x194] ss:$8 sps:$4 sm:$0xff]   ;;  %v1568_v48 = vld [vmem:[%s2156_s1 + $0x190] ss:$8 sps:$4 sm:$0xff]  }
  0x21   :  { %1032 = vmatprep.subr.bf16.mxu0 %v1464_v33  ;;  %v1954_v32 = vld [vmem:[%s2157_s0 + $0x8] sm:$0xff]  ;;  %v1959_v33 = vld [vmem:[%s2157_s0 + $0x18] sm:$0xff] }
  0x22   :  { %v1577_v53 = vld [vmem:[%s2156_s1 + $0x3a0] ss:$8 sps:$4 sm:$0xff]  }
  0x23   :  { %951 = vmatpush1.bf16.msra.mxu1 %v1466_v34  ;;  %v1550_v34 = vld [vmem:[%s2156_s1 + $0x160] ss:$8 sps:$4 sm:$0xff]  }
  0x24   :  { %1033 = vmatpush1.bf16.msra.mxu0 %v1467_v35  ;;  %952 = vmatprep.subr.bf16.mxu1 %v1468_v36  ;;  %v1553_v35 = vld [vmem:[%s2156_s1 + $0x360] ss:$8 sps:$4 sm:$0xff]   ;;  %v1244_v36 = vcombine.high %v1954_v32, %v1954_v32 }
  0x25   :  { %1034 = vmatprep.subr.bf16.mxu0 %v1470_v37  ;;  %v1248_v37 = vcombine.high %v1959_v33, %v1959_v33 }
  0x27   :  { %953 = vmatpush1.bf16.msra.mxu1 %v1472_v38  ;;  %v1558_v38 = vld [vmem:[%s2156_s1 + $0x174] ss:$8 sps:$4 sm:$0xff]  }
  0x28   :  { %1035 = vmatpush1.bf16.msra.mxu0 %v1473_v39  ;;  %954 = vmatprep.subr.bf16.mxu1 %v1474_v40  ;;  %v1561_v39 = vld [vmem:[%s2156_s1 + $0x374] ss:$8 sps:$4 sm:$0xff]   ;;  %v1556_v40 = vld [vmem:[%s2156_s1 + $0x170] ss:$8 sps:$4 sm:$0xff]  }
  0x29   :  { %1036 = vmatprep.subr.bf16.mxu0 %v1476_v41  ;;  %v1559_v41 = vld [vmem:[%s2156_s1 + $0x370] ss:$8 sps:$4 sm:$0xff]  }
  0x2b   :  { %955 = vmatpush1.bf16.msra.mxu1 %v1478_v42  ;;  %v1564_v42 = vld [vmem:[%s2156_s1 + $0x184] ss:$8 sps:$4 sm:$0xff]  }
  0x2c   :  { %1037 = vmatpush1.bf16.msra.mxu0 %v1479_v43  ;;  %956 = vmatprep.subr.bf16.mxu1 %v1480_v44  ;;  %v1567_v43 = vld [vmem:[%s2156_s1 + $0x384] ss:$8 sps:$4 sm:$0xff]   ;;  %v1562_v44 = vld [vmem:[%s2156_s1 + $0x180] ss:$8 sps:$4 sm:$0xff]  }
  0x2d   :  { %1038 = vmatprep.subr.bf16.mxu0 %v1482_v45  ;;  %v1565_v45 = vld [vmem:[%s2156_s1 + $0x380] ss:$8 sps:$4 sm:$0xff]  }
  0x2f   :  { %957 = vmatpush1.bf16.msra.mxu1 %v1484_v47  ;;  %v1573_v47 = vld [vmem:[%s2156_s1 + $0x394] ss:$8 sps:$4 sm:$0xff]  }
  0x30   :  { %1039 = vmatpush1.bf16.msra.mxu0 %v1485_v49  ;;  %958 = vmatprep.subr.bf16.mxu1 %v1486_v51  ;;  %v1571_v49 = vld [vmem:[%s2156_s1 + $0x390] ss:$8 sps:$4 sm:$0xff]   ;;  %v1579_v51 = vld [vmem:[%s2156_s1 + $0x3a4] ss:$8 sps:$4 sm:$0xff]  }
  0x31   :  { %1040 = vmatprep.subr.bf16.mxu0 %v1488_v52  ;;  %v1574_v52 = vld [vmem:[%s2156_s1 + $0x1a0] ss:$8 sps:$4 sm:$0xff]  }
  0x33   :  { %959 = vmatpush1.bf16.msra.mxu1 %v1490_v54  ;;  %v1582_v54 = vld [vmem:[%s2156_s1 + $0x1b4] ss:$8 sps:$4 sm:$0xff]  }
  0x34   :  { %1041 = vmatpush1.bf16.msra.mxu0 %v1491_v55  ;;  %960 = vmatprep.subr.bf16.mxu1 %v1492_v56  ;;  %v1585_v55 = vld [vmem:[%s2156_s1 + $0x3b4] ss:$8 sps:$4 sm:$0xff]   ;;  %v1580_v56 = vld [vmem:[%s2156_s1 + $0x1b0] ss:$8 sps:$4 sm:$0xff]  }
  0x35   :  { %1042 = vmatprep.subr.bf16.mxu0 %v1494_v57  ;;  %v1583_v57 = vld [vmem:[%s2156_s1 + $0x3b0] ss:$8 sps:$4 sm:$0xff]  }
  0x37   :  { %961 = vmatpush1.bf16.msra.mxu1 %v1496_v58  ;;  %v1588_v58 = vld [vmem:[%s2156_s1 + $0x1c4] ss:$8 sps:$4 sm:$0xff]  }
  0x38   :  { %1043 = vmatpush1.bf16.msra.mxu0 %v1497_v59  ;;  %962 = vmatprep.subr.bf16.mxu1 %v1498_v60  ;;  %v1591_v59 = vld [vmem:[%s2156_s1 + $0x3c4] ss:$8 sps:$4 sm:$0xff]   ;;  %v1586_v60 = vld [vmem:[%s2156_s1 + $0x1c0] ss:$8 sps:$4 sm:$0xff]  }
  0x39   :  { %1044 = vmatprep.subr.bf16.mxu0 %v1500_v61  ;;  %v1589_v61 = vld [vmem:[%s2156_s1 + $0x3c0] ss:$8 sps:$4 sm:$0xff]  }
  0x3b   :  { %963 = vmatpush1.bf16.msra.mxu1 %v1502_v62  ;;  %v1594_v62 = vld [vmem:[%s2156_s1 + $0x1d4] ss:$8 sps:$4 sm:$0xff]  }
  0x3c   :  { %1045 = vmatpush1.bf16.msra.mxu0 %v1503_v63  ;;  %964 = vmatprep.subr.bf16.mxu1 %v1504_v0  ;;  %v1597_v63 = vld [vmem:[%s2156_s1 + $0x3d4] ss:$8 sps:$4 sm:$0xff]   ;;  %v1592_v0 = vld [vmem:[%s2156_s1 + $0x1d0] ss:$8 sps:$4 sm:$0xff]  }
  0x3d   :  { %1046 = vmatprep.subr.bf16.mxu0 %v1506_v1  ;;  %v1595_v1 = vld [vmem:[%s2156_s1 + $0x3d0] ss:$8 sps:$4 sm:$0xff]  }
  0x3f   :  { %965 = vmatpush1.bf16.msra.mxu1 %v1508_v2  ;;  %v1600_v2 = vld [vmem:[%s2156_s1 + $0x1e4] ss:$8 sps:$4 sm:$0xff]  }
  0x40   :  { %1047 = vmatpush1.bf16.msra.mxu0 %v1509_v3  ;;  %975 = vmatprep.subr.bf16.mxu1 %v1514_v4  ;;  %v1603_v3 = vld [vmem:[%s2156_s1 + $0x3e4] ss:$8 sps:$4 sm:$0xff]   ;;  %v1598_v4 = vld [vmem:[%s2156_s1 + $0x1e0] ss:$8 sps:$4 sm:$0xff]  }
  0x41   :  { %1057 = vmatprep.subr.bf16.mxu0 %v1519_v5  ;;  %v1601_v5 = vld [vmem:[%s2156_s1 + $0x3e0] ss:$8 sps:$4 sm:$0xff]  }
  0x42   :  { %967 = vmatmul.mubr.bf16.vlgmr.msra.gmra.mrb[0].mxu1 %v1241_v6  ;;  %v1606_v6 = vld [vmem:[%s2156_s1 + $0x1f4] ss:$8 sps:$4 sm:$0xff]  }
  0x43   :  { %1049 = vmatmul.mubr.bf16.vlgmr.msra.gmra.mrb[0].mxu0 %v1245_v7  ;;  %976 = vmatpush1.bf16.msra.mxu1 %v1512_v8  ;;  %v1609_v7 = vld [vmem:[%s2156_s1 + $0x3f4] ss:$8 sps:$4 sm:$0xff]   ;;  %v1604_v8 = vld [vmem:[%s2156_s1 + $0x1f0] ss:$8 sps:$4 sm:$0xff]  }
  0x44   :  { %1058 = vmatpush1.bf16.msra.mxu0 %v1517_v9  ;;  %977 = vmatprep.subr.bf16.mxu1 %v1522_v10  ;;  %v1607_v9 = vld [vmem:[%s2156_s1 + $0x3f0] ss:$8 sps:$4 sm:$0xff]   ;;  %v1616_v10 = vld [vmem:[%s2156_s1 + $0x404] ss:$8 sps:$4 sm:$0xff]  }
  0x45   :  { %1059 = vmatprep.subr.bf16.mxu0 %v1525_v11  ;;  %1007 = vmatprep.mubr.bf16.mxu1 %v1244_v36  ;;  %v1243_v11 = vcombine.low %v1954_v32, %v1954_v32 }
  0x46   :  { %1089 = vmatprep.mubr.bf16.mxu0 %v1248_v37  ;;  %v170_v37 = vld [vmem:[%s2158_s2] sm:$0x3] }
  0x47   :  { %978 = vmatpush1.bf16.msra.mxu1 %v1520_v12  ;;  %v1247_v12 = vcombine.low %v1959_v33, %v1959_v33 }
  0x48   :  { %1060 = vmatpush1.bf16.msra.mxu0 %v1523_v13  ;;  %979 = vmatprep.subr.bf16.mxu1 %v1528_v14  ;;  %v1614_v13 = vld [vmem:[%s2156_s1 + $0x400] ss:$8 sps:$4 sm:$0xff]   ;;  %v1619_v14 = vld [vmem:[%s2156_s1 + $0x414] ss:$8 sps:$4 sm:$0xff]  }
  0x49   :  { %1061 = vmatprep.subr.bf16.mxu0 %v1531_v15  ;;  %v1617_v15 = vld [vmem:[%s2156_s1 + $0x410] ss:$8 sps:$4 sm:$0xff]  }
  0x4b   :  { %980 = vmatpush1.bf16.msra.mxu1 %v1526_v16  ;;  %v1643_v16 = vmov 0  }
  0x4c   :  { %1062 = vmatpush1.bf16.msra.mxu0 %v1529_v17  ;;  %981 = vmatprep.subr.bf16.mxu1 %v1534_v18  ;;  %v1622_v17 = vld [vmem:[%s2156_s1 + $0x424] ss:$8 sps:$4 sm:$0xff]   ;;  %v1620_v18 = vld [vmem:[%s2156_s1 + $0x420] ss:$8 sps:$4 sm:$0xff]  }
  0x4d   :  { %1063 = vmatprep.subr.bf16.mxu0 %v1537_v19  ;;  %v1625_v19 = vld [vmem:[%s2156_s1 + $0x434] ss:$8 sps:$4 sm:$0xff]  }
  0x4f   :  { %982 = vmatpush1.bf16.msra.mxu1 %v1532_v20  ;;  %v1623_v20 = vld [vmem:[%s2156_s1 + $0x430] ss:$8 sps:$4 sm:$0xff]  }
  0x50   :  { %1064 = vmatpush1.bf16.msra.mxu0 %v1535_v21  ;;  %983 = vmatprep.subr.bf16.mxu1 %v1540_v22  ;;  %v1628_v21 = vld [vmem:[%s2156_s1 + $0x444] ss:$8 sps:$4 sm:$0xff]   ;;  %v1626_v22 = vld [vmem:[%s2156_s1 + $0x440] ss:$8 sps:$4 sm:$0xff]  }
  0x51   :  { %1065 = vmatprep.subr.bf16.mxu0 %v1543_v23  ;;  %v1631_v23 = vld [vmem:[%s2156_s1 + $0x454] ss:$8 sps:$4 sm:$0xff]  }
  0x53   :  { %984 = vmatpush1.bf16.msra.mxu1 %v1538_v24  ;;  %v1629_v24 = vld [vmem:[%s2156_s1 + $0x450] ss:$8 sps:$4 sm:$0xff]  }
  0x54   :  { %1066 = vmatpush1.bf16.msra.mxu0 %v1541_v25  ;;  %985 = vmatprep.subr.bf16.mxu1 %v1546_v26  ;;  %v1634_v25 = vld [vmem:[%s2156_s1 + $0x464] ss:$8 sps:$4 sm:$0xff]   ;;  %v1632_v26 = vld [vmem:[%s2156_s1 + $0x460] ss:$8 sps:$4 sm:$0xff]  }
  0x55   :  { %1067 = vmatprep.subr.bf16.mxu0 %v1549_v27  ;;  %v1637_v27 = vld [vmem:[%s2156_s1 + $0x474] ss:$8 sps:$4 sm:$0xff]  }
  0x57   :  { %986 = vmatpush1.bf16.msra.mxu1 %v1544_v28  ;;  %v1635_v28 = vld [vmem:[%s2156_s1 + $0x470] ss:$8 sps:$4 sm:$0xff]  }
  0x58   :  { %1068 = vmatpush1.bf16.msra.mxu0 %v1547_v29  ;;  %987 = vmatprep.subr.bf16.mxu1 %v1552_v30  ;;  %v1638_v29 = vld [vmem:[%s2157_s0 + $0x20] ss:$0 sps:$4 sm:$0xff]  }
  0x59   :  { %1069 = vmatprep.subr.bf16.mxu0 %v1555_v31 }
  0x5b   :  { %988 = vmatpush1.bf16.msra.mxu1 %v1550_v34  ;;  %v172_v34 = vlaneseq }
  0x5c   :  { %1070 = vmatpush1.bf16.msra.mxu0 %v1553_v35  ;;  %989 = vmatprep.subr.bf16.mxu1 %v1558_v38 }
  0x5d   :  { %1071 = vmatprep.subr.bf16.mxu0 %v1561_v39  ;;  %v173_v35 = vshrl.u32 %v172_v34, 7 }
  0x5f   :  { %990 = vmatpush1.bf16.msra.mxu1 %v1556_v40  ;;  %v2134_v36 = vsub.s32 0, %v173_v35  ;;  %v2139_v38 = vsub.s32 1, %v173_v35 }
  0x60   :  { %1072 = vmatpush1.bf16.msra.mxu0 %v1559_v41  ;;  %991 = vmatprep.subr.bf16.mxu1 %v1564_v42 }
  0x61   :  { %1073 = vmatprep.subr.bf16.mxu0 %v1567_v43  ;;  %v175_v39 = vrot.slane %v170_v37, %v2134_v36  ;;  %v179_v40 = vrot.slane %v170_v37, %v2139_v38 }
  0x63   :  { %992 = vmatpush1.bf16.msra.mxu1 %v1562_v44 }
  0x64   :  { %1074 = vmatpush1.bf16.msra.mxu0 %v1565_v45  ;;  %993 = vmatprep.subr.bf16.mxu1 %v1570_v46 }
  0x65   :  { %1075 = vmatprep.subr.bf16.mxu0 %v1573_v47 }
  0x67   :  { %994 = vmatpush1.bf16.msra.mxu1 %v1568_v48 }
  0x68   :  { %1076 = vmatpush1.bf16.msra.mxu0 %v1571_v49  ;;  %995 = vmatprep.subr.bf16.mxu1 %v1576_v50 }
  0x69   :  { %1077 = vmatprep.subr.bf16.mxu0 %v1579_v51 }
  0x6b   :  { %996 = vmatpush1.bf16.msra.mxu1 %v1574_v52 }
  0x6c   :  { %1078 = vmatpush1.bf16.msra.mxu0 %v1577_v53  ;;  %997 = vmatprep.subr.bf16.mxu1 %v1582_v54 }
  0x6d   :  { %1079 = vmatprep.subr.bf16.mxu0 %v1585_v55 }
  0x6f   :  { %998 = vmatpush1.bf16.msra.mxu1 %v1580_v56 }
  0x70   :  { %1080 = vmatpush1.bf16.msra.mxu0 %v1583_v57  ;;  %999 = vmatprep.subr.bf16.mxu1 %v1588_v58 }
  0x71   :  { %1081 = vmatprep.subr.bf16.mxu0 %v1591_v59 }
  0x73   :  { %1000 = vmatpush1.bf16.msra.mxu1 %v1586_v60 }
  0x74   :  { %1082 = vmatpush1.bf16.msra.mxu0 %v1589_v61  ;;  %1001 = vmatprep.subr.bf16.mxu1 %v1594_v62 }
  0x75   :  { %1083 = vmatprep.subr.bf16.mxu0 %v1597_v63 }
  0x77   :  { %1002 = vmatpush1.bf16.msra.mxu1 %v1592_v0 }
  0x78   :  { %1084 = vmatpush1.bf16.msra.mxu0 %v1595_v1  ;;  %1003 = vmatprep.subr.bf16.mxu1 %v1600_v2 }
  0x79   :  { %1085 = vmatprep.subr.bf16.mxu0 %v1603_v3 }
  0x7b   :  { %1004 = vmatpush1.bf16.msra.mxu1 %v1598_v4 }
  0x7c   :  { %1086 = vmatpush1.bf16.msra.mxu0 %v1601_v5  ;;  %1005 = vmatprep.subr.bf16.mxu1 %v1606_v6 }
  0x7d   :  { %1087 = vmatprep.subr.bf16.mxu0 %v1609_v7 }
  0x7f   :  { %1006 = vmatpush1.bf16.msra.mxu1 %v1604_v8 }
  0x80   :  { %1088 = vmatpush1.bf16.msra.mxu0 %v1607_v9 }
  0x81   :  { %1098 = vmatprep.subr.bf16.mxu0 %v1616_v10 }
  0x82   :  { %1008 = vmatmul.mubr.bf16.vlgmr.msra.gmra.mrb[0].mxu1 %v1243_v11 }
  0x83   :  { %1090 = vmatmul.mubr.bf16.vlgmr.msra.gmra.mrb[0].mxu0 %v1247_v12 }
  0x84   :  { %1099 = vmatpush1.bf16.msra.mxu0 %v1614_v13  ;;  %1130 = vmatprep.mubr.bf16.mxu0 %v1643_v16 }
  0x85   :  { %1100 = vmatprep.subr.bf16.mxu0 %v1619_v14 }
  0x88   :  { %1101 = vmatpush1.bf16.msra.mxu0 %v1617_v15 }
  0x89   :  { %1102 = vmatprep.subr.bf16.mxu0 %v1622_v17 }
  0x8c   :  { %1103 = vmatpush1.bf16.msra.mxu0 %v1620_v18 }
  0x8d   :  { %1104 = vmatprep.subr.bf16.mxu0 %v1625_v19  ;;  %v1644_v19 = vmov 1966171168  }
  0x90   :  { %1105 = vmatpush1.bf16.msra.mxu0 %v1623_v20  ;;  %v1180_v20 = vunpack.c.l.s4 %v1644_v19 }
  0x91   :  { %1106 = vmatprep.subr.bf16.mxu0 %v1628_v21 }
  0x92   :  { %v1181_v21 = vunpack.c.0.s8 %v1180_v20 }
  0x94   :  { %1107 = vmatpush1.bf16.msra.mxu0 %v1626_v22 }
  0x95   :  { %1108 = vmatprep.subr.bf16.mxu0 %v1631_v23  ;;  %v1184_v23 = vsub.s32 %v1181_v21, %v173_v35 }
  0x98   :  { %1109 = vmatpush1.bf16.msra.mxu0 %v1629_v24 }
  0x99   :  { %1110 = vmatprep.subr.bf16.mxu0 %v1634_v25 }
  0x9c   :  { %1111 = vmatpush1.bf16.msra.mxu0 %v1632_v26 }
  0x9d   :  { %1112 = vmatprep.subr.bf16.mxu0 %v1637_v27  ;;  %v1171_v27 = vld [vmem:[%s2159_s3] sm:$0x3] }
  0xa0   :  { %1113 = vmatpush1.bf16.msra.mxu0 %v1635_v28 }
  0xa3   :  { %1131 = vmatmul.mubr.bf16.vlgmr.msra.gmra.mrb[0].mxu0 %v1638_v29  ;;  %v1208_v29 = vld [vmem:[%s2160_s4] sm:$0x3] }
  0xa4   :  { %v1217_v34 = vrot.slane %v1208_v29, %v2139_v38 }
 0x155   :  { %v1009_v30 = vpop.f32.mrb[0].mxu1 }
 0x156   :  { %v1011_v31 = vpop.f32.mrb[1].mxu1  ;;  %v1396_v41 = vadd.f32 %v1009_v30, %v175_v39 }
 0x157   :  { %v1013_v32 = vpop.f32.mrb[2].mxu1  ;;  %v1398_v42 = vadd.f32 %v1011_v31, %v179_v40  ;;  %v1213_v31 = vrot.slane %v1208_v29, %v2134_v36 }
 0x158   :  { %v1014_v33 = vpop.f32.mrb[3].mxu1 }
 0x176   :  { %v1132_v43 = vpop.f32.mrb[0].mxu0 }
 0x177   :  { %v1397_v44 = vadd.f32 %v1396_v41, %v1132_v43  ;;  %v1134_v45 = vpop.f32.mrb[1].mxu0 }
 0x178   :  { %v1399_v46 = vadd.f32 %v1398_v42, %v1134_v45  ;;  %v1136_v47 = vpop.f32.mrb[2].mxu0 }
 0x179   :  { %v1139_v48 = vrot.slane %v1397_v44, 4  ;;  %v1137_v49 = vpop.f32.mrb[3].mxu0 }
 0x17a   :  { %v1145_v50 = vrot.slane %v1399_v46, 4 }
 0x17b   :  { %v1140_v51 = vadd.f32 %v1397_v44, %v1139_v48 }
 0x17c   :  { %v1146_v52 = vadd.f32 %v1399_v46, %v1145_v50 }
 0x17d   :  { %v1141_v53 = vrot.slane %v1140_v51, 2 }
 0x17e   :  { %v1147_v54 = vrot.slane %v1146_v52, 2 }
 0x17f   :  { %v1142_v55 = vadd.f32 %v1141_v53, %v1140_v51 }
 0x180   :  { %v1148_v56 = vadd.f32 %v1147_v54, %v1146_v52 }
 0x181   :  { %v1143_v57 = vrot.slane %v1142_v55, 1 }
 0x182   :  { %v1149_v58 = vrot.slane %v1148_v56, 1 }
 0x183   :  { %v1144_v59 = vadd.f32 %v1143_v57, %v1142_v55 }
 0x184   :  { %v1150_v60 = vadd.f32 %v1149_v58, %v1148_v56 }
 0x185   :  { %v1151_v61 = vmul.f32 0.125, %v1144_v59 }
 0x186   :  { %v1152_v62 = vmul.f32 0.125, %v1150_v60 }
 0x187   :  { %v1153_v63 = vsub.f32 %v1397_v44, %v1151_v61 }
 0x188   :  { %v1154_v0 = vsub.f32 %v1399_v46, %v1152_v62 }
 0x189   :  { %v1155_v1 = vmul.f32 %v1153_v63, %v1153_v63 }
 0x18a   :  { %v1156_v2 = vmul.f32 %v1154_v0, %v1154_v0 }
 0x18b   :  { %v1157_v3 = vrot.slane %v1155_v1, 4 }
 0x18c   :  { %v1163_v4 = vrot.slane %v1156_v2, 4 }
 0x18d   :  { %v1158_v5 = vadd.f32 %v1157_v3, %v1155_v1 }
 0x18e   :  { %v1164_v6 = vadd.f32 %v1163_v4, %v1156_v2 }
 0x18f   :  { %v1159_v7 = vrot.slane %v1158_v5, 2 }
 0x190   :  { %v1165_v8 = vrot.slane %v1164_v6, 2 }
 0x191   :  { %v1160_v9 = vadd.f32 %v1159_v7, %v1158_v5 }
 0x192   :  { %v1166_v10 = vadd.f32 %v1165_v8, %v1164_v6 }
 0x193   :  { %v1161_v11 = vrot.slane %v1160_v9, 1 }
 0x194   :  { %v1167_v12 = vrot.slane %v1166_v10, 1 }
 0x195   :  { %v1162_v13 = vadd.f32 %v1161_v11, %v1160_v9 }
 0x196   :  { %v1168_v14 = vadd.f32 %v1167_v12, %v1166_v10 }
 0x197   :  { %v1169_v15 = vmul.f32 0.125, %v1162_v13 }
 0x198   :  { %v1170_v16 = vmul.f32 0.125, %v1168_v14 }
 0x199   :  { %v1172_v17 = vadd.f32 1e-05, %v1169_v15 }
 0x19a   :  { %v1173_v18 = vadd.f32 1e-05, %v1170_v16 }
 0x19b   :  { %1639 = vrsqrt.f32 %v1172_v17 }
 0x19c   :  { %1641 = vrsqrt.f32 %v1173_v18 }
 0x1a5   :  { %v1640_v22 = vpop.eup %1639 }
 0x1a6   :  { %v1642_v24 = vpop.eup %1641 }
 0x1a7   :  { %v1178_v25 = vcombine.low %v1640_v22, %v1642_v24 }
 0x1a9   :  { %v1185_v26 = vrot.slane %v1178_v25, %v1184_v23 }
 0x1ab   :  { %v1192_v28 = vrot.slane %v1185_v26, %v1184_v23 }
 0x1ad   :  { %v1194_v30 = vmul.f32 %v1192_v28, %v1171_v27 }
 0x1af   :  { %v1199_v32 = vrot.slane %v1194_v30, %v2134_v36  ;;  %v1203_v33 = vrot.slane %v1194_v30, %v2139_v38 }
 0x1b1   :  { %v1206_v35 = vmul.f32 %v1199_v32, %v1153_v63  ;;  %v1207_v37 = vmul.f32 %v1203_v33, %v1154_v0 }
 0x1b3   :  { %v1220_v39 = vadd.f32 %v1213_v31, %v1206_v35  ;;  %v1221_v40 = vadd.f32 %v1217_v34, %v1207_v37 }
 0x1b5   :  { %vm1222_vm0 = vcmp.ge.f32.partialorder %v1220_v39, 0.0  ;;  %vm1223_vm1 = vcmp.ge.f32.partialorder %v1221_v40, 0.0  ;;  %v1224_v41 = vmul.f32 0.2, %v1220_v39  ;;  %v1225_v42 = vmul.f32 0.2, %v1221_v40 }
 0x1b7   :  { %v1226_v43 = vsel %vm1222_vm0, %v1220_v39, %v1224_v41  ;;  %v1227_v44 = vsel %vm1223_vm1, %v1221_v40, %v1225_v42 }
 0x1b8   :  { %v1395_v45 = vpack.c.bf16 %v1227_v44, %v1226_v43 }
 0x1ba   :  { %1236 = vst [vmem:[%s2161_s5] sm:$0xff] %v1395_v45 }

// kernel: my_autoencoder_forward.13
= control target key start
LH: loop header
LB: loop body
LE: loop exit
PB: predicated region body
PF: predicated region fallthrough
CT: control target
= control target key end

     0   :  { %vm1309_vm0 = vcmask 523264   ;;  %s2507_s1 = inlined_call_operand.vmem [shape: bf16[1152,256], index: 1, kind: input, shape index: {}]   ;;  %s2508_s0 = inlined_call_operand.vmem [shape: bf16[32,1152], index: 0, kind: input, shape index: {}]   ;;  %s2509_s2 = inlined_call_operand.vmem [shape: f32[1,256], index: 2, kind: input, shape index: {}]   ;;  %s2510_s4 = inlined_call_operand.vmem [shape: f32[1,64], index: 4, kind: input, shape index: {}]   ;;  %s2511_s3 = inlined_call_operand.vmem [shape: f32[1,64], index: 3, kind: input, shape index: {}]   ;;  %s2512_s5 = inlined_call_operand.vmem [shape: bf16[32,256], index: 5, kind: output, shape index: {}]  }
   0x1   :  { %v1693_v0 = vld [vmem:[%s2507_s1 + $0x4] ss:$8 sps:$4 sm:$0xff]   ;;  %v1697_v2 = vld [vmem:[%s2507_s1] ss:$8 sps:$4 sm:$0xff]   ;;  %v1699_v4 = vld [vmem:[%s2507_s1 + $0x14] ss:$8 sps:$4 sm:$0xff]  }
   0x2   :  { %v1695_v1 = vld [vmem:[%s2507_s1 + $0x204] ss:$8 sps:$4 sm:$0xff]   ;;  %1009 = vmatprep.subr.bf16.mxu1 %v1693_v0  ;;  %v1698_v3 = vld [vmem:[%s2507_s1 + $0x200] ss:$8 sps:$4 sm:$0xff]   ;;  %v1701_v5 = vld [vmem:[%s2507_s1 + $0x214] ss:$8 sps:$4 sm:$0xff]  }
   0x3   :  { %1115 = vmatprep.subr.bf16.mxu0 %v1695_v1  ;;  %1010 = vmatpush1.bf16.msra.mxu1 %v1697_v2  ;;  %v1703_v6 = vld [vmem:[%s2507_s1 + $0x10] ss:$8 sps:$4 sm:$0xff]   ;;  %v1705_v8 = vld [vmem:[%s2507_s1 + $0x24] ss:$8 sps:$4 sm:$0xff]   ;;  %v1709_v10 = vld [vmem:[%s2507_s1 + $0x20] ss:$8 sps:$4 sm:$0xff]  }
   0x4   :  { %1116 = vmatpush1.bf16.msra.mxu0 %v1698_v3  ;;  %1011 = vmatprep.subr.bf16.mxu1 %v1699_v4  ;;  %v1704_v7 = vld [vmem:[%s2507_s1 + $0x210] ss:$8 sps:$4 sm:$0xff]   ;;  %v1707_v9 = vld [vmem:[%s2507_s1 + $0x224] ss:$8 sps:$4 sm:$0xff]   ;;  %v1710_v11 = vld [vmem:[%s2507_s1 + $0x220] ss:$8 sps:$4 sm:$0xff]  }
   0x5   :  { %1117 = vmatprep.subr.bf16.mxu0 %v1701_v5  ;;  %v1711_v12 = vld [vmem:[%s2507_s1 + $0x34] ss:$8 sps:$4 sm:$0xff]   ;;  %v1715_v14 = vld [vmem:[%s2507_s1 + $0x30] ss:$8 sps:$4 sm:$0xff]   ;;  %v1717_v16 = vld [vmem:[%s2507_s1 + $0x44] ss:$8 sps:$4 sm:$0xff]  }
   0x6   :  { %v1713_v13 = vld [vmem:[%s2507_s1 + $0x234] ss:$8 sps:$4 sm:$0xff]   ;;  %v1716_v15 = vld [vmem:[%s2507_s1 + $0x230] ss:$8 sps:$4 sm:$0xff]   ;;  %v1719_v17 = vld [vmem:[%s2507_s1 + $0x244] ss:$8 sps:$4 sm:$0xff]  }
   0x7   :  { %1012 = vmatpush1.bf16.msra.mxu1 %v1703_v6  ;;  %v1721_v18 = vld [vmem:[%s2507_s1 + $0x40] ss:$8 sps:$4 sm:$0xff]   ;;  %v1723_v20 = vld [vmem:[%s2507_s1 + $0x54] ss:$8 sps:$4 sm:$0xff]   ;;  %v1727_v22 = vld [vmem:[%s2507_s1 + $0x50] ss:$8 sps:$4 sm:$0xff]  }
   0x8   :  { %1118 = vmatpush1.bf16.msra.mxu0 %v1704_v7  ;;  %1013 = vmatprep.subr.bf16.mxu1 %v1705_v8  ;;  %v1722_v19 = vld [vmem:[%s2507_s1 + $0x240] ss:$8 sps:$4 sm:$0xff]   ;;  %v1725_v21 = vld [vmem:[%s2507_s1 + $0x254] ss:$8 sps:$4 sm:$0xff]   ;;  %v1728_v23 = vld [vmem:[%s2507_s1 + $0x250] ss:$8 sps:$4 sm:$0xff]  }
   0x9   :  { %1119 = vmatprep.subr.bf16.mxu0 %v1707_v9  ;;  %v1729_v24 = vld [vmem:[%s2507_s1 + $0x64] ss:$8 sps:$4 sm:$0xff]   ;;  %v1733_v26 = vld [vmem:[%s2507_s1 + $0x60] ss:$8 sps:$4 sm:$0xff]   ;;  %v1735_v28 = vld [vmem:[%s2507_s1 + $0x74] ss:$8 sps:$4 sm:$0xff]  }
   0xa   :  { %v1731_v25 = vld [vmem:[%s2507_s1 + $0x264] ss:$8 sps:$4 sm:$0xff]   ;;  %v1734_v27 = vld [vmem:[%s2507_s1 + $0x260] ss:$8 sps:$4 sm:$0xff]   ;;  %v1737_v29 = vld [vmem:[%s2507_s1 + $0x274] ss:$8 sps:$4 sm:$0xff]  }
   0xb   :  { %1014 = vmatpush1.bf16.msra.mxu1 %v1709_v10  ;;  %v1739_v30 = vld [vmem:[%s2507_s1 + $0x70] ss:$8 sps:$4 sm:$0xff]   ;;  %v1741_v32 = vld [vmem:[%s2507_s1 + $0x84] ss:$8 sps:$4 sm:$0xff]   ;;  %v1745_v34 = vld [vmem:[%s2507_s1 + $0x80] ss:$8 sps:$4 sm:$0xff]  }
   0xc   :  { %1120 = vmatpush1.bf16.msra.mxu0 %v1710_v11  ;;  %1015 = vmatprep.subr.bf16.mxu1 %v1711_v12  ;;  %v1740_v31 = vld [vmem:[%s2507_s1 + $0x270] ss:$8 sps:$4 sm:$0xff]   ;;  %v1743_v33 = vld [vmem:[%s2507_s1 + $0x284] ss:$8 sps:$4 sm:$0xff]   ;;  %v1746_v35 = vld [vmem:[%s2507_s1 + $0x280] ss:$8 sps:$4 sm:$0xff]  }
   0xd   :  { %1121 = vmatprep.subr.bf16.mxu0 %v1713_v13  ;;  %v1747_v36 = vld [vmem:[%s2507_s1 + $0x94] ss:$8 sps:$4 sm:$0xff]   ;;  %v1751_v38 = vld [vmem:[%s2507_s1 + $0x90] ss:$8 sps:$4 sm:$0xff]   ;;  %v1753_v40 = vld [vmem:[%s2507_s1 + $0xa4] ss:$8 sps:$4 sm:$0xff]  }
   0xe   :  { %v1749_v37 = vld [vmem:[%s2507_s1 + $0x294] ss:$8 sps:$4 sm:$0xff]   ;;  %v1752_v39 = vld [vmem:[%s2507_s1 + $0x290] ss:$8 sps:$4 sm:$0xff]   ;;  %v1755_v41 = vld [vmem:[%s2507_s1 + $0x2a4] ss:$8 sps:$4 sm:$0xff]  }
   0xf   :  { %1016 = vmatpush1.bf16.msra.mxu1 %v1715_v14  ;;  %v1757_v42 = vld [vmem:[%s2507_s1 + $0xa0] ss:$8 sps:$4 sm:$0xff]   ;;  %v1759_v44 = vld [vmem:[%s2507_s1 + $0xb4] ss:$8 sps:$4 sm:$0xff]   ;;  %v1763_v46 = vld [vmem:[%s2507_s1 + $0xb0] ss:$8 sps:$4 sm:$0xff]  }
  0x10   :  { %1122 = vmatpush1.bf16.msra.mxu0 %v1716_v15  ;;  %1017 = vmatprep.subr.bf16.mxu1 %v1717_v16  ;;  %v1758_v43 = vld [vmem:[%s2507_s1 + $0x2a0] ss:$8 sps:$4 sm:$0xff]   ;;  %v1761_v45 = vld [vmem:[%s2507_s1 + $0x2b4] ss:$8 sps:$4 sm:$0xff]   ;;  %v1764_v47 = vld [vmem:[%s2507_s1 + $0x2b0] ss:$8 sps:$4 sm:$0xff]  }
  0x11   :  { %1123 = vmatprep.subr.bf16.mxu0 %v1719_v17  ;;  %v1791_v48 = vld [vmem:[%s2508_s0 + $0x4] ss:$36 sps:$4 sm:$0xff]   ;;  %v1797_v51 = vld [vmem:[%s2508_s0 + $0x14] ss:$36 sps:$4 sm:$0xff]  }
  0x12   :  { %v1765_v49 = vld [vmem:[%s2507_s1 + $0xc4] ss:$8 sps:$4 sm:$0xff]   ;;  %1041 = vmatprep.mubr.bf16.mxu1 %v1791_v48  ;;  %v1769_v52 = vld [vmem:[%s2507_s1 + $0xc0] ss:$8 sps:$4 sm:$0xff]   ;;  %v1771_v54 = vld [vmem:[%s2507_s1 + $0xd4] ss:$8 sps:$4 sm:$0xff]   ;;  %1147 = vmatprep.mubr.bf16.mxu0 %v1797_v51 }
  0x13   :  { %1018 = vmatpush1.bf16.msra.mxu1 %v1721_v18  ;;  %v1767_v50 = vld [vmem:[%s2507_s1 + $0x2c4] ss:$8 sps:$4 sm:$0xff]   ;;  %v1770_v53 = vld [vmem:[%s2507_s1 + $0x2c0] ss:$8 sps:$4 sm:$0xff]   ;;  %v1773_v55 = vld [vmem:[%s2507_s1 + $0x2d4] ss:$8 sps:$4 sm:$0xff]  }
  0x14   :  { %1124 = vmatpush1.bf16.msra.mxu0 %v1722_v19  ;;  %1019 = vmatprep.subr.bf16.mxu1 %v1723_v20  ;;  %v1775_v56 = vld [vmem:[%s2507_s1 + $0xd0] ss:$8 sps:$4 sm:$0xff]   ;;  %v1777_v58 = vld [vmem:[%s2507_s1 + $0xe4] ss:$8 sps:$4 sm:$0xff]   ;;  %v1781_v60 = vld [vmem:[%s2507_s1 + $0xe0] ss:$8 sps:$4 sm:$0xff]  }
  0x15   :  { %1125 = vmatprep.subr.bf16.mxu0 %v1725_v21  ;;  %v1776_v57 = vld [vmem:[%s2507_s1 + $0x2d0] ss:$8 sps:$4 sm:$0xff]   ;;  %v1779_v59 = vld [vmem:[%s2507_s1 + $0x2e4] ss:$8 sps:$4 sm:$0xff]   ;;  %v1782_v61 = vld [vmem:[%s2507_s1 + $0x2e0] ss:$8 sps:$4 sm:$0xff]  }
  0x16   :  { %v1783_v62 = vld [vmem:[%s2507_s1 + $0xf4] ss:$8 sps:$4 sm:$0xff]   ;;  %v1787_v0 = vld [vmem:[%s2507_s1 + $0xf0] ss:$8 sps:$4 sm:$0xff]   ;;  %v1794_v2 = vld [vmem:[%s2507_s1 + $0x104] ss:$8 sps:$4 sm:$0xff]  }
  0x17   :  { %1020 = vmatpush1.bf16.msra.mxu1 %v1727_v22  ;;  %v1785_v63 = vld [vmem:[%s2507_s1 + $0x2f4] ss:$8 sps:$4 sm:$0xff]   ;;  %v1788_v1 = vld [vmem:[%s2507_s1 + $0x2f0] ss:$8 sps:$4 sm:$0xff]   ;;  %v1800_v3 = vld [vmem:[%s2507_s1 + $0x304] ss:$8 sps:$4 sm:$0xff]  }
  0x18   :  { %1126 = vmatpush1.bf16.msra.mxu0 %v1728_v23  ;;  %1021 = vmatprep.subr.bf16.mxu1 %v1729_v24  ;;  %v1789_v4 = vld [vmem:[%s2508_s0] ss:$36 sps:$4 sm:$0xff]   ;;  %v1795_v6 = vld [vmem:[%s2508_s0 + $0x10] ss:$36 sps:$4 sm:$0xff]  }
  0x19   :  { %1127 = vmatprep.subr.bf16.mxu0 %v1731_v25  ;;  %v1792_v5 = vld [vmem:[%s2507_s1 + $0x100] ss:$8 sps:$4 sm:$0xff]   ;;  %v1803_v8 = vld [vmem:[%s2507_s1 + $0x114] ss:$8 sps:$4 sm:$0xff]   ;;  %v1801_v10 = vld [vmem:[%s2507_s1 + $0x110] ss:$8 sps:$4 sm:$0xff]  }
  0x1a   :  { %v1798_v7 = vld [vmem:[%s2507_s1 + $0x300] ss:$8 sps:$4 sm:$0xff]   ;;  %v1806_v9 = vld [vmem:[%s2507_s1 + $0x314] ss:$8 sps:$4 sm:$0xff]   ;;  %v1804_v11 = vld [vmem:[%s2507_s1 + $0x310] ss:$8 sps:$4 sm:$0xff]  }
  0x1b   :  { %1022 = vmatpush1.bf16.msra.mxu1 %v1733_v26  ;;  %v1809_v12 = vld [vmem:[%s2507_s1 + $0x124] ss:$8 sps:$4 sm:$0xff]   ;;  %v1807_v14 = vld [vmem:[%s2507_s1 + $0x120] ss:$8 sps:$4 sm:$0xff]   ;;  %v1815_v16 = vld [vmem:[%s2507_s1 + $0x134] ss:$8 sps:$4 sm:$0xff]  }
  0x1c   :  { %1128 = vmatpush1.bf16.msra.mxu0 %v1734_v27  ;;  %1023 = vmatprep.subr.bf16.mxu1 %v1735_v28  ;;  %v1812_v13 = vld [vmem:[%s2507_s1 + $0x324] ss:$8 sps:$4 sm:$0xff]   ;;  %v1810_v15 = vld [vmem:[%s2507_s1 + $0x320] ss:$8 sps:$4 sm:$0xff]   ;;  %v1818_v17 = vld [vmem:[%s2507_s1 + $0x334] ss:$8 sps:$4 sm:$0xff]  }
  0x1d   :  { %1129 = vmatprep.subr.bf16.mxu0 %v1737_v29  ;;  %v1813_v18 = vld [vmem:[%s2507_s1 + $0x130] ss:$8 sps:$4 sm:$0xff]   ;;  %v1821_v20 = vld [vmem:[%s2507_s1 + $0x144] ss:$8 sps:$4 sm:$0xff]   ;;  %v1819_v22 = vld [vmem:[%s2507_s1 + $0x140] ss:$8 sps:$4 sm:$0xff]  }
  0x1e   :  { %v1816_v19 = vld [vmem:[%s2507_s1 + $0x330] ss:$8 sps:$4 sm:$0xff]   ;;  %v1824_v21 = vld [vmem:[%s2507_s1 + $0x344] ss:$8 sps:$4 sm:$0xff]   ;;  %v1822_v23 = vld [vmem:[%s2507_s1 + $0x340] ss:$8 sps:$4 sm:$0xff]  }
  0x1f   :  { %1024 = vmatpush1.bf16.msra.mxu1 %v1739_v30  ;;  %v1827_v24 = vld [vmem:[%s2507_s1 + $0x154] ss:$8 sps:$4 sm:$0xff]   ;;  %v1825_v26 = vld [vmem:[%s2507_s1 + $0x150] ss:$8 sps:$4 sm:$0xff]   ;;  %v1833_v28 = vld [vmem:[%s2507_s1 + $0x164] ss:$8 sps:$4 sm:$0xff]  }
  0x20   :  { %1130 = vmatpush1.bf16.msra.mxu0 %v1740_v31  ;;  %1025 = vmatprep.subr.bf16.mxu1 %v1741_v32  ;;  %v1830_v25 = vld [vmem:[%s2507_s1 + $0x354] ss:$8 sps:$4 sm:$0xff]   ;;  %v1828_v27 = vld [vmem:[%s2507_s1 + $0x350] ss:$8 sps:$4 sm:$0xff]   ;;  %v1883_v31 = vld [vmem:[%s2508_s0 + $0x48] ss:$36 sps:$4 sm:$0xff]  }
  0x21   :  { %1131 = vmatprep.subr.bf16.mxu0 %v1743_v33  ;;  %v1879_v29 = vld [vmem:[%s2508_s0 + $0x4c] ss:$36 sps:$4 sm:$0xff]   ;;  %v1881_v30 = vld [vmem:[%s2508_s0 + $0x5c] ss:$36 sps:$4 sm:$0xff]  }
  0x22   :  { %v1836_v32 = vld [vmem:[%s2507_s1 + $0x364] ss:$8 sps:$4 sm:$0xff]   ;;  %v1887_v33 = vld [vmem:[%s2508_s0 + $0x58] ss:$36 sps:$4 sm:$0xff]  }
  0x23   :  { %1026 = vmatpush1.bf16.msra.mxu1 %v1745_v34  ;;  %v1831_v34 = vld [vmem:[%s2507_s1 + $0x160] ss:$8 sps:$4 sm:$0xff]   ;;  %v1849_v48 = vld [vmem:[%s2507_s1 + $0x190] ss:$8 sps:$4 sm:$0xff]   ;;  %v1860_v51 = vld [vmem:[%s2507_s1 + $0x3a4] ss:$8 sps:$4 sm:$0xff]  }
  0x24   :  { %1132 = vmatpush1.bf16.msra.mxu0 %v1746_v35  ;;  %1027 = vmatprep.subr.bf16.mxu1 %v1747_v36  ;;  %v1834_v35 = vld [vmem:[%s2507_s1 + $0x360] ss:$8 sps:$4 sm:$0xff]   ;;  %v1839_v36 = vld [vmem:[%s2507_s1 + $0x174] ss:$8 sps:$4 sm:$0xff]  }
  0x25   :  { %1133 = vmatprep.subr.bf16.mxu0 %v1749_v37  ;;  %v1842_v37 = vld [vmem:[%s2507_s1 + $0x374] ss:$8 sps:$4 sm:$0xff]  }
  0x27   :  { %1028 = vmatpush1.bf16.msra.mxu1 %v1751_v38  ;;  %v1837_v38 = vld [vmem:[%s2507_s1 + $0x170] ss:$8 sps:$4 sm:$0xff]  }
  0x28   :  { %1134 = vmatpush1.bf16.msra.mxu0 %v1752_v39  ;;  %1029 = vmatprep.subr.bf16.mxu1 %v1753_v40  ;;  %v1840_v39 = vld [vmem:[%s2507_s1 + $0x370] ss:$8 sps:$4 sm:$0xff]   ;;  %v1845_v40 = vld [vmem:[%s2507_s1 + $0x184] ss:$8 sps:$4 sm:$0xff]  }
  0x29   :  { %1135 = vmatprep.subr.bf16.mxu0 %v1755_v41  ;;  %v1899_v41 = vld [vmem:[%s2508_s0 + $0xc] ss:$36 sps:$4 sm:$0xff]  }
  0x2b   :  { %1030 = vmatpush1.bf16.msra.mxu1 %v1757_v42  ;;  %v1848_v42 = vld [vmem:[%s2507_s1 + $0x384] ss:$8 sps:$4 sm:$0xff]  }
  0x2c   :  { %1136 = vmatpush1.bf16.msra.mxu0 %v1758_v43  ;;  %1031 = vmatprep.subr.bf16.mxu1 %v1759_v44  ;;  %v1902_v43 = vld [vmem:[%s2508_s0 + $0x1c] ss:$36 sps:$4 sm:$0xff]  }
  0x2d   :  { %1137 = vmatprep.subr.bf16.mxu0 %v1761_v45  ;;  %v1843_v44 = vld [vmem:[%s2507_s1 + $0x180] ss:$8 sps:$4 sm:$0xff]  }
  0x2e   :  { %v1846_v45 = vld [vmem:[%s2507_s1 + $0x380] ss:$8 sps:$4 sm:$0xff]  }
  0x2f   :  { %1032 = vmatpush1.bf16.msra.mxu1 %v1763_v46  ;;  %v1851_v46 = vld [vmem:[%s2507_s1 + $0x194] ss:$8 sps:$4 sm:$0xff]  }
  0x30   :  { %1138 = vmatpush1.bf16.msra.mxu0 %v1764_v47  ;;  %1033 = vmatprep.subr.bf16.mxu1 %v1765_v49  ;;  %v1854_v47 = vld [vmem:[%s2507_s1 + $0x394] ss:$8 sps:$4 sm:$0xff]   ;;  %v1852_v49 = vld [vmem:[%s2507_s1 + $0x390] ss:$8 sps:$4 sm:$0xff]  }
  0x31   :  { %1139 = vmatprep.subr.bf16.mxu0 %v1767_v50  ;;  %v1857_v50 = vld [vmem:[%s2507_s1 + $0x1a4] ss:$8 sps:$4 sm:$0xff]  }
  0x33   :  { %1034 = vmatpush1.bf16.msra.mxu1 %v1769_v52  ;;  %v1855_v52 = vld [vmem:[%s2507_s1 + $0x1a0] ss:$8 sps:$4 sm:$0xff]  }
  0x34   :  { %1140 = vmatpush1.bf16.msra.mxu0 %v1770_v53  ;;  %1035 = vmatprep.subr.bf16.mxu1 %v1771_v54  ;;  %v1858_v53 = vld [vmem:[%s2507_s1 + $0x3a0] ss:$8 sps:$4 sm:$0xff]   ;;  %v1863_v54 = vld [vmem:[%s2507_s1 + $0x1b4] ss:$8 sps:$4 sm:$0xff]  }
  0x35   :  { %1141 = vmatprep.subr.bf16.mxu0 %v1773_v55  ;;  %v1866_v55 = vld [vmem:[%s2507_s1 + $0x3b4] ss:$8 sps:$4 sm:$0xff]  }
  0x37   :  { %1036 = vmatpush1.bf16.msra.mxu1 %v1775_v56  ;;  %v1861_v56 = vld [vmem:[%s2507_s1 + $0x1b0] ss:$8 sps:$4 sm:$0xff]  }
  0x38   :  { %1142 = vmatpush1.bf16.msra.mxu0 %v1776_v57  ;;  %1037 = vmatprep.subr.bf16.mxu1 %v1777_v58  ;;  %v1864_v57 = vld [vmem:[%s2507_s1 + $0x3b0] ss:$8 sps:$4 sm:$0xff]   ;;  %v1869_v58 = vld [vmem:[%s2507_s1 + $0x1c4] ss:$8 sps:$4 sm:$0xff]  }
  0x39   :  { %1143 = vmatprep.subr.bf16.mxu0 %v1779_v59  ;;  %v1872_v59 = vld [vmem:[%s2507_s1 + $0x3c4] ss:$8 sps:$4 sm:$0xff]  }
  0x3b   :  { %1038 = vmatpush1.bf16.msra.mxu1 %v1781_v60  ;;  %v1867_v60 = vld [vmem:[%s2507_s1 + $0x1c0] ss:$8 sps:$4 sm:$0xff]  }
  0x3c   :  { %1144 = vmatpush1.bf16.msra.mxu0 %v1782_v61  ;;  %1039 = vmatprep.subr.bf16.mxu1 %v1783_v62  ;;  %v1870_v61 = vld [vmem:[%s2507_s1 + $0x3c0] ss:$8 sps:$4 sm:$0xff]   ;;  %v1875_v62 = vld [vmem:[%s2507_s1 + $0x1d4] ss:$8 sps:$4 sm:$0xff]  }
  0x3d   :  { %1145 = vmatprep.subr.bf16.mxu0 %v1785_v63  ;;  %v1878_v63 = vld [vmem:[%s2507_s1 + $0x3d4] ss:$8 sps:$4 sm:$0xff]  }
  0x3f   :  { %1040 = vmatpush1.bf16.msra.mxu1 %v1787_v0  ;;  %v1873_v0 = vld [vmem:[%s2507_s1 + $0x1d0] ss:$8 sps:$4 sm:$0xff]  }
  0x40   :  { %1146 = vmatpush1.bf16.msra.mxu0 %v1788_v1  ;;  %1062 = vmatprep.subr.bf16.mxu1 %v1794_v2  ;;  %v1876_v1 = vld [vmem:[%s2507_s1 + $0x3d0] ss:$8 sps:$4 sm:$0xff]   ;;  %v1886_v2 = vld [vmem:[%s2507_s1 + $0x1e4] ss:$8 sps:$4 sm:$0xff]  }
  0x41   :  { %1168 = vmatprep.subr.bf16.mxu0 %v1800_v3  ;;  %v1890_v3 = vld [vmem:[%s2507_s1 + $0x3e4] ss:$8 sps:$4 sm:$0xff]  }
  0x42   :  { %1042 = vmatmul.mubr.bf16.vlgmr.msra.gmra.mrb[0].mxu1 %v1789_v4  ;;  %v1884_v4 = vld [vmem:[%s2507_s1 + $0x1e0] ss:$8 sps:$4 sm:$0xff]  }
  0x43   :  { %1148 = vmatmul.mubr.bf16.vlgmr.msra.gmra.mrb[0].mxu0 %v1795_v6  ;;  %1063 = vmatpush1.bf16.msra.mxu1 %v1792_v5  ;;  %v1888_v5 = vld [vmem:[%s2507_s1 + $0x3e0] ss:$8 sps:$4 sm:$0xff]   ;;  %v1893_v6 = vld [vmem:[%s2507_s1 + $0x1f4] ss:$8 sps:$4 sm:$0xff]  }
  0x44   :  { %1169 = vmatpush1.bf16.msra.mxu0 %v1798_v7  ;;  %1064 = vmatprep.subr.bf16.mxu1 %v1803_v8  ;;  %v1896_v7 = vld [vmem:[%s2507_s1 + $0x3f4] ss:$8 sps:$4 sm:$0xff]   ;;  %v1891_v8 = vld [vmem:[%s2507_s1 + $0x1f0] ss:$8 sps:$4 sm:$0xff]  }
  0x45   :  { %1170 = vmatprep.subr.bf16.mxu0 %v1806_v9  ;;  %1051 = vmatprep.mubr.bf16.mxu1 %v1879_v29  ;;  %v1894_v9 = vld [vmem:[%s2507_s1 + $0x3f0] ss:$8 sps:$4 sm:$0xff]   ;;  %v1929_v29 = vld [vmem:[%s2507_s1 + $0x464] ss:$8 sps:$4 sm:$0xff]  }
  0x46   :  { %1157 = vmatprep.mubr.bf16.mxu0 %v1881_v30  ;;  %v1927_v30 = vld [vmem:[%s2507_s1 + $0x460] ss:$8 sps:$4 sm:$0xff]  }
  0x47   :  { %1065 = vmatpush1.bf16.msra.mxu1 %v1801_v10  ;;  %v1905_v10 = vld [vmem:[%s2507_s1 + $0x404] ss:$8 sps:$4 sm:$0xff]  }
  0x48   :  { %1171 = vmatpush1.bf16.msra.mxu0 %v1804_v11  ;;  %1066 = vmatprep.subr.bf16.mxu1 %v1809_v12  ;;  %v1897_v11 = vld [vmem:[%s2508_s0 + $0x8] ss:$36 sps:$4 sm:$0xff]   ;;  %v1900_v12 = vld [vmem:[%s2508_s0 + $0x18] ss:$36 sps:$4 sm:$0xff]  }
  0x49   :  { %1172 = vmatprep.subr.bf16.mxu0 %v1812_v13  ;;  %v1903_v13 = vld [vmem:[%s2507_s1 + $0x400] ss:$8 sps:$4 sm:$0xff]  }
  0x4a   :  { %1052 = vmatmul.mubr.bf16.gmra.mrb[4].mxu1 %v1883_v31  ;;  %v1932_v31 = vld [vmem:[%s2507_s1 + $0x474] ss:$8 sps:$4 sm:$0xff]  }
  0x4b   :  { %1067 = vmatpush1.bf16.msra.mxu1 %v1807_v14  ;;  %1158 = vmatmul.mubr.bf16.gmra.mrb[4].mxu0 %v1887_v33  ;;  %v1908_v14 = vld [vmem:[%s2507_s1 + $0x414] ss:$8 sps:$4 sm:$0xff]   ;;  %v1933_v33 = vld [vmem:[%s2508_s0 + $0x20] ss:$36 sps:$4 sm:$0xff]  }
  0x4c   :  { %1173 = vmatpush1.bf16.msra.mxu0 %v1810_v15  ;;  %1068 = vmatprep.subr.bf16.mxu1 %v1815_v16  ;;  %v1909_v15 = vld [vmem:[%s2508_s0 + $0x54] ss:$36 sps:$4 sm:$0xff]   ;;  %v1911_v16 = vld [vmem:[%s2508_s0 + $0x64] ss:$36 sps:$4 sm:$0xff]  }
  0x4d   :  { %1174 = vmatprep.subr.bf16.mxu0 %v1818_v17  ;;  %1094 = vmatprep.mubr.bf16.mxu1 %v1899_v41  ;;  %v1906_v17 = vld [vmem:[%s2507_s1 + $0x410] ss:$8 sps:$4 sm:$0xff]  }
  0x4e   :  { %1200 = vmatprep.mubr.bf16.mxu0 %v1902_v43 }
  0x4f   :  { %1069 = vmatpush1.bf16.msra.mxu1 %v1813_v18  ;;  %v1917_v18 = vld [vmem:[%s2507_s1 + $0x424] ss:$8 sps:$4 sm:$0xff]  }
  0x50   :  { %1175 = vmatpush1.bf16.msra.mxu0 %v1816_v19  ;;  %1070 = vmatprep.subr.bf16.mxu1 %v1821_v20  ;;  %v1913_v19 = vld [vmem:[%s2508_s0 + $0x50] ss:$36 sps:$4 sm:$0xff]   ;;  %v1914_v20 = vld [vmem:[%s2508_s0 + $0x60] ss:$36 sps:$4 sm:$0xff]  }
  0x51   :  { %1176 = vmatprep.subr.bf16.mxu0 %v1824_v21  ;;  %v1915_v21 = vld [vmem:[%s2507_s1 + $0x420] ss:$8 sps:$4 sm:$0xff]  }
  0x53   :  { %1071 = vmatpush1.bf16.msra.mxu1 %v1819_v22  ;;  %v1920_v22 = vld [vmem:[%s2507_s1 + $0x434] ss:$8 sps:$4 sm:$0xff]  }
  0x54   :  { %1177 = vmatpush1.bf16.msra.mxu0 %v1822_v23  ;;  %1072 = vmatprep.subr.bf16.mxu1 %v1827_v24  ;;  %v1918_v23 = vld [vmem:[%s2507_s1 + $0x430] ss:$8 sps:$4 sm:$0xff]   ;;  %v1923_v24 = vld [vmem:[%s2507_s1 + $0x444] ss:$8 sps:$4 sm:$0xff]  }
  0x55   :  { %1178 = vmatprep.subr.bf16.mxu0 %v1830_v25  ;;  %v1937_v25 = vmov 0  }
  0x57   :  { %1073 = vmatpush1.bf16.msra.mxu1 %v1825_v26  ;;  %v1921_v26 = vld [vmem:[%s2507_s1 + $0x440] ss:$8 sps:$4 sm:$0xff]  }
  0x58   :  { %1179 = vmatpush1.bf16.msra.mxu0 %v1828_v27  ;;  %1074 = vmatprep.subr.bf16.mxu1 %v1833_v28  ;;  %v1926_v27 = vld [vmem:[%s2507_s1 + $0x454] ss:$8 sps:$4 sm:$0xff]   ;;  %v1924_v28 = vld [vmem:[%s2507_s1 + $0x450] ss:$8 sps:$4 sm:$0xff]  }
  0x59   :  { %1180 = vmatprep.subr.bf16.mxu0 %v1836_v32  ;;  %v1930_v32 = vld [vmem:[%s2507_s1 + $0x470] ss:$8 sps:$4 sm:$0xff]  }
  0x5b   :  { %1075 = vmatpush1.bf16.msra.mxu1 %v1831_v34  ;;  %v1934_v34 = vld [vmem:[%s2508_s0 + $0x68] ss:$36 sps:$4 sm:$0xff]   ;;  %s1938_s0 = smov 64  }
  0x5c   :  { %1181 = vmatpush1.bf16.msra.mxu0 %v1834_v35  ;;  %1076 = vmatprep.subr.bf16.mxu1 %v1839_v36  ;;  %v187_v35 = vlaneseq }
  0x5d   :  { %1182 = vmatprep.subr.bf16.mxu0 %v1842_v37 }
  0x5e   :  { %v188_v36 = vshrl.u32 %v187_v35, 7 }
  0x5f   :  { %1077 = vmatpush1.bf16.msra.mxu1 %v1837_v38 }
  0x60   :  { %1183 = vmatpush1.bf16.msra.mxu0 %v1840_v39  ;;  %1078 = vmatprep.subr.bf16.mxu1 %v1845_v40  ;;  %v2455_v40 = vsub.s32 0, %v188_v36  ;;  %v193_v43 = vsub.s32 1, %v188_v36 }
  0x61   :  { %1184 = vmatprep.subr.bf16.mxu0 %v1848_v42  ;;  %v185_v42 = vld [vmem:[%s2509_s2] sm:$0x3] }
  0x63   :  { %1079 = vmatpush1.bf16.msra.mxu1 %v1843_v44  ;;  %v190_v44 = vrot.slane %v185_v42, %v2455_v40 }
  0x64   :  { %1185 = vmatpush1.bf16.msra.mxu0 %v1846_v45  ;;  %1080 = vmatprep.subr.bf16.mxu1 %v1851_v46  ;;  %v194_v45 = vrot.slane %v185_v42, %v193_v43 }
  0x65   :  { %1186 = vmatprep.subr.bf16.mxu0 %v1854_v47 }
  0x67   :  { %1081 = vmatpush1.bf16.msra.mxu1 %v1849_v48 }
  0x68   :  { %1187 = vmatpush1.bf16.msra.mxu0 %v1852_v49  ;;  %1082 = vmatprep.subr.bf16.mxu1 %v1857_v50 }
  0x69   :  { %1188 = vmatprep.subr.bf16.mxu0 %v1860_v51 }
  0x6b   :  { %1083 = vmatpush1.bf16.msra.mxu1 %v1855_v52 }
  0x6c   :  { %1189 = vmatpush1.bf16.msra.mxu0 %v1858_v53  ;;  %1084 = vmatprep.subr.bf16.mxu1 %v1863_v54 }
  0x6d   :  { %1190 = vmatprep.subr.bf16.mxu0 %v1866_v55 }
  0x6f   :  { %1085 = vmatpush1.bf16.msra.mxu1 %v1861_v56 }
  0x70   :  { %1191 = vmatpush1.bf16.msra.mxu0 %v1864_v57  ;;  %1086 = vmatprep.subr.bf16.mxu1 %v1869_v58 }
  0x71   :  { %1192 = vmatprep.subr.bf16.mxu0 %v1872_v59 }
  0x73   :  { %1087 = vmatpush1.bf16.msra.mxu1 %v1867_v60 }
  0x74   :  { %1193 = vmatpush1.bf16.msra.mxu0 %v1870_v61  ;;  %1088 = vmatprep.subr.bf16.mxu1 %v1875_v62 }
  0x75   :  { %1194 = vmatprep.subr.bf16.mxu0 %v1878_v63 }
  0x77   :  { %1089 = vmatpush1.bf16.msra.mxu1 %v1873_v0 }
  0x78   :  { %1195 = vmatpush1.bf16.msra.mxu0 %v1876_v1  ;;  %1090 = vmatprep.subr.bf16.mxu1 %v1886_v2 }
  0x79   :  { %1196 = vmatprep.subr.bf16.mxu0 %v1890_v3 }
  0x7b   :  { %1091 = vmatpush1.bf16.msra.mxu1 %v1884_v4 }
  0x7c   :  { %1197 = vmatpush1.bf16.msra.mxu0 %v1888_v5  ;;  %1092 = vmatprep.subr.bf16.mxu1 %v1893_v6 }
  0x7d   :  { %1198 = vmatprep.subr.bf16.mxu0 %v1896_v7 }
  0x7f   :  { %1093 = vmatpush1.bf16.msra.mxu1 %v1891_v8 }
  0x80   :  { %1199 = vmatpush1.bf16.msra.mxu0 %v1894_v9  ;;  %1635 = vmatprep.subr.bf16.mxu1 %v1905_v10 }
  0x81   :  { %1221 = vmatprep.subr.bf16.mxu0 %v1905_v10 }
  0x82   :  { %1095 = vmatmul.mubr.bf16.vlgmr.msra.gmra.mrb[0].mxu1 %v1897_v11 }
  0x83   :  { %1201 = vmatmul.mubr.bf16.vlgmr.msra.gmra.mrb[0].mxu0 %v1900_v12  ;;  %1643 = vmatpush1.bf16.msra.mxu1 %v1903_v13 }
  0x84   :  { %1222 = vmatpush1.bf16.msra.mxu0 %v1903_v13  ;;  %1636 = vmatprep.subr.bf16.mxu1 %v1908_v14 }
  0x85   :  { %1223 = vmatprep.subr.bf16.mxu0 %v1908_v14  ;;  %1104 = vmatprep.mubr.bf16.mxu1 %v1909_v15 }
  0x86   :  { %1210 = vmatprep.mubr.bf16.mxu0 %v1911_v16 }
  0x87   :  { %1644 = vmatpush1.bf16.msra.mxu1 %v1906_v17 }
  0x88   :  { %1224 = vmatpush1.bf16.msra.mxu0 %v1906_v17  ;;  %1637 = vmatprep.subr.bf16.mxu1 %v1917_v18 }
  0x89   :  { %1225 = vmatprep.subr.bf16.mxu0 %v1917_v18 }
  0x8a   :  { %1105 = vmatmul.mubr.bf16.gmra.mrb[4].mxu1 %v1913_v19 }
  0x8b   :  { %1211 = vmatmul.mubr.bf16.gmra.mrb[4].mxu0 %v1914_v20  ;;  %1645 = vmatpush1.bf16.msra.mxu1 %v1915_v21 }
  0x8c   :  { %1226 = vmatpush1.bf16.msra.mxu0 %v1915_v21  ;;  %1638 = vmatprep.subr.bf16.mxu1 %v1920_v22 }
  0x8d   :  { %1227 = vmatprep.subr.bf16.mxu0 %v1920_v22  ;;  %1253 = vmatprep.mubr.bf16.mxu0 %v1937_v25 }
  0x8e   :  { %1263 = vmatprep.mubr.bf16.mxu1 %v1937_v25 }
  0x8f   :  { %1646 = vmatpush1.bf16.msra.mxu1 %v1918_v23 }
  0x90   :  { %1228 = vmatpush1.bf16.msra.mxu0 %v1918_v23  ;;  %1639 = vmatprep.subr.bf16.mxu1 %v1923_v24 }
  0x91   :  { %1229 = vmatprep.subr.bf16.mxu0 %v1923_v24 }
  0x93   :  { %1647 = vmatpush1.bf16.msra.mxu1 %v1921_v26 }
  0x94   :  { %1230 = vmatpush1.bf16.msra.mxu0 %v1921_v26  ;;  %1640 = vmatprep.subr.bf16.mxu1 %v1926_v27 }
  0x95   :  { %1231 = vmatprep.subr.bf16.mxu0 %v1926_v27 }
  0x97   :  { %1648 = vmatpush1.bf16.msra.mxu1 %v1924_v28 }
  0x98   :  { %1232 = vmatpush1.bf16.msra.mxu0 %v1924_v28  ;;  %1641 = vmatprep.subr.bf16.mxu1 %v1929_v29 }
  0x99   :  { %1233 = vmatprep.subr.bf16.mxu0 %v1929_v29 }
  0x9b   :  { %1649 = vmatpush1.bf16.msra.mxu1 %v1927_v30 }
  0x9c   :  { %1234 = vmatpush1.bf16.msra.mxu0 %v1927_v30  ;;  %1642 = vmatprep.subr.bf16.mxu1 %v1932_v31 }
  0x9d   :  { %1235 = vmatprep.subr.bf16.mxu0 %v1932_v31 }
  0x9f   :  { %1650 = vmatpush1.bf16.msra.mxu1 %v1930_v32 }
  0xa0   :  { %1236 = vmatpush1.bf16.msra.mxu0 %v1930_v32 }
  0xa2   :  { %1264 = vmatmul.mubr.bf16.vlgmr.msra.gmra.mrb[8].mxu1 %v1934_v34 }
  0xa3   :  { %1254 = vmatmul.mubr.bf16.vlgmr.msra.gmra.mrb[0].mxu0 %v1933_v33 }
 0x155   :  { %v1096_v37 = vpop.f32.mrb[0].mxu1 }
 0x156   :  { %v1098_v38 = vpop.f32.mrb[1].mxu1  ;;  %v1651_v62 = vadd.f32 %v1096_v37, %v190_v44 }
 0x157   :  { %v1100_v39 = vpop.f32.mrb[2].mxu1  ;;  %v1653_v63 = vadd.f32 %v1098_v38, %v194_v45 }
 0x158   :  { %v1102_v41 = vpop.f32.mrb[3].mxu1  ;;  %v1655_v2 = vadd.f32 %v1100_v39, %v190_v44 }
 0x159   :  { %v1657_v7 = vadd.f32 %v1102_v41, %v194_v45 }
 0x15d   :  { %v1106_v46 = vpop.f32.mrb[4].mxu1 }
 0x15e   :  { %v1212_v47 = vpop.f32.mrb[4].mxu0  ;;  %v1659_v48 = vadd.f32 %v1106_v46, %v190_v44  ;;  %v1108_v49 = vpop.f32.mrb[5].mxu1 }
 0x15f   :  { %v1214_v50 = vpop.f32.mrb[5].mxu0  ;;  %v1662_v51 = vadd.f32 %v1108_v49, %v194_v45  ;;  %v1110_v52 = vpop.f32.mrb[6].mxu1 }
 0x160   :  { %v1216_v53 = vpop.f32.mrb[6].mxu0  ;;  %v1660_v54 = vadd.f32 %v1659_v48, %v1212_v47  ;;  %v1665_v55 = vadd.f32 %v1110_v52, %v190_v44  ;;  %v1112_v56 = vpop.f32.mrb[7].mxu1 }
 0x161   :  { %v1218_v57 = vpop.f32.mrb[7].mxu0  ;;  %v1663_v58 = vadd.f32 %v1662_v51, %v1214_v50  ;;  %v1668_v59 = vadd.f32 %v1112_v56, %v194_v45 }
 0x162   :  { %v1666_v60 = vadd.f32 %v1665_v55, %v1216_v53 }
 0x163   :  { %v1669_v61 = vadd.f32 %v1668_v59, %v1218_v57 }
 0x175   :  { %v1265_v1 = vpop.f32.mrb[8].mxu1 }
 0x176   :  { %v1255_v0 = vpop.f32.mrb[0].mxu0  ;;  %v1661_v4 = vadd.f32 %v1660_v54, %v1265_v1  ;;  %v1267_v6 = vpop.f32.mrb[9].mxu1 }
 0x177   :  { %v1652_v3 = vadd.f32 %v1651_v62, %v1255_v0  ;;  %v1257_v5 = vpop.f32.mrb[1].mxu0  ;;  %v1664_v9 = vadd.f32 %v1663_v58, %v1267_v6  ;;  %v1269_v11 = vpop.f32.mrb[10].mxu1 }
 0x178   :  { %v1654_v8 = vadd.f32 %v1653_v63, %v1257_v5  ;;  %v1259_v10 = vpop.f32.mrb[2].mxu0  ;;  %v1667_v13 = vadd.f32 %v1666_v60, %v1269_v11  ;;  %v1271_v15 = vpop.f32.mrb[11].mxu1 }
 0x179   :  { %v1656_v12 = vadd.f32 %v1655_v2, %v1259_v10  ;;  %v1261_v14 = vpop.f32.mrb[3].mxu0  ;;  %v1670_v17 = vadd.f32 %v1669_v61, %v1271_v15 }
 0x17a   :  { %v1658_v16 = vadd.f32 %v1657_v7, %v1261_v14 }
 0x17b   :  { %v1274_v18 = vadd.f32 %v1656_v12, %v1652_v3 }
 0x17c   :  { %v1283_v19 = vadd.f32 %v1658_v16, %v1654_v8 }
 0x17d   :  { %v1275_v20 = vadd.f32 %v1661_v4, %v1274_v18 }
 0x17e   :  { %v1284_v21 = vadd.f32 %v1664_v9, %v1283_v19 }
 0x17f   :  { %v1276_v22 = vadd.f32 %v1667_v13, %v1275_v20 }
 0x180   :  { %v1285_v23 = vadd.f32 %v1670_v17, %v1284_v21 }
 0x181   :  { %v1277_v24 = vrot.slane %v1276_v22, 4 }
 0x182   :  { %v1286_v25 = vrot.slane %v1285_v23, 4 }
 0x183   :  { %v1278_v26 = vadd.f32 %v1277_v24, %v1276_v22 }
 0x184   :  { %v1287_v27 = vadd.f32 %v1286_v25, %v1285_v23  ;;  %v1362_v25 = vld [vmem:[%s2511_s3] sm:$0x1] }
 0x185   :  { %v1279_v28 = vrot.slane %v1278_v26, 2 }
 0x186   :  { %v1288_v29 = vrot.slane %v1287_v27, 2 }
 0x187   :  { %v1280_v30 = vadd.f32 %v1279_v28, %v1278_v26 }
 0x188   :  { %v1289_v31 = vadd.f32 %v1288_v29, %v1287_v27 }
 0x189   :  { %v1281_v32 = vrot.slane %v1280_v30, 1 }
 0x18a   :  { %v1290_v34 = vrot.slane %v1289_v31, 1 }
 0x18b   :  { %v1282_v33 = vadd.f32 %v1281_v32, %v1280_v30 }
 0x18c   :  { %v1291_v35 = vadd.f32 %v1290_v34, %v1289_v31 }
 0x18d   :  { %1294 = vrot.lane.b32.xlu0 %v1282_v33, %s1938_s0 }
 0x191   :  { %1300 = vrot.lane.b32.xlu0 %v1291_v35, %s1938_s0 }
 0x1ff   :  { %v1295_v36 = vpop.permute.xlu0 %1294 }
 0x200   :  { %v1297_v37 = vadd.f32 %v1295_v36, %v1282_v33 }
 0x202   :  { %v1298_v38 = vadd.f32 %v1297_v37, %v1291_v35 }
 0x203   :  { %v1301_v39 = vpop.permute.xlu0 %1300 }
 0x204   :  { %v1303_v41 = vadd.f32 %v1301_v39, %v1298_v38 }
 0x206   :  { %v1304_v42 = vmul.f32 0.0078125, %v1303_v41 }
 0x208   :  { %1306 = vrot.lane.b32.xlu1 %v1304_v42, %s1938_s0 }
 0x27a   :  { %v1307_v43 = vpop.permute.xlu1 %1306 }
 0x27b   :  { %v1310_v44 = vsel %vm1309_vm0, %v1304_v42, %v1307_v43 }
 0x27c   :  { %v1314_v45 = vrot.slane %v1310_v44, %v2455_v40 }
 0x27e   :  { %v1316_v46 = vsub.f32 %v1654_v8, %v1314_v45  ;;  %v1318_v47 = vsub.f32 %v1658_v16, %v1314_v45  ;;  %v2466_v48 = vsub.f32 %v1664_v9, %v1314_v45  ;;  %v1315_v49 = vsub.f32 %v1652_v3, %v1314_v45  ;;  %v1387_v16 = vld [vmem:[%s2510_s4] sm:$0x1] }
 0x27f   :  { %v1317_v50 = vsub.f32 %v1656_v12, %v1314_v45  ;;  %v1319_v51 = vsub.f32 %v1661_v4, %v1314_v45  ;;  %v1322_v52 = vsub.f32 %v1670_v17, %v1314_v45  ;;  %v1321_v55 = vsub.f32 %v1667_v13, %v1314_v45 }
 0x280   :  { %v1324_v53 = vmul.f32 %v1316_v46, %v1316_v46  ;;  %v1326_v54 = vmul.f32 %v1318_v47, %v1318_v47  ;;  %v1323_v56 = vmul.f32 %v1315_v49, %v1315_v49  ;;  %v1328_v58 = vmul.f32 %v2466_v48, %v2466_v48 }
 0x281   :  { %v1325_v57 = vmul.f32 %v1317_v50, %v1317_v50  ;;  %v1327_v60 = vmul.f32 %v1319_v51, %v1319_v51  ;;  %v1330_v62 = vmul.f32 %v1322_v52, %v1322_v52  ;;  %v1329_v0 = vmul.f32 %v1321_v55, %v1321_v55 }
 0x282   :  { %v1340_v59 = vadd.f32 %v1326_v54, %v1324_v53  ;;  %v1392_v17 = vrot.slane %v1387_v16, %v2455_v40 }
 0x283   :  { %v1331_v61 = vadd.f32 %v1325_v57, %v1323_v56 }
 0x284   :  { %v1341_v63 = vadd.f32 %v1340_v59, %v1328_v58 }
 0x285   :  { %v1332_v1 = vadd.f32 %v1331_v61, %v1327_v60 }
 0x286   :  { %v1342_v2 = vadd.f32 %v1341_v63, %v1330_v62 }
 0x287   :  { %v1333_v3 = vadd.f32 %v1332_v1, %v1329_v0 }
 0x288   :  { %v1343_v5 = vrot.slane %v1342_v2, 4 }
 0x289   :  { %v1334_v4 = vrot.slane %v1333_v3, 4 }
 0x28a   :  { %v1344_v6 = vadd.f32 %v1343_v5, %v1342_v2 }
 0x28b   :  { %v1335_v7 = vadd.f32 %v1334_v4, %v1333_v3 }
 0x28c   :  { %v1345_v8 = vrot.slane %v1344_v6, 2 }
 0x28d   :  { %v1336_v9 = vrot.slane %v1335_v7, 2 }
 0x28e   :  { %v1346_v10 = vadd.f32 %v1345_v8, %v1344_v6 }
 0x28f   :  { %v1337_v11 = vadd.f32 %v1336_v9, %v1335_v7 }
 0x290   :  { %v1347_v12 = vrot.slane %v1346_v10, 1 }
 0x291   :  { %v1338_v13 = vrot.slane %v1337_v11, 1 }
 0x292   :  { %v1348_v14 = vadd.f32 %v1347_v12, %v1346_v10 }
 0x293   :  { %v1339_v15 = vadd.f32 %v1338_v13, %v1337_v11 }
 0x294   :  { %1357 = vrot.lane.b32.xlu0 %v1348_v14, %s1938_s0 }
 0x295   :  { %1351 = vrot.lane.b32.xlu1 %v1339_v15, %s1938_s0 }
 0x298   :  { %1393 = vrot.lane.b32.xlu0 %v1392_v17, %s1938_s0 }
 0x306   :  { %v1358_v21 = vpop.permute.xlu0 %1357 }
 0x307   :  { %v1352_v18 = vpop.permute.xlu1 %1351 }
 0x308   :  { %v1354_v19 = vadd.f32 %v1352_v18, %v1339_v15 }
 0x30a   :  { %v1355_v20 = vadd.f32 %v1354_v19, %v1348_v14  ;;  %v1394_v29 = vpop.permute.xlu0 %1393 }
 0x30b   :  { %v1396_v30 = vsel %vm1309_vm0, %v1387_v16, %v1394_v29 }
 0x30c   :  { %v1360_v22 = vadd.f32 %v1358_v21, %v1355_v20  ;;  %v1400_v34 = vrot.slane %v1396_v30, %v2455_v40 }
 0x30e   :  { %v1361_v23 = vmul.f32 0.0078125, %v1360_v22 }
 0x310   :  { %v1363_v24 = vadd.f32 1e-05, %v1361_v23 }
 0x312   :  { %1935 = vrsqrt.f32 %v1363_v24 }
 0x31c   :  { %v1936_v26 = vpop.eup %1935 }
 0x31d   :  { %v1365_v27 = vmul.f32 %v1936_v26, %v1362_v25 }
 0x31f   :  { %v1370_v28 = vrot.slane %v1365_v27, %v2455_v40 }
 0x321   :  { %1371 = vrot.lane.b32.xlu1 %v1370_v28, %s1938_s0 }
 0x393   :  { %v1372_v31 = vpop.permute.xlu1 %1371 }
 0x394   :  { %v1374_v32 = vsel %vm1309_vm0, %v1365_v27, %v1372_v31 }
 0x395   :  { %v1378_v33 = vrot.slane %v1374_v32, %v2455_v40 }
 0x397   :  { %v1379_v35 = vmul.f32 %v1378_v33, %v1315_v49  ;;  %v1380_v36 = vmul.f32 %v1378_v33, %v1316_v46  ;;  %v1381_v37 = vmul.f32 %v1378_v33, %v1317_v50  ;;  %v1382_v38 = vmul.f32 %v1378_v33, %v1318_v47 }
 0x398   :  { %v1383_v39 = vmul.f32 %v1378_v33, %v1319_v51  ;;  %v1384_v41 = vmul.f32 %v1378_v33, %v2466_v48  ;;  %v1385_v42 = vmul.f32 %v1378_v33, %v1321_v55  ;;  %v1386_v43 = vmul.f32 %v1378_v33, %v1322_v52 }
 0x399   :  { %v1401_v44 = vadd.f32 %v1400_v34, %v1379_v35  ;;  %v1402_v45 = vadd.f32 %v1400_v34, %v1380_v36  ;;  %v1403_v53 = vadd.f32 %v1400_v34, %v1381_v37  ;;  %v1404_v54 = vadd.f32 %v1400_v34, %v1382_v38 }
 0x39a   :  { %v1405_v56 = vadd.f32 %v1400_v34, %v1383_v39  ;;  %v1406_v57 = vadd.f32 %v1400_v34, %v1384_v41  ;;  %v1407_v58 = vadd.f32 %v1400_v34, %v1385_v42  ;;  %v1408_v59 = vadd.f32 %v1400_v34, %v1386_v43 }
 0x39b   :  { %vm1409_vm1 = vcmp.ge.f32.partialorder %v1401_v44, 0.0  ;;  %vm1410_vm2 = vcmp.ge.f32.partialorder %v1402_v45, 0.0  ;;  %vm1411_vm3 = vcmp.ge.f32.partialorder %v1403_v53, 0.0  ;;  %vm1412_vm4 = vcmp.ge.f32.partialorder %v1404_v54, 0.0 }
 0x39c   :  { %vm1413_vm5 = vcmp.ge.f32.partialorder %v1405_v56, 0.0  ;;  %vm1414_vm6 = vcmp.ge.f32.partialorder %v1406_v57, 0.0  ;;  %vm1415_vm7 = vcmp.ge.f32.partialorder %v1407_v58, 0.0  ;;  %vm1416_vm8 = vcmp.ge.f32.partialorder %v1408_v59, 0.0 }
 0x39d   :  { %v1417_v40 = vmul.f32 0.2, %v1401_v44  ;;  %v1418_v46 = vmul.f32 0.2, %v1402_v45  ;;  %v1419_v47 = vmul.f32 0.2, %v1403_v53 }
 0x39e   :  { %v1420_v48 = vmul.f32 0.2, %v1404_v54  ;;  %v1421_v49 = vmul.f32 0.2, %v1405_v56  ;;  %v1422_v50 = vmul.f32 0.2, %v1406_v57 }
 0x39f   :  { %v1423_v51 = vmul.f32 0.2, %v1407_v58  ;;  %v1424_v52 = vmul.f32 0.2, %v1408_v59  ;;  %v1425_v55 = vsel %vm1409_vm1, %v1401_v44, %v1417_v40  ;;  %v1426_v60 = vsel %vm1410_vm2, %v1402_v45, %v1418_v46 }
 0x3a0   :  { %v1427_v61 = vsel %vm1411_vm3, %v1403_v53, %v1419_v47  ;;  %v1428_v62 = vsel %vm1412_vm4, %v1404_v54, %v1420_v48  ;;  %v1429_v63 = vsel %vm1413_vm5, %v1405_v56, %v1421_v49  ;;  %v1430_v0 = vsel %vm1414_vm6, %v1406_v57, %v1422_v50 }
 0x3a1   :  { %v1431_v1 = vsel %vm1415_vm7, %v1407_v58, %v1423_v51  ;;  %v1432_v2 = vsel %vm1416_vm8, %v1408_v59, %v1424_v52  ;;  %v1631_v3 = vpack.c.bf16 %v1426_v60, %v1425_v55  ;;  %v1632_v5 = vpack.c.bf16 %v1428_v62, %v1427_v61 }
 0x3a2   :  { %v1633_v4 = vpack.c.bf16 %v1430_v0, %v1429_v63  ;;  %v1634_v6 = vpack.c.bf16 %v1432_v2, %v1431_v1 }
 0x3a3   :  { %1457 = vst [vmem:[%s2512_s5] sm:$0xff] %v1631_v3  ;;  %1458 = vst [vmem:[%s2512_s5 + $0x8] sm:$0xff] %v1632_v5 }
 0x3a4   :  { %1459 = vst [vmem:[%s2512_s5 + $0x10] sm:$0xff] %v1633_v4  ;;  %1460 = vst [vmem:[%s2512_s5 + $0x18] sm:$0xff] %v1634_v6 }

// kernel: my_autoencoder_forward.12
= control target key start
LH: loop header
LB: loop body
LE: loop exit
PB: predicated region body
PF: predicated region fallthrough
CT: control target
= control target key end

     0   :  { %s7837_s1 = inlined_call_operand.vmem [shape: bf16[2304,512], index: 1, kind: input, shape index: {}]   ;;  %s7838_s0 = inlined_call_operand.vmem [shape: bf16[8,2304], index: 0, kind: input, shape index: {}]   ;;  %s7839_s2 = inlined_call_operand.vmem [shape: f32[1,512], index: 2, kind: input, shape index: {}]   ;;  %s7840_s3 = inlined_call_operand.vmem [shape: f32[1,128], index: 3, kind: input, shape index: {}]   ;;  %s7841_s4 = inlined_call_operand.vmem [shape: f32[1,128], index: 4, kind: input, shape index: {}]   ;;  %s7842_s5 = inlined_call_operand.vmem [shape: bf16[8,512], index: 5, kind: output, shape index: {}]  }
   0x1   :  { %v5100_v0 = vld [vmem:[%s7837_s1 + $0x4] ss:$16 sps:$4 sm:$0xff]   ;;  %v5102_v1 = vld [vmem:[%s7837_s1 + $0xc] ss:$16 sps:$4 sm:$0xff]   ;;  %v5104_v2 = vld [vmem:[%s7837_s1] ss:$16 sps:$4 sm:$0xff]  }
   0x2   :  { %3570 = vmatprep.subr.bf16.mxu0 %v5100_v0  ;;  %v5105_v3 = vld [vmem:[%s7837_s1 + $0x8] ss:$16 sps:$4 sm:$0xff]   ;;  %3939 = vmatprep.subr.bf16.mxu1 %v5102_v1  ;;  %v5106_v4 = vld [vmem:[%s7837_s1 + $0x24] ss:$16 sps:$4 sm:$0xff]   ;;  %v5108_v5 = vld [vmem:[%s7837_s1 + $0x2c] ss:$16 sps:$4 sm:$0xff]  }
   0x3   :  { %3571 = vmatpush1.bf16.msra.mxu0 %v5104_v2  ;;  %3940 = vmatpush1.bf16.msra.mxu1 %v5105_v3  ;;  %v5110_v6 = vld [vmem:[%s7837_s1 + $0x20] ss:$16 sps:$4 sm:$0xff]   ;;  %v5111_v7 = vld [vmem:[%s7837_s1 + $0x28] ss:$16 sps:$4 sm:$0xff]   ;;  %v5112_v8 = vld [vmem:[%s7837_s1 + $0x44] ss:$16 sps:$4 sm:$0xff]  }
   0x4   :  { %3572 = vmatprep.subr.bf16.mxu0 %v5106_v4  ;;  %3941 = vmatprep.subr.bf16.mxu1 %v5108_v5  ;;  %v5114_v9 = vld [vmem:[%s7837_s1 + $0x4c] ss:$16 sps:$4 sm:$0xff]   ;;  %v5116_v10 = vld [vmem:[%s7837_s1 + $0x40] ss:$16 sps:$4 sm:$0xff]   ;;  %v5117_v11 = vld [vmem:[%s7837_s1 + $0x48] ss:$16 sps:$4 sm:$0xff]  }
   0x5   :  { %v5118_v12 = vld [vmem:[%s7837_s1 + $0x64] ss:$16 sps:$4 sm:$0xff]   ;;  %v5120_v13 = vld [vmem:[%s7837_s1 + $0x6c] ss:$16 sps:$4 sm:$0xff]   ;;  %v5122_v14 = vld [vmem:[%s7837_s1 + $0x60] ss:$16 sps:$4 sm:$0xff]  }
   0x6   :  { %v5123_v15 = vld [vmem:[%s7837_s1 + $0x68] ss:$16 sps:$4 sm:$0xff]   ;;  %v5124_v16 = vld [vmem:[%s7837_s1 + $0x84] ss:$16 sps:$4 sm:$0xff]   ;;  %v5126_v17 = vld [vmem:[%s7837_s1 + $0x8c] ss:$16 sps:$4 sm:$0xff]  }
   0x7   :  { %3573 = vmatpush1.bf16.msra.mxu0 %v5110_v6  ;;  %3942 = vmatpush1.bf16.msra.mxu1 %v5111_v7  ;;  %v5128_v18 = vld [vmem:[%s7837_s1 + $0x80] ss:$16 sps:$4 sm:$0xff]   ;;  %v5129_v19 = vld [vmem:[%s7837_s1 + $0x88] ss:$16 sps:$4 sm:$0xff]   ;;  %v5130_v20 = vld [vmem:[%s7837_s1 + $0xa4] ss:$16 sps:$4 sm:$0xff]  }
   0x8   :  { %3574 = vmatprep.subr.bf16.mxu0 %v5112_v8  ;;  %3943 = vmatprep.subr.bf16.mxu1 %v5114_v9  ;;  %v5132_v21 = vld [vmem:[%s7837_s1 + $0xac] ss:$16 sps:$4 sm:$0xff]   ;;  %v5134_v22 = vld [vmem:[%s7837_s1 + $0xa0] ss:$16 sps:$4 sm:$0xff]   ;;  %v5135_v23 = vld [vmem:[%s7837_s1 + $0xa8] ss:$16 sps:$4 sm:$0xff]  }
   0x9   :  { %v5136_v24 = vld [vmem:[%s7837_s1 + $0xc4] ss:$16 sps:$4 sm:$0xff]   ;;  %v5138_v25 = vld [vmem:[%s7837_s1 + $0xcc] ss:$16 sps:$4 sm:$0xff]   ;;  %v5140_v26 = vld [vmem:[%s7837_s1 + $0xc0] ss:$16 sps:$4 sm:$0xff]  }
   0xa   :  { %v5141_v27 = vld [vmem:[%s7837_s1 + $0xc8] ss:$16 sps:$4 sm:$0xff]   ;;  %v5142_v28 = vld [vmem:[%s7837_s1 + $0xe4] ss:$16 sps:$4 sm:$0xff]   ;;  %v5144_v29 = vld [vmem:[%s7837_s1 + $0xec] ss:$16 sps:$4 sm:$0xff]  }
   0xb   :  { %3575 = vmatpush1.bf16.msra.mxu0 %v5116_v10  ;;  %3944 = vmatpush1.bf16.msra.mxu1 %v5117_v11  ;;  %v5146_v30 = vld [vmem:[%s7837_s1 + $0xe0] ss:$16 sps:$4 sm:$0xff]   ;;  %v5147_v31 = vld [vmem:[%s7837_s1 + $0xe8] ss:$16 sps:$4 sm:$0xff]   ;;  %v5148_v32 = vld [vmem:[%s7837_s1 + $0x104] ss:$16 sps:$4 sm:$0xff]  }
   0xc   :  { %3576 = vmatprep.subr.bf16.mxu0 %v5118_v12  ;;  %3945 = vmatprep.subr.bf16.mxu1 %v5120_v13  ;;  %v5150_v33 = vld [vmem:[%s7837_s1 + $0x10c] ss:$16 sps:$4 sm:$0xff]   ;;  %v5152_v34 = vld [vmem:[%s7837_s1 + $0x100] ss:$16 sps:$4 sm:$0xff]   ;;  %v5153_v35 = vld [vmem:[%s7837_s1 + $0x108] ss:$16 sps:$4 sm:$0xff]  }
   0xd   :  { %v5154_v36 = vld [vmem:[%s7837_s1 + $0x124] ss:$16 sps:$4 sm:$0xff]   ;;  %v5156_v37 = vld [vmem:[%s7837_s1 + $0x12c] ss:$16 sps:$4 sm:$0xff]   ;;  %v5158_v38 = vld [vmem:[%s7837_s1 + $0x120] ss:$16 sps:$4 sm:$0xff]  }
   0xe   :  { %v5159_v39 = vld [vmem:[%s7837_s1 + $0x128] ss:$16 sps:$4 sm:$0xff]   ;;  %v5160_v40 = vld [vmem:[%s7837_s1 + $0x144] ss:$16 sps:$4 sm:$0xff]   ;;  %v5162_v41 = vld [vmem:[%s7837_s1 + $0x14c] ss:$16 sps:$4 sm:$0xff]  }
   0xf   :  { %3577 = vmatpush1.bf16.msra.mxu0 %v5122_v14  ;;  %3946 = vmatpush1.bf16.msra.mxu1 %v5123_v15  ;;  %v5164_v42 = vld [vmem:[%s7837_s1 + $0x140] ss:$16 sps:$4 sm:$0xff]   ;;  %v5165_v43 = vld [vmem:[%s7837_s1 + $0x148] ss:$16 sps:$4 sm:$0xff]   ;;  %v5166_v44 = vld [vmem:[%s7837_s1 + $0x164] ss:$16 sps:$4 sm:$0xff]  }
  0x10   :  { %3578 = vmatprep.subr.bf16.mxu0 %v5124_v16  ;;  %3947 = vmatprep.subr.bf16.mxu1 %v5126_v17  ;;  %v5168_v45 = vld [vmem:[%s7837_s1 + $0x16c] ss:$16 sps:$4 sm:$0xff]   ;;  %v20_v46 = vld [vmem:[%s7838_s0] sm:$0xff]  ;;  %v5171_v49 = vld [vmem:[%s7837_s1 + $0x168] ss:$16 sps:$4 sm:$0xff]  }
  0x11   :  { %v5170_v47 = vld [vmem:[%s7837_s1 + $0x160] ss:$16 sps:$4 sm:$0xff]   ;;  %v4434_v48 = vcombine.high %v20_v46, %v20_v46  ;;  %v5172_v50 = vld [vmem:[%s7837_s1 + $0x184] ss:$16 sps:$4 sm:$0xff]   ;;  %v5174_v51 = vld [vmem:[%s7837_s1 + $0x18c] ss:$16 sps:$4 sm:$0xff]   ;;  %v4433_v4 = vcombine.low %v20_v46, %v20_v46 }
  0x12   :  { %v5176_v52 = vld [vmem:[%s7837_s1 + $0x180] ss:$16 sps:$4 sm:$0xff]   ;;  %v5177_v53 = vld [vmem:[%s7837_s1 + $0x188] ss:$16 sps:$4 sm:$0xff]   ;;  %v5178_v54 = vld [vmem:[%s7837_s1 + $0x1a4] ss:$16 sps:$4 sm:$0xff]  }
  0x13   :  { %3579 = vmatpush1.bf16.msra.mxu0 %v5128_v18  ;;  %3948 = vmatpush1.bf16.msra.mxu1 %v5129_v19  ;;  %v5180_v55 = vld [vmem:[%s7837_s1 + $0x1ac] ss:$16 sps:$4 sm:$0xff]   ;;  %v5182_v56 = vld [vmem:[%s7837_s1 + $0x1a0] ss:$16 sps:$4 sm:$0xff]   ;;  %v5183_v57 = vld [vmem:[%s7837_s1 + $0x1a8] ss:$16 sps:$4 sm:$0xff]  }
  0x14   :  { %3580 = vmatprep.subr.bf16.mxu0 %v5130_v20  ;;  %3949 = vmatprep.subr.bf16.mxu1 %v5132_v21  ;;  %v5184_v58 = vld [vmem:[%s7837_s1 + $0x1c4] ss:$16 sps:$4 sm:$0xff]   ;;  %v5186_v59 = vld [vmem:[%s7837_s1 + $0x1cc] ss:$16 sps:$4 sm:$0xff]   ;;  %v5188_v60 = vld [vmem:[%s7837_s1 + $0x1c0] ss:$16 sps:$4 sm:$0xff]  }
  0x15   :  { %3602 = vmatprep.mubr.bf16.mxu0 %v4434_v48  ;;  %3971 = vmatprep.mubr.bf16.mxu1 %v4434_v48  ;;  %v5189_v61 = vld [vmem:[%s7837_s1 + $0x1c8] ss:$16 sps:$4 sm:$0xff]   ;;  %v5190_v62 = vld [vmem:[%s7837_s1 + $0x1e4] ss:$16 sps:$4 sm:$0xff]   ;;  %v5192_v63 = vld [vmem:[%s7837_s1 + $0x1ec] ss:$16 sps:$4 sm:$0xff]  }
  0x16   :  { %v5194_v0 = vld [vmem:[%s7837_s1 + $0x1e0] ss:$16 sps:$4 sm:$0xff]   ;;  %v5195_v1 = vld [vmem:[%s7837_s1 + $0x1e8] ss:$16 sps:$4 sm:$0xff]   ;;  %v5200_v2 = vld [vmem:[%s7837_s1 + $0x204] ss:$16 sps:$4 sm:$0xff]  }
  0x17   :  { %3581 = vmatpush1.bf16.msra.mxu0 %v5134_v22  ;;  %3950 = vmatpush1.bf16.msra.mxu1 %v5135_v23  ;;  %v5203_v3 = vld [vmem:[%s7837_s1 + $0x20c] ss:$16 sps:$4 sm:$0xff]   ;;  %v5198_v5 = vld [vmem:[%s7837_s1 + $0x200] ss:$16 sps:$4 sm:$0xff]   ;;  %v5201_v6 = vld [vmem:[%s7837_s1 + $0x208] ss:$16 sps:$4 sm:$0xff]  }
  0x18   :  { %3582 = vmatprep.subr.bf16.mxu0 %v5136_v24  ;;  %3951 = vmatprep.subr.bf16.mxu1 %v5138_v25  ;;  %v5206_v7 = vld [vmem:[%s7837_s1 + $0x224] ss:$16 sps:$4 sm:$0xff]   ;;  %v5209_v8 = vld [vmem:[%s7837_s1 + $0x22c] ss:$16 sps:$4 sm:$0xff]   ;;  %v5204_v9 = vld [vmem:[%s7837_s1 + $0x220] ss:$16 sps:$4 sm:$0xff]  }
  0x19   :  { %v5207_v10 = vld [vmem:[%s7837_s1 + $0x228] ss:$16 sps:$4 sm:$0xff]   ;;  %v5212_v11 = vld [vmem:[%s7837_s1 + $0x244] ss:$16 sps:$4 sm:$0xff]   ;;  %v5215_v12 = vld [vmem:[%s7837_s1 + $0x24c] ss:$16 sps:$4 sm:$0xff]  }
  0x1a   :  { %v5210_v13 = vld [vmem:[%s7837_s1 + $0x240] ss:$16 sps:$4 sm:$0xff]   ;;  %v5213_v14 = vld [vmem:[%s7837_s1 + $0x248] ss:$16 sps:$4 sm:$0xff]   ;;  %v5218_v15 = vld [vmem:[%s7837_s1 + $0x264] ss:$16 sps:$4 sm:$0xff]  }
  0x1b   :  { %3583 = vmatpush1.bf16.msra.mxu0 %v5140_v26  ;;  %3952 = vmatpush1.bf16.msra.mxu1 %v5141_v27  ;;  %v5221_v16 = vld [vmem:[%s7837_s1 + $0x26c] ss:$16 sps:$4 sm:$0xff]   ;;  %v5216_v17 = vld [vmem:[%s7837_s1 + $0x260] ss:$16 sps:$4 sm:$0xff]   ;;  %v5219_v18 = vld [vmem:[%s7837_s1 + $0x268] ss:$16 sps:$4 sm:$0xff]  }
  0x1c   :  { %3584 = vmatprep.subr.bf16.mxu0 %v5142_v28  ;;  %3953 = vmatprep.subr.bf16.mxu1 %v5144_v29  ;;  %v5224_v19 = vld [vmem:[%s7837_s1 + $0x284] ss:$16 sps:$4 sm:$0xff]   ;;  %v5227_v20 = vld [vmem:[%s7837_s1 + $0x28c] ss:$16 sps:$4 sm:$0xff]   ;;  %v5222_v21 = vld [vmem:[%s7837_s1 + $0x280] ss:$16 sps:$4 sm:$0xff]  }
  0x1d   :  { %v5225_v22 = vld [vmem:[%s7837_s1 + $0x288] ss:$16 sps:$4 sm:$0xff]   ;;  %v5230_v23 = vld [vmem:[%s7837_s1 + $0x2a4] ss:$16 sps:$4 sm:$0xff]   ;;  %v5233_v24 = vld [vmem:[%s7837_s1 + $0x2ac] ss:$16 sps:$4 sm:$0xff]  }
  0x1e   :  { %v5228_v25 = vld [vmem:[%s7837_s1 + $0x2a0] ss:$16 sps:$4 sm:$0xff]   ;;  %v5231_v26 = vld [vmem:[%s7837_s1 + $0x2a8] ss:$16 sps:$4 sm:$0xff]   ;;  %v5236_v27 = vld [vmem:[%s7837_s1 + $0x2c4] ss:$16 sps:$4 sm:$0xff]  }
  0x1f   :  { %3585 = vmatpush1.bf16.msra.mxu0 %v5146_v30  ;;  %3954 = vmatpush1.bf16.msra.mxu1 %v5147_v31  ;;  %v5239_v28 = vld [vmem:[%s7837_s1 + $0x2cc] ss:$16 sps:$4 sm:$0xff]   ;;  %v5234_v31 = vld [vmem:[%s7837_s1 + $0x2c0] ss:$16 sps:$4 sm:$0xff]   ;;  %v5261_v48 = vld [vmem:[%s7837_s1 + $0x348] ss:$16 sps:$4 sm:$0xff]  }
  0x20   :  { %3586 = vmatprep.subr.bf16.mxu0 %v5148_v32  ;;  %3955 = vmatprep.subr.bf16.mxu1 %v5150_v33  ;;  %v6290_v29 = vld [vmem:[%s7838_s0 + $0x8] sm:$0xff]  ;;  %v5242_v33 = vld [vmem:[%s7837_s1 + $0x2e4] ss:$16 sps:$4 sm:$0xff]  }
  0x21   :  { %v4436_v30 = vcombine.high %v6290_v29, %v6290_v29  ;;  %v5237_v32 = vld [vmem:[%s7837_s1 + $0x2c8] ss:$16 sps:$4 sm:$0xff]   ;;  %v5263_v46 = vld [vmem:[%s7837_s1 + $0x34c] ss:$16 sps:$4 sm:$0xff]  }
  0x23   :  { %3587 = vmatpush1.bf16.msra.mxu0 %v5152_v34  ;;  %3956 = vmatpush1.bf16.msra.mxu1 %v5153_v35  ;;  %v5245_v34 = vld [vmem:[%s7837_s1 + $0x2ec] ss:$16 sps:$4 sm:$0xff]   ;;  %v5240_v35 = vld [vmem:[%s7837_s1 + $0x2e0] ss:$16 sps:$4 sm:$0xff]  }
  0x24   :  { %3588 = vmatprep.subr.bf16.mxu0 %v5154_v36  ;;  %3957 = vmatprep.subr.bf16.mxu1 %v5156_v37  ;;  %v5243_v36 = vld [vmem:[%s7837_s1 + $0x2e8] ss:$16 sps:$4 sm:$0xff]   ;;  %v5248_v37 = vld [vmem:[%s7837_s1 + $0x304] ss:$16 sps:$4 sm:$0xff]  }
  0x27   :  { %3589 = vmatpush1.bf16.msra.mxu0 %v5158_v38  ;;  %3958 = vmatpush1.bf16.msra.mxu1 %v5159_v39  ;;  %v5251_v38 = vld [vmem:[%s7837_s1 + $0x30c] ss:$16 sps:$4 sm:$0xff]   ;;  %v5246_v39 = vld [vmem:[%s7837_s1 + $0x300] ss:$16 sps:$4 sm:$0xff]  }
  0x28   :  { %3590 = vmatprep.subr.bf16.mxu0 %v5160_v40  ;;  %3959 = vmatprep.subr.bf16.mxu1 %v5162_v41  ;;  %v5249_v40 = vld [vmem:[%s7837_s1 + $0x308] ss:$16 sps:$4 sm:$0xff]   ;;  %v5254_v41 = vld [vmem:[%s7837_s1 + $0x324] ss:$16 sps:$4 sm:$0xff]  }
  0x2b   :  { %3591 = vmatpush1.bf16.msra.mxu0 %v5164_v42  ;;  %3960 = vmatpush1.bf16.msra.mxu1 %v5165_v43  ;;  %v5257_v42 = vld [vmem:[%s7837_s1 + $0x32c] ss:$16 sps:$4 sm:$0xff]   ;;  %v5252_v43 = vld [vmem:[%s7837_s1 + $0x320] ss:$16 sps:$4 sm:$0xff]  }
  0x2c   :  { %3592 = vmatprep.subr.bf16.mxu0 %v5166_v44  ;;  %3961 = vmatprep.subr.bf16.mxu1 %v5168_v45  ;;  %v5255_v44 = vld [vmem:[%s7837_s1 + $0x328] ss:$16 sps:$4 sm:$0xff]   ;;  %v5260_v45 = vld [vmem:[%s7837_s1 + $0x344] ss:$16 sps:$4 sm:$0xff]  }
  0x2f   :  { %3593 = vmatpush1.bf16.msra.mxu0 %v5170_v47  ;;  %3962 = vmatpush1.bf16.msra.mxu1 %v5171_v49  ;;  %v5258_v47 = vld [vmem:[%s7837_s1 + $0x340] ss:$16 sps:$4 sm:$0xff]   ;;  %v5266_v49 = vld [vmem:[%s7837_s1 + $0x364] ss:$16 sps:$4 sm:$0xff]  }
  0x30   :  { %3594 = vmatprep.subr.bf16.mxu0 %v5172_v50  ;;  %3963 = vmatprep.subr.bf16.mxu1 %v5174_v51  ;;  %v5269_v50 = vld [vmem:[%s7837_s1 + $0x36c] ss:$16 sps:$4 sm:$0xff]   ;;  %v5264_v51 = vld [vmem:[%s7837_s1 + $0x360] ss:$16 sps:$4 sm:$0xff]  }
  0x33   :  { %3595 = vmatpush1.bf16.msra.mxu0 %v5176_v52  ;;  %3964 = vmatpush1.bf16.msra.mxu1 %v5177_v53  ;;  %v5267_v52 = vld [vmem:[%s7837_s1 + $0x368] ss:$16 sps:$4 sm:$0xff]   ;;  %v5272_v53 = vld [vmem:[%s7837_s1 + $0x384] ss:$16 sps:$4 sm:$0xff]  }
  0x34   :  { %3596 = vmatprep.subr.bf16.mxu0 %v5178_v54  ;;  %3965 = vmatprep.subr.bf16.mxu1 %v5180_v55  ;;  %v5275_v54 = vld [vmem:[%s7837_s1 + $0x38c] ss:$16 sps:$4 sm:$0xff]   ;;  %v5270_v55 = vld [vmem:[%s7837_s1 + $0x380] ss:$16 sps:$4 sm:$0xff]  }
  0x37   :  { %3597 = vmatpush1.bf16.msra.mxu0 %v5182_v56  ;;  %3966 = vmatpush1.bf16.msra.mxu1 %v5183_v57  ;;  %v5273_v56 = vld [vmem:[%s7837_s1 + $0x388] ss:$16 sps:$4 sm:$0xff]   ;;  %v5278_v57 = vld [vmem:[%s7837_s1 + $0x3a4] ss:$16 sps:$4 sm:$0xff]  }
  0x38   :  { %3598 = vmatprep.subr.bf16.mxu0 %v5184_v58  ;;  %3967 = vmatprep.subr.bf16.mxu1 %v5186_v59  ;;  %v5281_v58 = vld [vmem:[%s7837_s1 + $0x3ac] ss:$16 sps:$4 sm:$0xff]   ;;  %v5276_v59 = vld [vmem:[%s7837_s1 + $0x3a0] ss:$16 sps:$4 sm:$0xff]  }
  0x3b   :  { %3599 = vmatpush1.bf16.msra.mxu0 %v5188_v60  ;;  %3968 = vmatpush1.bf16.msra.mxu1 %v5189_v61  ;;  %v5279_v60 = vld [vmem:[%s7837_s1 + $0x3a8] ss:$16 sps:$4 sm:$0xff]   ;;  %v5284_v61 = vld [vmem:[%s7837_s1 + $0x3c4] ss:$16 sps:$4 sm:$0xff]  }
  0x3c   :  { %3600 = vmatprep.subr.bf16.mxu0 %v5190_v62  ;;  %3969 = vmatprep.subr.bf16.mxu1 %v5192_v63  ;;  %v5287_v62 = vld [vmem:[%s7837_s1 + $0x3cc] ss:$16 sps:$4 sm:$0xff]   ;;  %v5282_v63 = vld [vmem:[%s7837_s1 + $0x3c0] ss:$16 sps:$4 sm:$0xff]  }
  0x3f   :  { %3601 = vmatpush1.bf16.msra.mxu0 %v5194_v0  ;;  %3970 = vmatpush1.bf16.msra.mxu1 %v5195_v1  ;;  %v5285_v0 = vld [vmem:[%s7837_s1 + $0x3c8] ss:$16 sps:$4 sm:$0xff]   ;;  %v5290_v1 = vld [vmem:[%s7837_s1 + $0x3e4] ss:$16 sps:$4 sm:$0xff]  }
  0x40   :  { %3611 = vmatprep.subr.bf16.mxu0 %v5200_v2  ;;  %3980 = vmatprep.subr.bf16.mxu1 %v5203_v3  ;;  %v5293_v2 = vld [vmem:[%s7837_s1 + $0x3ec] ss:$16 sps:$4 sm:$0xff]   ;;  %v5288_v3 = vld [vmem:[%s7837_s1 + $0x3e0] ss:$16 sps:$4 sm:$0xff]  }
  0x42   :  { %3603 = vmatmul.mubr.bf16.vlgmr.msra.gmra.mrb[0].mxu0 %v4433_v4  ;;  %3972 = vmatmul.mubr.bf16.vlgmr.msra.gmra.mrb[0].mxu1 %v4433_v4  ;;  %v5291_v4 = vld [vmem:[%s7837_s1 + $0x3e8] ss:$16 sps:$4 sm:$0xff]  }
  0x43   :  { %3612 = vmatpush1.bf16.msra.mxu0 %v5198_v5  ;;  %3981 = vmatpush1.bf16.msra.mxu1 %v5201_v6  ;;  %v5298_v5 = vld [vmem:[%s7837_s1 + $0x404] ss:$16 sps:$4 sm:$0xff]   ;;  %v5301_v6 = vld [vmem:[%s7837_s1 + $0x40c] ss:$16 sps:$4 sm:$0xff]  }
  0x44   :  { %3613 = vmatprep.subr.bf16.mxu0 %v5206_v7  ;;  %3982 = vmatprep.subr.bf16.mxu1 %v5209_v8  ;;  %v4435_v7 = vcombine.low %v6290_v29, %v6290_v29  ;;  %v5296_v8 = vld [vmem:[%s7837_s1 + $0x400] ss:$16 sps:$4 sm:$0xff]   ;;  %v5331_v29 = vld [vmem:[%s7837_s1 + $0x4ac] ss:$16 sps:$4 sm:$0xff]  }
  0x45   :  { %3643 = vmatprep.mubr.bf16.mxu0 %v4436_v30  ;;  %4012 = vmatprep.mubr.bf16.mxu1 %v4436_v30  ;;  %v5326_v30 = vld [vmem:[%s7837_s1 + $0x4a0] ss:$16 sps:$4 sm:$0xff]  }
  0x47   :  { %3614 = vmatpush1.bf16.msra.mxu0 %v5204_v9  ;;  %3983 = vmatpush1.bf16.msra.mxu1 %v5207_v10  ;;  %v5299_v9 = vld [vmem:[%s7837_s1 + $0x408] ss:$16 sps:$4 sm:$0xff]   ;;  %v5304_v10 = vld [vmem:[%s7837_s1 + $0x424] ss:$16 sps:$4 sm:$0xff]  }
  0x48   :  { %3615 = vmatprep.subr.bf16.mxu0 %v5212_v11  ;;  %3984 = vmatprep.subr.bf16.mxu1 %v5215_v12  ;;  %v6428_v11 = vld [vmem:[%s7838_s0 + $0x10] sm:$0xff]  ;;  %v5307_v12 = vld [vmem:[%s7837_s1 + $0x42c] ss:$16 sps:$4 sm:$0xff]  }
  0x4b   :  { %3616 = vmatpush1.bf16.msra.mxu0 %v5210_v13  ;;  %3985 = vmatpush1.bf16.msra.mxu1 %v5213_v14  ;;  %v4438_v13 = vcombine.high %v6428_v11, %v6428_v11  ;;  %v5302_v14 = vld [vmem:[%s7837_s1 + $0x420] ss:$16 sps:$4 sm:$0xff]  }
  0x4c   :  { %3617 = vmatprep.subr.bf16.mxu0 %v5218_v15  ;;  %3986 = vmatprep.subr.bf16.mxu1 %v5221_v16  ;;  %v5305_v15 = vld [vmem:[%s7837_s1 + $0x428] ss:$16 sps:$4 sm:$0xff]   ;;  %v5310_v16 = vld [vmem:[%s7837_s1 + $0x444] ss:$16 sps:$4 sm:$0xff]  }
  0x4f   :  { %3618 = vmatpush1.bf16.msra.mxu0 %v5216_v17  ;;  %3987 = vmatpush1.bf16.msra.mxu1 %v5219_v18  ;;  %v5313_v17 = vld [vmem:[%s7837_s1 + $0x44c] ss:$16 sps:$4 sm:$0xff]   ;;  %v5308_v18 = vld [vmem:[%s7837_s1 + $0x440] ss:$16 sps:$4 sm:$0xff]  }
  0x50   :  { %3619 = vmatprep.subr.bf16.mxu0 %v5224_v19  ;;  %3988 = vmatprep.subr.bf16.mxu1 %v5227_v20  ;;  %v5311_v19 = vld [vmem:[%s7837_s1 + $0x448] ss:$16 sps:$4 sm:$0xff]   ;;  %v5316_v20 = vld [vmem:[%s7837_s1 + $0x464] ss:$16 sps:$4 sm:$0xff]  }
  0x53   :  { %3620 = vmatpush1.bf16.msra.mxu0 %v5222_v21  ;;  %3989 = vmatpush1.bf16.msra.mxu1 %v5225_v22  ;;  %v5319_v21 = vld [vmem:[%s7837_s1 + $0x46c] ss:$16 sps:$4 sm:$0xff]   ;;  %v5314_v22 = vld [vmem:[%s7837_s1 + $0x460] ss:$16 sps:$4 sm:$0xff]  }
  0x54   :  { %3621 = vmatprep.subr.bf16.mxu0 %v5230_v23  ;;  %3990 = vmatprep.subr.bf16.mxu1 %v5233_v24  ;;  %v5317_v23 = vld [vmem:[%s7837_s1 + $0x468] ss:$16 sps:$4 sm:$0xff]   ;;  %v5322_v24 = vld [vmem:[%s7837_s1 + $0x484] ss:$16 sps:$4 sm:$0xff]  }
  0x57   :  { %3622 = vmatpush1.bf16.msra.mxu0 %v5228_v25  ;;  %3991 = vmatpush1.bf16.msra.mxu1 %v5231_v26  ;;  %v5325_v25 = vld [vmem:[%s7837_s1 + $0x48c] ss:$16 sps:$4 sm:$0xff]   ;;  %v5320_v26 = vld [vmem:[%s7837_s1 + $0x480] ss:$16 sps:$4 sm:$0xff]  }
  0x58   :  { %3623 = vmatprep.subr.bf16.mxu0 %v5236_v27  ;;  %3992 = vmatprep.subr.bf16.mxu1 %v5239_v28  ;;  %v5323_v27 = vld [vmem:[%s7837_s1 + $0x488] ss:$16 sps:$4 sm:$0xff]   ;;  %v5328_v28 = vld [vmem:[%s7837_s1 + $0x4a4] ss:$16 sps:$4 sm:$0xff]  }
  0x5b   :  { %3624 = vmatpush1.bf16.msra.mxu0 %v5234_v31  ;;  %3993 = vmatpush1.bf16.msra.mxu1 %v5237_v32  ;;  %v5329_v31 = vld [vmem:[%s7837_s1 + $0x4a8] ss:$16 sps:$4 sm:$0xff]   ;;  %v5334_v32 = vld [vmem:[%s7837_s1 + $0x4c4] ss:$16 sps:$4 sm:$0xff]  }
  0x5c   :  { %3625 = vmatprep.subr.bf16.mxu0 %v5242_v33  ;;  %3994 = vmatprep.subr.bf16.mxu1 %v5245_v34  ;;  %v5337_v33 = vld [vmem:[%s7837_s1 + $0x4cc] ss:$16 sps:$4 sm:$0xff]   ;;  %v5332_v34 = vld [vmem:[%s7837_s1 + $0x4c0] ss:$16 sps:$4 sm:$0xff]  }
  0x5f   :  { %3626 = vmatpush1.bf16.msra.mxu0 %v5240_v35  ;;  %3995 = vmatpush1.bf16.msra.mxu1 %v5243_v36  ;;  %v5335_v35 = vld [vmem:[%s7837_s1 + $0x4c8] ss:$16 sps:$4 sm:$0xff]   ;;  %v5340_v36 = vld [vmem:[%s7837_s1 + $0x4e4] ss:$16 sps:$4 sm:$0xff]  }
  0x60   :  { %3627 = vmatprep.subr.bf16.mxu0 %v5248_v37  ;;  %3996 = vmatprep.subr.bf16.mxu1 %v5251_v38  ;;  %v5343_v37 = vld [vmem:[%s7837_s1 + $0x4ec] ss:$16 sps:$4 sm:$0xff]   ;;  %v5338_v38 = vld [vmem:[%s7837_s1 + $0x4e0] ss:$16 sps:$4 sm:$0xff]  }
  0x63   :  { %3628 = vmatpush1.bf16.msra.mxu0 %v5246_v39  ;;  %3997 = vmatpush1.bf16.msra.mxu1 %v5249_v40  ;;  %v5341_v39 = vld [vmem:[%s7837_s1 + $0x4e8] ss:$16 sps:$4 sm:$0xff]   ;;  %v5346_v40 = vld [vmem:[%s7837_s1 + $0x504] ss:$16 sps:$4 sm:$0xff]  }
  0x64   :  { %3629 = vmatprep.subr.bf16.mxu0 %v5254_v41  ;;  %3998 = vmatprep.subr.bf16.mxu1 %v5257_v42  ;;  %v5349_v41 = vld [vmem:[%s7837_s1 + $0x50c] ss:$16 sps:$4 sm:$0xff]   ;;  %v5344_v42 = vld [vmem:[%s7837_s1 + $0x500] ss:$16 sps:$4 sm:$0xff]  }
  0x67   :  { %3630 = vmatpush1.bf16.msra.mxu0 %v5252_v43  ;;  %3999 = vmatpush1.bf16.msra.mxu1 %v5255_v44  ;;  %v5347_v43 = vld [vmem:[%s7837_s1 + $0x508] ss:$16 sps:$4 sm:$0xff]   ;;  %v5352_v44 = vld [vmem:[%s7837_s1 + $0x524] ss:$16 sps:$4 sm:$0xff]  }
  0x68   :  { %3631 = vmatprep.subr.bf16.mxu0 %v5260_v45  ;;  %4000 = vmatprep.subr.bf16.mxu1 %v5263_v46  ;;  %v5355_v45 = vld [vmem:[%s7837_s1 + $0x52c] ss:$16 sps:$4 sm:$0xff]   ;;  %v5350_v46 = vld [vmem:[%s7837_s1 + $0x520] ss:$16 sps:$4 sm:$0xff]  }
  0x6b   :  { %3632 = vmatpush1.bf16.msra.mxu0 %v5258_v47  ;;  %4001 = vmatpush1.bf16.msra.mxu1 %v5261_v48  ;;  %v5353_v47 = vld [vmem:[%s7837_s1 + $0x528] ss:$16 sps:$4 sm:$0xff]   ;;  %v5358_v48 = vld [vmem:[%s7837_s1 + $0x544] ss:$16 sps:$4 sm:$0xff]  }
  0x6c   :  { %3633 = vmatprep.subr.bf16.mxu0 %v5266_v49  ;;  %4002 = vmatprep.subr.bf16.mxu1 %v5269_v50  ;;  %v5361_v49 = vld [vmem:[%s7837_s1 + $0x54c] ss:$16 sps:$4 sm:$0xff]   ;;  %v5356_v50 = vld [vmem:[%s7837_s1 + $0x540] ss:$16 sps:$4 sm:$0xff]  }
  0x6f   :  { %3634 = vmatpush1.bf16.msra.mxu0 %v5264_v51  ;;  %4003 = vmatpush1.bf16.msra.mxu1 %v5267_v52  ;;  %v5359_v51 = vld [vmem:[%s7837_s1 + $0x548] ss:$16 sps:$4 sm:$0xff]   ;;  %v5364_v52 = vld [vmem:[%s7837_s1 + $0x564] ss:$16 sps:$4 sm:$0xff]  }
  0x70   :  { %3635 = vmatprep.subr.bf16.mxu0 %v5272_v53  ;;  %4004 = vmatprep.subr.bf16.mxu1 %v5275_v54  ;;  %v5367_v53 = vld [vmem:[%s7837_s1 + $0x56c] ss:$16 sps:$4 sm:$0xff]   ;;  %v5362_v54 = vld [vmem:[%s7837_s1 + $0x560] ss:$16 sps:$4 sm:$0xff]  }
  0x73   :  { %3636 = vmatpush1.bf16.msra.mxu0 %v5270_v55  ;;  %4005 = vmatpush1.bf16.msra.mxu1 %v5273_v56  ;;  %v5365_v55 = vld [vmem:[%s7837_s1 + $0x568] ss:$16 sps:$4 sm:$0xff]   ;;  %v5370_v56 = vld [vmem:[%s7837_s1 + $0x584] ss:$16 sps:$4 sm:$0xff]  }
  0x74   :  { %3637 = vmatprep.subr.bf16.mxu0 %v5278_v57  ;;  %4006 = vmatprep.subr.bf16.mxu1 %v5281_v58  ;;  %v5373_v57 = vld [vmem:[%s7837_s1 + $0x58c] ss:$16 sps:$4 sm:$0xff]   ;;  %v5368_v58 = vld [vmem:[%s7837_s1 + $0x580] ss:$16 sps:$4 sm:$0xff]  }
  0x77   :  { %3638 = vmatpush1.bf16.msra.mxu0 %v5276_v59  ;;  %4007 = vmatpush1.bf16.msra.mxu1 %v5279_v60  ;;  %v5371_v59 = vld [vmem:[%s7837_s1 + $0x588] ss:$16 sps:$4 sm:$0xff]   ;;  %v5376_v60 = vld [vmem:[%s7837_s1 + $0x5a4] ss:$16 sps:$4 sm:$0xff]  }
  0x78   :  { %3639 = vmatprep.subr.bf16.mxu0 %v5284_v61  ;;  %4008 = vmatprep.subr.bf16.mxu1 %v5287_v62  ;;  %v5379_v61 = vld [vmem:[%s7837_s1 + $0x5ac] ss:$16 sps:$4 sm:$0xff]   ;;  %v5374_v62 = vld [vmem:[%s7837_s1 + $0x5a0] ss:$16 sps:$4 sm:$0xff]  }
  0x7b   :  { %3640 = vmatpush1.bf16.msra.mxu0 %v5282_v63  ;;  %4009 = vmatpush1.bf16.msra.mxu1 %v5285_v0  ;;  %v5377_v63 = vld [vmem:[%s7837_s1 + $0x5a8] ss:$16 sps:$4 sm:$0xff]   ;;  %v5382_v0 = vld [vmem:[%s7837_s1 + $0x5c4] ss:$16 sps:$4 sm:$0xff]  }
  0x7c   :  { %3641 = vmatprep.subr.bf16.mxu0 %v5290_v1  ;;  %4010 = vmatprep.subr.bf16.mxu1 %v5293_v2  ;;  %v5385_v1 = vld [vmem:[%s7837_s1 + $0x5cc] ss:$16 sps:$4 sm:$0xff]   ;;  %v5380_v2 = vld [vmem:[%s7837_s1 + $0x5c0] ss:$16 sps:$4 sm:$0xff]  }
  0x7f   :  { %3642 = vmatpush1.bf16.msra.mxu0 %v5288_v3  ;;  %4011 = vmatpush1.bf16.msra.mxu1 %v5291_v4  ;;  %v5383_v3 = vld [vmem:[%s7837_s1 + $0x5c8] ss:$16 sps:$4 sm:$0xff]   ;;  %v5388_v4 = vld [vmem:[%s7837_s1 + $0x5e4] ss:$16 sps:$4 sm:$0xff]  }
  0x80   :  { %3652 = vmatprep.subr.bf16.mxu0 %v5298_v5  ;;  %4021 = vmatprep.subr.bf16.mxu1 %v5301_v6  ;;  %v5391_v5 = vld [vmem:[%s7837_s1 + $0x5ec] ss:$16 sps:$4 sm:$0xff]   ;;  %v5386_v6 = vld [vmem:[%s7837_s1 + $0x5e0] ss:$16 sps:$4 sm:$0xff]  }
  0x82   :  { %3644 = vmatmul.mubr.bf16.vlgmr.msra.gmra.mrb[0].mxu0 %v4435_v7  ;;  %4013 = vmatmul.mubr.bf16.vlgmr.msra.gmra.mrb[0].mxu1 %v4435_v7  ;;  %v5389_v7 = vld [vmem:[%s7837_s1 + $0x5e8] ss:$16 sps:$4 sm:$0xff]  }
  0x83   :  { %3653 = vmatpush1.bf16.msra.mxu0 %v5296_v8  ;;  %4022 = vmatpush1.bf16.msra.mxu1 %v5299_v9  ;;  %v5396_v8 = vld [vmem:[%s7837_s1 + $0x604] ss:$16 sps:$4 sm:$0xff]   ;;  %v5399_v9 = vld [vmem:[%s7837_s1 + $0x60c] ss:$16 sps:$4 sm:$0xff]  }
  0x84   :  { %3654 = vmatprep.subr.bf16.mxu0 %v5304_v10  ;;  %4023 = vmatprep.subr.bf16.mxu1 %v5307_v12  ;;  %v5394_v10 = vld [vmem:[%s7837_s1 + $0x600] ss:$16 sps:$4 sm:$0xff]   ;;  %v4437_v12 = vcombine.low %v6428_v11, %v6428_v11  ;;  %v5405_v11 = vld [vmem:[%s7837_s1 + $0x62c] ss:$16 sps:$4 sm:$0xff]  }
  0x85   :  { %3684 = vmatprep.mubr.bf16.mxu0 %v4438_v13  ;;  %4053 = vmatprep.mubr.bf16.mxu1 %v4438_v13  ;;  %v5397_v13 = vld [vmem:[%s7837_s1 + $0x608] ss:$16 sps:$4 sm:$0xff]  }
  0x87   :  { %3655 = vmatpush1.bf16.msra.mxu0 %v5302_v14  ;;  %4024 = vmatpush1.bf16.msra.mxu1 %v5305_v15  ;;  %v6626_v14 = vld [vmem:[%s7838_s0 + $0x18] sm:$0xff]  ;;  %v5402_v15 = vld [vmem:[%s7837_s1 + $0x624] ss:$16 sps:$4 sm:$0xff]  }
  0x88   :  { %3656 = vmatprep.subr.bf16.mxu0 %v5310_v16  ;;  %4025 = vmatprep.subr.bf16.mxu1 %v5313_v17  ;;  %v4440_v16 = vcombine.high %v6626_v14, %v6626_v14  ;;  %v5400_v17 = vld [vmem:[%s7837_s1 + $0x620] ss:$16 sps:$4 sm:$0xff]  }
  0x8b   :  { %3657 = vmatpush1.bf16.msra.mxu0 %v5308_v18  ;;  %4026 = vmatpush1.bf16.msra.mxu1 %v5311_v19  ;;  %v5403_v18 = vld [vmem:[%s7837_s1 + $0x628] ss:$16 sps:$4 sm:$0xff]   ;;  %v5408_v19 = vld [vmem:[%s7837_s1 + $0x644] ss:$16 sps:$4 sm:$0xff]  }
  0x8c   :  { %3658 = vmatprep.subr.bf16.mxu0 %v5316_v20  ;;  %4027 = vmatprep.subr.bf16.mxu1 %v5319_v21  ;;  %v5411_v20 = vld [vmem:[%s7837_s1 + $0x64c] ss:$16 sps:$4 sm:$0xff]   ;;  %v5406_v21 = vld [vmem:[%s7837_s1 + $0x640] ss:$16 sps:$4 sm:$0xff]  }
  0x8f   :  { %3659 = vmatpush1.bf16.msra.mxu0 %v5314_v22  ;;  %4028 = vmatpush1.bf16.msra.mxu1 %v5317_v23  ;;  %v5409_v22 = vld [vmem:[%s7837_s1 + $0x648] ss:$16 sps:$4 sm:$0xff]   ;;  %v5414_v23 = vld [vmem:[%s7837_s1 + $0x664] ss:$16 sps:$4 sm:$0xff]  }
  0x90   :  { %3660 = vmatprep.subr.bf16.mxu0 %v5322_v24  ;;  %4029 = vmatprep.subr.bf16.mxu1 %v5325_v25  ;;  %v5417_v24 = vld [vmem:[%s7837_s1 + $0x66c] ss:$16 sps:$4 sm:$0xff]   ;;  %v5412_v25 = vld [vmem:[%s7837_s1 + $0x660] ss:$16 sps:$4 sm:$0xff]  }
  0x93   :  { %3661 = vmatpush1.bf16.msra.mxu0 %v5320_v26  ;;  %4030 = vmatpush1.bf16.msra.mxu1 %v5323_v27  ;;  %v5415_v26 = vld [vmem:[%s7837_s1 + $0x668] ss:$16 sps:$4 sm:$0xff]   ;;  %v5420_v27 = vld [vmem:[%s7837_s1 + $0x684] ss:$16 sps:$4 sm:$0xff]  }
  0x94   :  { %3662 = vmatprep.subr.bf16.mxu0 %v5328_v28  ;;  %4031 = vmatprep.subr.bf16.mxu1 %v5331_v29  ;;  %v5423_v28 = vld [vmem:[%s7837_s1 + $0x68c] ss:$16 sps:$4 sm:$0xff]   ;;  %v5418_v29 = vld [vmem:[%s7837_s1 + $0x680] ss:$16 sps:$4 sm:$0xff]  }
  0x97   :  { %3663 = vmatpush1.bf16.msra.mxu0 %v5326_v30  ;;  %4032 = vmatpush1.bf16.msra.mxu1 %v5329_v31  ;;  %v5421_v30 = vld [vmem:[%s7837_s1 + $0x688] ss:$16 sps:$4 sm:$0xff]   ;;  %v5426_v31 = vld [vmem:[%s7837_s1 + $0x6a4] ss:$16 sps:$4 sm:$0xff]  }
  0x98   :  { %3664 = vmatprep.subr.bf16.mxu0 %v5334_v32  ;;  %4033 = vmatprep.subr.bf16.mxu1 %v5337_v33  ;;  %v5429_v32 = vld [vmem:[%s7837_s1 + $0x6ac] ss:$16 sps:$4 sm:$0xff]   ;;  %v5424_v33 = vld [vmem:[%s7837_s1 + $0x6a0] ss:$16 sps:$4 sm:$0xff]  }
  0x9b   :  { %3665 = vmatpush1.bf16.msra.mxu0 %v5332_v34  ;;  %4034 = vmatpush1.bf16.msra.mxu1 %v5335_v35  ;;  %v5427_v34 = vld [vmem:[%s7837_s1 + $0x6a8] ss:$16 sps:$4 sm:$0xff]   ;;  %v5432_v35 = vld [vmem:[%s7837_s1 + $0x6c4] ss:$16 sps:$4 sm:$0xff]  }
  0x9c   :  { %3666 = vmatprep.subr.bf16.mxu0 %v5340_v36  ;;  %4035 = vmatprep.subr.bf16.mxu1 %v5343_v37  ;;  %v5435_v36 = vld [vmem:[%s7837_s1 + $0x6cc] ss:$16 sps:$4 sm:$0xff]   ;;  %v5430_v37 = vld [vmem:[%s7837_s1 + $0x6c0] ss:$16 sps:$4 sm:$0xff]  }
  0x9f   :  { %3667 = vmatpush1.bf16.msra.mxu0 %v5338_v38  ;;  %4036 = vmatpush1.bf16.msra.mxu1 %v5341_v39  ;;  %v5433_v38 = vld [vmem:[%s7837_s1 + $0x6c8] ss:$16 sps:$4 sm:$0xff]   ;;  %v5438_v39 = vld [vmem:[%s7837_s1 + $0x6e4] ss:$16 sps:$4 sm:$0xff]  }
  0xa0   :  { %3668 = vmatprep.subr.bf16.mxu0 %v5346_v40  ;;  %4037 = vmatprep.subr.bf16.mxu1 %v5349_v41  ;;  %v5441_v40 = vld [vmem:[%s7837_s1 + $0x6ec] ss:$16 sps:$4 sm:$0xff]   ;;  %v5436_v41 = vld [vmem:[%s7837_s1 + $0x6e0] ss:$16 sps:$4 sm:$0xff]  }
  0xa3   :  { %3669 = vmatpush1.bf16.msra.mxu0 %v5344_v42  ;;  %4038 = vmatpush1.bf16.msra.mxu1 %v5347_v43  ;;  %v5439_v42 = vld [vmem:[%s7837_s1 + $0x6e8] ss:$16 sps:$4 sm:$0xff]   ;;  %v5444_v43 = vld [vmem:[%s7837_s1 + $0x704] ss:$16 sps:$4 sm:$0xff]  }
  0xa4   :  { %3670 = vmatprep.subr.bf16.mxu0 %v5352_v44  ;;  %4039 = vmatprep.subr.bf16.mxu1 %v5355_v45  ;;  %v5447_v44 = vld [vmem:[%s7837_s1 + $0x70c] ss:$16 sps:$4 sm:$0xff]   ;;  %v5442_v45 = vld [vmem:[%s7837_s1 + $0x700] ss:$16 sps:$4 sm:$0xff]  }
  0xa7   :  { %3671 = vmatpush1.bf16.msra.mxu0 %v5350_v46  ;;  %4040 = vmatpush1.bf16.msra.mxu1 %v5353_v47  ;;  %v5445_v46 = vld [vmem:[%s7837_s1 + $0x708] ss:$16 sps:$4 sm:$0xff]   ;;  %v5450_v47 = vld [vmem:[%s7837_s1 + $0x724] ss:$16 sps:$4 sm:$0xff]  }
  0xa8   :  { %3672 = vmatprep.subr.bf16.mxu0 %v5358_v48  ;;  %4041 = vmatprep.subr.bf16.mxu1 %v5361_v49  ;;  %v5453_v48 = vld [vmem:[%s7837_s1 + $0x72c] ss:$16 sps:$4 sm:$0xff]   ;;  %v5448_v49 = vld [vmem:[%s7837_s1 + $0x720] ss:$16 sps:$4 sm:$0xff]  }
  0xab   :  { %3673 = vmatpush1.bf16.msra.mxu0 %v5356_v50  ;;  %4042 = vmatpush1.bf16.msra.mxu1 %v5359_v51  ;;  %v5451_v50 = vld [vmem:[%s7837_s1 + $0x728] ss:$16 sps:$4 sm:$0xff]   ;;  %v5456_v51 = vld [vmem:[%s7837_s1 + $0x744] ss:$16 sps:$4 sm:$0xff]  }
  0xac   :  { %3674 = vmatprep.subr.bf16.mxu0 %v5364_v52  ;;  %4043 = vmatprep.subr.bf16.mxu1 %v5367_v53  ;;  %v5459_v52 = vld [vmem:[%s7837_s1 + $0x74c] ss:$16 sps:$4 sm:$0xff]   ;;  %v5454_v53 = vld [vmem:[%s7837_s1 + $0x740] ss:$16 sps:$4 sm:$0xff]  }
  0xaf   :  { %3675 = vmatpush1.bf16.msra.mxu0 %v5362_v54  ;;  %4044 = vmatpush1.bf16.msra.mxu1 %v5365_v55  ;;  %v5457_v54 = vld [vmem:[%s7837_s1 + $0x748] ss:$16 sps:$4 sm:$0xff]   ;;  %v5462_v55 = vld [vmem:[%s7837_s1 + $0x764] ss:$16 sps:$4 sm:$0xff]  }
  0xb0   :  { %3676 = vmatprep.subr.bf16.mxu0 %v5370_v56  ;;  %4045 = vmatprep.subr.bf16.mxu1 %v5373_v57  ;;  %v5465_v56 = vld [vmem:[%s7837_s1 + $0x76c] ss:$16 sps:$4 sm:$0xff]   ;;  %v5460_v57 = vld [vmem:[%s7837_s1 + $0x760] ss:$16 sps:$4 sm:$0xff]  }
  0xb3   :  { %3677 = vmatpush1.bf16.msra.mxu0 %v5368_v58  ;;  %4046 = vmatpush1.bf16.msra.mxu1 %v5371_v59  ;;  %v5463_v58 = vld [vmem:[%s7837_s1 + $0x768] ss:$16 sps:$4 sm:$0xff]   ;;  %v5468_v59 = vld [vmem:[%s7837_s1 + $0x784] ss:$16 sps:$4 sm:$0xff]  }
  0xb4   :  { %3678 = vmatprep.subr.bf16.mxu0 %v5376_v60  ;;  %4047 = vmatprep.subr.bf16.mxu1 %v5379_v61  ;;  %v5471_v60 = vld [vmem:[%s7837_s1 + $0x78c] ss:$16 sps:$4 sm:$0xff]   ;;  %v5466_v61 = vld [vmem:[%s7837_s1 + $0x780] ss:$16 sps:$4 sm:$0xff]  }
  0xb7   :  { %3679 = vmatpush1.bf16.msra.mxu0 %v5374_v62  ;;  %4048 = vmatpush1.bf16.msra.mxu1 %v5377_v63  ;;  %v5469_v62 = vld [vmem:[%s7837_s1 + $0x788] ss:$16 sps:$4 sm:$0xff]   ;;  %v5474_v63 = vld [vmem:[%s7837_s1 + $0x7a4] ss:$16 sps:$4 sm:$0xff]  }
  0xb8   :  { %3680 = vmatprep.subr.bf16.mxu0 %v5382_v0  ;;  %4049 = vmatprep.subr.bf16.mxu1 %v5385_v1  ;;  %v5477_v0 = vld [vmem:[%s7837_s1 + $0x7ac] ss:$16 sps:$4 sm:$0xff]   ;;  %v5472_v1 = vld [vmem:[%s7837_s1 + $0x7a0] ss:$16 sps:$4 sm:$0xff]  }
  0xbb   :  { %3681 = vmatpush1.bf16.msra.mxu0 %v5380_v2  ;;  %4050 = vmatpush1.bf16.msra.mxu1 %v5383_v3  ;;  %v5475_v2 = vld [vmem:[%s7837_s1 + $0x7a8] ss:$16 sps:$4 sm:$0xff]   ;;  %v5480_v3 = vld [vmem:[%s7837_s1 + $0x7c4] ss:$16 sps:$4 sm:$0xff]  }
  0xbc   :  { %3682 = vmatprep.subr.bf16.mxu0 %v5388_v4  ;;  %4051 = vmatprep.subr.bf16.mxu1 %v5391_v5  ;;  %v5483_v4 = vld [vmem:[%s7837_s1 + $0x7cc] ss:$16 sps:$4 sm:$0xff]   ;;  %v5478_v5 = vld [vmem:[%s7837_s1 + $0x7c0] ss:$16 sps:$4 sm:$0xff]  }
  0xbf   :  { %3683 = vmatpush1.bf16.msra.mxu0 %v5386_v6  ;;  %4052 = vmatpush1.bf16.msra.mxu1 %v5389_v7  ;;  %v5481_v6 = vld [vmem:[%s7837_s1 + $0x7c8] ss:$16 sps:$4 sm:$0xff]   ;;  %v5486_v7 = vld [vmem:[%s7837_s1 + $0x7e4] ss:$16 sps:$4 sm:$0xff]  }
  0xc0   :  { %3693 = vmatprep.subr.bf16.mxu0 %v5396_v8  ;;  %4062 = vmatprep.subr.bf16.mxu1 %v5399_v9  ;;  %v5489_v8 = vld [vmem:[%s7837_s1 + $0x7ec] ss:$16 sps:$4 sm:$0xff]   ;;  %v5484_v9 = vld [vmem:[%s7837_s1 + $0x7e0] ss:$16 sps:$4 sm:$0xff]  }
  0xc2   :  { %3685 = vmatmul.mubr.bf16.vlgmr.msra.gmra.mrb[0].mxu0 %v4437_v12  ;;  %4054 = vmatmul.mubr.bf16.vlgmr.msra.gmra.mrb[0].mxu1 %v4437_v12  ;;  %v5494_v12 = vld [vmem:[%s7837_s1 + $0x804] ss:$16 sps:$4 sm:$0xff]  }
  0xc3   :  { %3694 = vmatpush1.bf16.msra.mxu0 %v5394_v10  ;;  %4063 = vmatpush1.bf16.msra.mxu1 %v5397_v13  ;;  %v5487_v10 = vld [vmem:[%s7837_s1 + $0x7e8] ss:$16 sps:$4 sm:$0xff]   ;;  %v5497_v13 = vld [vmem:[%s7837_s1 + $0x80c] ss:$16 sps:$4 sm:$0xff]  }
  0xc4   :  { %3695 = vmatprep.subr.bf16.mxu0 %v5402_v15  ;;  %4064 = vmatprep.subr.bf16.mxu1 %v5405_v11  ;;  %v5492_v15 = vld [vmem:[%s7837_s1 + $0x800] ss:$16 sps:$4 sm:$0xff]   ;;  %v4439_v11 = vcombine.low %v6626_v14, %v6626_v14  ;;  %v5503_v14 = vld [vmem:[%s7837_s1 + $0x82c] ss:$16 sps:$4 sm:$0xff]  }
  0xc5   :  { %3725 = vmatprep.mubr.bf16.mxu0 %v4440_v16  ;;  %4094 = vmatprep.mubr.bf16.mxu1 %v4440_v16  ;;  %v6824_v16 = vld [vmem:[%s7838_s0 + $0x20] sm:$0xff] }
  0xc7   :  { %3696 = vmatpush1.bf16.msra.mxu0 %v5400_v17  ;;  %4065 = vmatpush1.bf16.msra.mxu1 %v5403_v18  ;;  %v5495_v17 = vld [vmem:[%s7837_s1 + $0x808] ss:$16 sps:$4 sm:$0xff]   ;;  %v5500_v18 = vld [vmem:[%s7837_s1 + $0x824] ss:$16 sps:$4 sm:$0xff]  }
  0xc8   :  { %3697 = vmatprep.subr.bf16.mxu0 %v5408_v19  ;;  %4066 = vmatprep.subr.bf16.mxu1 %v5411_v20  ;;  %v4442_v19 = vcombine.high %v6824_v16, %v6824_v16  ;;  %v5498_v20 = vld [vmem:[%s7837_s1 + $0x820] ss:$16 sps:$4 sm:$0xff]  }
  0xcb   :  { %3698 = vmatpush1.bf16.msra.mxu0 %v5406_v21  ;;  %4067 = vmatpush1.bf16.msra.mxu1 %v5409_v22  ;;  %v5501_v21 = vld [vmem:[%s7837_s1 + $0x828] ss:$16 sps:$4 sm:$0xff]   ;;  %v5506_v22 = vld [vmem:[%s7837_s1 + $0x844] ss:$16 sps:$4 sm:$0xff]  }
  0xcc   :  { %3699 = vmatprep.subr.bf16.mxu0 %v5414_v23  ;;  %4068 = vmatprep.subr.bf16.mxu1 %v5417_v24  ;;  %v5509_v23 = vld [vmem:[%s7837_s1 + $0x84c] ss:$16 sps:$4 sm:$0xff]   ;;  %v5504_v24 = vld [vmem:[%s7837_s1 + $0x840] ss:$16 sps:$4 sm:$0xff]  }
  0xcf   :  { %3700 = vmatpush1.bf16.msra.mxu0 %v5412_v25  ;;  %4069 = vmatpush1.bf16.msra.mxu1 %v5415_v26  ;;  %v5507_v25 = vld [vmem:[%s7837_s1 + $0x848] ss:$16 sps:$4 sm:$0xff]   ;;  %v5512_v26 = vld [vmem:[%s7837_s1 + $0x864] ss:$16 sps:$4 sm:$0xff]  }
  0xd0   :  { %3701 = vmatprep.subr.bf16.mxu0 %v5420_v27  ;;  %4070 = vmatprep.subr.bf16.mxu1 %v5423_v28  ;;  %v5515_v27 = vld [vmem:[%s7837_s1 + $0x86c] ss:$16 sps:$4 sm:$0xff]   ;;  %v5510_v28 = vld [vmem:[%s7837_s1 + $0x860] ss:$16 sps:$4 sm:$0xff]  }
  0xd3   :  { %3702 = vmatpush1.bf16.msra.mxu0 %v5418_v29  ;;  %4071 = vmatpush1.bf16.msra.mxu1 %v5421_v30  ;;  %v5513_v29 = vld [vmem:[%s7837_s1 + $0x868] ss:$16 sps:$4 sm:$0xff]   ;;  %v5518_v30 = vld [vmem:[%s7837_s1 + $0x884] ss:$16 sps:$4 sm:$0xff]  }
  0xd4   :  { %3703 = vmatprep.subr.bf16.mxu0 %v5426_v31  ;;  %4072 = vmatprep.subr.bf16.mxu1 %v5429_v32  ;;  %v5521_v31 = vld [vmem:[%s7837_s1 + $0x88c] ss:$16 sps:$4 sm:$0xff]   ;;  %v5516_v32 = vld [vmem:[%s7837_s1 + $0x880] ss:$16 sps:$4 sm:$0xff]  }
  0xd7   :  { %3704 = vmatpush1.bf16.msra.mxu0 %v5424_v33  ;;  %4073 = vmatpush1.bf16.msra.mxu1 %v5427_v34  ;;  %v5519_v33 = vld [vmem:[%s7837_s1 + $0x888] ss:$16 sps:$4 sm:$0xff]   ;;  %v5524_v34 = vld [vmem:[%s7837_s1 + $0x8a4] ss:$16 sps:$4 sm:$0xff]  }
  0xd8   :  { %3705 = vmatprep.subr.bf16.mxu0 %v5432_v35  ;;  %4074 = vmatprep.subr.bf16.mxu1 %v5435_v36  ;;  %v5527_v35 = vld [vmem:[%s7837_s1 + $0x8ac] ss:$16 sps:$4 sm:$0xff]   ;;  %v5522_v36 = vld [vmem:[%s7837_s1 + $0x8a0] ss:$16 sps:$4 sm:$0xff]  }
  0xdb   :  { %3706 = vmatpush1.bf16.msra.mxu0 %v5430_v37  ;;  %4075 = vmatpush1.bf16.msra.mxu1 %v5433_v38  ;;  %v5525_v37 = vld [vmem:[%s7837_s1 + $0x8a8] ss:$16 sps:$4 sm:$0xff]   ;;  %v5530_v38 = vld [vmem:[%s7837_s1 + $0x8c4] ss:$16 sps:$4 sm:$0xff]  }
  0xdc   :  { %3707 = vmatprep.subr.bf16.mxu0 %v5438_v39  ;;  %4076 = vmatprep.subr.bf16.mxu1 %v5441_v40  ;;  %v5533_v39 = vld [vmem:[%s7837_s1 + $0x8cc] ss:$16 sps:$4 sm:$0xff]   ;;  %v5528_v40 = vld [vmem:[%s7837_s1 + $0x8c0] ss:$16 sps:$4 sm:$0xff]  }
  0xdf   :  { %3708 = vmatpush1.bf16.msra.mxu0 %v5436_v41  ;;  %4077 = vmatpush1.bf16.msra.mxu1 %v5439_v42  ;;  %v5531_v41 = vld [vmem:[%s7837_s1 + $0x8c8] ss:$16 sps:$4 sm:$0xff]   ;;  %v5536_v42 = vld [vmem:[%s7837_s1 + $0x8e4] ss:$16 sps:$4 sm:$0xff]  }
  0xe0   :  { %3709 = vmatprep.subr.bf16.mxu0 %v5444_v43  ;;  %4078 = vmatprep.subr.bf16.mxu1 %v5447_v44  ;;  %v5539_v43 = vld [vmem:[%s7837_s1 + $0x8ec] ss:$16 sps:$4 sm:$0xff]   ;;  %v5534_v44 = vld [vmem:[%s7837_s1 + $0x8e0] ss:$16 sps:$4 sm:$0xff]  }
  0xe3   :  { %3710 = vmatpush1.bf16.msra.mxu0 %v5442_v45  ;;  %4079 = vmatpush1.bf16.msra.mxu1 %v5445_v46  ;;  %v5537_v45 = vld [vmem:[%s7837_s1 + $0x8e8] ss:$16 sps:$4 sm:$0xff]   ;;  %v5542_v46 = vld [vmem:[%s7837_s1 + $0x904] ss:$16 sps:$4 sm:$0xff]  }
  0xe4   :  { %3711 = vmatprep.subr.bf16.mxu0 %v5450_v47  ;;  %4080 = vmatprep.subr.bf16.mxu1 %v5453_v48  ;;  %v5545_v47 = vld [vmem:[%s7837_s1 + $0x90c] ss:$16 sps:$4 sm:$0xff]   ;;  %v5540_v48 = vld [vmem:[%s7837_s1 + $0x900] ss:$16 sps:$4 sm:$0xff]  }
  0xe7   :  { %3712 = vmatpush1.bf16.msra.mxu0 %v5448_v49  ;;  %4081 = vmatpush1.bf16.msra.mxu1 %v5451_v50  ;;  %v5543_v49 = vld [vmem:[%s7837_s1 + $0x908] ss:$16 sps:$4 sm:$0xff]   ;;  %v5548_v50 = vld [vmem:[%s7837_s1 + $0x924] ss:$16 sps:$4 sm:$0xff]  }
  0xe8   :  { %3713 = vmatprep.subr.bf16.mxu0 %v5456_v51  ;;  %4082 = vmatprep.subr.bf16.mxu1 %v5459_v52  ;;  %v5551_v51 = vld [vmem:[%s7837_s1 + $0x92c] ss:$16 sps:$4 sm:$0xff]   ;;  %v5546_v52 = vld [vmem:[%s7837_s1 + $0x920] ss:$16 sps:$4 sm:$0xff]  }
  0xeb   :  { %3714 = vmatpush1.bf16.msra.mxu0 %v5454_v53  ;;  %4083 = vmatpush1.bf16.msra.mxu1 %v5457_v54  ;;  %v5549_v53 = vld [vmem:[%s7837_s1 + $0x928] ss:$16 sps:$4 sm:$0xff]   ;;  %v5554_v54 = vld [vmem:[%s7837_s1 + $0x944] ss:$16 sps:$4 sm:$0xff]  }
  0xec   :  { %3715 = vmatprep.subr.bf16.mxu0 %v5462_v55  ;;  %4084 = vmatprep.subr.bf16.mxu1 %v5465_v56  ;;  %v5557_v55 = vld [vmem:[%s7837_s1 + $0x94c] ss:$16 sps:$4 sm:$0xff]   ;;  %v5552_v56 = vld [vmem:[%s7837_s1 + $0x940] ss:$16 sps:$4 sm:$0xff]  }
  0xef   :  { %3716 = vmatpush1.bf16.msra.mxu0 %v5460_v57  ;;  %4085 = vmatpush1.bf16.msra.mxu1 %v5463_v58  ;;  %v5555_v57 = vld [vmem:[%s7837_s1 + $0x948] ss:$16 sps:$4 sm:$0xff]   ;;  %v5560_v58 = vld [vmem:[%s7837_s1 + $0x964] ss:$16 sps:$4 sm:$0xff]  }
  0xf0   :  { %3717 = vmatprep.subr.bf16.mxu0 %v5468_v59  ;;  %4086 = vmatprep.subr.bf16.mxu1 %v5471_v60  ;;  %v5563_v59 = vld [vmem:[%s7837_s1 + $0x96c] ss:$16 sps:$4 sm:$0xff]   ;;  %v5558_v60 = vld [vmem:[%s7837_s1 + $0x960] ss:$16 sps:$4 sm:$0xff]  }
  0xf3   :  { %3718 = vmatpush1.bf16.msra.mxu0 %v5466_v61  ;;  %4087 = vmatpush1.bf16.msra.mxu1 %v5469_v62  ;;  %v5561_v61 = vld [vmem:[%s7837_s1 + $0x968] ss:$16 sps:$4 sm:$0xff]   ;;  %v5566_v62 = vld [vmem:[%s7837_s1 + $0x984] ss:$16 sps:$4 sm:$0xff]  }
  0xf4   :  { %3719 = vmatprep.subr.bf16.mxu0 %v5474_v63  ;;  %4088 = vmatprep.subr.bf16.mxu1 %v5477_v0  ;;  %v5569_v63 = vld [vmem:[%s7837_s1 + $0x98c] ss:$16 sps:$4 sm:$0xff]   ;;  %v5564_v0 = vld [vmem:[%s7837_s1 + $0x980] ss:$16 sps:$4 sm:$0xff]  }
  0xf7   :  { %3720 = vmatpush1.bf16.msra.mxu0 %v5472_v1  ;;  %4089 = vmatpush1.bf16.msra.mxu1 %v5475_v2  ;;  %v5567_v1 = vld [vmem:[%s7837_s1 + $0x988] ss:$16 sps:$4 sm:$0xff]   ;;  %v5572_v2 = vld [vmem:[%s7837_s1 + $0x9a4] ss:$16 sps:$4 sm:$0xff]  }
  0xf8   :  { %3721 = vmatprep.subr.bf16.mxu0 %v5480_v3  ;;  %4090 = vmatprep.subr.bf16.mxu1 %v5483_v4  ;;  %v5575_v3 = vld [vmem:[%s7837_s1 + $0x9ac] ss:$16 sps:$4 sm:$0xff]   ;;  %v5570_v4 = vld [vmem:[%s7837_s1 + $0x9a0] ss:$16 sps:$4 sm:$0xff]  }
  0xfb   :  { %3722 = vmatpush1.bf16.msra.mxu0 %v5478_v5  ;;  %4091 = vmatpush1.bf16.msra.mxu1 %v5481_v6  ;;  %v5573_v5 = vld [vmem:[%s7837_s1 + $0x9a8] ss:$16 sps:$4 sm:$0xff]   ;;  %v5578_v6 = vld [vmem:[%s7837_s1 + $0x9c4] ss:$16 sps:$4 sm:$0xff]  }
  0xfc   :  { %3723 = vmatprep.subr.bf16.mxu0 %v5486_v7  ;;  %4092 = vmatprep.subr.bf16.mxu1 %v5489_v8  ;;  %v5581_v7 = vld [vmem:[%s7837_s1 + $0x9cc] ss:$16 sps:$4 sm:$0xff]   ;;  %v5576_v8 = vld [vmem:[%s7837_s1 + $0x9c0] ss:$16 sps:$4 sm:$0xff]  }
  0xff   :  { %3724 = vmatpush1.bf16.msra.mxu0 %v5484_v9  ;;  %4093 = vmatpush1.bf16.msra.mxu1 %v5487_v10  ;;  %v5579_v9 = vld [vmem:[%s7837_s1 + $0x9c8] ss:$16 sps:$4 sm:$0xff]   ;;  %v5584_v10 = vld [vmem:[%s7837_s1 + $0x9e4] ss:$16 sps:$4 sm:$0xff]  }
 0x100   :  { %3734 = vmatprep.subr.bf16.mxu0 %v5494_v12  ;;  %4103 = vmatprep.subr.bf16.mxu1 %v5497_v13  ;;  %v5587_v12 = vld [vmem:[%s7837_s1 + $0x9ec] ss:$16 sps:$4 sm:$0xff]   ;;  %v5582_v13 = vld [vmem:[%s7837_s1 + $0x9e0] ss:$16 sps:$4 sm:$0xff]  }
 0x102   :  { %3726 = vmatmul.mubr.bf16.vlgmr.msra.gmra.mrb[0].mxu0 %v4439_v11  ;;  %4095 = vmatmul.mubr.bf16.vlgmr.msra.gmra.mrb[0].mxu1 %v4439_v11  ;;  %v5592_v11 = vld [vmem:[%s7837_s1 + $0xa04] ss:$16 sps:$4 sm:$0xff]  }
 0x103   :  { %3735 = vmatpush1.bf16.msra.mxu0 %v5492_v15  ;;  %4104 = vmatpush1.bf16.msra.mxu1 %v5495_v17  ;;  %v5585_v15 = vld [vmem:[%s7837_s1 + $0x9e8] ss:$16 sps:$4 sm:$0xff]   ;;  %v5595_v17 = vld [vmem:[%s7837_s1 + $0xa0c] ss:$16 sps:$4 sm:$0xff]  }
 0x104   :  { %3736 = vmatprep.subr.bf16.mxu0 %v5500_v18  ;;  %4105 = vmatprep.subr.bf16.mxu1 %v5503_v14  ;;  %v7020_v18 = vld [vmem:[%s7838_s0 + $0x28] sm:$0xff]  ;;  %v4441_v14 = vcombine.low %v6824_v16, %v6824_v16 }
 0x105   :  { %3766 = vmatprep.mubr.bf16.mxu0 %v4442_v19  ;;  %4135 = vmatprep.mubr.bf16.mxu1 %v4442_v19  ;;  %v5590_v19 = vld [vmem:[%s7837_s1 + $0xa00] ss:$16 sps:$4 sm:$0xff]   ;;  %v5601_v16 = vld [vmem:[%s7837_s1 + $0xa2c] ss:$16 sps:$4 sm:$0xff]  }
 0x107   :  { %3737 = vmatpush1.bf16.msra.mxu0 %v5498_v20  ;;  %4106 = vmatpush1.bf16.msra.mxu1 %v5501_v21  ;;  %v5593_v20 = vld [vmem:[%s7837_s1 + $0xa08] ss:$16 sps:$4 sm:$0xff]   ;;  %v5598_v21 = vld [vmem:[%s7837_s1 + $0xa24] ss:$16 sps:$4 sm:$0xff]  }
 0x108   :  { %3738 = vmatprep.subr.bf16.mxu0 %v5506_v22  ;;  %4107 = vmatprep.subr.bf16.mxu1 %v5509_v23  ;;  %v4444_v22 = vcombine.high %v7020_v18, %v7020_v18  ;;  %v5596_v23 = vld [vmem:[%s7837_s1 + $0xa20] ss:$16 sps:$4 sm:$0xff]  }
 0x10b   :  { %3739 = vmatpush1.bf16.msra.mxu0 %v5504_v24  ;;  %4108 = vmatpush1.bf16.msra.mxu1 %v5507_v25  ;;  %v5599_v24 = vld [vmem:[%s7837_s1 + $0xa28] ss:$16 sps:$4 sm:$0xff]   ;;  %v5604_v25 = vld [vmem:[%s7837_s1 + $0xa44] ss:$16 sps:$4 sm:$0xff]  }
 0x10c   :  { %3740 = vmatprep.subr.bf16.mxu0 %v5512_v26  ;;  %4109 = vmatprep.subr.bf16.mxu1 %v5515_v27  ;;  %v5607_v26 = vld [vmem:[%s7837_s1 + $0xa4c] ss:$16 sps:$4 sm:$0xff]   ;;  %v5602_v27 = vld [vmem:[%s7837_s1 + $0xa40] ss:$16 sps:$4 sm:$0xff]  }
 0x10f   :  { %3741 = vmatpush1.bf16.msra.mxu0 %v5510_v28  ;;  %4110 = vmatpush1.bf16.msra.mxu1 %v5513_v29  ;;  %v5605_v28 = vld [vmem:[%s7837_s1 + $0xa48] ss:$16 sps:$4 sm:$0xff]   ;;  %v5610_v29 = vld [vmem:[%s7837_s1 + $0xa64] ss:$16 sps:$4 sm:$0xff]  }
 0x110   :  { %3742 = vmatprep.subr.bf16.mxu0 %v5518_v30  ;;  %4111 = vmatprep.subr.bf16.mxu1 %v5521_v31  ;;  %v5613_v30 = vld [vmem:[%s7837_s1 + $0xa6c] ss:$16 sps:$4 sm:$0xff]   ;;  %v5608_v31 = vld [vmem:[%s7837_s1 + $0xa60] ss:$16 sps:$4 sm:$0xff]  }
 0x113   :  { %3743 = vmatpush1.bf16.msra.mxu0 %v5516_v32  ;;  %4112 = vmatpush1.bf16.msra.mxu1 %v5519_v33  ;;  %v5611_v32 = vld [vmem:[%s7837_s1 + $0xa68] ss:$16 sps:$4 sm:$0xff]   ;;  %v5616_v33 = vld [vmem:[%s7837_s1 + $0xa84] ss:$16 sps:$4 sm:$0xff]  }
 0x114   :  { %3744 = vmatprep.subr.bf16.mxu0 %v5524_v34  ;;  %4113 = vmatprep.subr.bf16.mxu1 %v5527_v35  ;;  %v5619_v34 = vld [vmem:[%s7837_s1 + $0xa8c] ss:$16 sps:$4 sm:$0xff]   ;;  %v5614_v35 = vld [vmem:[%s7837_s1 + $0xa80] ss:$16 sps:$4 sm:$0xff]  }
 0x117   :  { %3745 = vmatpush1.bf16.msra.mxu0 %v5522_v36  ;;  %4114 = vmatpush1.bf16.msra.mxu1 %v5525_v37  ;;  %v5617_v36 = vld [vmem:[%s7837_s1 + $0xa88] ss:$16 sps:$4 sm:$0xff]   ;;  %v5622_v37 = vld [vmem:[%s7837_s1 + $0xaa4] ss:$16 sps:$4 sm:$0xff]  }
 0x118   :  { %3746 = vmatprep.subr.bf16.mxu0 %v5530_v38  ;;  %4115 = vmatprep.subr.bf16.mxu1 %v5533_v39  ;;  %v5625_v38 = vld [vmem:[%s7837_s1 + $0xaac] ss:$16 sps:$4 sm:$0xff]   ;;  %v5620_v39 = vld [vmem:[%s7837_s1 + $0xaa0] ss:$16 sps:$4 sm:$0xff]  }
 0x11b   :  { %3747 = vmatpush1.bf16.msra.mxu0 %v5528_v40  ;;  %4116 = vmatpush1.bf16.msra.mxu1 %v5531_v41  ;;  %v5623_v40 = vld [vmem:[%s7837_s1 + $0xaa8] ss:$16 sps:$4 sm:$0xff]   ;;  %v5628_v41 = vld [vmem:[%s7837_s1 + $0xac4] ss:$16 sps:$4 sm:$0xff]  }
 0x11c   :  { %3748 = vmatprep.subr.bf16.mxu0 %v5536_v42  ;;  %4117 = vmatprep.subr.bf16.mxu1 %v5539_v43  ;;  %v5631_v42 = vld [vmem:[%s7837_s1 + $0xacc] ss:$16 sps:$4 sm:$0xff]   ;;  %v5626_v43 = vld [vmem:[%s7837_s1 + $0xac0] ss:$16 sps:$4 sm:$0xff]  }
 0x11f   :  { %3749 = vmatpush1.bf16.msra.mxu0 %v5534_v44  ;;  %4118 = vmatpush1.bf16.msra.mxu1 %v5537_v45  ;;  %v5629_v44 = vld [vmem:[%s7837_s1 + $0xac8] ss:$16 sps:$4 sm:$0xff]   ;;  %v5634_v45 = vld [vmem:[%s7837_s1 + $0xae4] ss:$16 sps:$4 sm:$0xff]  }
 0x120   :  { %3750 = vmatprep.subr.bf16.mxu0 %v5542_v46  ;;  %4119 = vmatprep.subr.bf16.mxu1 %v5545_v47  ;;  %v5637_v46 = vld [vmem:[%s7837_s1 + $0xaec] ss:$16 sps:$4 sm:$0xff]   ;;  %v5632_v47 = vld [vmem:[%s7837_s1 + $0xae0] ss:$16 sps:$4 sm:$0xff]  }
 0x123   :  { %3751 = vmatpush1.bf16.msra.mxu0 %v5540_v48  ;;  %4120 = vmatpush1.bf16.msra.mxu1 %v5543_v49  ;;  %v5635_v48 = vld [vmem:[%s7837_s1 + $0xae8] ss:$16 sps:$4 sm:$0xff]   ;;  %v5640_v49 = vld [vmem:[%s7837_s1 + $0xb04] ss:$16 sps:$4 sm:$0xff]  }
 0x124   :  { %3752 = vmatprep.subr.bf16.mxu0 %v5548_v50  ;;  %4121 = vmatprep.subr.bf16.mxu1 %v5551_v51  ;;  %v5643_v50 = vld [vmem:[%s7837_s1 + $0xb0c] ss:$16 sps:$4 sm:$0xff]   ;;  %v5638_v51 = vld [vmem:[%s7837_s1 + $0xb00] ss:$16 sps:$4 sm:$0xff]  }
 0x127   :  { %3753 = vmatpush1.bf16.msra.mxu0 %v5546_v52  ;;  %4122 = vmatpush1.bf16.msra.mxu1 %v5549_v53  ;;  %v5641_v52 = vld [vmem:[%s7837_s1 + $0xb08] ss:$16 sps:$4 sm:$0xff]   ;;  %v5646_v53 = vld [vmem:[%s7837_s1 + $0xb24] ss:$16 sps:$4 sm:$0xff]  }
 0x128   :  { %3754 = vmatprep.subr.bf16.mxu0 %v5554_v54  ;;  %4123 = vmatprep.subr.bf16.mxu1 %v5557_v55  ;;  %v5649_v54 = vld [vmem:[%s7837_s1 + $0xb2c] ss:$16 sps:$4 sm:$0xff]   ;;  %v5644_v55 = vld [vmem:[%s7837_s1 + $0xb20] ss:$16 sps:$4 sm:$0xff]  }
 0x12b   :  { %3755 = vmatpush1.bf16.msra.mxu0 %v5552_v56  ;;  %4124 = vmatpush1.bf16.msra.mxu1 %v5555_v57  ;;  %v5647_v56 = vld [vmem:[%s7837_s1 + $0xb28] ss:$16 sps:$4 sm:$0xff]   ;;  %v5652_v57 = vld [vmem:[%s7837_s1 + $0xb44] ss:$16 sps:$4 sm:$0xff]  }
 0x12c   :  { %3756 = vmatprep.subr.bf16.mxu0 %v5560_v58  ;;  %4125 = vmatprep.subr.bf16.mxu1 %v5563_v59  ;;  %v5655_v58 = vld [vmem:[%s7837_s1 + $0xb4c] ss:$16 sps:$4 sm:$0xff]   ;;  %v5650_v59 = vld [vmem:[%s7837_s1 + $0xb40] ss:$16 sps:$4 sm:$0xff]  }
 0x12f   :  { %3757 = vmatpush1.bf16.msra.mxu0 %v5558_v60  ;;  %4126 = vmatpush1.bf16.msra.mxu1 %v5561_v61  ;;  %v5653_v60 = vld [vmem:[%s7837_s1 + $0xb48] ss:$16 sps:$4 sm:$0xff]   ;;  %v5658_v61 = vld [vmem:[%s7837_s1 + $0xb64] ss:$16 sps:$4 sm:$0xff]  }
 0x130   :  { %3758 = vmatprep.subr.bf16.mxu0 %v5566_v62  ;;  %4127 = vmatprep.subr.bf16.mxu1 %v5569_v63  ;;  %v5661_v62 = vld [vmem:[%s7837_s1 + $0xb6c] ss:$16 sps:$4 sm:$0xff]   ;;  %v5656_v63 = vld [vmem:[%s7837_s1 + $0xb60] ss:$16 sps:$4 sm:$0xff]  }
 0x133   :  { %3759 = vmatpush1.bf16.msra.mxu0 %v5564_v0  ;;  %4128 = vmatpush1.bf16.msra.mxu1 %v5567_v1  ;;  %v5659_v0 = vld [vmem:[%s7837_s1 + $0xb68] ss:$16 sps:$4 sm:$0xff]   ;;  %v5664_v1 = vld [vmem:[%s7837_s1 + $0xb84] ss:$16 sps:$4 sm:$0xff]  }
 0x134   :  { %3760 = vmatprep.subr.bf16.mxu0 %v5572_v2  ;;  %4129 = vmatprep.subr.bf16.mxu1 %v5575_v3  ;;  %v5667_v2 = vld [vmem:[%s7837_s1 + $0xb8c] ss:$16 sps:$4 sm:$0xff]   ;;  %v5662_v3 = vld [vmem:[%s7837_s1 + $0xb80] ss:$16 sps:$4 sm:$0xff]  }
 0x137   :  { %3761 = vmatpush1.bf16.msra.mxu0 %v5570_v4  ;;  %4130 = vmatpush1.bf16.msra.mxu1 %v5573_v5  ;;  %v5665_v4 = vld [vmem:[%s7837_s1 + $0xb88] ss:$16 sps:$4 sm:$0xff]   ;;  %v5670_v5 = vld [vmem:[%s7837_s1 + $0xba4] ss:$16 sps:$4 sm:$0xff]  }
 0x138   :  { %3762 = vmatprep.subr.bf16.mxu0 %v5578_v6  ;;  %4131 = vmatprep.subr.bf16.mxu1 %v5581_v7  ;;  %v5673_v6 = vld [vmem:[%s7837_s1 + $0xbac] ss:$16 sps:$4 sm:$0xff]   ;;  %v5668_v7 = vld [vmem:[%s7837_s1 + $0xba0] ss:$16 sps:$4 sm:$0xff]  }
 0x13b   :  { %3763 = vmatpush1.bf16.msra.mxu0 %v5576_v8  ;;  %4132 = vmatpush1.bf16.msra.mxu1 %v5579_v9  ;;  %v5671_v8 = vld [vmem:[%s7837_s1 + $0xba8] ss:$16 sps:$4 sm:$0xff]   ;;  %v5676_v9 = vld [vmem:[%s7837_s1 + $0xbc4] ss:$16 sps:$4 sm:$0xff]  }
 0x13c   :  { %3764 = vmatprep.subr.bf16.mxu0 %v5584_v10  ;;  %4133 = vmatprep.subr.bf16.mxu1 %v5587_v12  ;;  %v5679_v10 = vld [vmem:[%s7837_s1 + $0xbcc] ss:$16 sps:$4 sm:$0xff]   ;;  %v5674_v12 = vld [vmem:[%s7837_s1 + $0xbc0] ss:$16 sps:$4 sm:$0xff]  }
 0x13f   :  { %3765 = vmatpush1.bf16.msra.mxu0 %v5582_v13  ;;  %4134 = vmatpush1.bf16.msra.mxu1 %v5585_v15  ;;  %v5677_v13 = vld [vmem:[%s7837_s1 + $0xbc8] ss:$16 sps:$4 sm:$0xff]   ;;  %v5682_v15 = vld [vmem:[%s7837_s1 + $0xbe4] ss:$16 sps:$4 sm:$0xff]  }
 0x140   :  { %3775 = vmatprep.subr.bf16.mxu0 %v5592_v11  ;;  %4144 = vmatprep.subr.bf16.mxu1 %v5595_v17  ;;  %v5685_v11 = vld [vmem:[%s7837_s1 + $0xbec] ss:$16 sps:$4 sm:$0xff]   ;;  %v5680_v17 = vld [vmem:[%s7837_s1 + $0xbe0] ss:$16 sps:$4 sm:$0xff]  }
 0x142   :  { %3767 = vmatmul.mubr.bf16.vlgmr.msra.gmra.mrb[0].mxu0 %v4441_v14  ;;  %4136 = vmatmul.mubr.bf16.vlgmr.msra.gmra.mrb[0].mxu1 %v4441_v14  ;;  %v5683_v14 = vld [vmem:[%s7837_s1 + $0xbe8] ss:$16 sps:$4 sm:$0xff]  }
 0x143   :  { %3776 = vmatpush1.bf16.msra.mxu0 %v5590_v19  ;;  %4145 = vmatpush1.bf16.msra.mxu1 %v5593_v20  ;;  %v5690_v19 = vld [vmem:[%s7837_s1 + $0xc04] ss:$16 sps:$4 sm:$0xff]   ;;  %v5693_v20 = vld [vmem:[%s7837_s1 + $0xc0c] ss:$16 sps:$4 sm:$0xff]  }
 0x144   :  { %3777 = vmatprep.subr.bf16.mxu0 %v5598_v21  ;;  %4146 = vmatprep.subr.bf16.mxu1 %v5601_v16  ;;  %v4443_v21 = vcombine.low %v7020_v18, %v7020_v18  ;;  %v7223_v16 = vld [vmem:[%s7838_s0 + $0x30] sm:$0xff] }
 0x145   :  { %3807 = vmatprep.mubr.bf16.mxu0 %v4444_v22  ;;  %4176 = vmatprep.mubr.bf16.mxu1 %v4444_v22  ;;  %v5688_v22 = vld [vmem:[%s7837_s1 + $0xc00] ss:$16 sps:$4 sm:$0xff]   ;;  %v5696_v18 = vld [vmem:[%s7837_s1 + $0xc24] ss:$16 sps:$4 sm:$0xff]  }
 0x147   :  { %3778 = vmatpush1.bf16.msra.mxu0 %v5596_v23  ;;  %4147 = vmatpush1.bf16.msra.mxu1 %v5599_v24  ;;  %v5691_v23 = vld [vmem:[%s7837_s1 + $0xc08] ss:$16 sps:$4 sm:$0xff]   ;;  %v5699_v24 = vld [vmem:[%s7837_s1 + $0xc2c] ss:$16 sps:$4 sm:$0xff]  }
 0x148   :  { %3779 = vmatprep.subr.bf16.mxu0 %v5604_v25  ;;  %4148 = vmatprep.subr.bf16.mxu1 %v5607_v26  ;;  %v4446_v25 = vcombine.high %v7223_v16, %v7223_v16  ;;  %v5694_v26 = vld [vmem:[%s7837_s1 + $0xc20] ss:$16 sps:$4 sm:$0xff]  }
 0x14b   :  { %3780 = vmatpush1.bf16.msra.mxu0 %v5602_v27  ;;  %4149 = vmatpush1.bf16.msra.mxu1 %v5605_v28  ;;  %v5697_v27 = vld [vmem:[%s7837_s1 + $0xc28] ss:$16 sps:$4 sm:$0xff]   ;;  %v5702_v28 = vld [vmem:[%s7837_s1 + $0xc44] ss:$16 sps:$4 sm:$0xff]  }
 0x14c   :  { %3781 = vmatprep.subr.bf16.mxu0 %v5610_v29  ;;  %4150 = vmatprep.subr.bf16.mxu1 %v5613_v30  ;;  %v5705_v29 = vld [vmem:[%s7837_s1 + $0xc4c] ss:$16 sps:$4 sm:$0xff]   ;;  %v5700_v30 = vld [vmem:[%s7837_s1 + $0xc40] ss:$16 sps:$4 sm:$0xff]  }
 0x14f   :  { %3782 = vmatpush1.bf16.msra.mxu0 %v5608_v31  ;;  %4151 = vmatpush1.bf16.msra.mxu1 %v5611_v32  ;;  %v5703_v31 = vld [vmem:[%s7837_s1 + $0xc48] ss:$16 sps:$4 sm:$0xff]   ;;  %v5708_v32 = vld [vmem:[%s7837_s1 + $0xc64] ss:$16 sps:$4 sm:$0xff]  }
 0x150   :  { %3783 = vmatprep.subr.bf16.mxu0 %v5616_v33  ;;  %4152 = vmatprep.subr.bf16.mxu1 %v5619_v34  ;;  %v5711_v33 = vld [vmem:[%s7837_s1 + $0xc6c] ss:$16 sps:$4 sm:$0xff]   ;;  %v5706_v34 = vld [vmem:[%s7837_s1 + $0xc60] ss:$16 sps:$4 sm:$0xff]  }
 0x153   :  { %3784 = vmatpush1.bf16.msra.mxu0 %v5614_v35  ;;  %4153 = vmatpush1.bf16.msra.mxu1 %v5617_v36  ;;  %v5709_v35 = vld [vmem:[%s7837_s1 + $0xc68] ss:$16 sps:$4 sm:$0xff]   ;;  %v5714_v36 = vld [vmem:[%s7837_s1 + $0xc84] ss:$16 sps:$4 sm:$0xff]  }
 0x154   :  { %3785 = vmatprep.subr.bf16.mxu0 %v5622_v37  ;;  %4154 = vmatprep.subr.bf16.mxu1 %v5625_v38  ;;  %v5717_v37 = vld [vmem:[%s7837_s1 + $0xc8c] ss:$16 sps:$4 sm:$0xff]   ;;  %v5712_v38 = vld [vmem:[%s7837_s1 + $0xc80] ss:$16 sps:$4 sm:$0xff]  }
 0x157   :  { %3786 = vmatpush1.bf16.msra.mxu0 %v5620_v39  ;;  %4155 = vmatpush1.bf16.msra.mxu1 %v5623_v40  ;;  %v5715_v39 = vld [vmem:[%s7837_s1 + $0xc88] ss:$16 sps:$4 sm:$0xff]   ;;  %v5720_v40 = vld [vmem:[%s7837_s1 + $0xca4] ss:$16 sps:$4 sm:$0xff]  }
 0x158   :  { %3787 = vmatprep.subr.bf16.mxu0 %v5628_v41  ;;  %4156 = vmatprep.subr.bf16.mxu1 %v5631_v42  ;;  %v5723_v41 = vld [vmem:[%s7837_s1 + $0xcac] ss:$16 sps:$4 sm:$0xff]   ;;  %v5718_v42 = vld [vmem:[%s7837_s1 + $0xca0] ss:$16 sps:$4 sm:$0xff]  }
 0x15b   :  { %3788 = vmatpush1.bf16.msra.mxu0 %v5626_v43  ;;  %4157 = vmatpush1.bf16.msra.mxu1 %v5629_v44  ;;  %v5721_v43 = vld [vmem:[%s7837_s1 + $0xca8] ss:$16 sps:$4 sm:$0xff]   ;;  %v5726_v44 = vld [vmem:[%s7837_s1 + $0xcc4] ss:$16 sps:$4 sm:$0xff]  }
 0x15c   :  { %3789 = vmatprep.subr.bf16.mxu0 %v5634_v45  ;;  %4158 = vmatprep.subr.bf16.mxu1 %v5637_v46  ;;  %v5729_v45 = vld [vmem:[%s7837_s1 + $0xccc] ss:$16 sps:$4 sm:$0xff]   ;;  %v5724_v46 = vld [vmem:[%s7837_s1 + $0xcc0] ss:$16 sps:$4 sm:$0xff]  }
 0x15f   :  { %3790 = vmatpush1.bf16.msra.mxu0 %v5632_v47  ;;  %4159 = vmatpush1.bf16.msra.mxu1 %v5635_v48  ;;  %v5727_v47 = vld [vmem:[%s7837_s1 + $0xcc8] ss:$16 sps:$4 sm:$0xff]   ;;  %v5732_v48 = vld [vmem:[%s7837_s1 + $0xce4] ss:$16 sps:$4 sm:$0xff]  }
 0x160   :  { %3791 = vmatprep.subr.bf16.mxu0 %v5640_v49  ;;  %4160 = vmatprep.subr.bf16.mxu1 %v5643_v50  ;;  %v5735_v49 = vld [vmem:[%s7837_s1 + $0xcec] ss:$16 sps:$4 sm:$0xff]   ;;  %v5730_v50 = vld [vmem:[%s7837_s1 + $0xce0] ss:$16 sps:$4 sm:$0xff]  }
 0x163   :  { %3792 = vmatpush1.bf16.msra.mxu0 %v5638_v51  ;;  %4161 = vmatpush1.bf16.msra.mxu1 %v5641_v52  ;;  %v5733_v51 = vld [vmem:[%s7837_s1 + $0xce8] ss:$16 sps:$4 sm:$0xff]   ;;  %v5738_v52 = vld [vmem:[%s7837_s1 + $0xd04] ss:$16 sps:$4 sm:$0xff]  }
 0x164   :  { %3793 = vmatprep.subr.bf16.mxu0 %v5646_v53  ;;  %4162 = vmatprep.subr.bf16.mxu1 %v5649_v54  ;;  %v5741_v53 = vld [vmem:[%s7837_s1 + $0xd0c] ss:$16 sps:$4 sm:$0xff]   ;;  %v5736_v54 = vld [vmem:[%s7837_s1 + $0xd00] ss:$16 sps:$4 sm:$0xff]  }
 0x167   :  { %3794 = vmatpush1.bf16.msra.mxu0 %v5644_v55  ;;  %4163 = vmatpush1.bf16.msra.mxu1 %v5647_v56  ;;  %v5739_v55 = vld [vmem:[%s7837_s1 + $0xd08] ss:$16 sps:$4 sm:$0xff]   ;;  %v5744_v56 = vld [vmem:[%s7837_s1 + $0xd24] ss:$16 sps:$4 sm:$0xff]  }
 0x168   :  { %3795 = vmatprep.subr.bf16.mxu0 %v5652_v57  ;;  %4164 = vmatprep.subr.bf16.mxu1 %v5655_v58  ;;  %v5747_v57 = vld [vmem:[%s7837_s1 + $0xd2c] ss:$16 sps:$4 sm:$0xff]   ;;  %v5742_v58 = vld [vmem:[%s7837_s1 + $0xd20] ss:$16 sps:$4 sm:$0xff]  }
 0x16b   :  { %3796 = vmatpush1.bf16.msra.mxu0 %v5650_v59  ;;  %4165 = vmatpush1.bf16.msra.mxu1 %v5653_v60  ;;  %v5745_v59 = vld [vmem:[%s7837_s1 + $0xd28] ss:$16 sps:$4 sm:$0xff]   ;;  %v5750_v60 = vld [vmem:[%s7837_s1 + $0xd44] ss:$16 sps:$4 sm:$0xff]  }
 0x16c   :  { %3797 = vmatprep.subr.bf16.mxu0 %v5658_v61  ;;  %4166 = vmatprep.subr.bf16.mxu1 %v5661_v62  ;;  %v5753_v61 = vld [vmem:[%s7837_s1 + $0xd4c] ss:$16 sps:$4 sm:$0xff]   ;;  %v5748_v62 = vld [vmem:[%s7837_s1 + $0xd40] ss:$16 sps:$4 sm:$0xff]  }
 0x16f   :  { %3798 = vmatpush1.bf16.msra.mxu0 %v5656_v63  ;;  %4167 = vmatpush1.bf16.msra.mxu1 %v5659_v0  ;;  %v5751_v63 = vld [vmem:[%s7837_s1 + $0xd48] ss:$16 sps:$4 sm:$0xff]   ;;  %v5756_v0 = vld [vmem:[%s7837_s1 + $0xd64] ss:$16 sps:$4 sm:$0xff]  }
 0x170   :  { %3799 = vmatprep.subr.bf16.mxu0 %v5664_v1  ;;  %4168 = vmatprep.subr.bf16.mxu1 %v5667_v2  ;;  %v5759_v1 = vld [vmem:[%s7837_s1 + $0xd6c] ss:$16 sps:$4 sm:$0xff]   ;;  %v5754_v2 = vld [vmem:[%s7837_s1 + $0xd60] ss:$16 sps:$4 sm:$0xff]  }
 0x173   :  { %3800 = vmatpush1.bf16.msra.mxu0 %v5662_v3  ;;  %4169 = vmatpush1.bf16.msra.mxu1 %v5665_v4  ;;  %v5757_v3 = vld [vmem:[%s7837_s1 + $0xd68] ss:$16 sps:$4 sm:$0xff]   ;;  %v5762_v4 = vld [vmem:[%s7837_s1 + $0xd84] ss:$16 sps:$4 sm:$0xff]  }
 0x174   :  { %3801 = vmatprep.subr.bf16.mxu0 %v5670_v5  ;;  %4170 = vmatprep.subr.bf16.mxu1 %v5673_v6  ;;  %v5765_v5 = vld [vmem:[%s7837_s1 + $0xd8c] ss:$16 sps:$4 sm:$0xff]   ;;  %v5760_v6 = vld [vmem:[%s7837_s1 + $0xd80] ss:$16 sps:$4 sm:$0xff]  }
 0x177   :  { %3802 = vmatpush1.bf16.msra.mxu0 %v5668_v7  ;;  %4171 = vmatpush1.bf16.msra.mxu1 %v5671_v8  ;;  %v5763_v7 = vld [vmem:[%s7837_s1 + $0xd88] ss:$16 sps:$4 sm:$0xff]   ;;  %v5768_v8 = vld [vmem:[%s7837_s1 + $0xda4] ss:$16 sps:$4 sm:$0xff]  }
 0x178   :  { %3803 = vmatprep.subr.bf16.mxu0 %v5676_v9  ;;  %4172 = vmatprep.subr.bf16.mxu1 %v5679_v10  ;;  %v5771_v9 = vld [vmem:[%s7837_s1 + $0xdac] ss:$16 sps:$4 sm:$0xff]   ;;  %v5766_v10 = vld [vmem:[%s7837_s1 + $0xda0] ss:$16 sps:$4 sm:$0xff]  }
 0x17b   :  { %3804 = vmatpush1.bf16.msra.mxu0 %v5674_v12  ;;  %4173 = vmatpush1.bf16.msra.mxu1 %v5677_v13  ;;  %v5769_v12 = vld [vmem:[%s7837_s1 + $0xda8] ss:$16 sps:$4 sm:$0xff]   ;;  %v5774_v13 = vld [vmem:[%s7837_s1 + $0xdc4] ss:$16 sps:$4 sm:$0xff]  }
 0x17c   :  { %3805 = vmatprep.subr.bf16.mxu0 %v5682_v15  ;;  %4174 = vmatprep.subr.bf16.mxu1 %v5685_v11  ;;  %v5777_v15 = vld [vmem:[%s7837_s1 + $0xdcc] ss:$16 sps:$4 sm:$0xff]   ;;  %v5772_v11 = vld [vmem:[%s7837_s1 + $0xdc0] ss:$16 sps:$4 sm:$0xff]  }
 0x17f   :  { %3806 = vmatpush1.bf16.msra.mxu0 %v5680_v17  ;;  %4175 = vmatpush1.bf16.msra.mxu1 %v5683_v14  ;;  %v5775_v17 = vld [vmem:[%s7837_s1 + $0xdc8] ss:$16 sps:$4 sm:$0xff]   ;;  %v5780_v14 = vld [vmem:[%s7837_s1 + $0xde4] ss:$16 sps:$4 sm:$0xff]  }
 0x180   :  { %3816 = vmatprep.subr.bf16.mxu0 %v5690_v19  ;;  %4185 = vmatprep.subr.bf16.mxu1 %v5693_v20  ;;  %v5783_v19 = vld [vmem:[%s7837_s1 + $0xdec] ss:$16 sps:$4 sm:$0xff]   ;;  %v5778_v20 = vld [vmem:[%s7837_s1 + $0xde0] ss:$16 sps:$4 sm:$0xff]  }
 0x182   :  { %3808 = vmatmul.mubr.bf16.vlgmr.msra.gmra.mrb[0].mxu0 %v4443_v21  ;;  %4177 = vmatmul.mubr.bf16.vlgmr.msra.gmra.mrb[0].mxu1 %v4443_v21  ;;  %v5781_v21 = vld [vmem:[%s7837_s1 + $0xde8] ss:$16 sps:$4 sm:$0xff]  }
 0x183   :  { %3817 = vmatpush1.bf16.msra.mxu0 %v5688_v22  ;;  %4186 = vmatpush1.bf16.msra.mxu1 %v5691_v23  ;;  %v5788_v22 = vld [vmem:[%s7837_s1 + $0xe04] ss:$16 sps:$4 sm:$0xff]   ;;  %v5791_v23 = vld [vmem:[%s7837_s1 + $0xe0c] ss:$16 sps:$4 sm:$0xff]  }
 0x184   :  { %3818 = vmatprep.subr.bf16.mxu0 %v5696_v18  ;;  %4187 = vmatprep.subr.bf16.mxu1 %v5699_v24  ;;  %v4445_v18 = vcombine.low %v7223_v16, %v7223_v16  ;;  %v7424_v24 = vld [vmem:[%s7838_s0 + $0x38] sm:$0xff]  ;;  %v5794_v16 = vld [vmem:[%s7837_s1 + $0xe24] ss:$16 sps:$4 sm:$0xff]  }
 0x185   :  { %3848 = vmatprep.mubr.bf16.mxu0 %v4446_v25  ;;  %4217 = vmatprep.mubr.bf16.mxu1 %v4446_v25  ;;  %v5786_v25 = vld [vmem:[%s7837_s1 + $0xe00] ss:$16 sps:$4 sm:$0xff]  }
 0x187   :  { %3819 = vmatpush1.bf16.msra.mxu0 %v5694_v26  ;;  %4188 = vmatpush1.bf16.msra.mxu1 %v5697_v27  ;;  %v5789_v26 = vld [vmem:[%s7837_s1 + $0xe08] ss:$16 sps:$4 sm:$0xff]   ;;  %v5797_v27 = vld [vmem:[%s7837_s1 + $0xe2c] ss:$16 sps:$4 sm:$0xff]  }
 0x188   :  { %3820 = vmatprep.subr.bf16.mxu0 %v5702_v28  ;;  %4189 = vmatprep.subr.bf16.mxu1 %v5705_v29  ;;  %v4448_v28 = vcombine.high %v7424_v24, %v7424_v24  ;;  %v5792_v29 = vld [vmem:[%s7837_s1 + $0xe20] ss:$16 sps:$4 sm:$0xff]  }
 0x18b   :  { %3821 = vmatpush1.bf16.msra.mxu0 %v5700_v30  ;;  %4190 = vmatpush1.bf16.msra.mxu1 %v5703_v31  ;;  %v5795_v30 = vld [vmem:[%s7837_s1 + $0xe28] ss:$16 sps:$4 sm:$0xff]   ;;  %v5800_v31 = vld [vmem:[%s7837_s1 + $0xe44] ss:$16 sps:$4 sm:$0xff]  }
 0x18c   :  { %3822 = vmatprep.subr.bf16.mxu0 %v5708_v32  ;;  %4191 = vmatprep.subr.bf16.mxu1 %v5711_v33  ;;  %v5803_v32 = vld [vmem:[%s7837_s1 + $0xe4c] ss:$16 sps:$4 sm:$0xff]   ;;  %v5798_v33 = vld [vmem:[%s7837_s1 + $0xe40] ss:$16 sps:$4 sm:$0xff]  }
 0x18f   :  { %3823 = vmatpush1.bf16.msra.mxu0 %v5706_v34  ;;  %4192 = vmatpush1.bf16.msra.mxu1 %v5709_v35  ;;  %v5801_v34 = vld [vmem:[%s7837_s1 + $0xe48] ss:$16 sps:$4 sm:$0xff]   ;;  %v5806_v35 = vld [vmem:[%s7837_s1 + $0xe64] ss:$16 sps:$4 sm:$0xff]  }
 0x190   :  { %3824 = vmatprep.subr.bf16.mxu0 %v5714_v36  ;;  %4193 = vmatprep.subr.bf16.mxu1 %v5717_v37  ;;  %v5809_v36 = vld [vmem:[%s7837_s1 + $0xe6c] ss:$16 sps:$4 sm:$0xff]   ;;  %v5804_v37 = vld [vmem:[%s7837_s1 + $0xe60] ss:$16 sps:$4 sm:$0xff]  }
 0x193   :  { %3825 = vmatpush1.bf16.msra.mxu0 %v5712_v38  ;;  %4194 = vmatpush1.bf16.msra.mxu1 %v5715_v39  ;;  %v5807_v38 = vld [vmem:[%s7837_s1 + $0xe68] ss:$16 sps:$4 sm:$0xff]   ;;  %v5812_v39 = vld [vmem:[%s7837_s1 + $0xe84] ss:$16 sps:$4 sm:$0xff]  }
 0x194   :  { %3826 = vmatprep.subr.bf16.mxu0 %v5720_v40  ;;  %4195 = vmatprep.subr.bf16.mxu1 %v5723_v41  ;;  %v5815_v40 = vld [vmem:[%s7837_s1 + $0xe8c] ss:$16 sps:$4 sm:$0xff]   ;;  %v5810_v41 = vld [vmem:[%s7837_s1 + $0xe80] ss:$16 sps:$4 sm:$0xff]  }
 0x197   :  { %3827 = vmatpush1.bf16.msra.mxu0 %v5718_v42  ;;  %4196 = vmatpush1.bf16.msra.mxu1 %v5721_v43  ;;  %v5813_v42 = vld [vmem:[%s7837_s1 + $0xe88] ss:$16 sps:$4 sm:$0xff]   ;;  %v5818_v43 = vld [vmem:[%s7837_s1 + $0xea4] ss:$16 sps:$4 sm:$0xff]  }
 0x198   :  { %3828 = vmatprep.subr.bf16.mxu0 %v5726_v44  ;;  %4197 = vmatprep.subr.bf16.mxu1 %v5729_v45  ;;  %v5821_v44 = vld [vmem:[%s7837_s1 + $0xeac] ss:$16 sps:$4 sm:$0xff]   ;;  %v5816_v45 = vld [vmem:[%s7837_s1 + $0xea0] ss:$16 sps:$4 sm:$0xff]  }
 0x19b   :  { %3829 = vmatpush1.bf16.msra.mxu0 %v5724_v46  ;;  %4198 = vmatpush1.bf16.msra.mxu1 %v5727_v47  ;;  %v5819_v46 = vld [vmem:[%s7837_s1 + $0xea8] ss:$16 sps:$4 sm:$0xff]   ;;  %v5824_v47 = vld [vmem:[%s7837_s1 + $0xec4] ss:$16 sps:$4 sm:$0xff]  }
 0x19c   :  { %3830 = vmatprep.subr.bf16.mxu0 %v5732_v48  ;;  %4199 = vmatprep.subr.bf16.mxu1 %v5735_v49  ;;  %v5827_v48 = vld [vmem:[%s7837_s1 + $0xecc] ss:$16 sps:$4 sm:$0xff]   ;;  %v5822_v49 = vld [vmem:[%s7837_s1 + $0xec0] ss:$16 sps:$4 sm:$0xff]  }
 0x19f   :  { %3831 = vmatpush1.bf16.msra.mxu0 %v5730_v50  ;;  %4200 = vmatpush1.bf16.msra.mxu1 %v5733_v51  ;;  %v5825_v50 = vld [vmem:[%s7837_s1 + $0xec8] ss:$16 sps:$4 sm:$0xff]   ;;  %v5830_v51 = vld [vmem:[%s7837_s1 + $0xee4] ss:$16 sps:$4 sm:$0xff]  }
 0x1a0   :  { %3832 = vmatprep.subr.bf16.mxu0 %v5738_v52  ;;  %4201 = vmatprep.subr.bf16.mxu1 %v5741_v53  ;;  %v5833_v52 = vld [vmem:[%s7837_s1 + $0xeec] ss:$16 sps:$4 sm:$0xff]   ;;  %v5828_v53 = vld [vmem:[%s7837_s1 + $0xee0] ss:$16 sps:$4 sm:$0xff]  }
 0x1a3   :  { %3833 = vmatpush1.bf16.msra.mxu0 %v5736_v54  ;;  %4202 = vmatpush1.bf16.msra.mxu1 %v5739_v55  ;;  %v5831_v54 = vld [vmem:[%s7837_s1 + $0xee8] ss:$16 sps:$4 sm:$0xff]   ;;  %v5836_v55 = vld [vmem:[%s7837_s1 + $0xf04] ss:$16 sps:$4 sm:$0xff]  }
 0x1a4   :  { %3834 = vmatprep.subr.bf16.mxu0 %v5744_v56  ;;  %4203 = vmatprep.subr.bf16.mxu1 %v5747_v57  ;;  %v5839_v56 = vld [vmem:[%s7837_s1 + $0xf0c] ss:$16 sps:$4 sm:$0xff]   ;;  %v5834_v57 = vld [vmem:[%s7837_s1 + $0xf00] ss:$16 sps:$4 sm:$0xff]  }
 0x1a7   :  { %3835 = vmatpush1.bf16.msra.mxu0 %v5742_v58  ;;  %4204 = vmatpush1.bf16.msra.mxu1 %v5745_v59  ;;  %v5837_v58 = vld [vmem:[%s7837_s1 + $0xf08] ss:$16 sps:$4 sm:$0xff]   ;;  %v5842_v59 = vld [vmem:[%s7837_s1 + $0xf24] ss:$16 sps:$4 sm:$0xff]  }
 0x1a8   :  { %3836 = vmatprep.subr.bf16.mxu0 %v5750_v60  ;;  %4205 = vmatprep.subr.bf16.mxu1 %v5753_v61  ;;  %v5845_v60 = vld [vmem:[%s7837_s1 + $0xf2c] ss:$16 sps:$4 sm:$0xff]   ;;  %v5840_v61 = vld [vmem:[%s7837_s1 + $0xf20] ss:$16 sps:$4 sm:$0xff]  }
 0x1ab   :  { %3837 = vmatpush1.bf16.msra.mxu0 %v5748_v62  ;;  %4206 = vmatpush1.bf16.msra.mxu1 %v5751_v63  ;;  %v5843_v62 = vld [vmem:[%s7837_s1 + $0xf28] ss:$16 sps:$4 sm:$0xff]   ;;  %v5848_v63 = vld [vmem:[%s7837_s1 + $0xf44] ss:$16 sps:$4 sm:$0xff]  }
 0x1ac   :  { %3838 = vmatprep.subr.bf16.mxu0 %v5756_v0  ;;  %4207 = vmatprep.subr.bf16.mxu1 %v5759_v1  ;;  %v5851_v0 = vld [vmem:[%s7837_s1 + $0xf4c] ss:$16 sps:$4 sm:$0xff]   ;;  %v5846_v1 = vld [vmem:[%s7837_s1 + $0xf40] ss:$16 sps:$4 sm:$0xff]  }
 0x1af   :  { %3839 = vmatpush1.bf16.msra.mxu0 %v5754_v2  ;;  %4208 = vmatpush1.bf16.msra.mxu1 %v5757_v3  ;;  %v5849_v2 = vld [vmem:[%s7837_s1 + $0xf48] ss:$16 sps:$4 sm:$0xff]   ;;  %v5854_v3 = vld [vmem:[%s7837_s1 + $0xf64] ss:$16 sps:$4 sm:$0xff]  }
 0x1b0   :  { %3840 = vmatprep.subr.bf16.mxu0 %v5762_v4  ;;  %4209 = vmatprep.subr.bf16.mxu1 %v5765_v5  ;;  %v5857_v4 = vld [vmem:[%s7837_s1 + $0xf6c] ss:$16 sps:$4 sm:$0xff]   ;;  %v5852_v5 = vld [vmem:[%s7837_s1 + $0xf60] ss:$16 sps:$4 sm:$0xff]  }
 0x1b3   :  { %3841 = vmatpush1.bf16.msra.mxu0 %v5760_v6  ;;  %4210 = vmatpush1.bf16.msra.mxu1 %v5763_v7  ;;  %v5855_v6 = vld [vmem:[%s7837_s1 + $0xf68] ss:$16 sps:$4 sm:$0xff]   ;;  %v5860_v7 = vld [vmem:[%s7837_s1 + $0xf84] ss:$16 sps:$4 sm:$0xff]  }
 0x1b4   :  { %3842 = vmatprep.subr.bf16.mxu0 %v5768_v8  ;;  %4211 = vmatprep.subr.bf16.mxu1 %v5771_v9  ;;  %v5863_v8 = vld [vmem:[%s7837_s1 + $0xf8c] ss:$16 sps:$4 sm:$0xff]   ;;  %v5858_v9 = vld [vmem:[%s7837_s1 + $0xf80] ss:$16 sps:$4 sm:$0xff]  }
 0x1b7   :  { %3843 = vmatpush1.bf16.msra.mxu0 %v5766_v10  ;;  %4212 = vmatpush1.bf16.msra.mxu1 %v5769_v12  ;;  %v5861_v10 = vld [vmem:[%s7837_s1 + $0xf88] ss:$16 sps:$4 sm:$0xff]   ;;  %v5866_v12 = vld [vmem:[%s7837_s1 + $0xfa4] ss:$16 sps:$4 sm:$0xff]  }
 0x1b8   :  { %3844 = vmatprep.subr.bf16.mxu0 %v5774_v13  ;;  %4213 = vmatprep.subr.bf16.mxu1 %v5777_v15  ;;  %v5869_v13 = vld [vmem:[%s7837_s1 + $0xfac] ss:$16 sps:$4 sm:$0xff]   ;;  %v5864_v15 = vld [vmem:[%s7837_s1 + $0xfa0] ss:$16 sps:$4 sm:$0xff]  }
 0x1bb   :  { %3845 = vmatpush1.bf16.msra.mxu0 %v5772_v11  ;;  %4214 = vmatpush1.bf16.msra.mxu1 %v5775_v17  ;;  %v5867_v11 = vld [vmem:[%s7837_s1 + $0xfa8] ss:$16 sps:$4 sm:$0xff]   ;;  %v5872_v17 = vld [vmem:[%s7837_s1 + $0xfc4] ss:$16 sps:$4 sm:$0xff]  }
 0x1bc   :  { %3846 = vmatprep.subr.bf16.mxu0 %v5780_v14  ;;  %4215 = vmatprep.subr.bf16.mxu1 %v5783_v19  ;;  %v5875_v14 = vld [vmem:[%s7837_s1 + $0xfcc] ss:$16 sps:$4 sm:$0xff]   ;;  %v5870_v19 = vld [vmem:[%s7837_s1 + $0xfc0] ss:$16 sps:$4 sm:$0xff]  }
 0x1bf   :  { %3847 = vmatpush1.bf16.msra.mxu0 %v5778_v20  ;;  %4216 = vmatpush1.bf16.msra.mxu1 %v5781_v21  ;;  %v5873_v20 = vld [vmem:[%s7837_s1 + $0xfc8] ss:$16 sps:$4 sm:$0xff]   ;;  %v5878_v21 = vld [vmem:[%s7837_s1 + $0xfe4] ss:$16 sps:$4 sm:$0xff]  }
 0x1c0   :  { %3857 = vmatprep.subr.bf16.mxu0 %v5788_v22  ;;  %4226 = vmatprep.subr.bf16.mxu1 %v5791_v23  ;;  %v5881_v22 = vld [vmem:[%s7837_s1 + $0xfec] ss:$16 sps:$4 sm:$0xff]   ;;  %v5876_v23 = vld [vmem:[%s7837_s1 + $0xfe0] ss:$16 sps:$4 sm:$0xff]  }
 0x1c2   :  { %3849 = vmatmul.mubr.bf16.vlgmr.msra.gmra.mrb[0].mxu0 %v4445_v18  ;;  %4218 = vmatmul.mubr.bf16.vlgmr.msra.gmra.mrb[0].mxu1 %v4445_v18  ;;  %v5879_v18 = vld [vmem:[%s7837_s1 + $0xfe8] ss:$16 sps:$4 sm:$0xff]  }
 0x1c3   :  { %3858 = vmatpush1.bf16.msra.mxu0 %v5786_v25  ;;  %4227 = vmatpush1.bf16.msra.mxu1 %v5789_v26  ;;  %v5886_v25 = vld [vmem:[%s7837_s1 + $0x1004] ss:$16 sps:$4 sm:$0xff]   ;;  %v5889_v26 = vld [vmem:[%s7837_s1 + $0x100c] ss:$16 sps:$4 sm:$0xff]  }
 0x1c4   :  { %3859 = vmatprep.subr.bf16.mxu0 %v5794_v16  ;;  %4228 = vmatprep.subr.bf16.mxu1 %v5797_v27  ;;  %v4447_v16 = vcombine.low %v7424_v24, %v7424_v24  ;;  %v7625_v27 = vld [vmem:[%s7838_s0 + $0x40] sm:$0xff] }
 0x1c5   :  { %3889 = vmatprep.mubr.bf16.mxu0 %v4448_v28  ;;  %4258 = vmatprep.mubr.bf16.mxu1 %v4448_v28  ;;  %v5884_v28 = vld [vmem:[%s7837_s1 + $0x1000] ss:$16 sps:$4 sm:$0xff]   ;;  %v5892_v24 = vld [vmem:[%s7837_s1 + $0x1024] ss:$16 sps:$4 sm:$0xff]  }
 0x1c7   :  { %3860 = vmatpush1.bf16.msra.mxu0 %v5792_v29  ;;  %4229 = vmatpush1.bf16.msra.mxu1 %v5795_v30  ;;  %v5887_v29 = vld [vmem:[%s7837_s1 + $0x1008] ss:$16 sps:$4 sm:$0xff]   ;;  %v5895_v30 = vld [vmem:[%s7837_s1 + $0x102c] ss:$16 sps:$4 sm:$0xff]  }
 0x1c8   :  { %3861 = vmatprep.subr.bf16.mxu0 %v5800_v31  ;;  %4230 = vmatprep.subr.bf16.mxu1 %v5803_v32  ;;  %v4450_v31 = vcombine.high %v7625_v27, %v7625_v27  ;;  %v5890_v32 = vld [vmem:[%s7837_s1 + $0x1020] ss:$16 sps:$4 sm:$0xff]  }
 0x1cb   :  { %3862 = vmatpush1.bf16.msra.mxu0 %v5798_v33  ;;  %4231 = vmatpush1.bf16.msra.mxu1 %v5801_v34  ;;  %v5893_v33 = vld [vmem:[%s7837_s1 + $0x1028] ss:$16 sps:$4 sm:$0xff]   ;;  %v5898_v34 = vld [vmem:[%s7837_s1 + $0x1044] ss:$16 sps:$4 sm:$0xff]  }
 0x1cc   :  { %3863 = vmatprep.subr.bf16.mxu0 %v5806_v35  ;;  %4232 = vmatprep.subr.bf16.mxu1 %v5809_v36  ;;  %v5901_v35 = vld [vmem:[%s7837_s1 + $0x104c] ss:$16 sps:$4 sm:$0xff]   ;;  %v5896_v36 = vld [vmem:[%s7837_s1 + $0x1040] ss:$16 sps:$4 sm:$0xff]  }
 0x1cf   :  { %3864 = vmatpush1.bf16.msra.mxu0 %v5804_v37  ;;  %4233 = vmatpush1.bf16.msra.mxu1 %v5807_v38  ;;  %v5899_v37 = vld [vmem:[%s7837_s1 + $0x1048] ss:$16 sps:$4 sm:$0xff]   ;;  %v5904_v38 = vld [vmem:[%s7837_s1 + $0x1064] ss:$16 sps:$4 sm:$0xff]  }
 0x1d0   :  { %3865 = vmatprep.subr.bf16.mxu0 %v5812_v39  ;;  %4234 = vmatprep.subr.bf16.mxu1 %v5815_v40  ;;  %v5907_v39 = vld [vmem:[%s7837_s1 + $0x106c] ss:$16 sps:$4 sm:$0xff]   ;;  %v5902_v40 = vld [vmem:[%s7837_s1 + $0x1060] ss:$16 sps:$4 sm:$0xff]  }
 0x1d3   :  { %3866 = vmatpush1.bf16.msra.mxu0 %v5810_v41  ;;  %4235 = vmatpush1.bf16.msra.mxu1 %v5813_v42  ;;  %v5905_v41 = vld [vmem:[%s7837_s1 + $0x1068] ss:$16 sps:$4 sm:$0xff]   ;;  %v5910_v42 = vld [vmem:[%s7837_s1 + $0x1084] ss:$16 sps:$4 sm:$0xff]  }
 0x1d4   :  { %3867 = vmatprep.subr.bf16.mxu0 %v5818_v43  ;;  %4236 = vmatprep.subr.bf16.mxu1 %v5821_v44  ;;  %v5913_v43 = vld [vmem:[%s7837_s1 + $0x108c] ss:$16 sps:$4 sm:$0xff]   ;;  %v5908_v44 = vld [vmem:[%s7837_s1 + $0x1080] ss:$16 sps:$4 sm:$0xff]  }
 0x1d7   :  { %3868 = vmatpush1.bf16.msra.mxu0 %v5816_v45  ;;  %4237 = vmatpush1.bf16.msra.mxu1 %v5819_v46  ;;  %v5911_v45 = vld [vmem:[%s7837_s1 + $0x1088] ss:$16 sps:$4 sm:$0xff]   ;;  %v5916_v46 = vld [vmem:[%s7837_s1 + $0x10a4] ss:$16 sps:$4 sm:$0xff]  }
 0x1d8   :  { %3869 = vmatprep.subr.bf16.mxu0 %v5824_v47  ;;  %4238 = vmatprep.subr.bf16.mxu1 %v5827_v48  ;;  %v5919_v47 = vld [vmem:[%s7837_s1 + $0x10ac] ss:$16 sps:$4 sm:$0xff]   ;;  %v5914_v48 = vld [vmem:[%s7837_s1 + $0x10a0] ss:$16 sps:$4 sm:$0xff]  }
 0x1db   :  { %3870 = vmatpush1.bf16.msra.mxu0 %v5822_v49  ;;  %4239 = vmatpush1.bf16.msra.mxu1 %v5825_v50  ;;  %v5917_v49 = vld [vmem:[%s7837_s1 + $0x10a8] ss:$16 sps:$4 sm:$0xff]   ;;  %v5922_v50 = vld [vmem:[%s7837_s1 + $0x10c4] ss:$16 sps:$4 sm:$0xff]  }
 0x1dc   :  { %3871 = vmatprep.subr.bf16.mxu0 %v5830_v51  ;;  %4240 = vmatprep.subr.bf16.mxu1 %v5833_v52  ;;  %v5925_v51 = vld [vmem:[%s7837_s1 + $0x10cc] ss:$16 sps:$4 sm:$0xff]   ;;  %v5920_v52 = vld [vmem:[%s7837_s1 + $0x10c0] ss:$16 sps:$4 sm:$0xff]  }
 0x1df   :  { %3872 = vmatpush1.bf16.msra.mxu0 %v5828_v53  ;;  %4241 = vmatpush1.bf16.msra.mxu1 %v5831_v54  ;;  %v5923_v53 = vld [vmem:[%s7837_s1 + $0x10c8] ss:$16 sps:$4 sm:$0xff]   ;;  %v5928_v54 = vld [vmem:[%s7837_s1 + $0x10e4] ss:$16 sps:$4 sm:$0xff]  }
 0x1e0   :  { %3873 = vmatprep.subr.bf16.mxu0 %v5836_v55  ;;  %4242 = vmatprep.subr.bf16.mxu1 %v5839_v56  ;;  %v5931_v55 = vld [vmem:[%s7837_s1 + $0x10ec] ss:$16 sps:$4 sm:$0xff]   ;;  %v5926_v56 = vld [vmem:[%s7837_s1 + $0x10e0] ss:$16 sps:$4 sm:$0xff]  }
 0x1e3   :  { %3874 = vmatpush1.bf16.msra.mxu0 %v5834_v57  ;;  %4243 = vmatpush1.bf16.msra.mxu1 %v5837_v58  ;;  %v5929_v57 = vld [vmem:[%s7837_s1 + $0x10e8] ss:$16 sps:$4 sm:$0xff]   ;;  %v5934_v58 = vld [vmem:[%s7837_s1 + $0x1104] ss:$16 sps:$4 sm:$0xff]  }
 0x1e4   :  { %3875 = vmatprep.subr.bf16.mxu0 %v5842_v59  ;;  %4244 = vmatprep.subr.bf16.mxu1 %v5845_v60  ;;  %v5937_v59 = vld [vmem:[%s7837_s1 + $0x110c] ss:$16 sps:$4 sm:$0xff]   ;;  %v5932_v60 = vld [vmem:[%s7837_s1 + $0x1100] ss:$16 sps:$4 sm:$0xff]  }
 0x1e7   :  { %3876 = vmatpush1.bf16.msra.mxu0 %v5840_v61  ;;  %4245 = vmatpush1.bf16.msra.mxu1 %v5843_v62  ;;  %v5935_v61 = vld [vmem:[%s7837_s1 + $0x1108] ss:$16 sps:$4 sm:$0xff]   ;;  %v5940_v62 = vld [vmem:[%s7837_s1 + $0x1124] ss:$16 sps:$4 sm:$0xff]  }
 0x1e8   :  { %3877 = vmatprep.subr.bf16.mxu0 %v5848_v63  ;;  %4246 = vmatprep.subr.bf16.mxu1 %v5851_v0  ;;  %v5943_v63 = vld [vmem:[%s7837_s1 + $0x112c] ss:$16 sps:$4 sm:$0xff]   ;;  %v5938_v0 = vld [vmem:[%s7837_s1 + $0x1120] ss:$16 sps:$4 sm:$0xff]  }
 0x1eb   :  { %3878 = vmatpush1.bf16.msra.mxu0 %v5846_v1  ;;  %4247 = vmatpush1.bf16.msra.mxu1 %v5849_v2  ;;  %v5941_v1 = vld [vmem:[%s7837_s1 + $0x1128] ss:$16 sps:$4 sm:$0xff]   ;;  %v5946_v2 = vld [vmem:[%s7837_s1 + $0x1144] ss:$16 sps:$4 sm:$0xff]  }
 0x1ec   :  { %3879 = vmatprep.subr.bf16.mxu0 %v5854_v3  ;;  %4248 = vmatprep.subr.bf16.mxu1 %v5857_v4  ;;  %v5949_v3 = vld [vmem:[%s7837_s1 + $0x114c] ss:$16 sps:$4 sm:$0xff]   ;;  %v5944_v4 = vld [vmem:[%s7837_s1 + $0x1140] ss:$16 sps:$4 sm:$0xff]  }
 0x1ef   :  { %3880 = vmatpush1.bf16.msra.mxu0 %v5852_v5  ;;  %4249 = vmatpush1.bf16.msra.mxu1 %v5855_v6  ;;  %v5947_v5 = vld [vmem:[%s7837_s1 + $0x1148] ss:$16 sps:$4 sm:$0xff]   ;;  %v5952_v6 = vld [vmem:[%s7837_s1 + $0x1164] ss:$16 sps:$4 sm:$0xff]  }
 0x1f0   :  { %3881 = vmatprep.subr.bf16.mxu0 %v5860_v7  ;;  %4250 = vmatprep.subr.bf16.mxu1 %v5863_v8  ;;  %v5955_v7 = vld [vmem:[%s7837_s1 + $0x116c] ss:$16 sps:$4 sm:$0xff]   ;;  %v5950_v8 = vld [vmem:[%s7837_s1 + $0x1160] ss:$16 sps:$4 sm:$0xff]  }
 0x1f3   :  { %3882 = vmatpush1.bf16.msra.mxu0 %v5858_v9  ;;  %4251 = vmatpush1.bf16.msra.mxu1 %v5861_v10  ;;  %v5953_v9 = vld [vmem:[%s7837_s1 + $0x1168] ss:$16 sps:$4 sm:$0xff]   ;;  %v5958_v10 = vld [vmem:[%s7837_s1 + $0x1184] ss:$16 sps:$4 sm:$0xff]  }
 0x1f4   :  { %3883 = vmatprep.subr.bf16.mxu0 %v5866_v12  ;;  %4252 = vmatprep.subr.bf16.mxu1 %v5869_v13  ;;  %v5961_v12 = vld [vmem:[%s7837_s1 + $0x118c] ss:$16 sps:$4 sm:$0xff]   ;;  %v5956_v13 = vld [vmem:[%s7837_s1 + $0x1180] ss:$16 sps:$4 sm:$0xff]  }
 0x1f7   :  { %3884 = vmatpush1.bf16.msra.mxu0 %v5864_v15  ;;  %4253 = vmatpush1.bf16.msra.mxu1 %v5867_v11  ;;  %v5959_v15 = vld [vmem:[%s7837_s1 + $0x1188] ss:$16 sps:$4 sm:$0xff]   ;;  %v5964_v11 = vld [vmem:[%s7837_s1 + $0x11a4] ss:$16 sps:$4 sm:$0xff]  }
 0x1f8   :  { %3885 = vmatprep.subr.bf16.mxu0 %v5872_v17  ;;  %4254 = vmatprep.subr.bf16.mxu1 %v5875_v14  ;;  %v5967_v17 = vld [vmem:[%s7837_s1 + $0x11ac] ss:$16 sps:$4 sm:$0xff]   ;;  %v5962_v14 = vld [vmem:[%s7837_s1 + $0x11a0] ss:$16 sps:$4 sm:$0xff]  }
 0x1fb   :  { %3886 = vmatpush1.bf16.msra.mxu0 %v5870_v19  ;;  %4255 = vmatpush1.bf16.msra.mxu1 %v5873_v20  ;;  %v5965_v19 = vld [vmem:[%s7837_s1 + $0x11a8] ss:$16 sps:$4 sm:$0xff]   ;;  %v5970_v20 = vld [vmem:[%s7837_s1 + $0x11c4] ss:$16 sps:$4 sm:$0xff]  }
 0x1fc   :  { %3887 = vmatprep.subr.bf16.mxu0 %v5878_v21  ;;  %4256 = vmatprep.subr.bf16.mxu1 %v5881_v22  ;;  %v5973_v21 = vld [vmem:[%s7837_s1 + $0x11cc] ss:$16 sps:$4 sm:$0xff]   ;;  %v5968_v22 = vld [vmem:[%s7837_s1 + $0x11c0] ss:$16 sps:$4 sm:$0xff]  }
 0x1ff   :  { %3888 = vmatpush1.bf16.msra.mxu0 %v5876_v23  ;;  %4257 = vmatpush1.bf16.msra.mxu1 %v5879_v18  ;;  %v5971_v23 = vld [vmem:[%s7837_s1 + $0x11c8] ss:$16 sps:$4 sm:$0xff]   ;;  %v5976_v18 = vld [vmem:[%s7837_s1 + $0x11e4] ss:$16 sps:$4 sm:$0xff]  }
 0x200   :  { %3898 = vmatprep.subr.bf16.mxu0 %v5886_v25  ;;  %4267 = vmatprep.subr.bf16.mxu1 %v5889_v26  ;;  %v5979_v25 = vld [vmem:[%s7837_s1 + $0x11ec] ss:$16 sps:$4 sm:$0xff]   ;;  %v5974_v26 = vld [vmem:[%s7837_s1 + $0x11e0] ss:$16 sps:$4 sm:$0xff]  }
 0x202   :  { %3890 = vmatmul.mubr.bf16.vlgmr.msra.gmra.mrb[0].mxu0 %v4447_v16  ;;  %4259 = vmatmul.mubr.bf16.vlgmr.msra.gmra.mrb[0].mxu1 %v4447_v16  ;;  %v5977_v16 = vld [vmem:[%s7837_s1 + $0x11e8] ss:$16 sps:$4 sm:$0xff]  }
 0x203   :  { %3899 = vmatpush1.bf16.msra.mxu0 %v5884_v28  ;;  %4268 = vmatpush1.bf16.msra.mxu1 %v5887_v29  ;;  %v4449_v28 = vcombine.low %v7625_v27, %v7625_v27  ;;  %v607_v29 = vlaneseq }
 0x204   :  { %3900 = vmatprep.subr.bf16.mxu0 %v5892_v24  ;;  %4269 = vmatprep.subr.bf16.mxu1 %v5895_v30 }
 0x205   :  { %3930 = vmatprep.mubr.bf16.mxu0 %v4450_v31  ;;  %4299 = vmatprep.mubr.bf16.mxu1 %v4450_v31  ;;  %v608_v24 = vshrl.u32 %v607_v29, 7 }
 0x207   :  { %3901 = vmatpush1.bf16.msra.mxu0 %v5890_v32  ;;  %4270 = vmatpush1.bf16.msra.mxu1 %v5893_v33  ;;  %v7817_v30 = vsub.s32 0, %v608_v24  ;;  %v617_v31 = vsub.s32 2, %v608_v24  ;;  %v605_v32 = vld [vmem:[%s7839_s2] sm:$0xf]  ;;  %v613_v33 = vsub.s32 1, %v608_v24 }
 0x208   :  { %3902 = vmatprep.subr.bf16.mxu0 %v5898_v34  ;;  %4271 = vmatprep.subr.bf16.mxu1 %v5901_v35  ;;  %v621_v34 = vsub.s32 3, %v608_v24 }
 0x209   :  { %v610_v35 = vrot.slane %v605_v32, %v7817_v30 }
 0x20a   :  { %v622_v27 = vrot.slane %v605_v32, %v621_v34 }
 0x20b   :  { %3903 = vmatpush1.bf16.msra.mxu0 %v5896_v36  ;;  %4272 = vmatpush1.bf16.msra.mxu1 %v5899_v37  ;;  %v618_v36 = vrot.slane %v605_v32, %v617_v31  ;;  %v614_v37 = vrot.slane %v605_v32, %v613_v33 }
 0x20c   :  { %3904 = vmatprep.subr.bf16.mxu0 %v5904_v38  ;;  %4273 = vmatprep.subr.bf16.mxu1 %v5907_v39 }
 0x20f   :  { %3905 = vmatpush1.bf16.msra.mxu0 %v5902_v40  ;;  %4274 = vmatpush1.bf16.msra.mxu1 %v5905_v41 }
 0x210   :  { %3906 = vmatprep.subr.bf16.mxu0 %v5910_v42  ;;  %4275 = vmatprep.subr.bf16.mxu1 %v5913_v43 }
 0x213   :  { %3907 = vmatpush1.bf16.msra.mxu0 %v5908_v44  ;;  %4276 = vmatpush1.bf16.msra.mxu1 %v5911_v45 }
 0x214   :  { %3908 = vmatprep.subr.bf16.mxu0 %v5916_v46  ;;  %4277 = vmatprep.subr.bf16.mxu1 %v5919_v47 }
 0x217   :  { %3909 = vmatpush1.bf16.msra.mxu0 %v5914_v48  ;;  %4278 = vmatpush1.bf16.msra.mxu1 %v5917_v49 }
 0x218   :  { %3910 = vmatprep.subr.bf16.mxu0 %v5922_v50  ;;  %4279 = vmatprep.subr.bf16.mxu1 %v5925_v51 }
 0x21b   :  { %3911 = vmatpush1.bf16.msra.mxu0 %v5920_v52  ;;  %4280 = vmatpush1.bf16.msra.mxu1 %v5923_v53 }
 0x21c   :  { %3912 = vmatprep.subr.bf16.mxu0 %v5928_v54  ;;  %4281 = vmatprep.subr.bf16.mxu1 %v5931_v55 }
 0x21f   :  { %3913 = vmatpush1.bf16.msra.mxu0 %v5926_v56  ;;  %4282 = vmatpush1.bf16.msra.mxu1 %v5929_v57 }
 0x220   :  { %3914 = vmatprep.subr.bf16.mxu0 %v5934_v58  ;;  %4283 = vmatprep.subr.bf16.mxu1 %v5937_v59 }
 0x223   :  { %3915 = vmatpush1.bf16.msra.mxu0 %v5932_v60  ;;  %4284 = vmatpush1.bf16.msra.mxu1 %v5935_v61 }
 0x224   :  { %3916 = vmatprep.subr.bf16.mxu0 %v5940_v62  ;;  %4285 = vmatprep.subr.bf16.mxu1 %v5943_v63 }
 0x227   :  { %3917 = vmatpush1.bf16.msra.mxu0 %v5938_v0  ;;  %4286 = vmatpush1.bf16.msra.mxu1 %v5941_v1 }
 0x228   :  { %3918 = vmatprep.subr.bf16.mxu0 %v5946_v2  ;;  %4287 = vmatprep.subr.bf16.mxu1 %v5949_v3 }
 0x22b   :  { %3919 = vmatpush1.bf16.msra.mxu0 %v5944_v4  ;;  %4288 = vmatpush1.bf16.msra.mxu1 %v5947_v5 }
 0x22c   :  { %3920 = vmatprep.subr.bf16.mxu0 %v5952_v6  ;;  %4289 = vmatprep.subr.bf16.mxu1 %v5955_v7 }
 0x22f   :  { %3921 = vmatpush1.bf16.msra.mxu0 %v5950_v8  ;;  %4290 = vmatpush1.bf16.msra.mxu1 %v5953_v9 }
 0x230   :  { %3922 = vmatprep.subr.bf16.mxu0 %v5958_v10  ;;  %4291 = vmatprep.subr.bf16.mxu1 %v5961_v12 }
 0x233   :  { %3923 = vmatpush1.bf16.msra.mxu0 %v5956_v13  ;;  %4292 = vmatpush1.bf16.msra.mxu1 %v5959_v15 }
 0x234   :  { %3924 = vmatprep.subr.bf16.mxu0 %v5964_v11  ;;  %4293 = vmatprep.subr.bf16.mxu1 %v5967_v17 }
 0x237   :  { %3925 = vmatpush1.bf16.msra.mxu0 %v5962_v14  ;;  %4294 = vmatpush1.bf16.msra.mxu1 %v5965_v19 }
 0x238   :  { %3926 = vmatprep.subr.bf16.mxu0 %v5970_v20  ;;  %4295 = vmatprep.subr.bf16.mxu1 %v5973_v21 }
 0x23b   :  { %3927 = vmatpush1.bf16.msra.mxu0 %v5968_v22  ;;  %4296 = vmatpush1.bf16.msra.mxu1 %v5971_v23 }
 0x23c   :  { %3928 = vmatprep.subr.bf16.mxu0 %v5976_v18  ;;  %4297 = vmatprep.subr.bf16.mxu1 %v5979_v25 }
 0x23f   :  { %3929 = vmatpush1.bf16.msra.mxu0 %v5974_v26  ;;  %4298 = vmatpush1.bf16.msra.mxu1 %v5977_v16 }
 0x242   :  { %3931 = vmatmul.mubr.bf16.vlgmr.msra.gmra.mrb[0].mxu0 %v4449_v28  ;;  %4300 = vmatmul.mubr.bf16.vlgmr.msra.gmra.mrb[0].mxu1 %v4449_v28 }
 0x315   :  { %v3932_v38 = vpop.f32.mrb[0].mxu0  ;;  %v4301_v39 = vpop.f32.mrb[0].mxu1 }
 0x316   :  { %v5032_v40 = vadd.f32 %v3932_v38, %v610_v35  ;;  %v5034_v41 = vadd.f32 %v4301_v39, %v618_v36  ;;  %v3934_v42 = vpop.f32.mrb[1].mxu0  ;;  %v4303_v43 = vpop.f32.mrb[1].mxu1 }
 0x317   :  { %v5033_v44 = vadd.f32 %v3934_v42, %v614_v37  ;;  %v5035_v45 = vadd.f32 %v4303_v43, %v622_v27  ;;  %v3936_v46 = vpop.f32.mrb[2].mxu0  ;;  %v4305_v47 = vpop.f32.mrb[2].mxu1 }
 0x318   :  { %v4308_v48 = vrot.slane %v5032_v40, 4  ;;  %v4320_v49 = vrot.slane %v5034_v41, 4  ;;  %v3937_v50 = vpop.f32.mrb[3].mxu0  ;;  %v4306_v51 = vpop.f32.mrb[3].mxu1 }
 0x319   :  { %v4314_v52 = vrot.slane %v5033_v44, 4  ;;  %v4326_v53 = vrot.slane %v5035_v45, 4 }
 0x31a   :  { %v4309_v54 = vadd.f32 %v5032_v40, %v4308_v48  ;;  %v4321_v55 = vadd.f32 %v5034_v41, %v4320_v49 }
 0x31b   :  { %v4315_v56 = vadd.f32 %v5033_v44, %v4314_v52  ;;  %v4327_v57 = vadd.f32 %v5035_v45, %v4326_v53  ;;  %v4378_v53 = vld [vmem:[%s7840_s3] sm:$0x1] }
 0x31c   :  { %v4310_v58 = vrot.slane %v4309_v54, 2  ;;  %v4322_v59 = vrot.slane %v4321_v55, 2 }
 0x31d   :  { %v4316_v60 = vrot.slane %v4315_v56, 2  ;;  %v4328_v61 = vrot.slane %v4327_v57, 2 }
 0x31e   :  { %v4311_v62 = vadd.f32 %v4310_v58, %v4309_v54  ;;  %v4323_v63 = vadd.f32 %v4322_v59, %v4321_v55 }
 0x31f   :  { %v4317_v0 = vadd.f32 %v4316_v60, %v4315_v56  ;;  %v4329_v1 = vadd.f32 %v4328_v61, %v4327_v57  ;;  %v5027_v57 = vld [vmem:[%s7841_s4] ss:$0 sm:$0xff] }
 0x320   :  { %v4312_v2 = vrot.slane %v4311_v62, 1  ;;  %v4324_v3 = vrot.slane %v4323_v63, 1 }
 0x321   :  { %v4318_v4 = vrot.slane %v4317_v0, 1  ;;  %v4330_v7 = vrot.slane %v4329_v1, 1 }
 0x322   :  { %v4313_v5 = vadd.f32 %v4312_v2, %v4311_v62  ;;  %v4325_v8 = vadd.f32 %v4324_v3, %v4323_v63 }
 0x323   :  { %v4319_v6 = vadd.f32 %v4318_v4, %v4317_v0  ;;  %v4331_v10 = vadd.f32 %v4330_v7, %v4329_v1 }
 0x325   :  { %v4333_v9 = vadd.f32 %v4319_v6, %v4313_v5 }
 0x327   :  { %v4334_v12 = vadd.f32 %v4333_v9, %v4325_v8 }
 0x329   :  { %v4335_v13 = vadd.f32 %v4334_v12, %v4331_v10 }
 0x32b   :  { %v4336_v15 = vmul.f32 0.03125, %v4335_v13 }
 0x32d   :  { %v4340_v11 = vrot.slane %v4336_v15, %v7817_v30 }
 0x32f   :  { %v4341_v17 = vsub.f32 %v5032_v40, %v4340_v11  ;;  %v4342_v14 = vsub.f32 %v5033_v44, %v4340_v11  ;;  %v4343_v19 = vsub.f32 %v5034_v41, %v4340_v11  ;;  %v4344_v20 = vsub.f32 %v5035_v45, %v4340_v11 }
 0x331   :  { %v4345_v21 = vmul.f32 %v4341_v17, %v4341_v17  ;;  %v4346_v22 = vmul.f32 %v4342_v14, %v4342_v14  ;;  %v4347_v23 = vmul.f32 %v4343_v19, %v4343_v19  ;;  %v4348_v18 = vmul.f32 %v4344_v20, %v4344_v20 }
 0x333   :  { %v4349_v25 = vrot.slane %v4345_v21, 4  ;;  %v4355_v26 = vrot.slane %v4346_v22, 4  ;;  %v4361_v16 = vrot.slane %v4347_v23, 4  ;;  %v4367_v28 = vrot.slane %v4348_v18, 4 }
 0x335   :  { %v4350_v29 = vadd.f32 %v4349_v25, %v4345_v21  ;;  %v4356_v24 = vadd.f32 %v4355_v26, %v4346_v22  ;;  %v4362_v31 = vadd.f32 %v4361_v16, %v4347_v23  ;;  %v4368_v32 = vadd.f32 %v4367_v28, %v4348_v18 }
 0x337   :  { %v4351_v33 = vrot.slane %v4350_v29, 2  ;;  %v4357_v34 = vrot.slane %v4356_v24, 2  ;;  %v4363_v35 = vrot.slane %v4362_v31, 2  ;;  %v4369_v36 = vrot.slane %v4368_v32, 2 }
 0x339   :  { %v4352_v37 = vadd.f32 %v4351_v33, %v4350_v29  ;;  %v4358_v27 = vadd.f32 %v4357_v34, %v4356_v24  ;;  %v4364_v38 = vadd.f32 %v4363_v35, %v4362_v31  ;;  %v4370_v39 = vadd.f32 %v4369_v36, %v4368_v32 }
 0x33b   :  { %v4353_v40 = vrot.slane %v4352_v37, 1  ;;  %v4359_v41 = vrot.slane %v4358_v27, 1  ;;  %v4365_v42 = vrot.slane %v4364_v38, 1  ;;  %v4371_v45 = vrot.slane %v4370_v39, 1 }
 0x33d   :  { %v4354_v43 = vadd.f32 %v4353_v40, %v4352_v37  ;;  %v4360_v44 = vadd.f32 %v4359_v41, %v4358_v27  ;;  %v4366_v46 = vadd.f32 %v4365_v42, %v4364_v38  ;;  %v4372_v48 = vadd.f32 %v4371_v45, %v4370_v39 }
 0x33f   :  { %v4374_v47 = vadd.f32 %v4360_v44, %v4354_v43 }
 0x341   :  { %v4375_v49 = vadd.f32 %v4374_v47, %v4366_v46 }
 0x343   :  { %v4376_v50 = vadd.f32 %v4375_v49, %v4372_v48 }
 0x345   :  { %v4377_v51 = vmul.f32 0.03125, %v4376_v50 }
 0x347   :  { %v4379_v52 = vadd.f32 1e-05, %v4377_v51 }
 0x349   :  { %5982 = vrsqrt.f32 %v4379_v52 }
 0x353   :  { %v5983_v54 = vpop.eup %5982 }
 0x354   :  { %v4381_v55 = vmul.f32 %v5983_v54, %v4378_v53 }
 0x356   :  { %v4385_v56 = vrot.slane %v4381_v55, %v7817_v30 }
 0x358   :  { %v4386_v58 = vmul.f32 %v4385_v56, %v4341_v17  ;;  %v4387_v59 = vmul.f32 %v4385_v56, %v4342_v14  ;;  %v4388_v60 = vmul.f32 %v4385_v56, %v4343_v19  ;;  %v4389_v61 = vmul.f32 %v4385_v56, %v4344_v20 }
 0x35a   :  { %v4395_v62 = vadd.f32 %v5027_v57, %v4386_v58  ;;  %v4396_v63 = vadd.f32 %v5027_v57, %v4387_v59  ;;  %v4397_v0 = vadd.f32 %v5027_v57, %v4388_v60  ;;  %v4398_v1 = vadd.f32 %v5027_v57, %v4389_v61 }
 0x35c   :  { %vm4399_vm0 = vcmp.ge.f32.partialorder %v4395_v62, 0.0  ;;  %vm4400_vm1 = vcmp.ge.f32.partialorder %v4396_v63, 0.0  ;;  %vm4401_vm2 = vcmp.ge.f32.partialorder %v4397_v0, 0.0  ;;  %vm4402_vm3 = vcmp.ge.f32.partialorder %v4398_v1, 0.0 }
 0x35d   :  { %v4403_v2 = vmul.f32 0.2, %v4395_v62  ;;  %v4404_v3 = vmul.f32 0.2, %v4396_v63  ;;  %v4405_v4 = vmul.f32 0.2, %v4397_v0 }
 0x35e   :  { %v4406_v30 = vmul.f32 0.2, %v4398_v1 }
 0x35f   :  { %v4407_v5 = vsel %vm4399_vm0, %v4395_v62, %v4403_v2  ;;  %v4408_v6 = vsel %vm4400_vm1, %v4396_v63, %v4404_v3  ;;  %v4409_v7 = vsel %vm4401_vm2, %v4397_v0, %v4405_v4 }
 0x360   :  { %v4410_v8 = vsel %vm4402_vm3, %v4398_v1, %v4406_v30  ;;  %v5030_v9 = vpack.c.bf16 %v4408_v6, %v4407_v5 }
 0x361   :  { %v5031_v10 = vpack.c.bf16 %v4410_v8, %v4409_v7 }
 0x362   :  { %4427 = vst [vmem:[%s7842_s5] sm:$0xff] %v5030_v9 }
 0x363   :  { %4428 = vst [vmem:[%s7842_s5 + $0x8] sm:$0xff] %v5031_v10 }

// kernel: my_autoencoder_forward.14
= control target key start
LH: loop header
LB: loop body
LE: loop exit
PB: predicated region body
PF: predicated region fallthrough
CT: control target
= control target key end

     0   :  { %vm564_vm0 = vcmask 523264   ;;  %s1649_s20 = smov 64   ;;  %vm926_vm1 = vcmask 261120   ;;  %vm929_vm2 = vcmask 785408   ;;  %s2181_s1 = inlined_call_operand.vmem [shape: bf16[576,128], index: 1, kind: input, shape index: {}]   ;;  %s2182_s0 = inlined_call_operand.vmem [shape: bf16[128,576], index: 0, kind: input, shape index: {}]   ;;  %s2183_s2 = inlined_call_operand.vmem [shape: f32[1,128], index: 2, kind: input, shape index: {}]   ;;  %s2184_s4 = inlined_call_operand.vmem [shape: f32[1,32], index: 4, kind: input, shape index: {}]   ;;  %s2185_s3 = inlined_call_operand.vmem [shape: f32[1,32], index: 3, kind: input, shape index: {}]   ;;  %s2186_s5 = inlined_call_operand.vmem [shape: bf16[128,128], index: 5, kind: output, shape index: {}]  }
   0x1   :  { %v1553_v0 = vld [vmem:[%s2181_s1 + $0x40] sm:$0xff]   ;;  %v1557_v4 = vld [vmem:[%s2181_s1 + $0x48] sm:$0xff]   ;;  %v1561_v8 = vld [vmem:[%s2181_s1 + $0x50] sm:$0xff]  }
   0x2   :  { %v1554_v1 = vld [vmem:[%s2181_s1 + $0xc0] sm:$0xff]   ;;  %1378 = vmatprep.subr.bf16.mxu0 %v1553_v0  ;;  %v1558_v5 = vld [vmem:[%s2181_s1 + $0xc8] sm:$0xff]   ;;  %v1562_v9 = vld [vmem:[%s2181_s1 + $0xd0] sm:$0xff]  }
   0x3   :  { %v1555_v2 = vld [vmem:[%s2181_s1] sm:$0xff]   ;;  %1442 = vmatprep.subr.bf16.mxu1 %v1554_v1  ;;  %v1559_v6 = vld [vmem:[%s2181_s1 + $0x8] sm:$0xff]   ;;  %v1563_v10 = vld [vmem:[%s2181_s1 + $0x10] sm:$0xff]  }
   0x4   :  { %v1556_v3 = vld [vmem:[%s2181_s1 + $0x80] sm:$0xff]   ;;  %1379 = vmatpush3.bf16.msra.mxu0 %v1555_v2  ;;  %v1560_v7 = vld [vmem:[%s2181_s1 + $0x88] sm:$0xff]   ;;  %v1564_v11 = vld [vmem:[%s2181_s1 + $0x90] sm:$0xff]  }
   0x5   :  { %1443 = vmatpush3.bf16.msra.mxu1 %v1556_v3  ;;  %1380 = vmatprep.subr.bf16.mxu0 %v1557_v4  ;;  %v1565_v12 = vld [vmem:[%s2181_s1 + $0x58] sm:$0xff]   ;;  %v1569_v16 = vld [vmem:[%s2181_s1 + $0x60] sm:$0xff]   ;;  %v1573_v20 = vld [vmem:[%s2181_s1 + $0x68] sm:$0xff]  }
   0x6   :  { %1444 = vmatprep.subr.bf16.mxu1 %v1558_v5  ;;  %v1566_v13 = vld [vmem:[%s2181_s1 + $0xd8] sm:$0xff]   ;;  %v1570_v17 = vld [vmem:[%s2181_s1 + $0xe0] sm:$0xff]   ;;  %v1574_v21 = vld [vmem:[%s2181_s1 + $0xe8] sm:$0xff]  }
   0x7   :  { %v1567_v14 = vld [vmem:[%s2181_s1 + $0x18] sm:$0xff]   ;;  %v1571_v18 = vld [vmem:[%s2181_s1 + $0x20] sm:$0xff]   ;;  %v1575_v22 = vld [vmem:[%s2181_s1 + $0x28] sm:$0xff]  }
   0x8   :  { %1381 = vmatpush3.bf16.msra.mxu0 %v1559_v6  ;;  %v1568_v15 = vld [vmem:[%s2181_s1 + $0x98] sm:$0xff]   ;;  %v1572_v19 = vld [vmem:[%s2181_s1 + $0xa0] sm:$0xff]   ;;  %v1576_v23 = vld [vmem:[%s2181_s1 + $0xa8] sm:$0xff]  }
   0x9   :  { %1445 = vmatpush3.bf16.msra.mxu1 %v1560_v7  ;;  %1382 = vmatprep.subr.bf16.mxu0 %v1561_v8  ;;  %v1577_v24 = vld [vmem:[%s2181_s1 + $0x70] sm:$0xff]   ;;  %v1581_v28 = vld [vmem:[%s2181_s1 + $0x78] sm:$0xff]   ;;  %v1590_v35 = vld [vmem:[%s2182_s0 + $0xc] ss:$20 sps:$4 sm:$0xff]  }
   0xa   :  { %1446 = vmatprep.subr.bf16.mxu1 %v1562_v9  ;;  %v1578_v25 = vld [vmem:[%s2181_s1 + $0xf0] sm:$0xff]   ;;  %v1582_v29 = vld [vmem:[%s2181_s1 + $0xf8] sm:$0xff]   ;;  %v1591_v36 = vld [vmem:[%s2181_s1 + $0x100] sm:$0xff]   ;;  %718 = vmatprep.mubr.bf16.mxu1 %v1590_v35 }
   0xb   :  { %v1579_v26 = vld [vmem:[%s2181_s1 + $0x30] sm:$0xff]   ;;  %v1583_v30 = vld [vmem:[%s2181_s1 + $0x38] sm:$0xff]   ;;  %v1592_v37 = vld [vmem:[%s2182_s0 + $0x2c] ss:$20 sps:$4 sm:$0xff]  }
   0xc   :  { %1383 = vmatpush3.bf16.msra.mxu0 %v1563_v10  ;;  %v1580_v27 = vld [vmem:[%s2181_s1 + $0xb0] sm:$0xff]   ;;  %v1584_v31 = vld [vmem:[%s2181_s1 + $0xb8] sm:$0xff]   ;;  %v1604_v42 = vld [vmem:[%s2181_s1 + $0x108] sm:$0xff]  }
   0xd   :  { %1447 = vmatpush3.bf16.msra.mxu1 %v1564_v11  ;;  %1384 = vmatprep.subr.bf16.mxu0 %v1565_v12  ;;  %v1585_v32 = vld [vmem:[%s2182_s0] ss:$20 sps:$4 sm:$0xff]   ;;  %v1587_v33 = vld [vmem:[%s2182_s0 + $0x4] ss:$20 sps:$4 sm:$0xff]   ;;  %v1588_v34 = vld [vmem:[%s2182_s0 + $0x8] ss:$20 sps:$4 sm:$0xff]  }
   0xe   :  { %1448 = vmatprep.subr.bf16.mxu1 %v1566_v13  ;;  %621 = vmatprep.mubr.bf16.mxu0 %v1587_v33  ;;  %v1594_v38 = vld [vmem:[%s2182_s0 + $0x34] ss:$20 sps:$4 sm:$0xff]   ;;  %v1597_v40 = vld [vmem:[%s2182_s0 + $0x30] ss:$20 sps:$4 sm:$0xff]   ;;  %v1603_v45 = vld [vmem:[%s2182_s0 + $0x58] ss:$20 sps:$4 sm:$0xff]  }
   0xf   :  { %v1596_v39 = vld [vmem:[%s2182_s0 + $0x28] ss:$20 sps:$4 sm:$0xff]   ;;  %v1602_v44 = vld [vmem:[%s2182_s0 + $0x50] ss:$20 sps:$4 sm:$0xff]   ;;  %v1609_v50 = vld [vmem:[%s2182_s0 + $0x78] ss:$20 sps:$4 sm:$0xff]  }
  0x10   :  { %1385 = vmatpush3.bf16.msra.mxu0 %v1567_v14  ;;  %v1598_v41 = vld [vmem:[%s2182_s0 + $0x54] ss:$20 sps:$4 sm:$0xff]   ;;  %v1600_v43 = vld [vmem:[%s2182_s0 + $0x5c] ss:$20 sps:$4 sm:$0xff]   ;;  %v1607_v48 = vld [vmem:[%s2182_s0 + $0x84] ss:$20 sps:$4 sm:$0xff]  }
  0x11   :  { %1449 = vmatpush3.bf16.msra.mxu1 %v1568_v15  ;;  %1386 = vmatprep.subr.bf16.mxu0 %v1569_v16  ;;  %v1617_v46 = vld [vmem:[%s2181_s1 + $0x110] sm:$0xff]   ;;  %v1630_v49 = vld [vmem:[%s2181_s1 + $0x118] sm:$0xff]   ;;  %v1613_v53 = vld [vmem:[%s2182_s0 + $0xac] ss:$20 sps:$4 sm:$0xff]  }
  0x12   :  { %1450 = vmatprep.subr.bf16.mxu1 %v1570_v17  ;;  %v1605_v47 = vld [vmem:[%s2182_s0 + $0x7c] ss:$20 sps:$4 sm:$0xff]   ;;  %v1610_v51 = vld [vmem:[%s2182_s0 + $0x80] ss:$20 sps:$4 sm:$0xff]   ;;  %v1611_v52 = vld [vmem:[%s2182_s0 + $0xa4] ss:$20 sps:$4 sm:$0xff]  }
  0x13   :  { %v1615_v54 = vld [vmem:[%s2182_s0 + $0xa0] ss:$20 sps:$4 sm:$0xff]   ;;  %v1616_v55 = vld [vmem:[%s2182_s0 + $0xa8] ss:$20 sps:$4 sm:$0xff]   ;;  %v1623_v59 = vld [vmem:[%s2182_s0 + $0xd0] ss:$20 sps:$4 sm:$0xff]  }
  0x14   :  { %1387 = vmatpush3.bf16.msra.mxu0 %v1571_v18  ;;  %v1618_v56 = vld [vmem:[%s2182_s0 + $0xcc] ss:$20 sps:$4 sm:$0xff]   ;;  %v1620_v57 = vld [vmem:[%s2182_s0 + $0xd4] ss:$20 sps:$4 sm:$0xff]   ;;  %v1626_v61 = vld [vmem:[%s2182_s0 + $0xfc] ss:$20 sps:$4 sm:$0xff]  }
  0x15   :  { %1451 = vmatpush3.bf16.msra.mxu1 %v1572_v19  ;;  %1388 = vmatprep.subr.bf16.mxu0 %v1573_v20  ;;  %v1622_v58 = vld [vmem:[%s2182_s0 + $0xc8] ss:$20 sps:$4 sm:$0xff]   ;;  %v1628_v62 = vld [vmem:[%s2182_s0 + $0xf0] ss:$20 sps:$4 sm:$0xff]   ;;  %v1629_v63 = vld [vmem:[%s2182_s0 + $0xf8] ss:$20 sps:$4 sm:$0xff]  }
  0x16   :  { %1452 = vmatprep.subr.bf16.mxu1 %v1574_v21  ;;  %v1624_v60 = vld [vmem:[%s2182_s0 + $0xf4] ss:$20 sps:$4 sm:$0xff]   ;;  %v1631_v0 = vld [vmem:[%s2182_s0 + $0x11c] ss:$20 sps:$4 sm:$0xff]   ;;  %v1633_v1 = vld [vmem:[%s2182_s0 + $0x124] ss:$20 sps:$4 sm:$0xff]  }
  0x17   :  { %v1635_v2 = vld [vmem:[%s2182_s0 + $0x118] ss:$20 sps:$4 sm:$0xff]   ;;  %v1636_v3 = vld [vmem:[%s2182_s0 + $0x120] ss:$20 sps:$4 sm:$0xff]   ;;  %v1637_v4 = vld [vmem:[%s2182_s0 + $0x10] ss:$20 sps:$4 sm:$0xff]  }
  0x18   :  { %1389 = vmatpush3.bf16.msra.mxu0 %v1575_v22  ;;  %v1638_v5 = vld [vmem:[%s2182_s0 + $0xb0] ss:$20 sps:$4 sm:$0xff]   ;;  %v1639_v6 = vld [vmem:[%s2182_s0 + $0x38] ss:$20 sps:$4 sm:$0xff]   ;;  %v1641_v8 = vld [vmem:[%s2182_s0 + $0x60] ss:$20 sps:$4 sm:$0xff]  }
  0x19   :  { %1453 = vmatpush3.bf16.msra.mxu1 %v1576_v23  ;;  %1390 = vmatprep.subr.bf16.mxu0 %v1577_v24  ;;  %v1640_v7 = vld [vmem:[%s2182_s0 + $0xd8] ss:$20 sps:$4 sm:$0xff]   ;;  %v1642_v9 = vld [vmem:[%s2182_s0 + $0x100] ss:$20 sps:$4 sm:$0xff]   ;;  %v1643_v10 = vld [vmem:[%s2182_s0 + $0x88] ss:$20 sps:$4 sm:$0xff]  }
  0x1a   :  { %1454 = vmatprep.subr.bf16.mxu1 %v1578_v25  ;;  %v1644_v11 = vld [vmem:[%s2182_s0 + $0x128] ss:$20 sps:$4 sm:$0xff]   ;;  %v1919_v13 = vld [vmem:[%s2183_s2] ss:$0 sm:$0xff]  ;;  %s1647_s0 = smov 32   ;;  %s1648_s2 = smov 96  }
  0x1c   :  { %1391 = vmatpush3.bf16.msra.mxu0 %v1579_v26 }
  0x1d   :  { %1455 = vmatpush3.bf16.msra.mxu1 %v1580_v27  ;;  %1392 = vmatprep.subr.bf16.mxu0 %v1581_v28 }
  0x1e   :  { %1456 = vmatprep.subr.bf16.mxu1 %v1582_v29 }
  0x20   :  { %1393 = vmatpush3.bf16.msra.mxu0 %v1583_v30 }
  0x21   :  { %1457 = vmatpush3.bf16.msra.mxu1 %v1584_v31  ;;  %1518 = vmatprep.subr.bf16.mxu0 %v1591_v36 }
  0x22   :  { %1542 = vmatprep.subr.bf16.mxu1 %v1591_v36 }
  0x23   :  { %622 = vmatmul.mubr.bf16.vlgmr.msra.gmra.mrb[0].mxu0 %v1585_v32 }
  0x24   :  { %719 = vmatmul.mubr.bf16.vlgmr.msra.gmra.mrb[0].mxu1 %v1588_v34  ;;  %1519 = vmatpush3.bf16.msra.mxu0 %v1591_v36 }
  0x25   :  { %629 = vmatprep.mubr.bf16.mxu0 %v1592_v37  ;;  %726 = vmatprep.mubr.bf16.mxu1 %v1594_v38 }
  0x26   :  { %1546 = vmatpush3.bf16.msra.mxu1 %v1591_v36  ;;  %1520 = vmatprep.subr.bf16.mxu0 %v1604_v42 }
  0x27   :  { %1543 = vmatprep.subr.bf16.mxu1 %v1604_v42 }
  0x28   :  { %1521 = vmatpush3.bf16.msra.mxu0 %v1604_v42 }
  0x29   :  { %1522 = vmatprep.subr.bf16.mxu0 %v1617_v46 }
  0x2a   :  { %1547 = vmatpush3.bf16.msra.mxu1 %v1604_v42 }
  0x2b   :  { %630 = vmatmul.mubr.bf16.gmra.mrb[4].mxu0 %v1596_v39  ;;  %1544 = vmatprep.subr.bf16.mxu1 %v1617_v46 }
  0x2c   :  { %727 = vmatmul.mubr.bf16.gmra.mrb[4].mxu1 %v1597_v40  ;;  %637 = vmatprep.mubr.bf16.mxu0 %v1598_v41 }
  0x2d   :  { %734 = vmatprep.mubr.bf16.mxu1 %v1600_v43  ;;  %1523 = vmatpush3.bf16.msra.mxu0 %v1617_v46 }
  0x2e   :  { %1548 = vmatpush3.bf16.msra.mxu1 %v1617_v46  ;;  %1524 = vmatprep.subr.bf16.mxu0 %v1630_v49 }
  0x2f   :  { %1545 = vmatprep.subr.bf16.mxu1 %v1630_v49 }
  0x31   :  { %1525 = vmatpush3.bf16.msra.mxu0 %v1630_v49 }
  0x32   :  { %1549 = vmatpush3.bf16.msra.mxu1 %v1630_v49 }
  0x33   :  { %638 = vmatmul.mubr.bf16.gmra.mrb[8].mxu0 %v1602_v44 }
  0x34   :  { %735 = vmatmul.mubr.bf16.gmra.mrb[8].mxu1 %v1603_v45  ;;  %645 = vmatprep.mubr.bf16.mxu0 %v1605_v47 }
  0x35   :  { %742 = vmatprep.mubr.bf16.mxu1 %v1607_v48 }
  0x3b   :  { %646 = vmatmul.mubr.bf16.gmra.mrb[12].mxu0 %v1609_v50 }
  0x3c   :  { %743 = vmatmul.mubr.bf16.gmra.mrb[12].mxu1 %v1610_v51  ;;  %653 = vmatprep.mubr.bf16.mxu0 %v1611_v52 }
  0x3d   :  { %750 = vmatprep.mubr.bf16.mxu1 %v1613_v53 }
  0x43   :  { %654 = vmatmul.mubr.bf16.gmra.mrb[16].mxu0 %v1615_v54 }
  0x44   :  { %751 = vmatmul.mubr.bf16.gmra.mrb[16].mxu1 %v1616_v55  ;;  %661 = vmatprep.mubr.bf16.mxu0 %v1618_v56 }
  0x45   :  { %758 = vmatprep.mubr.bf16.mxu1 %v1620_v57 }
  0x4b   :  { %662 = vmatmul.mubr.bf16.gmra.mrb[20].mxu0 %v1622_v58 }
  0x4c   :  { %759 = vmatmul.mubr.bf16.gmra.mrb[20].mxu1 %v1623_v59  ;;  %669 = vmatprep.mubr.bf16.mxu0 %v1624_v60 }
  0x4d   :  { %766 = vmatprep.mubr.bf16.mxu1 %v1626_v61 }
  0x53   :  { %670 = vmatmul.mubr.bf16.gmra.mrb[24].mxu0 %v1628_v62 }
  0x54   :  { %767 = vmatmul.mubr.bf16.gmra.mrb[24].mxu1 %v1629_v63  ;;  %677 = vmatprep.mubr.bf16.mxu0 %v1631_v0 }
  0x55   :  { %774 = vmatprep.mubr.bf16.mxu1 %v1633_v1 }
  0x5b   :  { %678 = vmatmul.mubr.bf16.gmra.mrb[28].mxu0 %v1635_v2 }
  0x5c   :  { %775 = vmatmul.mubr.bf16.gmra.mrb[28].mxu1 %v1636_v3  ;;  %1526 = vmatprep.mubr.msk.bf16.mxu0 %vm564_vm0, %v1637_v4 }
  0x5d   :  { %1534 = vmatprep.mubr.msk.bf16.mxu1 %vm564_vm0, %v1638_v5 }
  0x63   :  { %1527 = vmatmul.mubr.msk.bf16.vlgmr.msra.gmra.mrb[32].mxu0 %vm564_vm0, %v1639_v6 }
  0x64   :  { %1535 = vmatmul.mubr.msk.bf16.vlgmr.msra.gmra.mrb[32].mxu1 %vm564_vm0, %v1640_v7  ;;  %1530 = vmatprep.mubr.msk.bf16.mxu0 %vm564_vm0, %v1641_v8 }
  0x65   :  { %1538 = vmatprep.mubr.msk.bf16.mxu1 %vm564_vm0, %v1642_v9 }
  0x6b   :  { %1531 = vmatmul.mubr.msk.bf16.gmra.mrb[36].mxu0 %vm564_vm0, %v1643_v10 }
  0x6c   :  { %1539 = vmatmul.mubr.msk.bf16.gmra.mrb[36].mxu1 %vm564_vm0, %v1644_v11 }
  0xf6   :  { %v1394_v12 = vpop.f32.mrb[0].mxu0 }
  0xf7   :  { %v1395_v14 = vpop.f32.mrb[1].mxu0  ;;  %v1458_v15 = vpop.f32.mrb[0].mxu1 }
  0xf8   :  { %v1396_v16 = vadd.f32 %v1395_v14, %v1394_v12  ;;  %v1397_v17 = vpop.f32.mrb[2].mxu0  ;;  %v1459_v18 = vpop.f32.mrb[1].mxu1 }
  0xf9   :  { %v1398_v19 = vpop.f32.mrb[3].mxu0  ;;  %v1460_v20 = vadd.f32 %v1459_v18, %v1458_v15  ;;  %v1461_v21 = vpop.f32.mrb[2].mxu1 }
  0xfa   :  { %v624_v22 = vadd.f32 %v1396_v16, %v1919_v13  ;;  %v1399_v23 = vadd.f32 %v1398_v19, %v1397_v17  ;;  %v1462_v24 = vpop.f32.mrb[3].mxu1 }
  0xfb   :  { %v1463_v25 = vadd.f32 %v1462_v24, %v1461_v21 }
  0xfc   :  { %v627_v26 = vadd.f32 %v1399_v23, %v1919_v13  ;;  %v1923_v27 = vadd.f32 %v1460_v20, %v624_v22 }
  0xfe   :  { %v1400_v28 = vpop.f32.mrb[4].mxu0  ;;  %v1925_v29 = vadd.f32 %v1463_v25, %v627_v26 }
  0xff   :  { %v1401_v30 = vpop.f32.mrb[5].mxu0  ;;  %v1464_v31 = vpop.f32.mrb[4].mxu1 }
 0x100   :  { %v1402_v32 = vadd.f32 %v1401_v30, %v1400_v28  ;;  %v1403_v33 = vpop.f32.mrb[6].mxu0  ;;  %v1465_v34 = vpop.f32.mrb[5].mxu1 }
 0x101   :  { %v1404_v35 = vpop.f32.mrb[7].mxu0  ;;  %v1466_v36 = vadd.f32 %v1465_v34, %v1464_v31  ;;  %v1467_v37 = vpop.f32.mrb[6].mxu1 }
 0x102   :  { %v632_v38 = vadd.f32 %v1402_v32, %v1919_v13  ;;  %v1405_v39 = vadd.f32 %v1404_v35, %v1403_v33  ;;  %v1468_v40 = vpop.f32.mrb[7].mxu1 }
 0x103   :  { %v1469_v41 = vadd.f32 %v1468_v40, %v1467_v37 }
 0x104   :  { %v635_v42 = vadd.f32 %v1405_v39, %v1919_v13  ;;  %v1929_v43 = vadd.f32 %v1466_v36, %v632_v38 }
 0x106   :  { %v1406_v44 = vpop.f32.mrb[8].mxu0  ;;  %v1931_v45 = vadd.f32 %v1469_v41, %v635_v42 }
 0x107   :  { %v1407_v46 = vpop.f32.mrb[9].mxu0  ;;  %v1470_v47 = vpop.f32.mrb[8].mxu1 }
 0x108   :  { %v1408_v48 = vadd.f32 %v1407_v46, %v1406_v44  ;;  %v1409_v49 = vpop.f32.mrb[10].mxu0  ;;  %v1471_v50 = vpop.f32.mrb[9].mxu1 }
 0x109   :  { %v1410_v51 = vpop.f32.mrb[11].mxu0  ;;  %v1472_v52 = vadd.f32 %v1471_v50, %v1470_v47  ;;  %v1473_v53 = vpop.f32.mrb[10].mxu1 }
 0x10a   :  { %v640_v54 = vadd.f32 %v1408_v48, %v1919_v13  ;;  %v1411_v55 = vadd.f32 %v1410_v51, %v1409_v49  ;;  %v1474_v56 = vpop.f32.mrb[11].mxu1 }
 0x10b   :  { %v1475_v57 = vadd.f32 %v1474_v56, %v1473_v53 }
 0x10c   :  { %v643_v58 = vadd.f32 %v1411_v55, %v1919_v13  ;;  %v1935_v59 = vadd.f32 %v1472_v52, %v640_v54 }
 0x10e   :  { %v1412_v60 = vpop.f32.mrb[12].mxu0  ;;  %v1937_v61 = vadd.f32 %v1475_v57, %v643_v58 }
 0x10f   :  { %v1413_v62 = vpop.f32.mrb[13].mxu0  ;;  %v1476_v63 = vpop.f32.mrb[12].mxu1 }
 0x110   :  { %v1414_v0 = vadd.f32 %v1413_v62, %v1412_v60  ;;  %v1415_v1 = vpop.f32.mrb[14].mxu0  ;;  %v1477_v2 = vpop.f32.mrb[13].mxu1 }
 0x111   :  { %v1416_v3 = vpop.f32.mrb[15].mxu0  ;;  %v1478_v4 = vadd.f32 %v1477_v2, %v1476_v63  ;;  %v1479_v5 = vpop.f32.mrb[14].mxu1 }
 0x112   :  { %v648_v6 = vadd.f32 %v1414_v0, %v1919_v13  ;;  %v1417_v7 = vadd.f32 %v1416_v3, %v1415_v1  ;;  %v1480_v8 = vpop.f32.mrb[15].mxu1 }
 0x113   :  { %v1481_v9 = vadd.f32 %v1480_v8, %v1479_v5 }
 0x114   :  { %v651_v10 = vadd.f32 %v1417_v7, %v1919_v13  ;;  %v1941_v11 = vadd.f32 %v1478_v4, %v648_v6 }
 0x116   :  { %v1418_v12 = vpop.f32.mrb[16].mxu0  ;;  %v1943_v14 = vadd.f32 %v1481_v9, %v651_v10 }
 0x117   :  { %v1419_v15 = vpop.f32.mrb[17].mxu0  ;;  %v1482_v16 = vpop.f32.mrb[16].mxu1 }
 0x118   :  { %v1420_v17 = vadd.f32 %v1419_v15, %v1418_v12  ;;  %v1421_v18 = vpop.f32.mrb[18].mxu0  ;;  %v1483_v19 = vpop.f32.mrb[17].mxu1 }
 0x119   :  { %v1422_v20 = vpop.f32.mrb[19].mxu0  ;;  %v1484_v21 = vadd.f32 %v1483_v19, %v1482_v16  ;;  %v1485_v22 = vpop.f32.mrb[18].mxu1 }
 0x11a   :  { %v656_v23 = vadd.f32 %v1420_v17, %v1919_v13  ;;  %v1423_v24 = vadd.f32 %v1422_v20, %v1421_v18  ;;  %v1486_v25 = vpop.f32.mrb[19].mxu1 }
 0x11b   :  { %v1487_v26 = vadd.f32 %v1486_v25, %v1485_v22 }
 0x11c   :  { %v659_v28 = vadd.f32 %v1423_v24, %v1919_v13  ;;  %v753_v30 = vadd.f32 %v1484_v21, %v656_v23 }
 0x11e   :  { %v1424_v31 = vpop.f32.mrb[20].mxu0  ;;  %v1947_v32 = vadd.f32 %v1487_v26, %v659_v28 }
 0x11f   :  { %v1425_v33 = vpop.f32.mrb[21].mxu0  ;;  %v1488_v34 = vpop.f32.mrb[20].mxu1 }
 0x120   :  { %v1426_v35 = vadd.f32 %v1425_v33, %v1424_v31  ;;  %v1427_v36 = vpop.f32.mrb[22].mxu0  ;;  %v1489_v37 = vpop.f32.mrb[21].mxu1 }
 0x121   :  { %v1428_v38 = vpop.f32.mrb[23].mxu0  ;;  %v1490_v39 = vadd.f32 %v1489_v37, %v1488_v34  ;;  %v1491_v40 = vpop.f32.mrb[22].mxu1 }
 0x122   :  { %v664_v41 = vadd.f32 %v1426_v35, %v1919_v13  ;;  %v1429_v42 = vadd.f32 %v1428_v38, %v1427_v36  ;;  %v1492_v44 = vpop.f32.mrb[23].mxu1 }
 0x123   :  { %v1493_v46 = vadd.f32 %v1492_v44, %v1491_v40 }
 0x124   :  { %v667_v47 = vadd.f32 %v1429_v42, %v1919_v13  ;;  %v761_v48 = vadd.f32 %v1490_v39, %v664_v41 }
 0x126   :  { %v1430_v49 = vpop.f32.mrb[24].mxu0  ;;  %v764_v50 = vadd.f32 %v1493_v46, %v667_v47 }
 0x127   :  { %v1431_v51 = vpop.f32.mrb[25].mxu0  ;;  %v1494_v52 = vpop.f32.mrb[24].mxu1 }
 0x128   :  { %v1432_v53 = vadd.f32 %v1431_v51, %v1430_v49  ;;  %v1433_v54 = vpop.f32.mrb[26].mxu0  ;;  %v1495_v55 = vpop.f32.mrb[25].mxu1 }
 0x129   :  { %v1434_v56 = vpop.f32.mrb[27].mxu0  ;;  %v1496_v57 = vadd.f32 %v1495_v55, %v1494_v52  ;;  %v1497_v58 = vpop.f32.mrb[26].mxu1 }
 0x12a   :  { %v672_v60 = vadd.f32 %v1432_v53, %v1919_v13  ;;  %v1435_v62 = vadd.f32 %v1434_v56, %v1433_v54  ;;  %v1498_v63 = vpop.f32.mrb[27].mxu1 }
 0x12b   :  { %v1499_v0 = vadd.f32 %v1498_v63, %v1497_v58 }
 0x12c   :  { %v675_v1 = vadd.f32 %v1435_v62, %v1919_v13  ;;  %v769_v2 = vadd.f32 %v1496_v57, %v672_v60 }
 0x12e   :  { %v1436_v3 = vpop.f32.mrb[28].mxu0  ;;  %v772_v4 = vadd.f32 %v1499_v0, %v675_v1 }
 0x12f   :  { %v1437_v5 = vpop.f32.mrb[29].mxu0  ;;  %v1500_v6 = vpop.f32.mrb[28].mxu1 }
 0x130   :  { %v1438_v7 = vadd.f32 %v1437_v5, %v1436_v3  ;;  %v1439_v8 = vpop.f32.mrb[30].mxu0  ;;  %v1501_v9 = vpop.f32.mrb[29].mxu1 }
 0x131   :  { %v1440_v10 = vpop.f32.mrb[31].mxu0  ;;  %v1502_v12 = vadd.f32 %v1501_v9, %v1500_v6  ;;  %v1503_v15 = vpop.f32.mrb[30].mxu1 }
 0x132   :  { %v680_v16 = vadd.f32 %v1438_v7, %v1919_v13  ;;  %v1441_v17 = vadd.f32 %v1440_v10, %v1439_v8  ;;  %v1504_v18 = vpop.f32.mrb[31].mxu1 }
 0x133   :  { %v1505_v19 = vadd.f32 %v1504_v18, %v1503_v15 }
 0x134   :  { %v683_v20 = vadd.f32 %v1441_v17, %v1919_v13  ;;  %v777_v21 = vadd.f32 %v1502_v12, %v680_v16 }
 0x136   :  { %v1528_v22 = vpop.f32.mrb[32].mxu0  ;;  %v780_v23 = vadd.f32 %v1505_v19, %v683_v20  ;;  %v931_v19 = vlaneseq }
 0x137   :  { %v1956_v24 = vadd.f32 %v1528_v22, %v1929_v43  ;;  %v1536_v25 = vpop.f32.mrb[32].mxu1  ;;  %v817_v26 = vpop.f32.mrb[33].mxu0 }
 0x138   :  { %v1958_v28 = vadd.f32 %v1536_v25, %v761_v48  ;;  %v1961_v31 = vadd.f32 %v817_v26, %v1923_v27  ;;  %v849_v33 = vpop.f32.mrb[33].mxu1  ;;  %v1529_v34 = vpop.f32.mrb[34].mxu0  ;;  %v932_v20 = vshrl.u32 %v931_v19, 7 }
 0x139   :  { %v1963_v35 = vadd.f32 %v849_v33, %v753_v30  ;;  %v1966_v36 = vadd.f32 %v1529_v34, %v1931_v45  ;;  %v1537_v13 = vpop.f32.mrb[34].mxu1  ;;  %v820_v37 = vpop.f32.mrb[35].mxu0 }
 0x13a   :  { %v1968_v38 = vadd.f32 %v1537_v13, %v764_v50  ;;  %v1971_v43 = vadd.f32 %v820_v37, %v1925_v29  ;;  %v852_v39 = vpop.f32.mrb[35].mxu1  ;;  %v2016_v25 = vsub.s32 0, %v932_v20 }
 0x13b   :  { %v1974_v40 = vadd.f32 %v852_v39, %v1947_v32 }
 0x13c   :  { %v880_v27 = vadd.f32 %v1971_v43, %v1961_v31 }
 0x13e   :  { %v881_v30 = vadd.f32 %v880_v27, %v1956_v24  ;;  %v1532_v41 = vpop.f32.mrb[36].mxu0 }
 0x13f   :  { %v1980_v45 = vadd.f32 %v1532_v41, %v1941_v11  ;;  %v1540_v42 = vpop.f32.mrb[36].mxu1  ;;  %v833_v44 = vpop.f32.mrb[37].mxu0 }
 0x140   :  { %v1982_v46 = vadd.f32 %v1540_v42, %v777_v21  ;;  %v1985_v29 = vadd.f32 %v833_v44, %v1935_v59  ;;  %v882_v47 = vadd.f32 %v881_v30, %v1966_v36  ;;  %v865_v32 = vpop.f32.mrb[37].mxu1  ;;  %v1533_v48 = vpop.f32.mrb[38].mxu0 }
 0x141   :  { %v1988_v49 = vadd.f32 %v865_v32, %v769_v2  ;;  %v1991_v50 = vadd.f32 %v1533_v48, %v1943_v14  ;;  %v1541_v51 = vpop.f32.mrb[38].mxu1  ;;  %v836_v52 = vpop.f32.mrb[39].mxu0 }
 0x142   :  { %v883_v11 = vadd.f32 %v882_v47, %v1985_v29  ;;  %v1994_v53 = vadd.f32 %v1541_v51, %v780_v23  ;;  %v837_v54 = vadd.f32 %v836_v52, %v1937_v61  ;;  %v868_v55 = vpop.f32.mrb[39].mxu1 }
 0x143   :  { %v1997_v59 = vadd.f32 %v868_v55, %v772_v4 }
 0x144   :  { %v884_v56 = vadd.f32 %v883_v11, %v837_v54 }
 0x146   :  { %v885_v57 = vadd.f32 %v884_v56, %v1980_v45 }
 0x148   :  { %v886_v58 = vadd.f32 %v885_v57, %v1991_v50 }
 0x14a   :  { %v887_v60 = vadd.f32 %v886_v58, %v1963_v35 }
 0x14c   :  { %v888_v14 = vadd.f32 %v887_v60, %v1974_v40 }
 0x14e   :  { %v889_v62 = vadd.f32 %v888_v14, %v1958_v28 }
 0x150   :  { %v890_v63 = vadd.f32 %v889_v62, %v1968_v38 }
 0x152   :  { %v891_v0 = vadd.f32 %v890_v63, %v1988_v49 }
 0x154   :  { %v892_v61 = vadd.f32 %v891_v0, %v1997_v59 }
 0x156   :  { %v893_v1 = vadd.f32 %v892_v61, %v1982_v46 }
 0x158   :  { %v894_v2 = vadd.f32 %v893_v1, %v1994_v53 }
 0x15a   :  { %v895_v3 = vrot.slane %v894_v2, 4 }
 0x15c   :  { %v896_v4 = vadd.f32 %v895_v3, %v894_v2 }
 0x15e   :  { %v897_v5 = vrot.slane %v896_v4, 2 }
 0x160   :  { %v898_v6 = vadd.f32 %v897_v5, %v896_v4 }
 0x162   :  { %v899_v7 = vrot.slane %v898_v6, 1 }
 0x164   :  { %v900_v8 = vadd.f32 %v899_v7, %v898_v6 }
 0x166   :  { %911 = vrot.lane.b32.xlu1 %v900_v8, %s1647_s0  ;;  %903 = vrot.lane.b32.xlu0 %v900_v8, %s1648_s2 }
 0x16a   :  { %907 = vrot.lane.b32.xlu0 %v900_v8, %s1649_s20 }
 0x1d8   :  { %v904_v9 = vpop.permute.xlu0 %903  ;;  %v912_v16 = vpop.permute.xlu1 %911 }
 0x1d9   :  { %v906_v10 = vadd.f32 %v904_v9, %v900_v8 }
 0x1dc   :  { %v908_v12 = vpop.permute.xlu0 %907 }
 0x1dd   :  { %v910_v15 = vadd.f32 %v908_v12, %v906_v10 }
 0x1df   :  { %v914_v17 = vadd.f32 %v912_v16, %v910_v15 }
 0x1e1   :  { %v915_v18 = vmul.f32 0.001953125, %v914_v17 }
 0x1e3   :  { %920 = vrot.lane.b32.xlu0 %v915_v18, %s1649_s20  ;;  %917 = vrot.lane.b32.xlu1 %v915_v18, %s1647_s0 }
 0x1e7   :  { %923 = vrot.lane.b32.xlu1 %v915_v18, %s1648_s2 }
 0x255   :  { %v918_v21 = vpop.permute.xlu1 %917  ;;  %v921_v22 = vpop.permute.xlu0 %920 }
 0x256   :  { %v927_v23 = vsel %vm926_vm1, %v915_v18, %v918_v21  ;;  %v1044_v18 = vld [vmem:[%s2184_s4] sm:$0x1] }
 0x257   :  { %v928_v26 = vsel %vm564_vm0, %v927_v23, %v921_v22  ;;  %v1049_v19 = vrot.slane %v1044_v18, %v2016_v25 }
 0x259   :  { %v924_v33 = vpop.permute.xlu1 %923 }
 0x25a   :  { %v930_v34 = vsel %vm929_vm2, %v928_v26, %v924_v33 }
 0x25b   :  { %v934_v13 = vrot.slane %v930_v34, %v2016_v25 }
 0x25d   :  { %v2022_v37 = vsub.f32 %v1961_v31, %v934_v13  ;;  %v2025_v39 = vsub.f32 %v1971_v43, %v934_v13  ;;  %v2028_v27 = vsub.f32 %v1956_v24, %v934_v13  ;;  %v2035_v42 = vsub.f32 %v1966_v36, %v934_v13 }
 0x25e   :  { %v2038_v44 = vsub.f32 %v1985_v29, %v934_v13  ;;  %v2042_v47 = vsub.f32 %v837_v54, %v934_v13  ;;  %v2047_v48 = vsub.f32 %v1980_v45, %v934_v13  ;;  %v2052_v29 = vsub.f32 %v1991_v50, %v934_v13 }
 0x25f   :  { %v951_v30 = vmul.f32 %v2022_v37, %v2022_v37  ;;  %v952_v41 = vmul.f32 %v2025_v39, %v2025_v39  ;;  %v953_v31 = vmul.f32 %v2028_v27, %v2028_v27  ;;  %v954_v24 = vmul.f32 %v2035_v42, %v2035_v42 }
 0x260   :  { %v955_v36 = vmul.f32 %v2038_v44, %v2038_v44  ;;  %v956_v52 = vmul.f32 %v2042_v47, %v2042_v47  ;;  %v2057_v54 = vsub.f32 %v1963_v35, %v934_v13  ;;  %v957_v55 = vmul.f32 %v2047_v48, %v2047_v48 }
 0x261   :  { %v967_v43 = vadd.f32 %v952_v41, %v951_v30  ;;  %v2062_v45 = vsub.f32 %v1974_v40, %v934_v13  ;;  %v958_v57 = vmul.f32 %v2052_v29, %v2052_v29  ;;  %v2067_v50 = vsub.f32 %v1958_v28, %v934_v13  ;;  %v1003_v30 = vld [vmem:[%s2185_s3] sm:$0x1] }
 0x262   :  { %v959_v60 = vmul.f32 %v2057_v54, %v2057_v54  ;;  %v2072_v35 = vsub.f32 %v1968_v38, %v934_v13  ;;  %v2077_v40 = vsub.f32 %v1988_v49, %v934_v13  ;;  %v2082_v28 = vsub.f32 %v1997_v59, %v934_v13 }
 0x263   :  { %v968_v32 = vadd.f32 %v967_v43, %v953_v31  ;;  %v960_v62 = vmul.f32 %v2062_v45, %v2062_v45  ;;  %v961_v0 = vmul.f32 %v2067_v50, %v2067_v50  ;;  %v2087_v38 = vsub.f32 %v1982_v46, %v934_v13 }
 0x264   :  { %v962_v1 = vmul.f32 %v2072_v35, %v2072_v35  ;;  %v963_v3 = vmul.f32 %v2077_v40, %v2077_v40  ;;  %v2092_v49 = vsub.f32 %v1994_v53, %v934_v13  ;;  %v964_v5 = vmul.f32 %v2082_v28, %v2082_v28 }
 0x265   :  { %v969_v51 = vadd.f32 %v968_v32, %v954_v24  ;;  %v965_v59 = vmul.f32 %v2087_v38, %v2087_v38 }
 0x266   :  { %v966_v8 = vmul.f32 %v2092_v49, %v2092_v49 }
 0x267   :  { %v970_v11 = vadd.f32 %v969_v51, %v955_v36 }
 0x269   :  { %v971_v56 = vadd.f32 %v970_v11, %v956_v52 }
 0x26b   :  { %v972_v58 = vadd.f32 %v971_v56, %v957_v55 }
 0x26d   :  { %v973_v14 = vadd.f32 %v972_v58, %v958_v57 }
 0x26f   :  { %v974_v63 = vadd.f32 %v973_v14, %v959_v60 }
 0x271   :  { %v975_v61 = vadd.f32 %v974_v63, %v960_v62 }
 0x273   :  { %v976_v2 = vadd.f32 %v975_v61, %v961_v0 }
 0x275   :  { %v977_v4 = vadd.f32 %v976_v2, %v962_v1 }
 0x277   :  { %v978_v6 = vadd.f32 %v977_v4, %v963_v3 }
 0x279   :  { %v979_v7 = vadd.f32 %v978_v6, %v964_v5 }
 0x27b   :  { %v980_v46 = vadd.f32 %v979_v7, %v965_v59 }
 0x27d   :  { %v981_v9 = vadd.f32 %v980_v46, %v966_v8 }
 0x27f   :  { %v982_v10 = vrot.slane %v981_v9, 4 }
 0x281   :  { %v983_v12 = vadd.f32 %v982_v10, %v981_v9 }
 0x283   :  { %v984_v15 = vrot.slane %v983_v12, 2 }
 0x285   :  { %v985_v16 = vadd.f32 %v984_v15, %v983_v12 }
 0x287   :  { %v986_v17 = vrot.slane %v985_v16, 1 }
 0x289   :  { %v987_v53 = vadd.f32 %v986_v17, %v985_v16 }
 0x28b   :  { %994 = vrot.lane.b32.xlu1 %v987_v53, %s1649_s20  ;;  %990 = vrot.lane.b32.xlu0 %v987_v53, %s1648_s2 }
 0x28f   :  { %998 = vrot.lane.b32.xlu0 %v987_v53, %s1647_s0 }
 0x293   :  { %1050 = vrot.lane.b32.xlu0 %v1049_v19, %s1647_s0 }
 0x2fd   :  { %v991_v20 = vpop.permute.xlu0 %990  ;;  %v995_v22 = vpop.permute.xlu1 %994 }
 0x2fe   :  { %v993_v21 = vadd.f32 %v991_v20, %v987_v53 }
 0x300   :  { %v997_v23 = vadd.f32 %v995_v22, %v993_v21 }
 0x301   :  { %v999_v26 = vpop.permute.xlu0 %998 }
 0x302   :  { %v1001_v33 = vadd.f32 %v999_v26, %v997_v23 }
 0x304   :  { %v1002_v34 = vmul.f32 0.001953125, %v1001_v33 }
 0x305   :  { %v1051_v24 = vpop.permute.xlu0 %1050 }
 0x306   :  { %v1004_v13 = vadd.f32 1e-05, %v1002_v34  ;;  %v1059_v60 = vsel %vm926_vm1, %v1044_v18, %v1051_v24 }
 0x308   :  { %1645 = vrsqrt.f32 %v1004_v13 }
 0x312   :  { %v1646_v41 = vpop.eup %1645 }
 0x313   :  { %v1006_v31 = vmul.f32 %v1646_v41, %v1003_v30 }
 0x315   :  { %v1011_v43 = vrot.slane %v1006_v31, %v2016_v25 }
 0x317   :  { %1015 = vrot.lane.b32.xlu0 %v1011_v43, %s1649_s20  ;;  %1012 = vrot.lane.b32.xlu1 %v1011_v43, %s1647_s0 }
 0x31b   :  { %1018 = vrot.lane.b32.xlu1 %v1011_v43, %s1648_s2  ;;  %1056 = vrot.lane.b32.xlu0 %v1049_v19, %s1648_s2 }
 0x31f   :  { %1053 = vrot.lane.b32.xlu1 %v1049_v19, %s1649_s20 }
 0x389   :  { %v1013_v32 = vpop.permute.xlu1 %1012  ;;  %v1016_v51 = vpop.permute.xlu0 %1015 }
 0x38a   :  { %v1021_v36 = vsel %vm926_vm1, %v1006_v31, %v1013_v32 }
 0x38b   :  { %v1022_v52 = vsel %vm564_vm0, %v1021_v36, %v1016_v51 }
 0x38d   :  { %v1019_v11 = vpop.permute.xlu1 %1018  ;;  %v1057_v58 = vpop.permute.xlu0 %1056 }
 0x38e   :  { %v1023_v55 = vsel %vm929_vm2, %v1022_v52, %v1019_v11 }
 0x38f   :  { %v1027_v56 = vrot.slane %v1023_v55, %v2016_v25 }
 0x391   :  { %v1054_v57 = vpop.permute.xlu1 %1053  ;;  %v1028_v14 = vmul.f32 %v1027_v56, %v2022_v37  ;;  %v1029_v62 = vmul.f32 %v1027_v56, %v2025_v39  ;;  %v1030_v63 = vmul.f32 %v1027_v56, %v2028_v27  ;;  %v1031_v0 = vmul.f32 %v1027_v56, %v2035_v42 }
 0x392   :  { %v1032_v61 = vmul.f32 %v1027_v56, %v2038_v44  ;;  %v1033_v1 = vmul.f32 %v1027_v56, %v2042_v47  ;;  %v1060_v2 = vsel %vm564_vm0, %v1059_v60, %v1054_v57  ;;  %v1034_v3 = vmul.f32 %v1027_v56, %v2047_v48 }
 0x393   :  { %v1035_v4 = vmul.f32 %v1027_v56, %v2052_v29  ;;  %v1036_v5 = vmul.f32 %v1027_v56, %v2057_v54  ;;  %v1061_v37 = vsel %vm929_vm2, %v1060_v2, %v1057_v58  ;;  %v1037_v39 = vmul.f32 %v1027_v56, %v2062_v45 }
 0x394   :  { %v1038_v27 = vmul.f32 %v1027_v56, %v2067_v50  ;;  %v1039_v42 = vmul.f32 %v1027_v56, %v2072_v35  ;;  %v1065_v44 = vrot.slane %v1061_v37, %v2016_v25  ;;  %v1040_v47 = vmul.f32 %v1027_v56, %v2077_v40 }
 0x395   :  { %v1041_v6 = vmul.f32 %v1027_v56, %v2082_v28  ;;  %v1042_v48 = vmul.f32 %v1027_v56, %v2087_v38  ;;  %v1043_v29 = vmul.f32 %v1027_v56, %v2092_v49 }
 0x396   :  { %v1066_v59 = vadd.f32 %v1065_v44, %v1028_v14  ;;  %v1067_v54 = vadd.f32 %v1065_v44, %v1029_v62  ;;  %v1068_v7 = vadd.f32 %v1065_v44, %v1030_v63  ;;  %v1069_v8 = vadd.f32 %v1065_v44, %v1031_v0 }
 0x397   :  { %v1070_v46 = vadd.f32 %v1065_v44, %v1032_v61  ;;  %v1071_v45 = vadd.f32 %v1065_v44, %v1033_v1  ;;  %v1072_v9 = vadd.f32 %v1065_v44, %v1034_v3  ;;  %v1073_v50 = vadd.f32 %v1065_v44, %v1035_v4 }
 0x398   :  { %v1074_v10 = vadd.f32 %v1065_v44, %v1036_v5  ;;  %v1075_v35 = vadd.f32 %v1065_v44, %v1037_v39  ;;  %v1076_v12 = vadd.f32 %v1065_v44, %v1038_v27  ;;  %v1077_v25 = vadd.f32 %v1065_v44, %v1039_v42 }
 0x399   :  { %v1078_v15 = vadd.f32 %v1065_v44, %v1040_v47  ;;  %v1079_v40 = vadd.f32 %v1065_v44, %v1041_v6  ;;  %v1080_v16 = vadd.f32 %v1065_v44, %v1042_v48  ;;  %v1081_v28 = vadd.f32 %v1065_v44, %v1043_v29 }
 0x39a   :  { %vm1082_vm3 = vcmp.ge.f32.partialorder %v1066_v59, 0.0  ;;  %vm1083_vm4 = vcmp.ge.f32.partialorder %v1067_v54, 0.0  ;;  %vm1084_vm5 = vcmp.ge.f32.partialorder %v1068_v7, 0.0  ;;  %vm1085_vm6 = vcmp.ge.f32.partialorder %v1069_v8, 0.0 }
 0x39b   :  { %vm1086_vm7 = vcmp.ge.f32.partialorder %v1070_v46, 0.0  ;;  %vm1087_vm8 = vcmp.ge.f32.partialorder %v1071_v45, 0.0  ;;  %vm1088_vm9 = vcmp.ge.f32.partialorder %v1072_v9, 0.0  ;;  %vm1089_vm10 = vcmp.ge.f32.partialorder %v1073_v50, 0.0 }
 0x39c   :  { %vm1090_vm11 = vcmp.ge.f32.partialorder %v1074_v10, 0.0  ;;  %vm1091_vm12 = vcmp.ge.f32.partialorder %v1075_v35, 0.0  ;;  %vm1092_vm13 = vcmp.ge.f32.partialorder %v1076_v12, 0.0  ;;  %vm1093_vm14 = vcmp.ge.f32.partialorder %v1077_v25, 0.0 }
 0x39d   :  { %vm1094_vm15 = vcmp.ge.f32.partialorder %v1078_v15, 0.0  ;;  %vm1095_vm0 = vcmp.ge.f32.partialorder %v1079_v40, 0.0  ;;  %vm1096_vm1 = vcmp.ge.f32.partialorder %v1080_v16, 0.0  ;;  %vm1097_vm2 = vcmp.ge.f32.partialorder %v1081_v28, 0.0 }
 0x39e   :  { %v1098_v38 = vmul.f32 0.2, %v1066_v59  ;;  %v1099_v49 = vmul.f32 0.2, %v1067_v54  ;;  %v1100_v17 = vmul.f32 0.2, %v1068_v7 }
 0x39f   :  { %v1101_v53 = vmul.f32 0.2, %v1069_v8  ;;  %v1102_v18 = vmul.f32 0.2, %v1070_v46  ;;  %v1103_v19 = vmul.f32 0.2, %v1071_v45 }
 0x3a0   :  { %v1104_v20 = vmul.f32 0.2, %v1072_v9  ;;  %v1105_v21 = vmul.f32 0.2, %v1073_v50  ;;  %v1106_v22 = vmul.f32 0.2, %v1074_v10  ;;  %v1114_v23 = vsel %vm1082_vm3, %v1066_v59, %v1098_v38 }
 0x3a1   :  { %v1107_v26 = vmul.f32 0.2, %v1075_v35  ;;  %v1108_v33 = vmul.f32 0.2, %v1076_v12  ;;  %v1109_v34 = vmul.f32 0.2, %v1077_v25  ;;  %v1115_v13 = vsel %vm1083_vm4, %v1067_v54, %v1099_v49 }
 0x3a2   :  { %v1110_v30 = vmul.f32 0.2, %v1078_v15  ;;  %v1111_v41 = vmul.f32 0.2, %v1079_v40  ;;  %v1112_v31 = vmul.f32 0.2, %v1080_v16  ;;  %v1116_v43 = vsel %vm1084_vm5, %v1068_v7, %v1100_v17 }
 0x3a3   :  { %v1113_v24 = vmul.f32 0.2, %v1081_v28  ;;  %v1117_v32 = vsel %vm1085_vm6, %v1069_v8, %v1101_v53  ;;  %v1118_v36 = vsel %vm1086_vm7, %v1070_v46, %v1102_v18  ;;  %v1119_v51 = vsel %vm1087_vm8, %v1071_v45, %v1103_v19 }
 0x3a4   :  { %v1120_v52 = vsel %vm1088_vm9, %v1072_v9, %v1104_v20  ;;  %v1121_v11 = vsel %vm1089_vm10, %v1073_v50, %v1105_v21  ;;  %v1122_v55 = vsel %vm1090_vm11, %v1074_v10, %v1106_v22  ;;  %v1123_v56 = vsel %vm1091_vm12, %v1075_v35, %v1107_v26 }
 0x3a5   :  { %v1124_v57 = vsel %vm1092_vm13, %v1076_v12, %v1108_v33  ;;  %v1125_v58 = vsel %vm1093_vm14, %v1077_v25, %v1109_v34  ;;  %v1126_v60 = vsel %vm1094_vm15, %v1078_v15, %v1110_v30  ;;  %v1127_v14 = vsel %vm1095_vm0, %v1079_v40, %v1111_v41 }
 0x3a6   :  { %v1128_v62 = vsel %vm1096_vm1, %v1080_v16, %v1112_v31  ;;  %v1129_v63 = vsel %vm1097_vm2, %v1081_v28, %v1113_v24  ;;  %v1334_v0 = vpack.c.bf16 %v1115_v13, %v1114_v23  ;;  %v1339_v61 = vpack.c.bf16 %v1117_v32, %v1116_v43 }
 0x3a7   :  { %v1344_v1 = vpack.c.bf16 %v1119_v51, %v1118_v36  ;;  %v1349_v2 = vpack.c.bf16 %v1121_v11, %v1120_v52  ;;  %v1354_v3 = vpack.c.bf16 %v1123_v56, %v1122_v55  ;;  %v1359_v4 = vpack.c.bf16 %v1125_v58, %v1124_v57 }
 0x3a8   :  { %1335 = vst [vmem:[%s2186_s5] sm:$0xff] %v1334_v0   ;;  %1371 = vst [vmem:[%s2186_s5 + $0x8] sm:$0xff] %v1339_v61   ;;  %v1364_v5 = vpack.c.bf16 %v1127_v14, %v1126_v60  ;;  %v1369_v37 = vpack.c.bf16 %v1129_v63, %v1128_v62 }
 0x3a9   :  { %1372 = vst [vmem:[%s2186_s5 + $0x10] sm:$0xff] %v1344_v1   ;;  %1373 = vst [vmem:[%s2186_s5 + $0x18] sm:$0xff] %v1349_v2  }
 0x3aa   :  { %1374 = vst [vmem:[%s2186_s5 + $0x20] sm:$0xff] %v1354_v3   ;;  %1375 = vst [vmem:[%s2186_s5 + $0x28] sm:$0xff] %v1359_v4  }
 0x3ab   :  { %1376 = vst [vmem:[%s2186_s5 + $0x30] sm:$0xff] %v1364_v5   ;;  %1377 = vst [vmem:[%s2186_s5 + $0x38] sm:$0xff] %v1369_v37  }

// kernel: my_autoencoder_forward.15
= control target key start
LH: loop header
LB: loop body
LE: loop exit
PB: predicated region body
PF: predicated region fallthrough
CT: control target
= control target key end

     0   :  { %s1775_s12 = smov 0   ;;  %s2029_s0 = inlined_call_operand.vmem [shape: bf16[512,288], index: 0, kind: input, shape index: {}]   ;;  %s2030_s1 = inlined_call_operand.vmem [shape: bf16[288,128], index: 1, kind: input, shape index: {}]   ;;  %s2031_s2 = inlined_call_operand.vmem [shape: f32[1,128], index: 2, kind: input, shape index: {}]   ;;  %s2032_s3 = inlined_call_operand.vmem [shape: f32[512,128], index: 3, kind: output, shape index: {}]  }
   0x1 LB: > { %s1252_s13 = sadd.s32 4294967295, %s1753_s12   ;;  %p1256_p0 = scmp.ge.s32.totalorder %s1753_s12, 1  ;;  %s1753_s12 = sphi %s1775_s12, %s13_s12  }
   0x2   : > { %p139_p1 = scmp.lt.s32.totalorder %s1753_s12, 3 }
   0x4   : > { %p140_p2 = pnand %p1256_p0, %p139_p1 }
   0x5   : > { %v1537_v0 = vld [vmem:[%s2030_s1 + $0x40] sm:$0xff] (!%p140_p2)   ;;  %s1257_s16 = sshll.u32 (!%p140_p2), %s1252_s13, 5  ;;  %v1539_v2 = vld [vmem:[%s2030_s1 + $0x48] sm:$0xff] (!%p140_p2)   ;;  %v1541_v4 = vld [vmem:[%s2030_s1 + $0x50] sm:$0xff] (!%p140_p2)   ;;  %vm633_vm0 = vcmask (!%p140_p2), 261120  }
   0x6   : > { %143 = sbr.rel (%p140_p2) target bundleno = 386 (0x182), region = 32  ;;  %v1538_v1 = vld [vmem:[%s2030_s1] sm:$0xff] (!%p140_p2)   ;;  %1346 = vmatprep.subr.bf16.mxu0 (!%p140_p2), %v1537_v0  ;;  %1512 = vmatprep.subr.bf16.mxu1 (!%p140_p2), %v1537_v0  ;;  %p165_p3 = scmp.lt.s32.totalorder (!%p140_p2), %s1257_s16, 63  ;;  %v1540_v3 = vld [vmem:[%s2030_s1 + $0x8] sm:$0xff] (!%p140_p2)   ;;  %v1542_v5 = vld [vmem:[%s2030_s1 + $0x10] sm:$0xff] (!%p140_p2)  }
   0x7   : > { %1347 = vmatpush3.bf16.msra.mxu0 (!%p140_p2), %v1538_v1  ;;  %1520 = vmatpush3.bf16.msra.mxu1 (!%p140_p2), %v1538_v1  ;;  %v1543_v6 = vld [vmem:[%s2030_s1 + $0x58] sm:$0xff] (!%p140_p2)   ;;  %v1545_v8 = vld [vmem:[%s2030_s1 + $0x60] sm:$0xff] (!%p140_p2)   ;;  %v1547_v10 = vld [vmem:[%s2030_s1 + $0x68] sm:$0xff] (!%p140_p2)  }
   0x8   : > { %1348 = vmatprep.subr.bf16.mxu0 (!%p140_p2), %v1539_v2  ;;  %1513 = vmatprep.subr.bf16.mxu1 (!%p140_p2), %v1539_v2  ;;  %v1544_v7 = vld [vmem:[%s2030_s1 + $0x18] sm:$0xff] (!%p140_p2)   ;;  %v1546_v9 = vld [vmem:[%s2030_s1 + $0x20] sm:$0xff] (!%p140_p2)   ;;  %v1548_v13 = vld [vmem:[%s2030_s1 + $0x28] sm:$0xff] (!%p140_p2)  }
   0x9   : > { %v1549_v14 = vld [vmem:[%s2030_s1 + $0x70] sm:$0xff] (!%p140_p2)   ;;  %v1551_v16 = vld [vmem:[%s2030_s1 + $0x78] sm:$0xff] (!%p140_p2)   ;;  %v1559_v18 = vld [vmem:[%s2030_s1 + $0x80] sm:$0xff] (!%p140_p2)  }
   0xa   : > { %v1550_v15 = vld [vmem:[%s2030_s1 + $0x30] sm:$0xff] (!%p140_p2)   ;;  %v1552_v17 = vld [vmem:[%s2030_s1 + $0x38] sm:$0xff] (!%p140_p2)   ;;  %v1572_v23 = vld [vmem:[%s2030_s1 + $0x88] sm:$0xff] (!%p140_p2)  }
   0xb   : > { %1349 = vmatpush3.bf16.msra.mxu0 (!%p140_p2), %v1540_v3  ;;  %1521 = vmatpush3.bf16.msra.mxu1 (!%p140_p2), %v1540_v3 }
   0xc   : > { %1350 = vmatprep.subr.bf16.mxu0 (!%p140_p2), %v1541_v4  ;;  %1514 = vmatprep.subr.bf16.mxu1 (!%p140_p2), %v1541_v4 }
   0xd   : > { %s2034_s16 = smov (!%p165_p3, %s1257_s16), 63 }
   0xe   : > { %s1528_s29 = smul.u32 12, %s2034_s16  ;;  %s1260_s5 = sshll.u32 %s2034_s16, 3 }
   0xf   : > { %1351 = vmatpush3.bf16.msra.mxu0 %v1542_v5  ;;  %1522 = vmatpush3.bf16.msra.mxu1 %v1542_v5  ;;  %s1948_s7 = scalar_lea.vmem %s2032_s3, %s1260_s5 }
  0x10   : > { %1352 = vmatprep.subr.bf16.mxu0 %v1543_v6  ;;  %1515 = vmatprep.subr.bf16.mxu1 %v1543_v6  ;;  %s1816_s9 = scalar_lea.vmem %s2029_s0, %s1528_s29 }
  0x11   : > { %v1555_v11 = vld [vmem:[%s1816_s9 + $0x4] ss:$12 sps:$4 sm:$0xff]   ;;  %v1553_v19 = vld [vmem:[%s1816_s9] ss:$12 sps:$4 sm:$0xff]   ;;  %v1560_v21 = vld [vmem:[%s1816_s9 + $0x1c] ss:$12 sps:$4 sm:$0xff]  }
  0x12   : > { %v1558_v12 = vld [vmem:[%s1816_s9 + $0x124] ss:$12 sps:$4 sm:$0xff]   ;;  %714 = vmatprep.mubr.bf16.mxu0 %v1555_v11  ;;  %v1556_v20 = vld [vmem:[%s1816_s9 + $0x120] ss:$12 sps:$4 sm:$0xff]   ;;  %v1562_v22 = vld [vmem:[%s1816_s9 + $0x13c] ss:$12 sps:$4 sm:$0xff]  }
  0x13   : > { %1353 = vmatpush3.bf16.msra.mxu0 %v1544_v7  ;;  %1523 = vmatpush3.bf16.msra.mxu1 %v1544_v7  ;;  %v1564_v24 = vld [vmem:[%s1816_s9 + $0x18] ss:$12 sps:$4 sm:$0xff]   ;;  %v1566_v26 = vld [vmem:[%s1816_s9 + $0x34] ss:$12 sps:$4 sm:$0xff]   ;;  %v1570_v28 = vld [vmem:[%s1816_s9 + $0x30] ss:$12 sps:$4 sm:$0xff]  }
  0x14   : > { %1354 = vmatprep.subr.bf16.mxu0 %v1545_v8  ;;  %1516 = vmatprep.subr.bf16.mxu1 %v1545_v8  ;;  %v1565_v25 = vld [vmem:[%s1816_s9 + $0x138] ss:$12 sps:$4 sm:$0xff]   ;;  %v1568_v27 = vld [vmem:[%s1816_s9 + $0x154] ss:$12 sps:$4 sm:$0xff]   ;;  %v1571_v29 = vld [vmem:[%s1816_s9 + $0x150] ss:$12 sps:$4 sm:$0xff]  }
  0x15   : > { %810 = vmatprep.mubr.bf16.mxu1 %v1558_v12  ;;  %v1573_v30 = vld [vmem:[%s1816_s9 + $0x4c] ss:$12 sps:$4 sm:$0xff]   ;;  %v1577_v32 = vld [vmem:[%s1816_s9 + $0x48] ss:$12 sps:$4 sm:$0xff]   ;;  %v1579_v34 = vld [vmem:[%s1816_s9 + $0x64] ss:$12 sps:$4 sm:$0xff]  }
  0x16   : > { %v1575_v31 = vld [vmem:[%s1816_s9 + $0x16c] ss:$12 sps:$4 sm:$0xff]   ;;  %v1578_v33 = vld [vmem:[%s1816_s9 + $0x168] ss:$12 sps:$4 sm:$0xff]   ;;  %v1588_v41 = vld [vmem:[%s1816_s9 + $0x50] ss:$12 sps:$4 sm:$0xff]  }
  0x17   : > { %1355 = vmatpush3.bf16.msra.mxu0 %v1546_v9  ;;  %1524 = vmatpush3.bf16.msra.mxu1 %v1546_v9  ;;  %v1581_v35 = vld [vmem:[%s1816_s9 + $0x8] ss:$12 sps:$4 sm:$0xff]   ;;  %v1582_v36 = vld [vmem:[%s1816_s9 + $0x60] ss:$12 sps:$4 sm:$0xff]   ;;  %v1586_v39 = vld [vmem:[%s1816_s9 + $0x38] ss:$12 sps:$4 sm:$0xff]  }
  0x18   : > { %1356 = vmatprep.subr.bf16.mxu0 %v1547_v10  ;;  %1517 = vmatprep.subr.bf16.mxu1 %v1547_v10  ;;  %v1583_v37 = vld [vmem:[%s1816_s9 + $0x20] ss:$12 sps:$4 sm:$0xff]   ;;  %v1584_v38 = vld [vmem:[%s1816_s9 + $0x7c] ss:$12 sps:$4 sm:$0xff]   ;;  %v1587_v40 = vld [vmem:[%s1816_s9 + $0x78] ss:$12 sps:$4 sm:$0xff]  }
  0x19   : > { %v1589_v42 = vld [vmem:[%s1816_s9 + $0x94] ss:$12 sps:$4 sm:$0xff]   ;;  %v1592_v44 = vld [vmem:[%s1816_s9 + $0x90] ss:$12 sps:$4 sm:$0xff]   ;;  %v1594_v46 = vld [vmem:[%s1816_s9 + $0xac] ss:$12 sps:$4 sm:$0xff]  }
  0x1a   : > { %v1591_v43 = vld [vmem:[%s1816_s9 + $0x68] ss:$12 sps:$4 sm:$0xff]   ;;  %v1593_v45 = vld [vmem:[%s1816_s9 + $0x80] ss:$12 sps:$4 sm:$0xff]   ;;  %v1596_v47 = vld [vmem:[%s1816_s9 + $0x98] ss:$12 sps:$4 sm:$0xff]  }
  0x1b   : > { %1357 = vmatpush3.bf16.msra.mxu0 %v1548_v13  ;;  %1525 = vmatpush3.bf16.msra.mxu1 %v1548_v13  ;;  %v1597_v48 = vld [vmem:[%s1816_s9 + $0xa8] ss:$12 sps:$4 sm:$0xff]   ;;  %v1598_v49 = vld [vmem:[%s1816_s9 + $0xb0] ss:$12 sps:$4 sm:$0xff]   ;;  %v1602_v52 = vld [vmem:[%s1816_s9 + $0xc0] ss:$12 sps:$4 sm:$0xff]  }
  0x1c   : > { %1358 = vmatprep.subr.bf16.mxu0 %v1549_v14  ;;  %1518 = vmatprep.subr.bf16.mxu1 %v1549_v14  ;;  %v1599_v50 = vld [vmem:[%s1816_s9 + $0xc4] ss:$12 sps:$4 sm:$0xff]   ;;  %v1601_v51 = vld [vmem:[%s1816_s9 + $0xc8] ss:$12 sps:$4 sm:$0xff]   ;;  %v1603_v53 = vld [vmem:[%s1816_s9 + $0xe0] ss:$12 sps:$4 sm:$0xff]  }
  0x1d   : > { %v1604_v54 = vld [vmem:[%s1816_s9 + $0xdc] ss:$12 sps:$4 sm:$0xff]   ;;  %v1606_v55 = vld [vmem:[%s1816_s9 + $0xf8] ss:$12 sps:$4 sm:$0xff]   ;;  %v1609_v58 = vld [vmem:[%s1816_s9 + $0xf4] ss:$12 sps:$4 sm:$0xff]  }
  0x1e   : > { %v1607_v56 = vld [vmem:[%s1816_s9 + $0xd8] ss:$12 sps:$4 sm:$0xff]   ;;  %v1608_v57 = vld [vmem:[%s1816_s9 + $0x110] ss:$12 sps:$4 sm:$0xff]   ;;  %v1611_v59 = vld [vmem:[%s1816_s9 + $0x128] ss:$12 sps:$4 sm:$0xff]  }
  0x1f   : > { %1359 = vmatpush3.bf16.msra.mxu0 %v1550_v15  ;;  %1526 = vmatpush3.bf16.msra.mxu1 %v1550_v15  ;;  %v1612_v60 = vld [vmem:[%s1816_s9 + $0xf0] ss:$12 sps:$4 sm:$0xff]   ;;  %v1613_v61 = vld [vmem:[%s1816_s9 + $0x140] ss:$12 sps:$4 sm:$0xff]   ;;  %v1616_v63 = vld [vmem:[%s1816_s9 + $0x158] ss:$12 sps:$4 sm:$0xff]  }
  0x20   : > { %1360 = vmatprep.subr.bf16.mxu0 %v1551_v16  ;;  %1519 = vmatprep.subr.bf16.mxu1 %v1551_v16  ;;  %v1614_v62 = vld [vmem:[%s1816_s9 + $0x10c] ss:$12 sps:$4 sm:$0xff]   ;;  %v1617_v0 = vld [vmem:[%s1816_s9 + $0x108] ss:$12 sps:$4 sm:$0xff]   ;;  %v1618_v1 = vld [vmem:[%s1816_s9 + $0x170] ss:$12 sps:$4 sm:$0xff]  }
  0x23   : > { %1361 = vmatpush3.bf16.msra.mxu0 %v1552_v17  ;;  %1527 = vmatpush3.bf16.msra.mxu1 %v1552_v17 }
  0x24   : > { %1476 = vmatprep.subr.bf16.mxu1 %v1559_v18 }
  0x26   : > { %715 = vmatmul.mubr.bf16.vlgmr.msra.gmra.mrb[0].mxu0 %v1553_v19  ;;  %811 = vmatmul.mubr.bf16.vlgmr.msra.gmra.mrb[0].mxu1 %v1556_v20 }
  0x27   : > { %1477 = vmatpush3.bf16.msra.mxu1 %v1559_v18  ;;  %722 = vmatprep.mubr.bf16.mxu0 %v1560_v21 }
  0x28   : > { %818 = vmatprep.mubr.bf16.mxu1 %v1562_v22  ;;  %1478 = vmatprep.subr.bf16.mxu1 %v1572_v23 }
  0x2b   : > { %1479 = vmatpush3.bf16.msra.mxu1 %v1572_v23 }
  0x2e   : > { %723 = vmatmul.mubr.bf16.gmra.mrb[4].mxu0 %v1564_v24  ;;  %819 = vmatmul.mubr.bf16.gmra.mrb[4].mxu1 %v1565_v25 }
  0x2f   : > { %730 = vmatprep.mubr.bf16.mxu0 %v1566_v26  ;;  %826 = vmatprep.mubr.bf16.mxu1 %v1568_v27 }
  0x36   : > { %731 = vmatmul.mubr.bf16.gmra.mrb[8].mxu0 %v1570_v28  ;;  %827 = vmatmul.mubr.bf16.gmra.mrb[8].mxu1 %v1571_v29 }
  0x37   : > { %738 = vmatprep.mubr.bf16.mxu0 %v1573_v30  ;;  %834 = vmatprep.mubr.bf16.mxu1 %v1575_v31 }
  0x3e   : > { %739 = vmatmul.mubr.bf16.gmra.mrb[12].mxu0 %v1577_v32  ;;  %835 = vmatmul.mubr.bf16.gmra.mrb[12].mxu1 %v1578_v33 }
  0x3f   : > { %746 = vmatprep.mubr.bf16.mxu0 %v1579_v34  ;;  %1480 = vmatprep.mubr.msk.bf16.mxu1 %vm633_vm0, %v1581_v35 }
  0x46   : > { %747 = vmatmul.mubr.bf16.gmra.mrb[16].mxu0 %v1582_v36  ;;  %1481 = vmatmul.mubr.msk.bf16.vlgmr.msra.gmra.mrb[16].mxu1 %vm633_vm0, %v1583_v37 }
  0x47   : > { %754 = vmatprep.mubr.bf16.mxu0 %v1584_v38  ;;  %1484 = vmatprep.mubr.msk.bf16.mxu1 %vm633_vm0, %v1586_v39 }
  0x4e   : > { %755 = vmatmul.mubr.bf16.gmra.mrb[20].mxu0 %v1587_v40  ;;  %1485 = vmatmul.mubr.msk.bf16.gmra.mrb[20].mxu1 %vm633_vm0, %v1588_v41 }
  0x4f   : > { %762 = vmatprep.mubr.bf16.mxu0 %v1589_v42  ;;  %1488 = vmatprep.mubr.msk.bf16.mxu1 %vm633_vm0, %v1591_v43 }
  0x56   : > { %763 = vmatmul.mubr.bf16.gmra.mrb[24].mxu0 %v1592_v44  ;;  %1489 = vmatmul.mubr.msk.bf16.gmra.mrb[24].mxu1 %vm633_vm0, %v1593_v45 }
  0x57   : > { %770 = vmatprep.mubr.bf16.mxu0 %v1594_v46  ;;  %1492 = vmatprep.mubr.msk.bf16.mxu1 %vm633_vm0, %v1596_v47 }
  0x5e   : > { %771 = vmatmul.mubr.bf16.gmra.mrb[28].mxu0 %v1597_v48  ;;  %1493 = vmatmul.mubr.msk.bf16.gmra.mrb[28].mxu1 %vm633_vm0, %v1598_v49 }
  0x5f   : > { %778 = vmatprep.mubr.bf16.mxu0 %v1599_v50  ;;  %1496 = vmatprep.mubr.msk.bf16.mxu1 %vm633_vm0, %v1601_v51  ;;  %v1928_v50 = vld [vmem:[%s2031_s2] ss:$0 sm:$0xff] }
  0x66   : > { %779 = vmatmul.mubr.bf16.gmra.mrb[32].mxu0 %v1602_v52  ;;  %1497 = vmatmul.mubr.msk.bf16.gmra.mrb[32].mxu1 %vm633_vm0, %v1603_v53 }
  0x67   : > { %786 = vmatprep.mubr.bf16.mxu0 %v1604_v54  ;;  %1500 = vmatprep.mubr.msk.bf16.mxu1 %vm633_vm0, %v1606_v55 }
  0x6e   : > { %787 = vmatmul.mubr.bf16.gmra.mrb[36].mxu0 %v1607_v56  ;;  %1501 = vmatmul.mubr.msk.bf16.gmra.mrb[36].mxu1 %vm633_vm0, %v1608_v57 }
  0x6f   : > { %794 = vmatprep.mubr.bf16.mxu0 %v1609_v58  ;;  %1504 = vmatprep.mubr.msk.bf16.mxu1 %vm633_vm0, %v1611_v59 }
  0x76   : > { %795 = vmatmul.mubr.bf16.gmra.mrb[40].mxu0 %v1612_v60  ;;  %1505 = vmatmul.mubr.msk.bf16.gmra.mrb[40].mxu1 %vm633_vm0, %v1613_v61 }
  0x77   : > { %802 = vmatprep.mubr.bf16.mxu0 %v1614_v62  ;;  %1508 = vmatprep.mubr.msk.bf16.mxu1 %vm633_vm0, %v1616_v63 }
  0x7e   : > { %803 = vmatmul.mubr.bf16.gmra.mrb[44].mxu0 %v1617_v0  ;;  %1509 = vmatmul.mubr.msk.bf16.gmra.mrb[44].mxu1 %vm633_vm0, %v1618_v1 }
  0xf9   : > { %v1362_v2 = vpop.f32.mrb[0].mxu0  ;;  %v1434_v3 = vpop.f32.mrb[0].mxu1 }
  0xfa   : > { %v1363_v4 = vpop.f32.mrb[1].mxu0  ;;  %v1435_v5 = vpop.f32.mrb[1].mxu1 }
  0xfb   : > { %v1364_v6 = vadd.f32 %v1363_v4, %v1362_v2  ;;  %v1365_v7 = vpop.f32.mrb[2].mxu0  ;;  %v1909_v8 = vadd.f32 %v1435_v5, %v1434_v3  ;;  %v1437_v9 = vpop.f32.mrb[2].mxu1 }
  0xfc   : > { %v1366_v10 = vpop.f32.mrb[3].mxu0  ;;  %v1438_v11 = vpop.f32.mrb[3].mxu1 }
  0xfd   : > { %v1367_v12 = vadd.f32 %v1366_v10, %v1365_v7  ;;  %v1911_v13 = vadd.f32 %v1438_v11, %v1437_v9  ;;  %v717_v54 = vadd.f32 %v1364_v6, %v1928_v50 }
  0xff   : > { %v720_v63 = vadd.f32 %v1367_v12, %v1928_v50 }
 0x101   : > { %v1368_v14 = vpop.f32.mrb[4].mxu0  ;;  %v1440_v15 = vpop.f32.mrb[4].mxu1 }
 0x102   : > { %v1369_v16 = vpop.f32.mrb[5].mxu0  ;;  %v1441_v17 = vpop.f32.mrb[5].mxu1 }
 0x103   : > { %v1370_v18 = vadd.f32 %v1369_v16, %v1368_v14  ;;  %v1371_v19 = vpop.f32.mrb[6].mxu0  ;;  %v1913_v20 = vadd.f32 %v1441_v17, %v1440_v15  ;;  %v1443_v21 = vpop.f32.mrb[6].mxu1 }
 0x104   : > { %v1372_v22 = vpop.f32.mrb[7].mxu0  ;;  %v1444_v23 = vpop.f32.mrb[7].mxu1 }
 0x105   : > { %v1373_v24 = vadd.f32 %v1372_v22, %v1371_v19  ;;  %v1915_v25 = vadd.f32 %v1444_v23, %v1443_v21  ;;  %v725_v51 = vadd.f32 %v1370_v18, %v1928_v50 }
 0x107   : > { %v728_v58 = vadd.f32 %v1373_v24, %v1928_v50 }
 0x109   : > { %v1374_v26 = vpop.f32.mrb[8].mxu0  ;;  %v1446_v27 = vpop.f32.mrb[8].mxu1 }
 0x10a   : > { %v1375_v28 = vpop.f32.mrb[9].mxu0  ;;  %v1447_v29 = vpop.f32.mrb[9].mxu1 }
 0x10b   : > { %v1376_v30 = vadd.f32 %v1375_v28, %v1374_v26  ;;  %v1377_v31 = vpop.f32.mrb[10].mxu0  ;;  %v1917_v32 = vadd.f32 %v1447_v29, %v1446_v27  ;;  %v1449_v33 = vpop.f32.mrb[10].mxu1 }
 0x10c   : > { %v1378_v34 = vpop.f32.mrb[11].mxu0  ;;  %v1450_v35 = vpop.f32.mrb[11].mxu1 }
 0x10d   : > { %v1379_v36 = vadd.f32 %v1378_v34, %v1377_v31  ;;  %v1919_v37 = vadd.f32 %v1450_v35, %v1449_v33  ;;  %v733_v12 = vadd.f32 %v1376_v30, %v1928_v50 }
 0x10f   : > { %v736_v29 = vadd.f32 %v1379_v36, %v1928_v50 }
 0x111   : > { %v1380_v38 = vpop.f32.mrb[12].mxu0  ;;  %v1452_v39 = vpop.f32.mrb[12].mxu1 }
 0x112   : > { %v1381_v40 = vpop.f32.mrb[13].mxu0  ;;  %v1453_v41 = vpop.f32.mrb[13].mxu1 }
 0x113   : > { %v1382_v42 = vadd.f32 %v1381_v40, %v1380_v38  ;;  %v1383_v43 = vpop.f32.mrb[14].mxu0  ;;  %v1921_v44 = vadd.f32 %v1453_v41, %v1452_v39  ;;  %v1455_v45 = vpop.f32.mrb[14].mxu1 }
 0x114   : > { %v1384_v46 = vpop.f32.mrb[15].mxu0  ;;  %v1456_v47 = vpop.f32.mrb[15].mxu1 }
 0x115   : > { %v1385_v48 = vadd.f32 %v1384_v46, %v1383_v43  ;;  %v1923_v49 = vadd.f32 %v1456_v47, %v1455_v45  ;;  %v741_v15 = vadd.f32 %v1382_v42, %v1928_v50 }
 0x117   : > { %v744_v23 = vadd.f32 %v1385_v48, %v1928_v50 }
 0x119   : > { %v1386_v52 = vpop.f32.mrb[16].mxu0  ;;  %v1482_v53 = vpop.f32.mrb[16].mxu1 }
 0x11a   : > { %v886_v55 = vadd.f32 %v1482_v53, %v725_v51  ;;  %v1387_v56 = vpop.f32.mrb[17].mxu0  ;;  %v877_v57 = vpop.f32.mrb[17].mxu1 }
 0x11b   : > { %v1388_v59 = vadd.f32 %v1387_v56, %v1386_v52  ;;  %v878_v60 = vadd.f32 %v877_v57, %v717_v54  ;;  %v1389_v61 = vpop.f32.mrb[18].mxu0  ;;  %v1483_v62 = vpop.f32.mrb[18].mxu1 }
 0x11c   : > { %v1006_v0 = vsub.f32 0.0, %v886_v55  ;;  %v889_v1 = vadd.f32 %v1483_v62, %v728_v58  ;;  %v1390_v2 = vpop.f32.mrb[19].mxu0  ;;  %v880_v3 = vpop.f32.mrb[19].mxu1 }
 0x11d   : > { %v1004_v4 = vsub.f32 0.0, %v878_v60  ;;  %v1391_v5 = vadd.f32 %v1390_v2, %v1389_v61  ;;  %v881_v7 = vadd.f32 %v880_v3, %v720_v63  ;;  %v749_v36 = vadd.f32 %v1388_v59, %v1928_v50 }
 0x11e   : > { %v1040_v9 = vmul.f32 1.442695, %v1006_v0  ;;  %v1007_v6 = vsub.f32 0.0, %v889_v1 }
 0x11f   : > { %v1036_v10 = vmul.f32 1.442695, %v1004_v4  ;;  %v1005_v11 = vsub.f32 0.0, %v881_v7  ;;  %v752_v59 = vadd.f32 %v1391_v5, %v1928_v50 }
 0x120   : > { %1619 = vpow2.f32 %v1040_v9  ;;  %v1042_v14 = vmul.f32 1.442695, %v1007_v6 }
 0x121   : > { %1621 = vpow2.f32 %v1036_v10  ;;  %v1038_v16 = vmul.f32 1.442695, %v1005_v11  ;;  %v1392_v17 = vpop.f32.mrb[20].mxu0  ;;  %v1486_v18 = vpop.f32.mrb[20].mxu1 }
 0x122   : > { %1623 = vpow2.f32 %v1042_v14  ;;  %v902_v19 = vadd.f32 %v1486_v18, %v741_v15  ;;  %v1393_v21 = vpop.f32.mrb[21].mxu0  ;;  %v893_v22 = vpop.f32.mrb[21].mxu1 }
 0x123   : > { %1625 = vpow2.f32 %v1038_v16  ;;  %v1394_v24 = vadd.f32 %v1393_v21, %v1392_v17  ;;  %v894_v26 = vadd.f32 %v893_v22, %v733_v12  ;;  %v1395_v27 = vpop.f32.mrb[22].mxu0  ;;  %v1487_v28 = vpop.f32.mrb[22].mxu1 }
 0x124   : > { %v1010_v31 = vsub.f32 0.0, %v902_v19  ;;  %v905_v33 = vadd.f32 %v1487_v28, %v744_v23  ;;  %v1396_v34 = vpop.f32.mrb[23].mxu0  ;;  %v896_v35 = vpop.f32.mrb[23].mxu1 }
 0x125   : > { %v1008_v38 = vsub.f32 0.0, %v894_v26  ;;  %v1397_v39 = vadd.f32 %v1396_v34, %v1395_v27  ;;  %v897_v30 = vadd.f32 %v896_v35, %v736_v29  ;;  %v757_v46 = vadd.f32 %v1394_v24, %v1928_v50 }
 0x126   : > { %v1048_v40 = vmul.f32 1.442695, %v1010_v31  ;;  %v1011_v41 = vsub.f32 0.0, %v905_v33 }
 0x127   : > { %v1044_v42 = vmul.f32 1.442695, %v1008_v38  ;;  %v1009_v43 = vsub.f32 0.0, %v897_v30  ;;  %v760_v56 = vadd.f32 %v1397_v39, %v1928_v50 }
 0x128   : > { %1627 = vpow2.f32 %v1048_v40  ;;  %v1050_v45 = vmul.f32 1.442695, %v1011_v41 }
 0x129   : > { %1629 = vpow2.f32 %v1044_v42  ;;  %v1046_v47 = vmul.f32 1.442695, %v1009_v43  ;;  %v1398_v48 = vpop.f32.mrb[24].mxu0  ;;  %v1490_v51 = vpop.f32.mrb[24].mxu1 }
 0x12a   : > { %v1620_v52 = vpop.eup %1619  ;;  %1631 = vpow2.f32 %v1050_v45  ;;  %v918_v53 = vadd.f32 %v1490_v51, %v757_v46  ;;  %v1399_v54 = vpop.f32.mrb[25].mxu0 }
 0x12b   : > { %v909_v55 = vpop.f32.mrb[25].mxu1  ;;  %v1622_v57 = vpop.eup %1621  ;;  %v1102_v58 = vadd.f32 1.0, %v1620_v52  ;;  %1633 = vpow2.f32 %v1046_v47  ;;  %v1400_v60 = vadd.f32 %v1399_v54, %v1398_v48 }
 0x12c   : > { %v910_v61 = vadd.f32 %v909_v55, %v749_v36  ;;  %v1401_v62 = vpop.f32.mrb[26].mxu0  ;;  %v1491_v63 = vpop.f32.mrb[26].mxu1  ;;  %v1100_v1 = vadd.f32 1.0, %v1622_v57  ;;  %v1014_v2 = vsub.f32 0.0, %v918_v53 }
 0x12d   : > { %v1624_v0 = vpop.eup %1623  ;;  %v921_v3 = vadd.f32 %v1491_v63, %v760_v56  ;;  %v1402_v4 = vpop.f32.mrb[27].mxu0  ;;  %1635 = vrcp.f32 %v1102_v58  ;;  %v765_v24 = vadd.f32 %v1400_v60, %v1928_v50 }
 0x12e   : > { %v912_v7 = vpop.f32.mrb[27].mxu1  ;;  %v1626_v9 = vpop.eup %1625  ;;  %v1103_v6 = vadd.f32 1.0, %v1624_v0  ;;  %v1012_v10 = vsub.f32 0.0, %v910_v61  ;;  %v1403_v11 = vadd.f32 %v1402_v4, %v1401_v62  ;;  %1637 = vrcp.f32 %v1100_v1 }
 0x12f   : > { %v1101_v14 = vadd.f32 1.0, %v1626_v9  ;;  %v1056_v15 = vmul.f32 1.442695, %v1014_v2  ;;  %v1015_v16 = vsub.f32 0.0, %v921_v3  ;;  %v913_v18 = vadd.f32 %v912_v7, %v752_v59 }
 0x130   : > { %1639 = vrcp.f32 %v1103_v6  ;;  %v1052_v17 = vmul.f32 1.442695, %v1012_v10  ;;  %v768_v40 = vadd.f32 %v1403_v11, %v1928_v50 }
 0x131   : > { %1641 = vrcp.f32 %v1101_v14  ;;  %v1058_v12 = vmul.f32 1.442695, %v1015_v16  ;;  %v1013_v19 = vsub.f32 0.0, %v913_v18  ;;  %v1404_v21 = vpop.f32.mrb[28].mxu0  ;;  %v1494_v5 = vpop.f32.mrb[28].mxu1 }
 0x132   : > { %1643 = vpow2.f32 %v1056_v15  ;;  %v1628_v22 = vpop.eup %1627  ;;  %v1405_v23 = vpop.f32.mrb[29].mxu0 }
 0x133   : > { %1645 = vpow2.f32 %v1052_v17  ;;  %v925_v26 = vpop.f32.mrb[29].mxu1  ;;  %v1630_v27 = vpop.eup %1629  ;;  %v1106_v28 = vadd.f32 1.0, %v1628_v22  ;;  %v1406_v29 = vadd.f32 %v1405_v23, %v1404_v21  ;;  %v1054_v38 = vmul.f32 1.442695, %v1013_v19 }
 0x134   : > { %1647 = vpow2.f32 %v1058_v12  ;;  %v1407_v31 = vpop.f32.mrb[30].mxu0  ;;  %v1495_v33 = vpop.f32.mrb[30].mxu1  ;;  %v1104_v35 = vadd.f32 1.0, %v1630_v27  ;;  %v926_v39 = vadd.f32 %v925_v26, %v765_v24 }
 0x135   : > { %v1632_v34 = vpop.eup %1631  ;;  %v1408_v30 = vpop.f32.mrb[31].mxu0  ;;  %1649 = vrcp.f32 %v1106_v28  ;;  %v773_v45 = vadd.f32 %v1406_v29, %v1928_v50 }
 0x136   : > { %v928_v41 = vpop.f32.mrb[31].mxu1  ;;  %v1634_v42 = vpop.eup %1633  ;;  %v1107_v43 = vadd.f32 1.0, %v1632_v34  ;;  %v1409_v46 = vadd.f32 %v1408_v30, %v1407_v31  ;;  %1651 = vrcp.f32 %v1104_v35  ;;  %v1016_v48 = vsub.f32 0.0, %v926_v39 }
 0x137   : > { %v1105_v47 = vadd.f32 1.0, %v1634_v42  ;;  %v929_v51 = vadd.f32 %v928_v41, %v768_v40  ;;  %v1636_v36 = vpop.eup %1635  ;;  %v934_v52 = vadd.f32 %v1494_v5, %v773_v45 }
 0x138   : > { %1653 = vrcp.f32 %v1107_v43  ;;  %v776_v53 = vadd.f32 %v1409_v46, %v1928_v50  ;;  %v1638_v54 = vpop.eup %1637  ;;  %1166 = vst [vmem:[%s1948_s7 + $0x10] sm:$0xff] %v1636_v36  ;;  %v1060_v55 = vmul.f32 1.442695, %v1016_v48 }
 0x139   : > { %1655 = vrcp.f32 %v1105_v47  ;;  %v1017_v56 = vsub.f32 0.0, %v929_v51  ;;  %1164 = vst [vmem:[%s1948_s7] sm:$0xff] %v1638_v54  ;;  %v1018_v58 = vsub.f32 0.0, %v934_v52  ;;  %v1410_v61 = vpop.f32.mrb[32].mxu0  ;;  %v1954_v62 = vpop.f32.mrb[32].mxu1 }
 0x13a   : > { %v1640_v57 = vpop.eup %1639  ;;  %1657 = vpow2.f32 %v1054_v38  ;;  %v937_v60 = vadd.f32 %v1495_v33, %v776_v53  ;;  %v1411_v1 = vpop.f32.mrb[33].mxu0 }
 0x13b   : > { %v1642_v63 = vpop.eup %1641  ;;  %1167 = vst [vmem:[%s1948_s7 + $0x18] sm:$0xff] %v1640_v57  ;;  %1659 = vpow2.f32 %v1060_v55  ;;  %v1062_v0 = vmul.f32 1.442695, %v1017_v56  ;;  %v941_v2 = vpop.f32.mrb[33].mxu1  ;;  %v1064_v4 = vmul.f32 1.442695, %v1018_v58  ;;  %v1412_v7 = vadd.f32 %v1411_v1, %v1410_v61 }
 0x13c   : > { %v1644_v3 = vpop.eup %1643  ;;  %1165 = vst [vmem:[%s1948_s7 + $0x8] sm:$0xff] %v1642_v63  ;;  %v1019_v59 = vsub.f32 0.0, %v937_v60  ;;  %v1413_v9 = vpop.f32.mrb[34].mxu0  ;;  %v821_v61 = vadd.f32 %v1913_v20, %v1928_v50  ;;  %v824_v20 = vadd.f32 %v1915_v25, %v1928_v50 }
 0x13d   : > { %v1958_v6 = vpop.f32.mrb[34].mxu1  ;;  %v1646_v10 = vpop.eup %1645  ;;  %v1110_v11 = vadd.f32 1.0, %v1644_v3  ;;  %1661 = vpow2.f32 %v1062_v0  ;;  %v781_v12 = vadd.f32 %v1412_v7, %v1928_v50 }
 0x13e   : > { %v1414_v14 = vpop.f32.mrb[35].mxu0  ;;  %v944_v15 = vpop.f32.mrb[35].mxu1  ;;  %v1108_v17 = vadd.f32 1.0, %v1646_v10  ;;  %1663 = vpow2.f32 %v1064_v4  ;;  %v1066_v18 = vmul.f32 1.442695, %v1019_v59  ;;  %v816_v10 = vadd.f32 %v1911_v13, %v1928_v50 }
 0x13f   : > { %v1648_v16 = vpop.eup %1647  ;;  %1665 = vrcp.f32 %v1110_v11  ;;  %v1415_v21 = vadd.f32 %v1414_v14, %v1413_v9  ;;  %v942_v22 = vadd.f32 %v941_v2, %v781_v12 }
 0x140   : > { %v1111_v19 = vadd.f32 1.0, %v1648_v16  ;;  %v1650_v5 = vpop.eup %1649  ;;  %1667 = vrcp.f32 %v1108_v17 }
 0x141   : > { %v1652_v23 = vpop.eup %1651  ;;  %1170 = vst [vmem:[%s1948_s7 + $0x30] sm:$0xff] %v1650_v5  ;;  %v784_v24 = vadd.f32 %v1415_v21, %v1928_v50  ;;  %v1020_v27 = vsub.f32 0.0, %v942_v22  ;;  %v1416_v28 = vpop.f32.mrb[36].mxu0  ;;  %v837_v22 = vadd.f32 %v1921_v44, %v1928_v50 }
 0x142   : > { %1669 = vrcp.f32 %v1111_v19  ;;  %v1654_v26 = vpop.eup %1653  ;;  %1168 = vst [vmem:[%s1948_s7 + $0x20] sm:$0xff] %v1652_v23  ;;  %v1964_v29 = vpop.f32.mrb[36].mxu1 }
 0x143   : > { %1671 = vpow2.f32 %v1066_v18  ;;  %v1656_v31 = vpop.eup %1655  ;;  %1171 = vst [vmem:[%s1948_s7 + $0x38] sm:$0xff] %v1654_v26  ;;  %v945_v33 = vadd.f32 %v944_v15, %v784_v24  ;;  %v1417_v34 = vpop.f32.mrb[37].mxu0  ;;  %v1068_v39 = vmul.f32 1.442695, %v1020_v27 }
 0x144   : > { %v1967_v35 = vpop.f32.mrb[37].mxu1  ;;  %v1658_v38 = vpop.eup %1657  ;;  %1169 = vst [vmem:[%s1948_s7 + $0x28] sm:$0xff] %v1656_v31  ;;  %v1418_v30 = vadd.f32 %v1417_v34, %v1416_v28 }
 0x145   : > { %v1419_v40 = vpop.f32.mrb[38].mxu0  ;;  %v1970_v41 = vpop.f32.mrb[38].mxu1  ;;  %v1109_v43 = vadd.f32 1.0, %v1658_v38  ;;  %v1021_v45 = vsub.f32 0.0, %v945_v33  ;;  %1673 = vpow2.f32 %v1068_v39 }
 0x146   : > { %v1660_v42 = vpop.eup %1659  ;;  %v1420_v46 = vpop.f32.mrb[39].mxu0  ;;  %v789_v51 = vadd.f32 %v1418_v30, %v1928_v50 }
 0x147   : > { %v1972_v47 = vpop.f32.mrb[39].mxu1  ;;  %v1112_v48 = vadd.f32 1.0, %v1660_v42  ;;  %v1421_v36 = vadd.f32 %v1420_v46, %v1419_v40  ;;  %v1662_v52 = vpop.eup %1661  ;;  %1675 = vrcp.f32 %v1109_v43  ;;  %v1070_v53 = vmul.f32 1.442695, %v1021_v45 }
 0x148   : > { %v1664_v54 = vpop.eup %1663  ;;  %v1113_v55 = vadd.f32 1.0, %v1662_v52  ;;  %v950_v56 = vadd.f32 %v1954_v62, %v789_v51  ;;  %v813_v62 = vadd.f32 %v1909_v8, %v1928_v50 }
 0x149   : > { %1677 = vrcp.f32 %v1112_v48  ;;  %v792_v57 = vadd.f32 %v1421_v36, %v1928_v50  ;;  %v1666_v58 = vpop.eup %1665  ;;  %v1114_v60 = vadd.f32 1.0, %v1664_v54  ;;  %v1422_v2 = vpop.f32.mrb[40].mxu0  ;;  %v829_v48 = vadd.f32 %v1917_v32, %v1928_v50 }
 0x14a   : > { %1679 = vpow2.f32 %v1070_v53  ;;  %v1668_v63 = vpop.eup %1667  ;;  %1174 = vst [vmem:[%s1948_s7 + $0x50] sm:$0xff] %v1666_v58  ;;  %v1022_v0 = vsub.f32 0.0, %v950_v56  ;;  %v1506_v3 = vpop.f32.mrb[40].mxu1  ;;  %v840_v54 = vadd.f32 %v1923_v49, %v1928_v50  ;;  %v832_v49 = vadd.f32 %v1919_v37, %v1928_v50 }
 0x14b   : > { %1681 = vrcp.f32 %v1113_v55  ;;  %v953_v1 = vadd.f32 %v1958_v6, %v792_v57  ;;  %1172 = vst [vmem:[%s1948_s7 + $0x40] sm:$0xff] %v1668_v63  ;;  %v982_v59 = vadd.f32 %v1506_v3, %v821_v61  ;;  %v1423_v7 = vpop.f32.mrb[41].mxu0  ;;  %v973_v9 = vpop.f32.mrb[41].mxu1 }
 0x14c   : > { %v1670_v4 = vpop.eup %1669  ;;  %1683 = vrcp.f32 %v1114_v60  ;;  %v1072_v6 = vmul.f32 1.442695, %v1022_v0  ;;  %v1424_v15 = vadd.f32 %v1423_v7, %v1422_v2  ;;  %v974_v16 = vadd.f32 %v973_v9, %v813_v62  ;;  %v1425_v17 = vpop.f32.mrb[42].mxu0 }
 0x14d   : > { %v1672_v11 = vpop.eup %1671  ;;  %1175 = vst [vmem:[%s1948_s7 + $0x58] sm:$0xff] %v1670_v4  ;;  %v1023_v14 = vsub.f32 0.0, %v953_v1  ;;  %v1507_v8 = vpop.f32.mrb[42].mxu1  ;;  %v1030_v12 = vsub.f32 0.0, %v982_v59 }
 0x14e   : > { %v1115_v18 = vadd.f32 1.0, %v1672_v11  ;;  %v985_v19 = vadd.f32 %v1507_v8, %v824_v20  ;;  %v1426_v21 = vpop.f32.mrb[43].mxu0  ;;  %v976_v5 = vpop.f32.mrb[43].mxu1  ;;  %1685 = vpow2.f32 %v1072_v6  ;;  %v797_v13 = vadd.f32 %v1424_v15, %v1928_v50 }
 0x14f   : > { %v1074_v25 = vmul.f32 1.442695, %v1023_v14  ;;  %v1028_v23 = vsub.f32 0.0, %v974_v16  ;;  %v1088_v24 = vmul.f32 1.442695, %v1030_v12  ;;  %v1427_v27 = vadd.f32 %v1426_v21, %v1425_v17  ;;  %v1674_v28 = vpop.eup %1673 }
 0x150   : > { %1687 = vrcp.f32 %v1115_v18  ;;  %v1031_v26 = vsub.f32 0.0, %v985_v19  ;;  %v958_v31 = vadd.f32 %v1967_v35, %v797_v13  ;;  %v977_v34 = vadd.f32 %v976_v5, %v816_v10 }
 0x151   : > { %1689 = vpow2.f32 %v1074_v25  ;;  %v1084_v33 = vmul.f32 1.442695, %v1028_v23  ;;  %v1676_v38 = vpop.eup %1675  ;;  %v1116_v39 = vadd.f32 1.0, %v1674_v28  ;;  %v800_v30 = vadd.f32 %v1427_v27, %v1928_v50  ;;  %v1428_v45 = vpop.f32.mrb[44].mxu0 }
 0x152   : > { %1691 = vpow2.f32 %v1088_v24  ;;  %v1090_v44 = vmul.f32 1.442695, %v1031_v26  ;;  %1173 = vst [vmem:[%s1948_s7 + $0x48] sm:$0xff] %v1676_v38  ;;  %v1024_v42 = vsub.f32 0.0, %v958_v31  ;;  %v1029_v43 = vsub.f32 0.0, %v977_v34  ;;  %v1510_v46 = vpop.f32.mrb[44].mxu1 }
 0x153   : > { %v1678_v40 = vpop.eup %1677  ;;  %1693 = vpow2.f32 %v1084_v33  ;;  %v961_v51 = vadd.f32 %v1972_v47, %v800_v30  ;;  %v998_v36 = vadd.f32 %v1510_v46, %v837_v22  ;;  %v1429_v52 = vpop.f32.mrb[45].mxu0 }
 0x154   : > { %v1680_v35 = vpop.eup %1679  ;;  %1176 = vst [vmem:[%s1948_s7 + $0x60] sm:$0xff] %v1678_v40  ;;  %1695 = vrcp.f32 %v1116_v39  ;;  %v989_v53 = vpop.f32.mrb[45].mxu1  ;;  %v1076_v57 = vmul.f32 1.442695, %v1024_v42  ;;  %v1086_v58 = vmul.f32 1.442695, %v1029_v43  ;;  %v1430_v0 = vadd.f32 %v1429_v52, %v1428_v45 }
 0x155   : > { %v1682_v55 = vpop.eup %1681  ;;  %v1117_v56 = vadd.f32 1.0, %v1680_v35  ;;  %1697 = vpow2.f32 %v1090_v44  ;;  %v1431_v60 = vpop.f32.mrb[46].mxu0  ;;  %v1025_v61 = vsub.f32 0.0, %v961_v51  ;;  %v1034_v63 = vsub.f32 0.0, %v998_v36 }
 0x156   : > { %v1684_v32 = vpop.eup %1683  ;;  %1177 = vst [vmem:[%s1948_s7 + $0x68] sm:$0xff] %v1682_v55  ;;  %v990_v1 = vadd.f32 %v989_v53, %v829_v48  ;;  %v1511_v47 = vpop.f32.mrb[46].mxu1  ;;  %v805_v9 = vadd.f32 %v1430_v0, %v1928_v50 }
 0x157   : > { %v1432_v2 = vpop.f32.mrb[47].mxu0  ;;  %1178 = vst [vmem:[%s1948_s7 + $0x70] sm:$0xff] %v1684_v32  ;;  %1699 = vrcp.f32 %v1117_v56  ;;  %v1001_v3 = vadd.f32 %v1511_v47, %v840_v54  ;;  %v992_v4 = vpop.f32.mrb[47].mxu1  ;;  %v1078_v59 = vmul.f32 1.442695, %v1025_v61 }
 0x158   : > { %v1433_v62 = vadd.f32 %v1432_v2, %v1431_v60  ;;  %1701 = vpow2.f32 %v1076_v57  ;;  %v1096_v7 = vmul.f32 1.442695, %v1034_v63  ;;  %v1686_v20 = vpop.eup %1685  ;;  %v1032_v10 = vsub.f32 0.0, %v990_v1 }
 0x159   : > { %1703 = vpow2.f32 %v1086_v58  ;;  %v1118_v14 = vadd.f32 1.0, %v1686_v20  ;;  %v966_v15 = vadd.f32 %v1964_v29, %v805_v9  ;;  %v993_v16 = vadd.f32 %v992_v4, %v832_v49 }
 0x15a   : > { %v808_v11 = vadd.f32 %v1433_v62, %v1928_v50  ;;  %v1688_v6 = vpop.eup %1687  ;;  %1705 = vpow2.f32 %v1078_v59  ;;  %v1092_v37 = vmul.f32 1.442695, %v1032_v10  ;;  %v1035_v8 = vsub.f32 0.0, %v1001_v3 }
 0x15b   : > { %v1690_v17 = vpop.eup %1689  ;;  %1179 = vst [vmem:[%s1948_s7 + $0x78] sm:$0xff] %v1688_v6  ;;  %1707 = vpow2.f32 %v1096_v7  ;;  %v1026_v21 = vsub.f32 0.0, %v966_v15  ;;  %v1033_v28 = vsub.f32 0.0, %v993_v16 }
 0x15c   : > { %v969_v18 = vadd.f32 %v1970_v41, %v808_v11  ;;  %v1692_v12 = vpop.eup %1691  ;;  %1709 = vrcp.f32 %v1118_v14  ;;  %v1119_v19 = vadd.f32 1.0, %v1690_v17  ;;  %v1098_v24 = vmul.f32 1.442695, %v1035_v8 }
 0x15d   : > { %v1694_v5 = vpop.eup %1693  ;;  %v1126_v50 = vadd.f32 1.0, %v1692_v12  ;;  %1711 = vpow2.f32 %v1092_v37  ;;  %v1080_v13 = vmul.f32 1.442695, %v1026_v21  ;;  %v1094_v40 = vmul.f32 1.442695, %v1033_v28 }
 0x15e   : > { %v1027_v22 = vsub.f32 0.0, %v969_v18  ;;  %v1696_v25 = vpop.eup %1695  ;;  %1713 = vrcp.f32 %v1119_v19  ;;  %v1124_v29 = vadd.f32 1.0, %v1694_v5 }
 0x15f   : > { %v1698_v23 = vpop.eup %1697  ;;  %1180 = vst [vmem:[%s1948_s7 + $0x80] sm:$0xff] %v1696_v25  ;;  %1715 = vrcp.f32 %v1126_v50 }
 0x160   : > { %1717 = vrcp.f32 %v1124_v29  ;;  %v1127_v26 = vadd.f32 1.0, %v1698_v23  ;;  %v1082_v41 = vmul.f32 1.442695, %v1027_v22 }
 0x161   : > { %v1700_v27 = vpop.eup %1699  ;;  %1719 = vpow2.f32 %v1080_v13 }
 0x162   : > { %v1702_v31 = vpop.eup %1701  ;;  %1181 = vst [vmem:[%s1948_s7 + $0x88] sm:$0xff] %v1700_v27  ;;  %1721 = vrcp.f32 %v1127_v26 }
 0x163   : > { %v1704_v33 = vpop.eup %1703  ;;  %v1120_v34 = vadd.f32 1.0, %v1702_v31  ;;  %1723 = vpow2.f32 %v1098_v24 }
 0x164   : > { %v1706_v38 = vpop.eup %1705  ;;  %v1125_v39 = vadd.f32 1.0, %v1704_v33  ;;  %1725 = vpow2.f32 %v1082_v41 }
 0x165   : > { %v1708_v44 = vpop.eup %1707  ;;  %1727 = vrcp.f32 %v1120_v34  ;;  %v1121_v30 = vadd.f32 1.0, %v1706_v38 }
 0x166   : > { %v1710_v42 = vpop.eup %1709  ;;  %1729 = vrcp.f32 %v1125_v39  ;;  %v1130_v43 = vadd.f32 1.0, %v1708_v44 }
 0x167   : > { %v1712_v45 = vpop.eup %1711  ;;  %1182 = vst [vmem:[%s1948_s7 + $0x90] sm:$0xff] %v1710_v42  ;;  %1731 = vrcp.f32 %v1121_v30 }
 0x168   : > { %v1714_v46 = vpop.eup %1713  ;;  %1733 = vrcp.f32 %v1130_v43  ;;  %v1128_v48 = vadd.f32 1.0, %v1712_v45 }
 0x169   : > { %v1716_v35 = vpop.eup %1715  ;;  %1183 = vst [vmem:[%s1948_s7 + $0x98] sm:$0xff] %v1714_v46  ;;  %1735 = vpow2.f32 %v1094_v40 }
 0x16a   : > { %v1718_v51 = vpop.eup %1717  ;;  %1190 = vst [vmem:[%s1948_s7 + $0xd0] sm:$0xff] %v1716_v35  ;;  %1737 = vrcp.f32 %v1128_v48 }
 0x16b   : > { %v1720_v36 = vpop.eup %1719  ;;  %1188 = vst [vmem:[%s1948_s7 + $0xc0] sm:$0xff] %v1718_v51 }
 0x16c   : > { %v1722_v52 = vpop.eup %1721  ;;  %v1122_v53 = vadd.f32 1.0, %v1720_v36 }
 0x16d   : > { %v1724_v54 = vpop.eup %1723  ;;  %1191 = vst [vmem:[%s1948_s7 + $0xd8] sm:$0xff] %v1722_v52 }
 0x16e   : > { %v1726_v55 = vpop.eup %1725  ;;  %1739 = vrcp.f32 %v1122_v53  ;;  %v1131_v56 = vadd.f32 1.0, %v1724_v54 }
 0x16f   : > { %v1728_v57 = vpop.eup %1727  ;;  %v1123_v58 = vadd.f32 1.0, %v1726_v55 }
 0x170   : > { %v1730_v60 = vpop.eup %1729  ;;  %1184 = vst [vmem:[%s1948_s7 + $0xa0] sm:$0xff] %v1728_v57  ;;  %1741 = vrcp.f32 %v1131_v56 }
 0x171   : > { %v1732_v32 = vpop.eup %1731  ;;  %1189 = vst [vmem:[%s1948_s7 + $0xc8] sm:$0xff] %v1730_v60  ;;  %1743 = vrcp.f32 %v1123_v58 }
 0x172   : > { %v1734_v61 = vpop.eup %1733  ;;  %1185 = vst [vmem:[%s1948_s7 + $0xa8] sm:$0xff] %v1732_v32 }
 0x173   : > { %v1736_v63 = vpop.eup %1735  ;;  %1194 = vst [vmem:[%s1948_s7 + $0xf0] sm:$0xff] %v1734_v61 }
 0x174   : > { %v1738_v0 = vpop.eup %1737  ;;  %v1129_v1 = vadd.f32 1.0, %v1736_v63 }
 0x175   : > { %1192 = vst [vmem:[%s1948_s7 + $0xe0] sm:$0xff] %v1738_v0 }
 0x176   : > { %1745 = vrcp.f32 %v1129_v1 }
 0x178   : > { %v1740_v47 = vpop.eup %1739 }
 0x179   : > { %1186 = vst [vmem:[%s1948_s7 + $0xb0] sm:$0xff] %v1740_v47 }
 0x17a   : > { %v1742_v2 = vpop.eup %1741 }
 0x17b   : > { %v1744_v3 = vpop.eup %1743  ;;  %1195 = vst [vmem:[%s1948_s7 + $0xf8] sm:$0xff] %v1742_v2 }
 0x17c   : > { %1187 = vst [vmem:[%s1948_s7 + $0xb8] sm:$0xff] %v1744_v3 }
 0x180   : > { %v1746_v62 = vpop.eup %1745 }
 0x181   : > { %1193 = vst [vmem:[%s1948_s7 + $0xe8] sm:$0xff] %v1746_v62 }
 0x182 PF: > { %s13_s12 = sadd.s32 1, %s1753_s12  }
 0x183   : > { %p10_p4 = scmp.ge.s32.totalorder %s13_s12, 4  }
 0x185   :  { %12 = sbr.rel (!%p10_p4) target bundleno = 1 (0x1), region = 62 }

</bundles_post_ra>
